<compile_context>
chip_gen: v5e
topology: v5e:2x2
jax: 0.10.0
libtpu: 0.0.40
codegen_flags: <defaults>
</compile_context>

<pallas_src>
import numpy as np

import jax
import jax.numpy as jnp
from jax.experimental import pallas as pl
from jax.experimental.pallas import tpu as pltpu


# ------------------------------ parameters --------------------------------- #

def make_params(key, nf=8, num_classes=10, num_blocks=(2, 2, 2, 2)):
    eps = 1e-5
    bn_scale = lambda c: jnp.full((c,), 1.0 / (1.0 + eps) ** 0.5, jnp.float32)
    bn_bias = lambda c: jnp.zeros((c,), jnp.float32)
    keys = iter(jax.random.split(key, 256))

    def conv_w(cout, cin, k):
        fan_in = cin * k * k
        return jax.random.normal(next(keys), (cout, cin, k, k), jnp.float32) * (2.0 / fan_in) ** 0.5

    def lin(cout, cin):
        bound = 1.0 / (cin ** 0.5)
        w = jax.random.uniform(next(keys), (cout, cin), jnp.float32, -bound, bound)
        b = jax.random.uniform(next(keys), (cout,), jnp.float32, -bound, bound)
        return w, b

    params = {"conv1_w": conv_w(nf, 3, 3), "bn1_s": bn_scale(nf), "bn1_b": bn_bias(nf)}
    layers = []
    in_planes = nf
    layer_strides = [1, 2, 2, 2]
    for li, nb in enumerate(num_blocks):
        planes = nf * (2 ** li)
        strides = [layer_strides[li]] + [1] * (nb - 1)
        blocks = []
        for s in strides:
            blk = {"stride": s,
                   "conv1_w": conv_w(planes, in_planes, 3),
                   "bn1_s": bn_scale(planes), "bn1_b": bn_bias(planes),
                   "conv2_w": conv_w(planes, planes, 3),
                   "bn2_s": bn_scale(planes), "bn2_b": bn_bias(planes)}
            if s != 1 or in_planes != planes:
                blk["sc_w"] = conv_w(planes, in_planes, 1)
                blk["sc_bn_s"] = bn_scale(planes)
                blk["sc_bn_b"] = bn_bias(planes)
            blocks.append(blk)
            in_planes = planes
        layers.append(blocks)
    params["layers"] = layers

    feat_dim = nf * 8
    params["cls1_w"], params["cls1_b"] = lin(num_classes, feat_dim)
    params["cls2_w"], params["cls2_b"] = lin(num_classes, feat_dim)
    params["cls3_w"], params["cls3_b"] = lin(num_classes, feat_dim)   # num_rot == 0 branch
    params["pred_w"], params["pred_b"] = lin(num_classes, num_classes)  # unused in forward
    return params


# ------------------------------ forward (one Pallas kernel) ----------------- #

def resnetm_forward(params, x_nchw):
    """Forward pass. Input is NCHW (PyTorch convention); returns dict of logits."""
    f32, bf16 = jnp.float32, jnp.bfloat16
    nf = int(params["conv1_w"].shape[0])
    nc = int(params["cls1_w"].shape[0])
    N, c_in, H0, W0 = (int(d) for d in x_nchw.shape)
    n_res = len(params["layers"])
    CMAX = nf * (2 ** (n_res - 1))
    assert nf >= c_in, "stem channel padding assumes nf >= number of input channels"
    assert H0 % (2 ** (n_res - 1)) == 0 and W0 % (2 ** (n_res - 1)) == 0

    PADL = 128                 # lane zero-guard so the 9 tap shifts are plain static slices
    W_COLS = 9 * CMAX          # weight-blob column width (max 9*cin)
    ROW_ALIGN = 16             # keep per-conv weight rows bf16-sublane aligned

    # --- per-resolution geometry: zero-halo flat spatial axis, padded to 128 --
    res = []
    moff = 0
    for r in range(n_res):
        H, W = H0 >> r, W0 >> r
        Hp, Wp = H + 2, W + 2
        M = ((Hp * Wp + 127) // 128) * 128
        res.append(dict(H=H, W=W, Hp=Hp, Wp=Wp, M=M, moff=moff))
        moff += M

    # interior masks (zero halo + flat padding), concatenated into one row
    m_np = np.zeros((1, moff), np.float32)
    for r_ in res:
        for y in range(1, r_["H"] + 1):
            base = r_["moff"] + y * r_["Wp"]
            m_np[0, base + 1: base + r_["W"] + 1] = 1.0
    m_blob = jnp.asarray(m_np)

    # stride-2 selection matrices (fine flat -> coarse flat), per single sample
    sels = []
    for r in range(n_res - 1):
        a, b = res[r], res[r + 1]
        S = np.zeros((a["M"], b["M"]), np.float32)
        for y2 in range(b["H"]):
            for x2 in range(b["W"]):
                S[(2 * y2 + 1) * a["Wp"] + (2 * x2 + 1),
                  (y2 + 1) * b["Wp"] + (x2 + 1)] = 1.0
        sels.append(jnp.asarray(S).astype(bf16))
    n_sel = len(sels)

    # --- pack conv weights (as (cout, 9*cin)) and BN affines into two blobs ---
    w_rows, sb_rows = [], []
    w_cursor, sb_cursor = [0], [0]

    def add_conv(w_pt):
        cout, cin, kh, kw = (int(d) for d in w_pt.shape)
        wt = jnp.transpose(w_pt, (0, 2, 3, 1)).reshape(cout, kh * kw * cin)
        rows = ((cout + ROW_ALIGN - 1) // ROW_ALIGN) * ROW_ALIGN
        w_rows.append(jnp.pad(wt.astype(f32),
                              ((0, rows - cout), (0, W_COLS - kh * kw * cin))))
        off = w_cursor[0]
        w_cursor[0] += rows
        return off

    def add_bn(s, b):
        c = int(s.shape[0])
        sb_rows.append(jnp.stack([s.astype(f32), b.astype(f32)], axis=1))  # (c, 2)
        off = sb_cursor[0]
        sb_cursor[0] += c
        return off

    # stem: pad the 3 input channels up to nf so all layer-1 convs share cin=nf
    w_stem = jnp.pad(params["conv1_w"], ((0, 0), (0, nf - c_in), (0, 0), (0, 0)))
    stem_w = add_conv(w_stem)
    stem_bn = add_bn(params["bn1_s"], params["bn1_b"])

    plan = []
    cur_r = 0
    for blocks in params["layers"]:
        for blk in blocks:
            cout, cin = int(blk["conv1_w"].shape[0]), int(blk["conv1_w"].shape[1])
            down = int(blk["stride"]) == 2
            e = dict(rin=cur_r, rout=cur_r + (1 if down else 0), cin=cin, cout=cout,
                     down=down, has_sc=("sc_w" in blk),
                     w1=add_conv(blk["conv1_w"]),
                     bn1=add_bn(blk["bn1_s"], blk["bn1_b"]),
                     w2=add_conv(blk["conv2_w"]),
                     bn2=add_bn(blk["bn2_s"], blk["bn2_b"]))
            if e["has_sc"]:
                e["wsc"] = add_conv(blk["sc_w"])
                e["bnsc"] = add_bn(blk["sc_bn_s"], blk["sc_bn_b"])
            plan.append(e)
            cur_r = e["rout"]

    w_blob = jnp.concatenate(w_rows, axis=0).astype(bf16)     # (Rw, 9*CMAX) bf16
    sb_blob = jnp.concatenate(sb_rows, axis=0)                # (Rb, 2) f32

    # three classifiers fused into one (3*nc, feat) matmul
    cls_wT = jnp.concatenate([params["cls1_w"], params["cls2_w"],
                              params["cls3_w"]], axis=0).astype(bf16)     # (3*nc, feat)
    cls_b = jnp.concatenate([params["cls1_b"], params["cls2_b"],
                             params["cls3_b"]]).reshape(3 * nc, 1).astype(f32)

    # --- input -> (N, nf, M0): channels on sublanes, zero-halo flat spatial ---
    r0 = res[0]
    xp = jnp.pad(x_nchw.astype(f32), ((0, 0), (0, nf - c_in), (1, 1), (1, 1)))
    xp = xp.reshape(N, nf, r0["Hp"] * r0["Wp"])
    xp = jnp.pad(xp, ((0, 0), (0, 0), (0, r0["M"] - r0["Hp"] * r0["Wp"])))

    inv_hw = 1.0 / float(res[-1]["H"] * res[-1]["W"])

    # --- the fused whole-network kernel (one sample per grid step) ------------
    def kernel(*refs):
        x_ref, w_ref, sb_ref, m_ref = refs[:4]
        sel_refs = refs[4:4 + n_sel]
        cw_ref, cb_ref, out_ref = refs[4 + n_sel], refs[5 + n_sel], refs[6 + n_sel]

        def conv3x3(act, ridx, w_off, cin, cout):
            # single fused im2col dot: 9 lane-shifted taps stacked on sublanes.
            Wp, M = res[ridx]["Wp"], res[ridx]["M"]
            a16 = act.astype(bf16)                                 # cast once per conv
            z = jnp.zeros((cin, PADL), bf16)
            apad = jnp.concatenate([z, a16, z], axis=-1)           # 128-aligned pieces
            taps = []
            for dy in (-1, 0, 1):
                for dx in (-1, 0, 1):
                    off = dy * Wp + dx
                    taps.append(apad[:, PADL + off: PADL + off + M])
            a_im2col = jnp.concatenate(taps, axis=0)               # (9*cin, M) bf16
            wt = w_ref[w_off: w_off + cout, : 9 * cin]             # (cout, 9*cin) bf16
            return jnp.dot(wt, a_im2col, preferred_element_type=f32)   # (cout, M) f32

        def bn(y, off, cout, relu):
            s = sb_ref[off: off + cout, 0:1]
            b = sb_ref[off: off + cout, 1:2]
            y = y * s + b
            return jnp.maximum(y, 0.0) if relu else y

        def mask(y, ridx):
            o, M = res[ridx]["moff"], res[ridx]["M"]
            return y * m_ref[:, o: o + M]

        def downsample(y, tidx):
            # stride-2 column selection (fine flat -> coarse flat) on the MXU
            return jnp.dot(y.astype(bf16), sel_refs[tidx][...],
                           preferred_element_type=f32)

        # stem: relu(bn1(conv1(x)))
        act = x_ref[0]                                             # (nf, M0) f32
        act = mask(bn(conv3x3(act, 0, stem_w, nf, nf), stem_bn, nf, True), 0)

        # BasicBlock stacks (conv+BN+ReLU, conv+BN, shortcut, add, ReLU fused)
        for e in plan:
            identity = act
            h = conv3x3(act, e["rin"], e["w1"], e["cin"], e["cout"])
            if e["down"]:
                h = downsample(h, e["rin"])
            h = mask(bn(h, e["bn1"], e["cout"], True), e["rout"])
            y = bn(conv3x3(h, e["rout"], e["w2"], e["cout"], e["cout"]),
                   e["bn2"], e["cout"], False)
            if e["has_sc"]:
                idc = downsample(identity, e["rin"]) if e["down"] else identity
                wsc = w_ref[e["wsc"]: e["wsc"] + e["cout"], : e["cin"]]
                sc = jnp.dot(wsc, idc.astype(bf16), preferred_element_type=f32)
                sc = bn(sc, e["bnsc"], e["cout"], False)
            else:
                sc = identity                                      # f32, lossless skip
            act = mask(jnp.maximum(y + sc, 0.0), e["rout"])

        # global average pool (lane sum) + the three classifiers fused
        pooled = jnp.sum(act, axis=-1, keepdims=True) * inv_hw     # (CMAX, 1) f32
        logits = jnp.dot(cw_ref[...], pooled.astype(bf16),
                         preferred_element_type=f32) + cb_ref[...]  # (3*nc, 1)
        out_ref[0] = logits

    def full_spec(arr):
        zeros = (0,) * arr.ndim
        return pl.BlockSpec(arr.shape, lambda i, _z=zeros: _z)

    inputs = [xp, w_blob, sb_blob, m_blob] + sels + [cls_wT, cls_b]
    in_specs = ([pl.BlockSpec((1, nf, r0["M"]), lambda i: (i, 0, 0))] +
                [full_spec(a) for a in inputs[1:]])

    out3 = pl.pallas_call(
        kernel,
        out_shape=jax.ShapeDtypeStruct((N, 3 * nc, 1), f32),
        grid=(N,),
        in_specs=in_specs,
        out_specs=pl.BlockSpec((1, 3 * nc, 1), lambda i: (i, 0, 0)),
        compiler_params=pltpu.CompilerParams(
            dimension_semantics=("parallel",),          # batch across v7x's 2 TCs
            vmem_limit_bytes=32 * 1024 * 1024),
    )(*inputs)

    out = out3.reshape(N, 3 * nc)
    return {"logits1": out[:, :nc],
            "logits2": out[:, nc:2 * nc],
            "logits3": out[:, 2 * nc:]}


# ------------------------------ pure-JAX reference -------------------------- #

def resnetm_reference(params, x):
    def conv(x, w, stride):
        k = int(w.shape[2])
        pad = (k - 1) // 2
        return jax.lax.conv_general_dilated(
            x, w, (stride, stride), ((pad, pad), (pad, pad)),
            dimension_numbers=("NCHW", "OIHW", "NCHW"))

    def bn(x, s, b):
        return x * s[None, :, None, None] + b[None, :, None, None]

    out = jax.nn.relu(bn(conv(x, params["conv1_w"], 1), params["bn1_s"], params["bn1_b"]))
    for blocks in params["layers"]:
        for blk in blocks:
            s = int(blk["stride"])
            h = jax.nn.relu(bn(conv(out, blk["conv1_w"], s), blk["bn1_s"], blk["bn1_b"]))
            y = bn(conv(h, blk["conv2_w"], 1), blk["bn2_s"], blk["bn2_b"])
            if "sc_w" in blk:
                sc = bn(conv(out, blk["sc_w"], s), blk["sc_bn_s"], blk["sc_bn_b"])
            else:
                sc = out
            out = jax.nn.relu(y + sc)
    feat = jnp.mean(out, axis=(2, 3))
    return {"logits1": feat @ params["cls1_w"].T + params["cls1_b"],
            "logits2": feat @ params["cls2_w"].T + params["cls2_b"],
            "logits3": feat @ params["cls3_w"].T + params["cls3_b"]}


# ------------------------------ main ---------------------------------------- #

if __name__ == "__main__":
    key = jax.random.PRNGKey(0)
    kp, kx = jax.random.split(key)

    nf = 8
    num_classes = 10
    params = make_params(kp, nf=nf, num_classes=num_classes, num_blocks=(2, 2, 2, 2))

    # Small input consistent with the module: RGB image, NCHW.
    x = jax.random.normal(kx, (2, 3, 16, 16), jnp.float32)

    out = resnetm_forward(params, x)
    out = jax.block_until_ready(out)

    ref = jax.block_until_ready(resnetm_reference(params, x))
    for k in ("logits1", "logits2", "logits3"):
        assert out[k].shape == (2, num_classes)
        assert bool(jnp.all(jnp.isfinite(out[k])))
        # loose, scale-aware check (kernel uses bf16 MXU operands, f32 accumulation)
        err = float(jnp.max(jnp.abs(out[k] - ref[k])))
        lim = 0.08 * max(1.0, float(jnp.max(jnp.abs(ref[k]))))
        assert err < lim, f"{k}: max abs err {err} exceeds {lim}"

    print("KERNEL_OK")
</pallas_src>

<mosaic_0001>
module attributes {stable_mosaic.version = 11 : i64} {
  func.func @kernel(%arg0: i32, %arg1: memref<1x8x384xf32, #tpu.memory_space<vmem>>, %arg2: memref<640x576xbf16, #tpu.memory_space<vmem>>, %arg3: memref<600x2xf32, #tpu.memory_space<vmem>>, %arg4: memref<1x768xf32, #tpu.memory_space<vmem>>, %arg5: memref<384x128xbf16, #tpu.memory_space<vmem>>, %arg6: memref<128x128xbf16, #tpu.memory_space<vmem>>, %arg7: memref<128x128xbf16, #tpu.memory_space<vmem>>, %arg8: memref<30x64xbf16, #tpu.memory_space<vmem>>, %arg9: memref<30x1xf32, #tpu.memory_space<vmem>>, %arg10: memref<1x30x1xf32, #tpu.memory_space<vmem>>) attributes {dimension_semantics = [#tpu.dimension_semantics<parallel>], iteration_bounds = array<i64: 2>, scalar_prefetch = 0 : i64, scratch_operands = 0 : i64, tpu.core_type = #tpu.core_type<tc>, window_params = [{transform_indices = @transform_0, window_bounds = array<i64: 1, 8, 384>}, {pipeline_mode = #tpu.pipeline_mode<synchronous>, transform_indices = @transform_1, window_bounds = array<i64: 640, 576>}, {pipeline_mode = #tpu.pipeline_mode<synchronous>, transform_indices = @transform_2, window_bounds = array<i64: 600, 2>}, {pipeline_mode = #tpu.pipeline_mode<synchronous>, transform_indices = @transform_3, window_bounds = array<i64: 1, 768>}, {pipeline_mode = #tpu.pipeline_mode<synchronous>, transform_indices = @transform_4, window_bounds = array<i64: 384, 128>}, {pipeline_mode = #tpu.pipeline_mode<synchronous>, transform_indices = @transform_5, window_bounds = array<i64: 128, 128>}, {pipeline_mode = #tpu.pipeline_mode<synchronous>, transform_indices = @transform_6, window_bounds = array<i64: 128, 128>}, {pipeline_mode = #tpu.pipeline_mode<synchronous>, transform_indices = @transform_7, window_bounds = array<i64: 30, 64>}, {pipeline_mode = #tpu.pipeline_mode<synchronous>, transform_indices = @transform_8, window_bounds = array<i64: 30, 1>}, {transform_indices = @transform_9, window_bounds = array<i64: 1, 30, 1>}]} {
    %c0 = arith.constant 0 : index
    %c0_0 = arith.constant 0 : index
    %c0_1 = arith.constant 0 : index
    %0 = vector.load %arg1[%c0, %c0_0, %c0_1] : memref<1x8x384xf32, #tpu.memory_space<vmem>>, vector<1x8x384xf32>
    %1 = vector.shape_cast %0 : vector<1x8x384xf32> to vector<8x384xf32>
    %2 = arith.truncf %1 : vector<8x384xf32> to vector<8x384xbf16>
    %cst = arith.constant 0.000000e+00 : bf16
    %3 = vector.broadcast %cst : bf16 to vector<8x128xbf16>
    %4 = tpu.concatenate %3, %2, %3 in 1 : vector<8x128xbf16>, vector<8x384xbf16>, vector<8x128xbf16> -> vector<8x640xbf16>
    %5 = vector.extract_strided_slice %4 {offsets = [0, 109], sizes = [8, 384], strides = [1, 1]} : vector<8x640xbf16> to vector<8x384xbf16>
    %6 = vector.extract_strided_slice %4 {offsets = [0, 110], sizes = [8, 384], strides = [1, 1]} : vector<8x640xbf16> to vector<8x384xbf16>
    %7 = vector.extract_strided_slice %4 {offsets = [0, 111], sizes = [8, 384], strides = [1, 1]} : vector<8x640xbf16> to vector<8x384xbf16>
    %8 = vector.extract_strided_slice %4 {offsets = [0, 127], sizes = [8, 384], strides = [1, 1]} : vector<8x640xbf16> to vector<8x384xbf16>
    %9 = vector.extract_strided_slice %4 {offsets = [0, 128], sizes = [8, 384], strides = [1, 1]} : vector<8x640xbf16> to vector<8x384xbf16>
    %10 = vector.extract_strided_slice %4 {offsets = [0, 129], sizes = [8, 384], strides = [1, 1]} : vector<8x640xbf16> to vector<8x384xbf16>
    %11 = vector.extract_strided_slice %4 {offsets = [0, 145], sizes = [8, 384], strides = [1, 1]} : vector<8x640xbf16> to vector<8x384xbf16>
    %12 = vector.extract_strided_slice %4 {offsets = [0, 146], sizes = [8, 384], strides = [1, 1]} : vector<8x640xbf16> to vector<8x384xbf16>
    %13 = vector.extract_strided_slice %4 {offsets = [0, 147], sizes = [8, 384], strides = [1, 1]} : vector<8x640xbf16> to vector<8x384xbf16>
    %14 = tpu.concatenate %5, %6, %7, %8, %9, %10, %11, %12, %13 in 0 : vector<8x384xbf16>, vector<8x384xbf16>, vector<8x384xbf16>, vector<8x384xbf16>, vector<8x384xbf16>, vector<8x384xbf16>, vector<8x384xbf16>, vector<8x384xbf16>, vector<8x384xbf16> -> vector<72x384xbf16>
    %c0_2 = arith.constant 0 : index
    %c0_3 = arith.constant 0 : index
    %15 = vector.load %arg2[%c0_2, %c0_3] : memref<640x576xbf16, #tpu.memory_space<vmem>>, vector<8x72xbf16>
    %cst_4 = arith.constant dense<0.000000e+00> : vector<8x384xf32>
    %16 = tpu.matmul %15, %14, %cst_4 {dimension_numbers = #tpu.dot_dimension_numbers<[1], [0], [0], [1], [0, 0, 1, 1], [], []>} : vector<8x72xbf16>, vector<72x384xbf16>, vector<8x384xf32> -> vector<8x384xf32>
    %c0_5 = arith.constant 0 : index
    %c0_6 = arith.constant 0 : index
    %17 = vector.load %arg3[%c0_5, %c0_6] : memref<600x2xf32, #tpu.memory_space<vmem>>, vector<8x1xf32>
    %c0_7 = arith.constant 0 : index
    %c1 = arith.constant 1 : index
    %18 = vector.load %arg3[%c0_7, %c1] : memref<600x2xf32, #tpu.memory_space<vmem>>, vector<8x1xf32>
    %19 = vector.broadcast %17 : vector<8x1xf32> to vector<8x384xf32>
    %20 = arith.mulf %16, %19 : vector<8x384xf32>
    %21 = vector.broadcast %18 : vector<8x1xf32> to vector<8x384xf32>
    %22 = arith.addf %20, %21 : vector<8x384xf32>
    %cst_8 = arith.constant 0.000000e+00 : f32
    %23 = vector.broadcast %cst_8 : f32 to vector<8x384xf32>
    %24 = arith.maximumf %22, %23 : vector<8x384xf32>
    %c0_9 = arith.constant 0 : index
    %c0_10 = arith.constant 0 : index
    %25 = vector.load %arg4[%c0_9, %c0_10] : memref<1x768xf32, #tpu.memory_space<vmem>>, vector<1x384xf32>
    %26 = vector.broadcast %25 : vector<1x384xf32> to vector<8x384xf32>
    %27 = arith.mulf %24, %26 : vector<8x384xf32>
    %28 = arith.truncf %27 : vector<8x384xf32> to vector<8x384xbf16>
    %cst_11 = arith.constant 0.000000e+00 : bf16
    %29 = vector.broadcast %cst_11 : bf16 to vector<8x128xbf16>
    %30 = tpu.concatenate %29, %28, %29 in 1 : vector<8x128xbf16>, vector<8x384xbf16>, vector<8x128xbf16> -> vector<8x640xbf16>
    %31 = vector.extract_strided_slice %30 {offsets = [0, 109], sizes = [8, 384], strides = [1, 1]} : vector<8x640xbf16> to vector<8x384xbf16>
    %32 = vector.extract_strided_slice %30 {offsets = [0, 110], sizes = [8, 384], strides = [1, 1]} : vector<8x640xbf16> to vector<8x384xbf16>
    %33 = vector.extract_strided_slice %30 {offsets = [0, 111], sizes = [8, 384], strides = [1, 1]} : vector<8x640xbf16> to vector<8x384xbf16>
    %34 = vector.extract_strided_slice %30 {offsets = [0, 127], sizes = [8, 384], strides = [1, 1]} : vector<8x640xbf16> to vector<8x384xbf16>
    %35 = vector.extract_strided_slice %30 {offsets = [0, 128], sizes = [8, 384], strides = [1, 1]} : vector<8x640xbf16> to vector<8x384xbf16>
    %36 = vector.extract_strided_slice %30 {offsets = [0, 129], sizes = [8, 384], strides = [1, 1]} : vector<8x640xbf16> to vector<8x384xbf16>
    %37 = vector.extract_strided_slice %30 {offsets = [0, 145], sizes = [8, 384], strides = [1, 1]} : vector<8x640xbf16> to vector<8x384xbf16>
    %38 = vector.extract_strided_slice %30 {offsets = [0, 146], sizes = [8, 384], strides = [1, 1]} : vector<8x640xbf16> to vector<8x384xbf16>
    %39 = vector.extract_strided_slice %30 {offsets = [0, 147], sizes = [8, 384], strides = [1, 1]} : vector<8x640xbf16> to vector<8x384xbf16>
    %40 = tpu.concatenate %31, %32, %33, %34, %35, %36, %37, %38, %39 in 0 : vector<8x384xbf16>, vector<8x384xbf16>, vector<8x384xbf16>, vector<8x384xbf16>, vector<8x384xbf16>, vector<8x384xbf16>, vector<8x384xbf16>, vector<8x384xbf16>, vector<8x384xbf16> -> vector<72x384xbf16>
    %c16 = arith.constant 16 : index
    %c0_12 = arith.constant 0 : index
    %41 = vector.load %arg2[%c16, %c0_12] : memref<640x576xbf16, #tpu.memory_space<vmem>>, vector<8x72xbf16>
    %cst_13 = arith.constant dense<0.000000e+00> : vector<8x384xf32>
    %42 = tpu.matmul %41, %40, %cst_13 {dimension_numbers = #tpu.dot_dimension_numbers<[1], [0], [0], [1], [0, 0, 1, 1], [], []>} : vector<8x72xbf16>, vector<72x384xbf16>, vector<8x384xf32> -> vector<8x384xf32>
    %c8 = arith.constant 8 : index
    %c0_14 = arith.constant 0 : index
    %43 = vector.load %arg3[%c8, %c0_14] : memref<600x2xf32, #tpu.memory_space<vmem>>, vector<8x1xf32>
    %c8_15 = arith.constant 8 : index
    %c1_16 = arith.constant 1 : index
    %44 = vector.load %arg3[%c8_15, %c1_16] : memref<600x2xf32, #tpu.memory_space<vmem>>, vector<8x1xf32>
    %45 = vector.broadcast %43 : vector<8x1xf32> to vector<8x384xf32>
    %46 = arith.mulf %42, %45 : vector<8x384xf32>
    %47 = vector.broadcast %44 : vector<8x1xf32> to vector<8x384xf32>
    %48 = arith.addf %46, %47 : vector<8x384xf32>
    %cst_17 = arith.constant 0.000000e+00 : f32
    %49 = vector.broadcast %cst_17 : f32 to vector<8x384xf32>
    %50 = arith.maximumf %48, %49 : vector<8x384xf32>
    %c0_18 = arith.constant 0 : index
    %c0_19 = arith.constant 0 : index
    %51 = vector.load %arg4[%c0_18, %c0_19] : memref<1x768xf32, #tpu.memory_space<vmem>>, vector<1x384xf32>
    %52 = vector.broadcast %51 : vector<1x384xf32> to vector<8x384xf32>
    %53 = arith.mulf %50, %52 : vector<8x384xf32>
    %54 = arith.truncf %53 : vector<8x384xf32> to vector<8x384xbf16>
    %cst_20 = arith.constant 0.000000e+00 : bf16
    %55 = vector.broadcast %cst_20 : bf16 to vector<8x128xbf16>
    %56 = tpu.concatenate %55, %54, %55 in 1 : vector<8x128xbf16>, vector<8x384xbf16>, vector<8x128xbf16> -> vector<8x640xbf16>
    %57 = vector.extract_strided_slice %56 {offsets = [0, 109], sizes = [8, 384], strides = [1, 1]} : vector<8x640xbf16> to vector<8x384xbf16>
    %58 = vector.extract_strided_slice %56 {offsets = [0, 110], sizes = [8, 384], strides = [1, 1]} : vector<8x640xbf16> to vector<8x384xbf16>
    %59 = vector.extract_strided_slice %56 {offsets = [0, 111], sizes = [8, 384], strides = [1, 1]} : vector<8x640xbf16> to vector<8x384xbf16>
    %60 = vector.extract_strided_slice %56 {offsets = [0, 127], sizes = [8, 384], strides = [1, 1]} : vector<8x640xbf16> to vector<8x384xbf16>
    %61 = vector.extract_strided_slice %56 {offsets = [0, 128], sizes = [8, 384], strides = [1, 1]} : vector<8x640xbf16> to vector<8x384xbf16>
    %62 = vector.extract_strided_slice %56 {offsets = [0, 129], sizes = [8, 384], strides = [1, 1]} : vector<8x640xbf16> to vector<8x384xbf16>
    %63 = vector.extract_strided_slice %56 {offsets = [0, 145], sizes = [8, 384], strides = [1, 1]} : vector<8x640xbf16> to vector<8x384xbf16>
    %64 = vector.extract_strided_slice %56 {offsets = [0, 146], sizes = [8, 384], strides = [1, 1]} : vector<8x640xbf16> to vector<8x384xbf16>
    %65 = vector.extract_strided_slice %56 {offsets = [0, 147], sizes = [8, 384], strides = [1, 1]} : vector<8x640xbf16> to vector<8x384xbf16>
    %66 = tpu.concatenate %57, %58, %59, %60, %61, %62, %63, %64, %65 in 0 : vector<8x384xbf16>, vector<8x384xbf16>, vector<8x384xbf16>, vector<8x384xbf16>, vector<8x384xbf16>, vector<8x384xbf16>, vector<8x384xbf16>, vector<8x384xbf16>, vector<8x384xbf16> -> vector<72x384xbf16>
    %c32 = arith.constant 32 : index
    %c0_21 = arith.constant 0 : index
    %67 = vector.load %arg2[%c32, %c0_21] : memref<640x576xbf16, #tpu.memory_space<vmem>>, vector<8x72xbf16>
    %cst_22 = arith.constant dense<0.000000e+00> : vector<8x384xf32>
    %68 = tpu.matmul %67, %66, %cst_22 {dimension_numbers = #tpu.dot_dimension_numbers<[1], [0], [0], [1], [0, 0, 1, 1], [], []>} : vector<8x72xbf16>, vector<72x384xbf16>, vector<8x384xf32> -> vector<8x384xf32>
    %c16_23 = arith.constant 16 : index
    %c0_24 = arith.constant 0 : index
    %69 = vector.load %arg3[%c16_23, %c0_24] : memref<600x2xf32, #tpu.memory_space<vmem>>, vector<8x1xf32>
    %c16_25 = arith.constant 16 : index
    %c1_26 = arith.constant 1 : index
    %70 = vector.load %arg3[%c16_25, %c1_26] : memref<600x2xf32, #tpu.memory_space<vmem>>, vector<8x1xf32>
    %71 = vector.broadcast %69 : vector<8x1xf32> to vector<8x384xf32>
    %72 = arith.mulf %68, %71 : vector<8x384xf32>
    %73 = vector.broadcast %70 : vector<8x1xf32> to vector<8x384xf32>
    %74 = arith.addf %72, %73 : vector<8x384xf32>
    %75 = arith.addf %74, %27 : vector<8x384xf32>
    %cst_27 = arith.constant 0.000000e+00 : f32
    %76 = vector.broadcast %cst_27 : f32 to vector<8x384xf32>
    %77 = arith.maximumf %75, %76 : vector<8x384xf32>
    %c0_28 = arith.constant 0 : index
    %c0_29 = arith.constant 0 : index
    %78 = vector.load %arg4[%c0_28, %c0_29] : memref<1x768xf32, #tpu.memory_space<vmem>>, vector<1x384xf32>
    %79 = vector.broadcast %78 : vector<1x384xf32> to vector<8x384xf32>
    %80 = arith.mulf %77, %79 : vector<8x384xf32>
    %81 = arith.truncf %80 : vector<8x384xf32> to vector<8x384xbf16>
    %cst_30 = arith.constant 0.000000e+00 : bf16
    %82 = vector.broadcast %cst_30 : bf16 to vector<8x128xbf16>
    %83 = tpu.concatenate %82, %81, %82 in 1 : vector<8x128xbf16>, vector<8x384xbf16>, vector<8x128xbf16> -> vector<8x640xbf16>
    %84 = vector.extract_strided_slice %83 {offsets = [0, 109], sizes = [8, 384], strides = [1, 1]} : vector<8x640xbf16> to vector<8x384xbf16>
    %85 = vector.extract_strided_slice %83 {offsets = [0, 110], sizes = [8, 384], strides = [1, 1]} : vector<8x640xbf16> to vector<8x384xbf16>
    %86 = vector.extract_strided_slice %83 {offsets = [0, 111], sizes = [8, 384], strides = [1, 1]} : vector<8x640xbf16> to vector<8x384xbf16>
    %87 = vector.extract_strided_slice %83 {offsets = [0, 127], sizes = [8, 384], strides = [1, 1]} : vector<8x640xbf16> to vector<8x384xbf16>
    %88 = vector.extract_strided_slice %83 {offsets = [0, 128], sizes = [8, 384], strides = [1, 1]} : vector<8x640xbf16> to vector<8x384xbf16>
    %89 = vector.extract_strided_slice %83 {offsets = [0, 129], sizes = [8, 384], strides = [1, 1]} : vector<8x640xbf16> to vector<8x384xbf16>
    %90 = vector.extract_strided_slice %83 {offsets = [0, 145], sizes = [8, 384], strides = [1, 1]} : vector<8x640xbf16> to vector<8x384xbf16>
    %91 = vector.extract_strided_slice %83 {offsets = [0, 146], sizes = [8, 384], strides = [1, 1]} : vector<8x640xbf16> to vector<8x384xbf16>
    %92 = vector.extract_strided_slice %83 {offsets = [0, 147], sizes = [8, 384], strides = [1, 1]} : vector<8x640xbf16> to vector<8x384xbf16>
    %93 = tpu.concatenate %84, %85, %86, %87, %88, %89, %90, %91, %92 in 0 : vector<8x384xbf16>, vector<8x384xbf16>, vector<8x384xbf16>, vector<8x384xbf16>, vector<8x384xbf16>, vector<8x384xbf16>, vector<8x384xbf16>, vector<8x384xbf16>, vector<8x384xbf16> -> vector<72x384xbf16>
    %c48 = arith.constant 48 : index
    %c0_31 = arith.constant 0 : index
    %94 = vector.load %arg2[%c48, %c0_31] : memref<640x576xbf16, #tpu.memory_space<vmem>>, vector<8x72xbf16>
    %cst_32 = arith.constant dense<0.000000e+00> : vector<8x384xf32>
    %95 = tpu.matmul %94, %93, %cst_32 {dimension_numbers = #tpu.dot_dimension_numbers<[1], [0], [0], [1], [0, 0, 1, 1], [], []>} : vector<8x72xbf16>, vector<72x384xbf16>, vector<8x384xf32> -> vector<8x384xf32>
    %c24 = arith.constant 24 : index
    %c0_33 = arith.constant 0 : index
    %96 = vector.load %arg3[%c24, %c0_33] : memref<600x2xf32, #tpu.memory_space<vmem>>, vector<8x1xf32>
    %c24_34 = arith.constant 24 : index
    %c1_35 = arith.constant 1 : index
    %97 = vector.load %arg3[%c24_34, %c1_35] : memref<600x2xf32, #tpu.memory_space<vmem>>, vector<8x1xf32>
    %98 = vector.broadcast %96 : vector<8x1xf32> to vector<8x384xf32>
    %99 = arith.mulf %95, %98 : vector<8x384xf32>
    %100 = vector.broadcast %97 : vector<8x1xf32> to vector<8x384xf32>
    %101 = arith.addf %99, %100 : vector<8x384xf32>
    %cst_36 = arith.constant 0.000000e+00 : f32
    %102 = vector.broadcast %cst_36 : f32 to vector<8x384xf32>
    %103 = arith.maximumf %101, %102 : vector<8x384xf32>
    %c0_37 = arith.constant 0 : index
    %c0_38 = arith.constant 0 : index
    %104 = vector.load %arg4[%c0_37, %c0_38] : memref<1x768xf32, #tpu.memory_space<vmem>>, vector<1x384xf32>
    %105 = vector.broadcast %104 : vector<1x384xf32> to vector<8x384xf32>
    %106 = arith.mulf %103, %105 : vector<8x384xf32>
    %107 = arith.truncf %106 : vector<8x384xf32> to vector<8x384xbf16>
    %cst_39 = arith.constant 0.000000e+00 : bf16
    %108 = vector.broadcast %cst_39 : bf16 to vector<8x128xbf16>
    %109 = tpu.concatenate %108, %107, %108 in 1 : vector<8x128xbf16>, vector<8x384xbf16>, vector<8x128xbf16> -> vector<8x640xbf16>
    %110 = vector.extract_strided_slice %109 {offsets = [0, 109], sizes = [8, 384], strides = [1, 1]} : vector<8x640xbf16> to vector<8x384xbf16>
    %111 = vector.extract_strided_slice %109 {offsets = [0, 110], sizes = [8, 384], strides = [1, 1]} : vector<8x640xbf16> to vector<8x384xbf16>
    %112 = vector.extract_strided_slice %109 {offsets = [0, 111], sizes = [8, 384], strides = [1, 1]} : vector<8x640xbf16> to vector<8x384xbf16>
    %113 = vector.extract_strided_slice %109 {offsets = [0, 127], sizes = [8, 384], strides = [1, 1]} : vector<8x640xbf16> to vector<8x384xbf16>
    %114 = vector.extract_strided_slice %109 {offsets = [0, 128], sizes = [8, 384], strides = [1, 1]} : vector<8x640xbf16> to vector<8x384xbf16>
    %115 = vector.extract_strided_slice %109 {offsets = [0, 129], sizes = [8, 384], strides = [1, 1]} : vector<8x640xbf16> to vector<8x384xbf16>
    %116 = vector.extract_strided_slice %109 {offsets = [0, 145], sizes = [8, 384], strides = [1, 1]} : vector<8x640xbf16> to vector<8x384xbf16>
    %117 = vector.extract_strided_slice %109 {offsets = [0, 146], sizes = [8, 384], strides = [1, 1]} : vector<8x640xbf16> to vector<8x384xbf16>
    %118 = vector.extract_strided_slice %109 {offsets = [0, 147], sizes = [8, 384], strides = [1, 1]} : vector<8x640xbf16> to vector<8x384xbf16>
    %119 = tpu.concatenate %110, %111, %112, %113, %114, %115, %116, %117, %118 in 0 : vector<8x384xbf16>, vector<8x384xbf16>, vector<8x384xbf16>, vector<8x384xbf16>, vector<8x384xbf16>, vector<8x384xbf16>, vector<8x384xbf16>, vector<8x384xbf16>, vector<8x384xbf16> -> vector<72x384xbf16>
    %c64 = arith.constant 64 : index
    %c0_40 = arith.constant 0 : index
    %120 = vector.load %arg2[%c64, %c0_40] : memref<640x576xbf16, #tpu.memory_space<vmem>>, vector<8x72xbf16>
    %cst_41 = arith.constant dense<0.000000e+00> : vector<8x384xf32>
    %121 = tpu.matmul %120, %119, %cst_41 {dimension_numbers = #tpu.dot_dimension_numbers<[1], [0], [0], [1], [0, 0, 1, 1], [], []>} : vector<8x72xbf16>, vector<72x384xbf16>, vector<8x384xf32> -> vector<8x384xf32>
    %c32_42 = arith.constant 32 : index
    %c0_43 = arith.constant 0 : index
    %122 = vector.load %arg3[%c32_42, %c0_43] : memref<600x2xf32, #tpu.memory_space<vmem>>, vector<8x1xf32>
    %c32_44 = arith.constant 32 : index
    %c1_45 = arith.constant 1 : index
    %123 = vector.load %arg3[%c32_44, %c1_45] : memref<600x2xf32, #tpu.memory_space<vmem>>, vector<8x1xf32>
    %124 = vector.broadcast %122 : vector<8x1xf32> to vector<8x384xf32>
    %125 = arith.mulf %121, %124 : vector<8x384xf32>
    %126 = vector.broadcast %123 : vector<8x1xf32> to vector<8x384xf32>
    %127 = arith.addf %125, %126 : vector<8x384xf32>
    %128 = arith.addf %127, %80 : vector<8x384xf32>
    %cst_46 = arith.constant 0.000000e+00 : f32
    %129 = vector.broadcast %cst_46 : f32 to vector<8x384xf32>
    %130 = arith.maximumf %128, %129 : vector<8x384xf32>
    %c0_47 = arith.constant 0 : index
    %c0_48 = arith.constant 0 : index
    %131 = vector.load %arg4[%c0_47, %c0_48] : memref<1x768xf32, #tpu.memory_space<vmem>>, vector<1x384xf32>
    %132 = vector.broadcast %131 : vector<1x384xf32> to vector<8x384xf32>
    %133 = arith.mulf %130, %132 : vector<8x384xf32>
    %134 = arith.truncf %133 : vector<8x384xf32> to vector<8x384xbf16>
    %cst_49 = arith.constant 0.000000e+00 : bf16
    %135 = vector.broadcast %cst_49 : bf16 to vector<8x128xbf16>
    %136 = tpu.concatenate %135, %134, %135 in 1 : vector<8x128xbf16>, vector<8x384xbf16>, vector<8x128xbf16> -> vector<8x640xbf16>
    %137 = vector.extract_strided_slice %136 {offsets = [0, 109], sizes = [8, 384], strides = [1, 1]} : vector<8x640xbf16> to vector<8x384xbf16>
    %138 = vector.extract_strided_slice %136 {offsets = [0, 110], sizes = [8, 384], strides = [1, 1]} : vector<8x640xbf16> to vector<8x384xbf16>
    %139 = vector.extract_strided_slice %136 {offsets = [0, 111], sizes = [8, 384], strides = [1, 1]} : vector<8x640xbf16> to vector<8x384xbf16>
    %140 = vector.extract_strided_slice %136 {offsets = [0, 127], sizes = [8, 384], strides = [1, 1]} : vector<8x640xbf16> to vector<8x384xbf16>
    %141 = vector.extract_strided_slice %136 {offsets = [0, 128], sizes = [8, 384], strides = [1, 1]} : vector<8x640xbf16> to vector<8x384xbf16>
    %142 = vector.extract_strided_slice %136 {offsets = [0, 129], sizes = [8, 384], strides = [1, 1]} : vector<8x640xbf16> to vector<8x384xbf16>
    %143 = vector.extract_strided_slice %136 {offsets = [0, 145], sizes = [8, 384], strides = [1, 1]} : vector<8x640xbf16> to vector<8x384xbf16>
    %144 = vector.extract_strided_slice %136 {offsets = [0, 146], sizes = [8, 384], strides = [1, 1]} : vector<8x640xbf16> to vector<8x384xbf16>
    %145 = vector.extract_strided_slice %136 {offsets = [0, 147], sizes = [8, 384], strides = [1, 1]} : vector<8x640xbf16> to vector<8x384xbf16>
    %146 = tpu.concatenate %137, %138, %139, %140, %141, %142, %143, %144, %145 in 0 : vector<8x384xbf16>, vector<8x384xbf16>, vector<8x384xbf16>, vector<8x384xbf16>, vector<8x384xbf16>, vector<8x384xbf16>, vector<8x384xbf16>, vector<8x384xbf16>, vector<8x384xbf16> -> vector<72x384xbf16>
    %c80 = arith.constant 80 : index
    %c0_50 = arith.constant 0 : index
    %147 = vector.load %arg2[%c80, %c0_50] : memref<640x576xbf16, #tpu.memory_space<vmem>>, vector<16x72xbf16>
    %cst_51 = arith.constant dense<0.000000e+00> : vector<16x384xf32>
    %148 = tpu.matmul %147, %146, %cst_51 {dimension_numbers = #tpu.dot_dimension_numbers<[1], [0], [0], [1], [0, 0, 1, 1], [], []>} : vector<16x72xbf16>, vector<72x384xbf16>, vector<16x384xf32> -> vector<16x384xf32>
    %149 = arith.truncf %148 : vector<16x384xf32> to vector<16x384xbf16>
    %c0_52 = arith.constant 0 : index
    %c0_53 = arith.constant 0 : index
    %150 = vector.load %arg5[%c0_52, %c0_53] : memref<384x128xbf16, #tpu.memory_space<vmem>>, vector<384x128xbf16>
    %cst_54 = arith.constant dense<0.000000e+00> : vector<16x128xf32>
    %151 = tpu.matmul %149, %150, %cst_54 {dimension_numbers = #tpu.dot_dimension_numbers<[1], [0], [0], [1], [0, 0, 1, 1], [], []>} : vector<16x384xbf16>, vector<384x128xbf16>, vector<16x128xf32> -> vector<16x128xf32>
    %c40 = arith.constant 40 : index
    %c0_55 = arith.constant 0 : index
    %152 = vector.load %arg3[%c40, %c0_55] : memref<600x2xf32, #tpu.memory_space<vmem>>, vector<16x1xf32>
    %c40_56 = arith.constant 40 : index
    %c1_57 = arith.constant 1 : index
    %153 = vector.load %arg3[%c40_56, %c1_57] : memref<600x2xf32, #tpu.memory_space<vmem>>, vector<16x1xf32>
    %154 = vector.broadcast %152 : vector<16x1xf32> to vector<16x128xf32>
    %155 = arith.mulf %151, %154 : vector<16x128xf32>
    %156 = vector.broadcast %153 : vector<16x1xf32> to vector<16x128xf32>
    %157 = arith.addf %155, %156 : vector<16x128xf32>
    %cst_58 = arith.constant 0.000000e+00 : f32
    %158 = vector.broadcast %cst_58 : f32 to vector<16x128xf32>
    %159 = arith.maximumf %157, %158 : vector<16x128xf32>
    %c0_59 = arith.constant 0 : index
    %c384 = arith.constant 384 : index
    %160 = vector.load %arg4[%c0_59, %c384] : memref<1x768xf32, #tpu.memory_space<vmem>>, vector<1x128xf32>
    %161 = vector.broadcast %160 : vector<1x128xf32> to vector<16x128xf32>
    %162 = arith.mulf %159, %161 : vector<16x128xf32>
    %163 = arith.truncf %162 : vector<16x128xf32> to vector<16x128xbf16>
    %cst_60 = arith.constant 0.000000e+00 : bf16
    %164 = vector.broadcast %cst_60 : bf16 to vector<16x128xbf16>
    %165 = tpu.concatenate %164, %163, %164 in 1 : vector<16x128xbf16>, vector<16x128xbf16>, vector<16x128xbf16> -> vector<16x384xbf16>
    %166 = vector.extract_strided_slice %165 {offsets = [0, 117], sizes = [16, 128], strides = [1, 1]} : vector<16x384xbf16> to vector<16x128xbf16>
    %167 = vector.extract_strided_slice %165 {offsets = [0, 118], sizes = [16, 128], strides = [1, 1]} : vector<16x384xbf16> to vector<16x128xbf16>
    %168 = vector.extract_strided_slice %165 {offsets = [0, 119], sizes = [16, 128], strides = [1, 1]} : vector<16x384xbf16> to vector<16x128xbf16>
    %169 = vector.extract_strided_slice %165 {offsets = [0, 127], sizes = [16, 128], strides = [1, 1]} : vector<16x384xbf16> to vector<16x128xbf16>
    %170 = vector.extract_strided_slice %165 {offsets = [0, 128], sizes = [16, 128], strides = [1, 1]} : vector<16x384xbf16> to vector<16x128xbf16>
    %171 = vector.extract_strided_slice %165 {offsets = [0, 129], sizes = [16, 128], strides = [1, 1]} : vector<16x384xbf16> to vector<16x128xbf16>
    %172 = vector.extract_strided_slice %165 {offsets = [0, 137], sizes = [16, 128], strides = [1, 1]} : vector<16x384xbf16> to vector<16x128xbf16>
    %173 = vector.extract_strided_slice %165 {offsets = [0, 138], sizes = [16, 128], strides = [1, 1]} : vector<16x384xbf16> to vector<16x128xbf16>
    %174 = vector.extract_strided_slice %165 {offsets = [0, 139], sizes = [16, 128], strides = [1, 1]} : vector<16x384xbf16> to vector<16x128xbf16>
    %175 = tpu.concatenate %166, %167, %168, %169, %170, %171, %172, %173, %174 in 0 : vector<16x128xbf16>, vector<16x128xbf16>, vector<16x128xbf16>, vector<16x128xbf16>, vector<16x128xbf16>, vector<16x128xbf16>, vector<16x128xbf16>, vector<16x128xbf16>, vector<16x128xbf16> -> vector<144x128xbf16>
    %c96 = arith.constant 96 : index
    %c0_61 = arith.constant 0 : index
    %176 = vector.load %arg2[%c96, %c0_61] : memref<640x576xbf16, #tpu.memory_space<vmem>>, vector<16x144xbf16>
    %cst_62 = arith.constant dense<0.000000e+00> : vector<16x128xf32>
    %177 = tpu.matmul %176, %175, %cst_62 {dimension_numbers = #tpu.dot_dimension_numbers<[1], [0], [0], [1], [0, 0, 1, 1], [], []>} : vector<16x144xbf16>, vector<144x128xbf16>, vector<16x128xf32> -> vector<16x128xf32>
    %c56 = arith.constant 56 : index
    %c0_63 = arith.constant 0 : index
    %178 = vector.load %arg3[%c56, %c0_63] : memref<600x2xf32, #tpu.memory_space<vmem>>, vector<16x1xf32>
    %c56_64 = arith.constant 56 : index
    %c1_65 = arith.constant 1 : index
    %179 = vector.load %arg3[%c56_64, %c1_65] : memref<600x2xf32, #tpu.memory_space<vmem>>, vector<16x1xf32>
    %180 = vector.broadcast %178 : vector<16x1xf32> to vector<16x128xf32>
    %181 = arith.mulf %177, %180 : vector<16x128xf32>
    %182 = vector.broadcast %179 : vector<16x1xf32> to vector<16x128xf32>
    %183 = arith.addf %181, %182 : vector<16x128xf32>
    %184 = arith.truncf %133 : vector<8x384xf32> to vector<8x384xbf16>
    %c0_66 = arith.constant 0 : index
    %c0_67 = arith.constant 0 : index
    %185 = vector.load %arg5[%c0_66, %c0_67] : memref<384x128xbf16, #tpu.memory_space<vmem>>, vector<384x128xbf16>
    %cst_68 = arith.constant dense<0.000000e+00> : vector<8x128xf32>
    %186 = tpu.matmul %184, %185, %cst_68 {dimension_numbers = #tpu.dot_dimension_numbers<[1], [0], [0], [1], [0, 0, 1, 1], [], []>} : vector<8x384xbf16>, vector<384x128xbf16>, vector<8x128xf32> -> vector<8x128xf32>
    %c112 = arith.constant 112 : index
    %c0_69 = arith.constant 0 : index
    %187 = vector.load %arg2[%c112, %c0_69] : memref<640x576xbf16, #tpu.memory_space<vmem>>, vector<16x8xbf16>
    %188 = arith.truncf %186 : vector<8x128xf32> to vector<8x128xbf16>
    %cst_70 = arith.constant dense<0.000000e+00> : vector<16x128xf32>
    %189 = tpu.matmul %187, %188, %cst_70 {dimension_numbers = #tpu.dot_dimension_numbers<[1], [0], [0], [1], [0, 0, 1, 1], [], []>} : vector<16x8xbf16>, vector<8x128xbf16>, vector<16x128xf32> -> vector<16x128xf32>
    %c72 = arith.constant 72 : index
    %c0_71 = arith.constant 0 : index
    %190 = vector.load %arg3[%c72, %c0_71] : memref<600x2xf32, #tpu.memory_space<vmem>>, vector<16x1xf32>
    %c72_72 = arith.constant 72 : index
    %c1_73 = arith.constant 1 : index
    %191 = vector.load %arg3[%c72_72, %c1_73] : memref<600x2xf32, #tpu.memory_space<vmem>>, vector<16x1xf32>
    %192 = vector.broadcast %190 : vector<16x1xf32> to vector<16x128xf32>
    %193 = arith.mulf %189, %192 : vector<16x128xf32>
    %194 = vector.broadcast %191 : vector<16x1xf32> to vector<16x128xf32>
    %195 = arith.addf %193, %194 : vector<16x128xf32>
    %196 = arith.addf %183, %195 : vector<16x128xf32>
    %cst_74 = arith.constant 0.000000e+00 : f32
    %197 = vector.broadcast %cst_74 : f32 to vector<16x128xf32>
    %198 = arith.maximumf %196, %197 : vector<16x128xf32>
    %c0_75 = arith.constant 0 : index
    %c384_76 = arith.constant 384 : index
    %199 = vector.load %arg4[%c0_75, %c384_76] : memref<1x768xf32, #tpu.memory_space<vmem>>, vector<1x128xf32>
    %200 = vector.broadcast %199 : vector<1x128xf32> to vector<16x128xf32>
    %201 = arith.mulf %198, %200 : vector<16x128xf32>
    %202 = arith.truncf %201 : vector<16x128xf32> to vector<16x128xbf16>
    %cst_77 = arith.constant 0.000000e+00 : bf16
    %203 = vector.broadcast %cst_77 : bf16 to vector<16x128xbf16>
    %204 = tpu.concatenate %203, %202, %203 in 1 : vector<16x128xbf16>, vector<16x128xbf16>, vector<16x128xbf16> -> vector<16x384xbf16>
    %205 = vector.extract_strided_slice %204 {offsets = [0, 117], sizes = [16, 128], strides = [1, 1]} : vector<16x384xbf16> to vector<16x128xbf16>
    %206 = vector.extract_strided_slice %204 {offsets = [0, 118], sizes = [16, 128], strides = [1, 1]} : vector<16x384xbf16> to vector<16x128xbf16>
    %207 = vector.extract_strided_slice %204 {offsets = [0, 119], sizes = [16, 128], strides = [1, 1]} : vector<16x384xbf16> to vector<16x128xbf16>
    %208 = vector.extract_strided_slice %204 {offsets = [0, 127], sizes = [16, 128], strides = [1, 1]} : vector<16x384xbf16> to vector<16x128xbf16>
    %209 = vector.extract_strided_slice %204 {offsets = [0, 128], sizes = [16, 128], strides = [1, 1]} : vector<16x384xbf16> to vector<16x128xbf16>
    %210 = vector.extract_strided_slice %204 {offsets = [0, 129], sizes = [16, 128], strides = [1, 1]} : vector<16x384xbf16> to vector<16x128xbf16>
    %211 = vector.extract_strided_slice %204 {offsets = [0, 137], sizes = [16, 128], strides = [1, 1]} : vector<16x384xbf16> to vector<16x128xbf16>
    %212 = vector.extract_strided_slice %204 {offsets = [0, 138], sizes = [16, 128], strides = [1, 1]} : vector<16x384xbf16> to vector<16x128xbf16>
    %213 = vector.extract_strided_slice %204 {offsets = [0, 139], sizes = [16, 128], strides = [1, 1]} : vector<16x384xbf16> to vector<16x128xbf16>
    %214 = tpu.concatenate %205, %206, %207, %208, %209, %210, %211, %212, %213 in 0 : vector<16x128xbf16>, vector<16x128xbf16>, vector<16x128xbf16>, vector<16x128xbf16>, vector<16x128xbf16>, vector<16x128xbf16>, vector<16x128xbf16>, vector<16x128xbf16>, vector<16x128xbf16> -> vector<144x128xbf16>
    %c128 = arith.constant 128 : index
    %c0_78 = arith.constant 0 : index
    %215 = vector.load %arg2[%c128, %c0_78] : memref<640x576xbf16, #tpu.memory_space<vmem>>, vector<16x144xbf16>
    %cst_79 = arith.constant dense<0.000000e+00> : vector<16x128xf32>
    %216 = tpu.matmul %215, %214, %cst_79 {dimension_numbers = #tpu.dot_dimension_numbers<[1], [0], [0], [1], [0, 0, 1, 1], [], []>} : vector<16x144xbf16>, vector<144x128xbf16>, vector<16x128xf32> -> vector<16x128xf32>
    %c88 = arith.constant 88 : index
    %c0_80 = arith.constant 0 : index
    %217 = vector.load %arg3[%c88, %c0_80] : memref<600x2xf32, #tpu.memory_space<vmem>>, vector<16x1xf32>
    %c88_81 = arith.constant 88 : index
    %c1_82 = arith.constant 1 : index
    %218 = vector.load %arg3[%c88_81, %c1_82] : memref<600x2xf32, #tpu.memory_space<vmem>>, vector<16x1xf32>
    %219 = vector.broadcast %217 : vector<16x1xf32> to vector<16x128xf32>
    %220 = arith.mulf %216, %219 : vector<16x128xf32>
    %221 = vector.broadcast %218 : vector<16x1xf32> to vector<16x128xf32>
    %222 = arith.addf %220, %221 : vector<16x128xf32>
    %cst_83 = arith.constant 0.000000e+00 : f32
    %223 = vector.broadcast %cst_83 : f32 to vector<16x128xf32>
    %224 = arith.maximumf %222, %223 : vector<16x128xf32>
    %c0_84 = arith.constant 0 : index
    %c384_85 = arith.constant 384 : index
    %225 = vector.load %arg4[%c0_84, %c384_85] : memref<1x768xf32, #tpu.memory_space<vmem>>, vector<1x128xf32>
    %226 = vector.broadcast %225 : vector<1x128xf32> to vector<16x128xf32>
    %227 = arith.mulf %224, %226 : vector<16x128xf32>
    %228 = arith.truncf %227 : vector<16x128xf32> to vector<16x128xbf16>
    %cst_86 = arith.constant 0.000000e+00 : bf16
    %229 = vector.broadcast %cst_86 : bf16 to vector<16x128xbf16>
    %230 = tpu.concatenate %229, %228, %229 in 1 : vector<16x128xbf16>, vector<16x128xbf16>, vector<16x128xbf16> -> vector<16x384xbf16>
    %231 = vector.extract_strided_slice %230 {offsets = [0, 117], sizes = [16, 128], strides = [1, 1]} : vector<16x384xbf16> to vector<16x128xbf16>
    %232 = vector.extract_strided_slice %230 {offsets = [0, 118], sizes = [16, 128], strides = [1, 1]} : vector<16x384xbf16> to vector<16x128xbf16>
    %233 = vector.extract_strided_slice %230 {offsets = [0, 119], sizes = [16, 128], strides = [1, 1]} : vector<16x384xbf16> to vector<16x128xbf16>
    %234 = vector.extract_strided_slice %230 {offsets = [0, 127], sizes = [16, 128], strides = [1, 1]} : vector<16x384xbf16> to vector<16x128xbf16>
    %235 = vector.extract_strided_slice %230 {offsets = [0, 128], sizes = [16, 128], strides = [1, 1]} : vector<16x384xbf16> to vector<16x128xbf16>
    %236 = vector.extract_strided_slice %230 {offsets = [0, 129], sizes = [16, 128], strides = [1, 1]} : vector<16x384xbf16> to vector<16x128xbf16>
    %237 = vector.extract_strided_slice %230 {offsets = [0, 137], sizes = [16, 128], strides = [1, 1]} : vector<16x384xbf16> to vector<16x128xbf16>
    %238 = vector.extract_strided_slice %230 {offsets = [0, 138], sizes = [16, 128], strides = [1, 1]} : vector<16x384xbf16> to vector<16x128xbf16>
    %239 = vector.extract_strided_slice %230 {offsets = [0, 139], sizes = [16, 128], strides = [1, 1]} : vector<16x384xbf16> to vector<16x128xbf16>
    %240 = tpu.concatenate %231, %232, %233, %234, %235, %236, %237, %238, %239 in 0 : vector<16x128xbf16>, vector<16x128xbf16>, vector<16x128xbf16>, vector<16x128xbf16>, vector<16x128xbf16>, vector<16x128xbf16>, vector<16x128xbf16>, vector<16x128xbf16>, vector<16x128xbf16> -> vector<144x128xbf16>
    %c144 = arith.constant 144 : index
    %c0_87 = arith.constant 0 : index
    %241 = vector.load %arg2[%c144, %c0_87] : memref<640x576xbf16, #tpu.memory_space<vmem>>, vector<16x144xbf16>
    %cst_88 = arith.constant dense<0.000000e+00> : vector<16x128xf32>
    %242 = tpu.matmul %241, %240, %cst_88 {dimension_numbers = #tpu.dot_dimension_numbers<[1], [0], [0], [1], [0, 0, 1, 1], [], []>} : vector<16x144xbf16>, vector<144x128xbf16>, vector<16x128xf32> -> vector<16x128xf32>
    %c104 = arith.constant 104 : index
    %c0_89 = arith.constant 0 : index
    %243 = vector.load %arg3[%c104, %c0_89] : memref<600x2xf32, #tpu.memory_space<vmem>>, vector<16x1xf32>
    %c104_90 = arith.constant 104 : index
    %c1_91 = arith.constant 1 : index
    %244 = vector.load %arg3[%c104_90, %c1_91] : memref<600x2xf32, #tpu.memory_space<vmem>>, vector<16x1xf32>
    %245 = vector.broadcast %243 : vector<16x1xf32> to vector<16x128xf32>
    %246 = arith.mulf %242, %245 : vector<16x128xf32>
    %247 = vector.broadcast %244 : vector<16x1xf32> to vector<16x128xf32>
    %248 = arith.addf %246, %247 : vector<16x128xf32>
    %249 = arith.addf %248, %201 : vector<16x128xf32>
    %cst_92 = arith.constant 0.000000e+00 : f32
    %250 = vector.broadcast %cst_92 : f32 to vector<16x128xf32>
    %251 = arith.maximumf %249, %250 : vector<16x128xf32>
    %c0_93 = arith.constant 0 : index
    %c384_94 = arith.constant 384 : index
    %252 = vector.load %arg4[%c0_93, %c384_94] : memref<1x768xf32, #tpu.memory_space<vmem>>, vector<1x128xf32>
    %253 = vector.broadcast %252 : vector<1x128xf32> to vector<16x128xf32>
    %254 = arith.mulf %251, %253 : vector<16x128xf32>
    %255 = arith.truncf %254 : vector<16x128xf32> to vector<16x128xbf16>
    %cst_95 = arith.constant 0.000000e+00 : bf16
    %256 = vector.broadcast %cst_95 : bf16 to vector<16x128xbf16>
    %257 = tpu.concatenate %256, %255, %256 in 1 : vector<16x128xbf16>, vector<16x128xbf16>, vector<16x128xbf16> -> vector<16x384xbf16>
    %258 = vector.extract_strided_slice %257 {offsets = [0, 117], sizes = [16, 128], strides = [1, 1]} : vector<16x384xbf16> to vector<16x128xbf16>
    %259 = vector.extract_strided_slice %257 {offsets = [0, 118], sizes = [16, 128], strides = [1, 1]} : vector<16x384xbf16> to vector<16x128xbf16>
    %260 = vector.extract_strided_slice %257 {offsets = [0, 119], sizes = [16, 128], strides = [1, 1]} : vector<16x384xbf16> to vector<16x128xbf16>
    %261 = vector.extract_strided_slice %257 {offsets = [0, 127], sizes = [16, 128], strides = [1, 1]} : vector<16x384xbf16> to vector<16x128xbf16>
    %262 = vector.extract_strided_slice %257 {offsets = [0, 128], sizes = [16, 128], strides = [1, 1]} : vector<16x384xbf16> to vector<16x128xbf16>
    %263 = vector.extract_strided_slice %257 {offsets = [0, 129], sizes = [16, 128], strides = [1, 1]} : vector<16x384xbf16> to vector<16x128xbf16>
    %264 = vector.extract_strided_slice %257 {offsets = [0, 137], sizes = [16, 128], strides = [1, 1]} : vector<16x384xbf16> to vector<16x128xbf16>
    %265 = vector.extract_strided_slice %257 {offsets = [0, 138], sizes = [16, 128], strides = [1, 1]} : vector<16x384xbf16> to vector<16x128xbf16>
    %266 = vector.extract_strided_slice %257 {offsets = [0, 139], sizes = [16, 128], strides = [1, 1]} : vector<16x384xbf16> to vector<16x128xbf16>
    %267 = tpu.concatenate %258, %259, %260, %261, %262, %263, %264, %265, %266 in 0 : vector<16x128xbf16>, vector<16x128xbf16>, vector<16x128xbf16>, vector<16x128xbf16>, vector<16x128xbf16>, vector<16x128xbf16>, vector<16x128xbf16>, vector<16x128xbf16>, vector<16x128xbf16> -> vector<144x128xbf16>
    %c160 = arith.constant 160 : index
    %c0_96 = arith.constant 0 : index
    %268 = vector.load %arg2[%c160, %c0_96] : memref<640x576xbf16, #tpu.memory_space<vmem>>, vector<32x144xbf16>
    %cst_97 = arith.constant dense<0.000000e+00> : vector<32x128xf32>
    %269 = tpu.matmul %268, %267, %cst_97 {dimension_numbers = #tpu.dot_dimension_numbers<[1], [0], [0], [1], [0, 0, 1, 1], [], []>} : vector<32x144xbf16>, vector<144x128xbf16>, vector<32x128xf32> -> vector<32x128xf32>
    %270 = arith.truncf %269 : vector<32x128xf32> to vector<32x128xbf16>
    %c0_98 = arith.constant 0 : index
    %c0_99 = arith.constant 0 : index
    %271 = vector.load %arg6[%c0_98, %c0_99] : memref<128x128xbf16, #tpu.memory_space<vmem>>, vector<128x128xbf16>
    %cst_100 = arith.constant dense<0.000000e+00> : vector<32x128xf32>
    %272 = tpu.matmul %270, %271, %cst_100 {dimension_numbers = #tpu.dot_dimension_numbers<[1], [0], [0], [1], [0, 0, 1, 1], [], []>} : vector<32x128xbf16>, vector<128x128xbf16>, vector<32x128xf32> -> vector<32x128xf32>
    %c120 = arith.constant 120 : index
    %c0_101 = arith.constant 0 : index
    %273 = vector.load %arg3[%c120, %c0_101] : memref<600x2xf32, #tpu.memory_space<vmem>>, vector<32x1xf32>
    %c120_102 = arith.constant 120 : index
    %c1_103 = arith.constant 1 : index
    %274 = vector.load %arg3[%c120_102, %c1_103] : memref<600x2xf32, #tpu.memory_space<vmem>>, vector<32x1xf32>
    %275 = vector.broadcast %273 : vector<32x1xf32> to vector<32x128xf32>
    %276 = arith.mulf %272, %275 : vector<32x128xf32>
    %277 = vector.broadcast %274 : vector<32x1xf32> to vector<32x128xf32>
    %278 = arith.addf %276, %277 : vector<32x128xf32>
    %cst_104 = arith.constant 0.000000e+00 : f32
    %279 = vector.broadcast %cst_104 : f32 to vector<32x128xf32>
    %280 = arith.maximumf %278, %279 : vector<32x128xf32>
    %c0_105 = arith.constant 0 : index
    %c512 = arith.constant 512 : index
    %281 = vector.load %arg4[%c0_105, %c512] : memref<1x768xf32, #tpu.memory_space<vmem>>, vector<1x128xf32>
    %282 = vector.broadcast %281 : vector<1x128xf32> to vector<32x128xf32>
    %283 = arith.mulf %280, %282 : vector<32x128xf32>
    %284 = arith.truncf %283 : vector<32x128xf32> to vector<32x128xbf16>
    %cst_106 = arith.constant 0.000000e+00 : bf16
    %285 = vector.broadcast %cst_106 : bf16 to vector<32x128xbf16>
    %286 = tpu.concatenate %285, %284, %285 in 1 : vector<32x128xbf16>, vector<32x128xbf16>, vector<32x128xbf16> -> vector<32x384xbf16>
    %287 = vector.extract_strided_slice %286 {offsets = [0, 121], sizes = [32, 128], strides = [1, 1]} : vector<32x384xbf16> to vector<32x128xbf16>
    %288 = vector.extract_strided_slice %286 {offsets = [0, 122], sizes = [32, 128], strides = [1, 1]} : vector<32x384xbf16> to vector<32x128xbf16>
    %289 = vector.extract_strided_slice %286 {offsets = [0, 123], sizes = [32, 128], strides = [1, 1]} : vector<32x384xbf16> to vector<32x128xbf16>
    %290 = vector.extract_strided_slice %286 {offsets = [0, 127], sizes = [32, 128], strides = [1, 1]} : vector<32x384xbf16> to vector<32x128xbf16>
    %291 = vector.extract_strided_slice %286 {offsets = [0, 128], sizes = [32, 128], strides = [1, 1]} : vector<32x384xbf16> to vector<32x128xbf16>
    %292 = vector.extract_strided_slice %286 {offsets = [0, 129], sizes = [32, 128], strides = [1, 1]} : vector<32x384xbf16> to vector<32x128xbf16>
    %293 = vector.extract_strided_slice %286 {offsets = [0, 133], sizes = [32, 128], strides = [1, 1]} : vector<32x384xbf16> to vector<32x128xbf16>
    %294 = vector.extract_strided_slice %286 {offsets = [0, 134], sizes = [32, 128], strides = [1, 1]} : vector<32x384xbf16> to vector<32x128xbf16>
    %295 = vector.extract_strided_slice %286 {offsets = [0, 135], sizes = [32, 128], strides = [1, 1]} : vector<32x384xbf16> to vector<32x128xbf16>
    %296 = tpu.concatenate %287, %288, %289, %290, %291, %292, %293, %294, %295 in 0 : vector<32x128xbf16>, vector<32x128xbf16>, vector<32x128xbf16>, vector<32x128xbf16>, vector<32x128xbf16>, vector<32x128xbf16>, vector<32x128xbf16>, vector<32x128xbf16>, vector<32x128xbf16> -> vector<288x128xbf16>
    %c192 = arith.constant 192 : index
    %c0_107 = arith.constant 0 : index
    %297 = vector.load %arg2[%c192, %c0_107] : memref<640x576xbf16, #tpu.memory_space<vmem>>, vector<32x288xbf16>
    %cst_108 = arith.constant dense<0.000000e+00> : vector<32x128xf32>
    %298 = tpu.matmul %297, %296, %cst_108 {dimension_numbers = #tpu.dot_dimension_numbers<[1], [0], [0], [1], [0, 0, 1, 1], [], []>} : vector<32x288xbf16>, vector<288x128xbf16>, vector<32x128xf32> -> vector<32x128xf32>
    %c152 = arith.constant 152 : index
    %c0_109 = arith.constant 0 : index
    %299 = vector.load %arg3[%c152, %c0_109] : memref<600x2xf32, #tpu.memory_space<vmem>>, vector<32x1xf32>
    %c152_110 = arith.constant 152 : index
    %c1_111 = arith.constant 1 : index
    %300 = vector.load %arg3[%c152_110, %c1_111] : memref<600x2xf32, #tpu.memory_space<vmem>>, vector<32x1xf32>
    %301 = vector.broadcast %299 : vector<32x1xf32> to vector<32x128xf32>
    %302 = arith.mulf %298, %301 : vector<32x128xf32>
    %303 = vector.broadcast %300 : vector<32x1xf32> to vector<32x128xf32>
    %304 = arith.addf %302, %303 : vector<32x128xf32>
    %305 = arith.truncf %254 : vector<16x128xf32> to vector<16x128xbf16>
    %c0_112 = arith.constant 0 : index
    %c0_113 = arith.constant 0 : index
    %306 = vector.load %arg6[%c0_112, %c0_113] : memref<128x128xbf16, #tpu.memory_space<vmem>>, vector<128x128xbf16>
    %cst_114 = arith.constant dense<0.000000e+00> : vector<16x128xf32>
    %307 = tpu.matmul %305, %306, %cst_114 {dimension_numbers = #tpu.dot_dimension_numbers<[1], [0], [0], [1], [0, 0, 1, 1], [], []>} : vector<16x128xbf16>, vector<128x128xbf16>, vector<16x128xf32> -> vector<16x128xf32>
    %c224 = arith.constant 224 : index
    %c0_115 = arith.constant 0 : index
    %308 = vector.load %arg2[%c224, %c0_115] : memref<640x576xbf16, #tpu.memory_space<vmem>>, vector<32x16xbf16>
    %309 = arith.truncf %307 : vector<16x128xf32> to vector<16x128xbf16>
    %cst_116 = arith.constant dense<0.000000e+00> : vector<32x128xf32>
    %310 = tpu.matmul %308, %309, %cst_116 {dimension_numbers = #tpu.dot_dimension_numbers<[1], [0], [0], [1], [0, 0, 1, 1], [], []>} : vector<32x16xbf16>, vector<16x128xbf16>, vector<32x128xf32> -> vector<32x128xf32>
    %c184 = arith.constant 184 : index
    %c0_117 = arith.constant 0 : index
    %311 = vector.load %arg3[%c184, %c0_117] : memref<600x2xf32, #tpu.memory_space<vmem>>, vector<32x1xf32>
    %c184_118 = arith.constant 184 : index
    %c1_119 = arith.constant 1 : index
    %312 = vector.load %arg3[%c184_118, %c1_119] : memref<600x2xf32, #tpu.memory_space<vmem>>, vector<32x1xf32>
    %313 = vector.broadcast %311 : vector<32x1xf32> to vector<32x128xf32>
    %314 = arith.mulf %310, %313 : vector<32x128xf32>
    %315 = vector.broadcast %312 : vector<32x1xf32> to vector<32x128xf32>
    %316 = arith.addf %314, %315 : vector<32x128xf32>
    %317 = arith.addf %304, %316 : vector<32x128xf32>
    %cst_120 = arith.constant 0.000000e+00 : f32
    %318 = vector.broadcast %cst_120 : f32 to vector<32x128xf32>
    %319 = arith.maximumf %317, %318 : vector<32x128xf32>
    %c0_121 = arith.constant 0 : index
    %c512_122 = arith.constant 512 : index
    %320 = vector.load %arg4[%c0_121, %c512_122] : memref<1x768xf32, #tpu.memory_space<vmem>>, vector<1x128xf32>
    %321 = vector.broadcast %320 : vector<1x128xf32> to vector<32x128xf32>
    %322 = arith.mulf %319, %321 : vector<32x128xf32>
    %323 = arith.truncf %322 : vector<32x128xf32> to vector<32x128xbf16>
    %cst_123 = arith.constant 0.000000e+00 : bf16
    %324 = vector.broadcast %cst_123 : bf16 to vector<32x128xbf16>
    %325 = tpu.concatenate %324, %323, %324 in 1 : vector<32x128xbf16>, vector<32x128xbf16>, vector<32x128xbf16> -> vector<32x384xbf16>
    %326 = vector.extract_strided_slice %325 {offsets = [0, 121], sizes = [32, 128], strides = [1, 1]} : vector<32x384xbf16> to vector<32x128xbf16>
    %327 = vector.extract_strided_slice %325 {offsets = [0, 122], sizes = [32, 128], strides = [1, 1]} : vector<32x384xbf16> to vector<32x128xbf16>
    %328 = vector.extract_strided_slice %325 {offsets = [0, 123], sizes = [32, 128], strides = [1, 1]} : vector<32x384xbf16> to vector<32x128xbf16>
    %329 = vector.extract_strided_slice %325 {offsets = [0, 127], sizes = [32, 128], strides = [1, 1]} : vector<32x384xbf16> to vector<32x128xbf16>
    %330 = vector.extract_strided_slice %325 {offsets = [0, 128], sizes = [32, 128], strides = [1, 1]} : vector<32x384xbf16> to vector<32x128xbf16>
    %331 = vector.extract_strided_slice %325 {offsets = [0, 129], sizes = [32, 128], strides = [1, 1]} : vector<32x384xbf16> to vector<32x128xbf16>
    %332 = vector.extract_strided_slice %325 {offsets = [0, 133], sizes = [32, 128], strides = [1, 1]} : vector<32x384xbf16> to vector<32x128xbf16>
    %333 = vector.extract_strided_slice %325 {offsets = [0, 134], sizes = [32, 128], strides = [1, 1]} : vector<32x384xbf16> to vector<32x128xbf16>
    %334 = vector.extract_strided_slice %325 {offsets = [0, 135], sizes = [32, 128], strides = [1, 1]} : vector<32x384xbf16> to vector<32x128xbf16>
    %335 = tpu.concatenate %326, %327, %328, %329, %330, %331, %332, %333, %334 in 0 : vector<32x128xbf16>, vector<32x128xbf16>, vector<32x128xbf16>, vector<32x128xbf16>, vector<32x128xbf16>, vector<32x128xbf16>, vector<32x128xbf16>, vector<32x128xbf16>, vector<32x128xbf16> -> vector<288x128xbf16>
    %c256 = arith.constant 256 : index
    %c0_124 = arith.constant 0 : index
    %336 = vector.load %arg2[%c256, %c0_124] : memref<640x576xbf16, #tpu.memory_space<vmem>>, vector<32x288xbf16>
    %cst_125 = arith.constant dense<0.000000e+00> : vector<32x128xf32>
    %337 = tpu.matmul %336, %335, %cst_125 {dimension_numbers = #tpu.dot_dimension_numbers<[1], [0], [0], [1], [0, 0, 1, 1], [], []>} : vector<32x288xbf16>, vector<288x128xbf16>, vector<32x128xf32> -> vector<32x128xf32>
    %c216 = arith.constant 216 : index
    %c0_126 = arith.constant 0 : index
    %338 = vector.load %arg3[%c216, %c0_126] : memref<600x2xf32, #tpu.memory_space<vmem>>, vector<32x1xf32>
    %c216_127 = arith.constant 216 : index
    %c1_128 = arith.constant 1 : index
    %339 = vector.load %arg3[%c216_127, %c1_128] : memref<600x2xf32, #tpu.memory_space<vmem>>, vector<32x1xf32>
    %340 = vector.broadcast %338 : vector<32x1xf32> to vector<32x128xf32>
    %341 = arith.mulf %337, %340 : vector<32x128xf32>
    %342 = vector.broadcast %339 : vector<32x1xf32> to vector<32x128xf32>
    %343 = arith.addf %341, %342 : vector<32x128xf32>
    %cst_129 = arith.constant 0.000000e+00 : f32
    %344 = vector.broadcast %cst_129 : f32 to vector<32x128xf32>
    %345 = arith.maximumf %343, %344 : vector<32x128xf32>
    %c0_130 = arith.constant 0 : index
    %c512_131 = arith.constant 512 : index
    %346 = vector.load %arg4[%c0_130, %c512_131] : memref<1x768xf32, #tpu.memory_space<vmem>>, vector<1x128xf32>
    %347 = vector.broadcast %346 : vector<1x128xf32> to vector<32x128xf32>
    %348 = arith.mulf %345, %347 : vector<32x128xf32>
    %349 = arith.truncf %348 : vector<32x128xf32> to vector<32x128xbf16>
    %cst_132 = arith.constant 0.000000e+00 : bf16
    %350 = vector.broadcast %cst_132 : bf16 to vector<32x128xbf16>
    %351 = tpu.concatenate %350, %349, %350 in 1 : vector<32x128xbf16>, vector<32x128xbf16>, vector<32x128xbf16> -> vector<32x384xbf16>
    %352 = vector.extract_strided_slice %351 {offsets = [0, 121], sizes = [32, 128], strides = [1, 1]} : vector<32x384xbf16> to vector<32x128xbf16>
    %353 = vector.extract_strided_slice %351 {offsets = [0, 122], sizes = [32, 128], strides = [1, 1]} : vector<32x384xbf16> to vector<32x128xbf16>
    %354 = vector.extract_strided_slice %351 {offsets = [0, 123], sizes = [32, 128], strides = [1, 1]} : vector<32x384xbf16> to vector<32x128xbf16>
    %355 = vector.extract_strided_slice %351 {offsets = [0, 127], sizes = [32, 128], strides = [1, 1]} : vector<32x384xbf16> to vector<32x128xbf16>
    %356 = vector.extract_strided_slice %351 {offsets = [0, 128], sizes = [32, 128], strides = [1, 1]} : vector<32x384xbf16> to vector<32x128xbf16>
    %357 = vector.extract_strided_slice %351 {offsets = [0, 129], sizes = [32, 128], strides = [1, 1]} : vector<32x384xbf16> to vector<32x128xbf16>
    %358 = vector.extract_strided_slice %351 {offsets = [0, 133], sizes = [32, 128], strides = [1, 1]} : vector<32x384xbf16> to vector<32x128xbf16>
    %359 = vector.extract_strided_slice %351 {offsets = [0, 134], sizes = [32, 128], strides = [1, 1]} : vector<32x384xbf16> to vector<32x128xbf16>
    %360 = vector.extract_strided_slice %351 {offsets = [0, 135], sizes = [32, 128], strides = [1, 1]} : vector<32x384xbf16> to vector<32x128xbf16>
    %361 = tpu.concatenate %352, %353, %354, %355, %356, %357, %358, %359, %360 in 0 : vector<32x128xbf16>, vector<32x128xbf16>, vector<32x128xbf16>, vector<32x128xbf16>, vector<32x128xbf16>, vector<32x128xbf16>, vector<32x128xbf16>, vector<32x128xbf16>, vector<32x128xbf16> -> vector<288x128xbf16>
    %c288 = arith.constant 288 : index
    %c0_133 = arith.constant 0 : index
    %362 = vector.load %arg2[%c288, %c0_133] : memref<640x576xbf16, #tpu.memory_space<vmem>>, vector<32x288xbf16>
    %cst_134 = arith.constant dense<0.000000e+00> : vector<32x128xf32>
    %363 = tpu.matmul %362, %361, %cst_134 {dimension_numbers = #tpu.dot_dimension_numbers<[1], [0], [0], [1], [0, 0, 1, 1], [], []>} : vector<32x288xbf16>, vector<288x128xbf16>, vector<32x128xf32> -> vector<32x128xf32>
    %c248 = arith.constant 248 : index
    %c0_135 = arith.constant 0 : index
    %364 = vector.load %arg3[%c248, %c0_135] : memref<600x2xf32, #tpu.memory_space<vmem>>, vector<32x1xf32>
    %c248_136 = arith.constant 248 : index
    %c1_137 = arith.constant 1 : index
    %365 = vector.load %arg3[%c248_136, %c1_137] : memref<600x2xf32, #tpu.memory_space<vmem>>, vector<32x1xf32>
    %366 = vector.broadcast %364 : vector<32x1xf32> to vector<32x128xf32>
    %367 = arith.mulf %363, %366 : vector<32x128xf32>
    %368 = vector.broadcast %365 : vector<32x1xf32> to vector<32x128xf32>
    %369 = arith.addf %367, %368 : vector<32x128xf32>
    %370 = arith.addf %369, %322 : vector<32x128xf32>
    %cst_138 = arith.constant 0.000000e+00 : f32
    %371 = vector.broadcast %cst_138 : f32 to vector<32x128xf32>
    %372 = arith.maximumf %370, %371 : vector<32x128xf32>
    %c0_139 = arith.constant 0 : index
    %c512_140 = arith.constant 512 : index
    %373 = vector.load %arg4[%c0_139, %c512_140] : memref<1x768xf32, #tpu.memory_space<vmem>>, vector<1x128xf32>
    %374 = vector.broadcast %373 : vector<1x128xf32> to vector<32x128xf32>
    %375 = arith.mulf %372, %374 : vector<32x128xf32>
    %376 = arith.truncf %375 : vector<32x128xf32> to vector<32x128xbf16>
    %cst_141 = arith.constant 0.000000e+00 : bf16
    %377 = vector.broadcast %cst_141 : bf16 to vector<32x128xbf16>
    %378 = tpu.concatenate %377, %376, %377 in 1 : vector<32x128xbf16>, vector<32x128xbf16>, vector<32x128xbf16> -> vector<32x384xbf16>
    %379 = vector.extract_strided_slice %378 {offsets = [0, 121], sizes = [32, 128], strides = [1, 1]} : vector<32x384xbf16> to vector<32x128xbf16>
    %380 = vector.extract_strided_slice %378 {offsets = [0, 122], sizes = [32, 128], strides = [1, 1]} : vector<32x384xbf16> to vector<32x128xbf16>
    %381 = vector.extract_strided_slice %378 {offsets = [0, 123], sizes = [32, 128], strides = [1, 1]} : vector<32x384xbf16> to vector<32x128xbf16>
    %382 = vector.extract_strided_slice %378 {offsets = [0, 127], sizes = [32, 128], strides = [1, 1]} : vector<32x384xbf16> to vector<32x128xbf16>
    %383 = vector.extract_strided_slice %378 {offsets = [0, 128], sizes = [32, 128], strides = [1, 1]} : vector<32x384xbf16> to vector<32x128xbf16>
    %384 = vector.extract_strided_slice %378 {offsets = [0, 129], sizes = [32, 128], strides = [1, 1]} : vector<32x384xbf16> to vector<32x128xbf16>
    %385 = vector.extract_strided_slice %378 {offsets = [0, 133], sizes = [32, 128], strides = [1, 1]} : vector<32x384xbf16> to vector<32x128xbf16>
    %386 = vector.extract_strided_slice %378 {offsets = [0, 134], sizes = [32, 128], strides = [1, 1]} : vector<32x384xbf16> to vector<32x128xbf16>
    %387 = vector.extract_strided_slice %378 {offsets = [0, 135], sizes = [32, 128], strides = [1, 1]} : vector<32x384xbf16> to vector<32x128xbf16>
    %388 = tpu.concatenate %379, %380, %381, %382, %383, %384, %385, %386, %387 in 0 : vector<32x128xbf16>, vector<32x128xbf16>, vector<32x128xbf16>, vector<32x128xbf16>, vector<32x128xbf16>, vector<32x128xbf16>, vector<32x128xbf16>, vector<32x128xbf16>, vector<32x128xbf16> -> vector<288x128xbf16>
    %c320 = arith.constant 320 : index
    %c0_142 = arith.constant 0 : index
    %389 = vector.load %arg2[%c320, %c0_142] : memref<640x576xbf16, #tpu.memory_space<vmem>>, vector<64x288xbf16>
    %cst_143 = arith.constant dense<0.000000e+00> : vector<64x128xf32>
    %390 = tpu.matmul %389, %388, %cst_143 {dimension_numbers = #tpu.dot_dimension_numbers<[1], [0], [0], [1], [0, 0, 1, 1], [], []>} : vector<64x288xbf16>, vector<288x128xbf16>, vector<64x128xf32> -> vector<64x128xf32>
    %391 = arith.truncf %390 : vector<64x128xf32> to vector<64x128xbf16>
    %c0_144 = arith.constant 0 : index
    %c0_145 = arith.constant 0 : index
    %392 = vector.load %arg7[%c0_144, %c0_145] : memref<128x128xbf16, #tpu.memory_space<vmem>>, vector<128x128xbf16>
    %cst_146 = arith.constant dense<0.000000e+00> : vector<64x128xf32>
    %393 = tpu.matmul %391, %392, %cst_146 {dimension_numbers = #tpu.dot_dimension_numbers<[1], [0], [0], [1], [0, 0, 1, 1], [], []>} : vector<64x128xbf16>, vector<128x128xbf16>, vector<64x128xf32> -> vector<64x128xf32>
    %c280 = arith.constant 280 : index
    %c0_147 = arith.constant 0 : index
    %394 = vector.load %arg3[%c280, %c0_147] : memref<600x2xf32, #tpu.memory_space<vmem>>, vector<64x1xf32>
    %c280_148 = arith.constant 280 : index
    %c1_149 = arith.constant 1 : index
    %395 = vector.load %arg3[%c280_148, %c1_149] : memref<600x2xf32, #tpu.memory_space<vmem>>, vector<64x1xf32>
    %396 = vector.broadcast %394 : vector<64x1xf32> to vector<64x128xf32>
    %397 = arith.mulf %393, %396 : vector<64x128xf32>
    %398 = vector.broadcast %395 : vector<64x1xf32> to vector<64x128xf32>
    %399 = arith.addf %397, %398 : vector<64x128xf32>
    %cst_150 = arith.constant 0.000000e+00 : f32
    %400 = vector.broadcast %cst_150 : f32 to vector<64x128xf32>
    %401 = arith.maximumf %399, %400 : vector<64x128xf32>
    %c0_151 = arith.constant 0 : index
    %c640 = arith.constant 640 : index
    %402 = vector.load %arg4[%c0_151, %c640] : memref<1x768xf32, #tpu.memory_space<vmem>>, vector<1x128xf32>
    %403 = vector.broadcast %402 : vector<1x128xf32> to vector<64x128xf32>
    %404 = arith.mulf %401, %403 : vector<64x128xf32>
    %405 = arith.truncf %404 : vector<64x128xf32> to vector<64x128xbf16>
    %cst_152 = arith.constant 0.000000e+00 : bf16
    %406 = vector.broadcast %cst_152 : bf16 to vector<64x128xbf16>
    %407 = tpu.concatenate %406, %405, %406 in 1 : vector<64x128xbf16>, vector<64x128xbf16>, vector<64x128xbf16> -> vector<64x384xbf16>
    %408 = vector.extract_strided_slice %407 {offsets = [0, 123], sizes = [64, 128], strides = [1, 1]} : vector<64x384xbf16> to vector<64x128xbf16>
    %409 = vector.extract_strided_slice %407 {offsets = [0, 124], sizes = [64, 128], strides = [1, 1]} : vector<64x384xbf16> to vector<64x128xbf16>
    %410 = vector.extract_strided_slice %407 {offsets = [0, 125], sizes = [64, 128], strides = [1, 1]} : vector<64x384xbf16> to vector<64x128xbf16>
    %411 = vector.extract_strided_slice %407 {offsets = [0, 127], sizes = [64, 128], strides = [1, 1]} : vector<64x384xbf16> to vector<64x128xbf16>
    %412 = vector.extract_strided_slice %407 {offsets = [0, 128], sizes = [64, 128], strides = [1, 1]} : vector<64x384xbf16> to vector<64x128xbf16>
    %413 = vector.extract_strided_slice %407 {offsets = [0, 129], sizes = [64, 128], strides = [1, 1]} : vector<64x384xbf16> to vector<64x128xbf16>
    %414 = vector.extract_strided_slice %407 {offsets = [0, 131], sizes = [64, 128], strides = [1, 1]} : vector<64x384xbf16> to vector<64x128xbf16>
    %415 = vector.extract_strided_slice %407 {offsets = [0, 132], sizes = [64, 128], strides = [1, 1]} : vector<64x384xbf16> to vector<64x128xbf16>
    %416 = vector.extract_strided_slice %407 {offsets = [0, 133], sizes = [64, 128], strides = [1, 1]} : vector<64x384xbf16> to vector<64x128xbf16>
    %417 = tpu.concatenate %408, %409, %410, %411, %412, %413, %414, %415, %416 in 0 : vector<64x128xbf16>, vector<64x128xbf16>, vector<64x128xbf16>, vector<64x128xbf16>, vector<64x128xbf16>, vector<64x128xbf16>, vector<64x128xbf16>, vector<64x128xbf16>, vector<64x128xbf16> -> vector<576x128xbf16>
    %c384_153 = arith.constant 384 : index
    %c0_154 = arith.constant 0 : index
    %418 = vector.load %arg2[%c384_153, %c0_154] : memref<640x576xbf16, #tpu.memory_space<vmem>>, vector<64x576xbf16>
    %cst_155 = arith.constant dense<0.000000e+00> : vector<64x128xf32>
    %419 = tpu.matmul %418, %417, %cst_155 {dimension_numbers = #tpu.dot_dimension_numbers<[1], [0], [0], [1], [0, 0, 1, 1], [], []>} : vector<64x576xbf16>, vector<576x128xbf16>, vector<64x128xf32> -> vector<64x128xf32>
    %c344 = arith.constant 344 : index
    %c0_156 = arith.constant 0 : index
    %420 = vector.load %arg3[%c344, %c0_156] : memref<600x2xf32, #tpu.memory_space<vmem>>, vector<64x1xf32>
    %c344_157 = arith.constant 344 : index
    %c1_158 = arith.constant 1 : index
    %421 = vector.load %arg3[%c344_157, %c1_158] : memref<600x2xf32, #tpu.memory_space<vmem>>, vector<64x1xf32>
    %422 = vector.broadcast %420 : vector<64x1xf32> to vector<64x128xf32>
    %423 = arith.mulf %419, %422 : vector<64x128xf32>
    %424 = vector.broadcast %421 : vector<64x1xf32> to vector<64x128xf32>
    %425 = arith.addf %423, %424 : vector<64x128xf32>
    %426 = arith.truncf %375 : vector<32x128xf32> to vector<32x128xbf16>
    %c0_159 = arith.constant 0 : index
    %c0_160 = arith.constant 0 : index
    %427 = vector.load %arg7[%c0_159, %c0_160] : memref<128x128xbf16, #tpu.memory_space<vmem>>, vector<128x128xbf16>
    %cst_161 = arith.constant dense<0.000000e+00> : vector<32x128xf32>
    %428 = tpu.matmul %426, %427, %cst_161 {dimension_numbers = #tpu.dot_dimension_numbers<[1], [0], [0], [1], [0, 0, 1, 1], [], []>} : vector<32x128xbf16>, vector<128x128xbf16>, vector<32x128xf32> -> vector<32x128xf32>
    %c448 = arith.constant 448 : index
    %c0_162 = arith.constant 0 : index
    %429 = vector.load %arg2[%c448, %c0_162] : memref<640x576xbf16, #tpu.memory_space<vmem>>, vector<64x32xbf16>
    %430 = arith.truncf %428 : vector<32x128xf32> to vector<32x128xbf16>
    %cst_163 = arith.constant dense<0.000000e+00> : vector<64x128xf32>
    %431 = tpu.matmul %429, %430, %cst_163 {dimension_numbers = #tpu.dot_dimension_numbers<[1], [0], [0], [1], [0, 0, 1, 1], [], []>} : vector<64x32xbf16>, vector<32x128xbf16>, vector<64x128xf32> -> vector<64x128xf32>
    %c408 = arith.constant 408 : index
    %c0_164 = arith.constant 0 : index
    %432 = vector.load %arg3[%c408, %c0_164] : memref<600x2xf32, #tpu.memory_space<vmem>>, vector<64x1xf32>
    %c408_165 = arith.constant 408 : index
    %c1_166 = arith.constant 1 : index
    %433 = vector.load %arg3[%c408_165, %c1_166] : memref<600x2xf32, #tpu.memory_space<vmem>>, vector<64x1xf32>
    %434 = vector.broadcast %432 : vector<64x1xf32> to vector<64x128xf32>
    %435 = arith.mulf %431, %434 : vector<64x128xf32>
    %436 = vector.broadcast %433 : vector<64x1xf32> to vector<64x128xf32>
    %437 = arith.addf %435, %436 : vector<64x128xf32>
    %438 = arith.addf %425, %437 : vector<64x128xf32>
    %cst_167 = arith.constant 0.000000e+00 : f32
    %439 = vector.broadcast %cst_167 : f32 to vector<64x128xf32>
    %440 = arith.maximumf %438, %439 : vector<64x128xf32>
    %c0_168 = arith.constant 0 : index
    %c640_169 = arith.constant 640 : index
    %441 = vector.load %arg4[%c0_168, %c640_169] : memref<1x768xf32, #tpu.memory_space<vmem>>, vector<1x128xf32>
    %442 = vector.broadcast %441 : vector<1x128xf32> to vector<64x128xf32>
    %443 = arith.mulf %440, %442 : vector<64x128xf32>
    %444 = arith.truncf %443 : vector<64x128xf32> to vector<64x128xbf16>
    %cst_170 = arith.constant 0.000000e+00 : bf16
    %445 = vector.broadcast %cst_170 : bf16 to vector<64x128xbf16>
    %446 = tpu.concatenate %445, %444, %445 in 1 : vector<64x128xbf16>, vector<64x128xbf16>, vector<64x128xbf16> -> vector<64x384xbf16>
    %447 = vector.extract_strided_slice %446 {offsets = [0, 123], sizes = [64, 128], strides = [1, 1]} : vector<64x384xbf16> to vector<64x128xbf16>
    %448 = vector.extract_strided_slice %446 {offsets = [0, 124], sizes = [64, 128], strides = [1, 1]} : vector<64x384xbf16> to vector<64x128xbf16>
    %449 = vector.extract_strided_slice %446 {offsets = [0, 125], sizes = [64, 128], strides = [1, 1]} : vector<64x384xbf16> to vector<64x128xbf16>
    %450 = vector.extract_strided_slice %446 {offsets = [0, 127], sizes = [64, 128], strides = [1, 1]} : vector<64x384xbf16> to vector<64x128xbf16>
    %451 = vector.extract_strided_slice %446 {offsets = [0, 128], sizes = [64, 128], strides = [1, 1]} : vector<64x384xbf16> to vector<64x128xbf16>
    %452 = vector.extract_strided_slice %446 {offsets = [0, 129], sizes = [64, 128], strides = [1, 1]} : vector<64x384xbf16> to vector<64x128xbf16>
    %453 = vector.extract_strided_slice %446 {offsets = [0, 131], sizes = [64, 128], strides = [1, 1]} : vector<64x384xbf16> to vector<64x128xbf16>
    %454 = vector.extract_strided_slice %446 {offsets = [0, 132], sizes = [64, 128], strides = [1, 1]} : vector<64x384xbf16> to vector<64x128xbf16>
    %455 = vector.extract_strided_slice %446 {offsets = [0, 133], sizes = [64, 128], strides = [1, 1]} : vector<64x384xbf16> to vector<64x128xbf16>
    %456 = tpu.concatenate %447, %448, %449, %450, %451, %452, %453, %454, %455 in 0 : vector<64x128xbf16>, vector<64x128xbf16>, vector<64x128xbf16>, vector<64x128xbf16>, vector<64x128xbf16>, vector<64x128xbf16>, vector<64x128xbf16>, vector<64x128xbf16>, vector<64x128xbf16> -> vector<576x128xbf16>
    %c512_171 = arith.constant 512 : index
    %c0_172 = arith.constant 0 : index
    %457 = vector.load %arg2[%c512_171, %c0_172] : memref<640x576xbf16, #tpu.memory_space<vmem>>, vector<64x576xbf16>
    %cst_173 = arith.constant dense<0.000000e+00> : vector<64x128xf32>
    %458 = tpu.matmul %457, %456, %cst_173 {dimension_numbers = #tpu.dot_dimension_numbers<[1], [0], [0], [1], [0, 0, 1, 1], [], []>} : vector<64x576xbf16>, vector<576x128xbf16>, vector<64x128xf32> -> vector<64x128xf32>
    %c472 = arith.constant 472 : index
    %c0_174 = arith.constant 0 : index
    %459 = vector.load %arg3[%c472, %c0_174] : memref<600x2xf32, #tpu.memory_space<vmem>>, vector<64x1xf32>
    %c472_175 = arith.constant 472 : index
    %c1_176 = arith.constant 1 : index
    %460 = vector.load %arg3[%c472_175, %c1_176] : memref<600x2xf32, #tpu.memory_space<vmem>>, vector<64x1xf32>
    %461 = vector.broadcast %459 : vector<64x1xf32> to vector<64x128xf32>
    %462 = arith.mulf %458, %461 : vector<64x128xf32>
    %463 = vector.broadcast %460 : vector<64x1xf32> to vector<64x128xf32>
    %464 = arith.addf %462, %463 : vector<64x128xf32>
    %cst_177 = arith.constant 0.000000e+00 : f32
    %465 = vector.broadcast %cst_177 : f32 to vector<64x128xf32>
    %466 = arith.maximumf %464, %465 : vector<64x128xf32>
    %c0_178 = arith.constant 0 : index
    %c640_179 = arith.constant 640 : index
    %467 = vector.load %arg4[%c0_178, %c640_179] : memref<1x768xf32, #tpu.memory_space<vmem>>, vector<1x128xf32>
    %468 = vector.broadcast %467 : vector<1x128xf32> to vector<64x128xf32>
    %469 = arith.mulf %466, %468 : vector<64x128xf32>
    %470 = arith.truncf %469 : vector<64x128xf32> to vector<64x128xbf16>
    %cst_180 = arith.constant 0.000000e+00 : bf16
    %471 = vector.broadcast %cst_180 : bf16 to vector<64x128xbf16>
    %472 = tpu.concatenate %471, %470, %471 in 1 : vector<64x128xbf16>, vector<64x128xbf16>, vector<64x128xbf16> -> vector<64x384xbf16>
    %473 = vector.extract_strided_slice %472 {offsets = [0, 123], sizes = [64, 128], strides = [1, 1]} : vector<64x384xbf16> to vector<64x128xbf16>
    %474 = vector.extract_strided_slice %472 {offsets = [0, 124], sizes = [64, 128], strides = [1, 1]} : vector<64x384xbf16> to vector<64x128xbf16>
    %475 = vector.extract_strided_slice %472 {offsets = [0, 125], sizes = [64, 128], strides = [1, 1]} : vector<64x384xbf16> to vector<64x128xbf16>
    %476 = vector.extract_strided_slice %472 {offsets = [0, 127], sizes = [64, 128], strides = [1, 1]} : vector<64x384xbf16> to vector<64x128xbf16>
    %477 = vector.extract_strided_slice %472 {offsets = [0, 128], sizes = [64, 128], strides = [1, 1]} : vector<64x384xbf16> to vector<64x128xbf16>
    %478 = vector.extract_strided_slice %472 {offsets = [0, 129], sizes = [64, 128], strides = [1, 1]} : vector<64x384xbf16> to vector<64x128xbf16>
    %479 = vector.extract_strided_slice %472 {offsets = [0, 131], sizes = [64, 128], strides = [1, 1]} : vector<64x384xbf16> to vector<64x128xbf16>
    %480 = vector.extract_strided_slice %472 {offsets = [0, 132], sizes = [64, 128], strides = [1, 1]} : vector<64x384xbf16> to vector<64x128xbf16>
    %481 = vector.extract_strided_slice %472 {offsets = [0, 133], sizes = [64, 128], strides = [1, 1]} : vector<64x384xbf16> to vector<64x128xbf16>
    %482 = tpu.concatenate %473, %474, %475, %476, %477, %478, %479, %480, %481 in 0 : vector<64x128xbf16>, vector<64x128xbf16>, vector<64x128xbf16>, vector<64x128xbf16>, vector<64x128xbf16>, vector<64x128xbf16>, vector<64x128xbf16>, vector<64x128xbf16>, vector<64x128xbf16> -> vector<576x128xbf16>
    %c576 = arith.constant 576 : index
    %c0_181 = arith.constant 0 : index
    %483 = vector.load %arg2[%c576, %c0_181] : memref<640x576xbf16, #tpu.memory_space<vmem>>, vector<64x576xbf16>
    %cst_182 = arith.constant dense<0.000000e+00> : vector<64x128xf32>
    %484 = tpu.matmul %483, %482, %cst_182 {dimension_numbers = #tpu.dot_dimension_numbers<[1], [0], [0], [1], [0, 0, 1, 1], [], []>} : vector<64x576xbf16>, vector<576x128xbf16>, vector<64x128xf32> -> vector<64x128xf32>
    %c536 = arith.constant 536 : index
    %c0_183 = arith.constant 0 : index
    %485 = vector.load %arg3[%c536, %c0_183] : memref<600x2xf32, #tpu.memory_space<vmem>>, vector<64x1xf32>
    %c536_184 = arith.constant 536 : index
    %c1_185 = arith.constant 1 : index
    %486 = vector.load %arg3[%c536_184, %c1_185] : memref<600x2xf32, #tpu.memory_space<vmem>>, vector<64x1xf32>
    %487 = vector.broadcast %485 : vector<64x1xf32> to vector<64x128xf32>
    %488 = arith.mulf %484, %487 : vector<64x128xf32>
    %489 = vector.broadcast %486 : vector<64x1xf32> to vector<64x128xf32>
    %490 = arith.addf %488, %489 : vector<64x128xf32>
    %491 = arith.addf %490, %443 : vector<64x128xf32>
    %cst_186 = arith.constant 0.000000e+00 : f32
    %492 = vector.broadcast %cst_186 : f32 to vector<64x128xf32>
    %493 = arith.maximumf %491, %492 : vector<64x128xf32>
    %c0_187 = arith.constant 0 : index
    %c640_188 = arith.constant 640 : index
    %494 = vector.load %arg4[%c0_187, %c640_188] : memref<1x768xf32, #tpu.memory_space<vmem>>, vector<1x128xf32>
    %495 = vector.broadcast %494 : vector<1x128xf32> to vector<64x128xf32>
    %496 = arith.mulf %493, %495 : vector<64x128xf32>
    %cst_189 = arith.constant dense<0.000000e+00> : vector<64xf32>
    %497 = vector.multi_reduction <add>, %496, %cst_189 [1] : vector<64x128xf32> to vector<64xf32>
    %498 = vector.shape_cast %497 : vector<64xf32> to vector<64x1xf32>
    %cst_190 = arith.constant 2.500000e-01 : f32
    %499 = vector.broadcast %cst_190 : f32 to vector<64x1xf32>
    %500 = arith.mulf %498, %499 : vector<64x1xf32>
    %c0_191 = arith.constant 0 : index
    %c0_192 = arith.constant 0 : index
    %501 = vector.load %arg8[%c0_191, %c0_192] : memref<30x64xbf16, #tpu.memory_space<vmem>>, vector<30x64xbf16>
    %502 = arith.truncf %500 : vector<64x1xf32> to vector<64x1xbf16>
    %cst_193 = arith.constant dense<0.000000e+00> : vector<30x1xf32>
    %503 = tpu.matmul %501, %502, %cst_193 {dimension_numbers = #tpu.dot_dimension_numbers<[1], [0], [0], [1], [0, 0, 1, 1], [], []>} : vector<30x64xbf16>, vector<64x1xbf16>, vector<30x1xf32> -> vector<30x1xf32>
    %c0_194 = arith.constant 0 : index
    %c0_195 = arith.constant 0 : index
    %504 = vector.load %arg9[%c0_194, %c0_195] : memref<30x1xf32, #tpu.memory_space<vmem>>, vector<30x1xf32>
    %505 = arith.addf %503, %504 : vector<30x1xf32>
    %c0_196 = arith.constant 0 : index
    %c0_197 = arith.constant 0 : index
    %c0_198 = arith.constant 0 : index
    %506 = vector.load %arg10[%c0_196, %c0_197, %c0_198] : memref<1x30x1xf32, #tpu.memory_space<vmem>>, vector<1x30x1xf32>
    %507 = vector.shape_cast %506 : vector<1x30x1xf32> to vector<30x1xf32>
    %508 = vector.shape_cast %505 : vector<30x1xf32> to vector<1x30x1xf32>
    tpu.vector_store %arg10[%c0_196, %c0_197, %c0_198], %508 {strides = array<i32>} : memref<1x30x1xf32, #tpu.memory_space<vmem>>, vector<1x30x1xf32>,
    return
  }
  func.func @transform_0(%arg0: i32) -> (i32, i32, i32) {
    %c0_i32 = arith.constant 0 : i32
    %c0_i32_0 = arith.constant 0 : i32
    %c0_i32_1 = arith.constant 0 : i32
    return %arg0, %c0_i32, %c0_i32_0 : i32, i32, i32
  }
  func.func @transform_1(%arg0: i32) -> (i32, i32) {
    %c0_i32 = arith.constant 0 : i32
    %c0_i32_0 = arith.constant 0 : i32
    %c0_i32_1 = arith.constant 0 : i32
    return %c0_i32, %c0_i32_0 : i32, i32
  }
  func.func @transform_2(%arg0: i32) -> (i32, i32) {
    %c0_i32 = arith.constant 0 : i32
    %c0_i32_0 = arith.constant 0 : i32
    %c0_i32_1 = arith.constant 0 : i32
    return %c0_i32, %c0_i32_0 : i32, i32
  }
  func.func @transform_3(%arg0: i32) -> (i32, i32) {
    %c0_i32 = arith.constant 0 : i32
    %c0_i32_0 = arith.constant 0 : i32
    %c0_i32_1 = arith.constant 0 : i32
    return %c0_i32, %c0_i32_0 : i32, i32
  }
  func.func @transform_4(%arg0: i32) -> (i32, i32) {
    %c0_i32 = arith.constant 0 : i32
    %c0_i32_0 = arith.constant 0 : i32
    %c0_i32_1 = arith.constant 0 : i32
    return %c0_i32, %c0_i32_0 : i32, i32
  }
  func.func @transform_5(%arg0: i32) -> (i32, i32) {
    %c0_i32 = arith.constant 0 : i32
    %c0_i32_0 = arith.constant 0 : i32
    %c0_i32_1 = arith.constant 0 : i32
    return %c0_i32, %c0_i32_0 : i32, i32
  }
  func.func @transform_6(%arg0: i32) -> (i32, i32) {
    %c0_i32 = arith.constant 0 : i32
    %c0_i32_0 = arith.constant 0 : i32
    %c0_i32_1 = arith.constant 0 : i32
    return %c0_i32, %c0_i32_0 : i32, i32
  }
  func.func @transform_7(%arg0: i32) -> (i32, i32) {
    %c0_i32 = arith.constant 0 : i32
    %c0_i32_0 = arith.constant 0 : i32
    %c0_i32_1 = arith.constant 0 : i32
    return %c0_i32, %c0_i32_0 : i32, i32
  }
  func.func @transform_8(%arg0: i32) -> (i32, i32) {
    %c0_i32 = arith.constant 0 : i32
    %c0_i32_0 = arith.constant 0 : i32
    %c0_i32_1 = arith.constant 0 : i32
    return %c0_i32, %c0_i32_0 : i32, i32
  }
  func.func @transform_9(%arg0: i32) -> (i32, i32, i32) {
    %c0_i32 = arith.constant 0 : i32
    %c0_i32_0 = arith.constant 0 : i32
    %c0_i32_1 = arith.constant 0 : i32
    return %arg0, %c0_i32, %c0_i32_0 : i32, i32, i32
  }
}

</mosaic_0001>

<bundles_post_ra>
// kernel: tpu_custom_call.1
= control target key start
LH: loop header
LB: loop body
LE: loop exit
PB: predicated region body
PF: predicated region fallthrough
CT: control target
= control target key end

     0   :  { %s8348_s30 = smov 0   ;;  %s12449_s0 = inlined_call_operand.vmem [shape: f32[2,8,384], index: 0, kind: input, shape index: {}]   ;;  %s12450_s1 = inlined_call_operand.vmem [shape: bf16[640,576], index: 1, kind: input, shape index: {}]   ;;  %s12451_s2 = inlined_call_operand.vmem [shape: f32[600,2], index: 2, kind: input, shape index: {}]   ;;  %s12452_s3 = inlined_call_operand.vmem [shape: f32[1,768], index: 3, kind: input, shape index: {}]   ;;  %s12453_s4 = inlined_call_operand.vmem [shape: bf16[384,128], index: 4, kind: input, shape index: {}]   ;;  %s12454_s5 = inlined_call_operand.vmem [shape: bf16[128,128], index: 5, kind: input, shape index: {}]   ;;  %s12455_s6 = inlined_call_operand.vmem [shape: bf16[128,128], index: 6, kind: input, shape index: {}]   ;;  %s12456_s7 = inlined_call_operand.vmem [shape: bf16[30,64], index: 7, kind: input, shape index: {}]   ;;  %s12457_s8 = inlined_call_operand.vmem [shape: f32[30,1], index: 8, kind: input, shape index: {}]   ;;  %s12458_s9 = inlined_call_operand.vmem [shape: f32[2,30,1], index: 9, kind: output, shape index: {}]  }
   0x1 LB: > { %s7310_s10 = sadd.s32 4294967295, %s8269_s30   ;;  %p7314_p0 = scmp.ge.s32.totalorder %s8269_s30, 1  ;;  %s8269_s30 = sphi %s8348_s30, %s19_s30  }
   0x2   : > { %p287_p1 = scmp.lt.s32.totalorder %s8269_s30, 3 }
   0x4   : > { %p288_p2 = pnand %p7314_p0, %p287_p1 }
   0x6   : > { %291 = sbr.rel (%p288_p2) target bundleno = 9159 (0x23c7), region = 56 }
   0xb   : > { %p323_p3 = scmp.lt.s32.totalorder %s7310_s10, 1  ;;  %v12463_v0 = vmov 0   ;;  %s8272_s11 = smov 90   ;;  %vm441_vm0 = vcmask 736256   ;;  %vm445_vm1 = vcmask 1043456   ;;  %vm429_vm2 = vcmask 744448  }
   0xc   : > { %439 = vrot.lane.b32.xlu1 %v12463_v0, %s8272_s11  ;;  %8161 = vset.pattern.permute.xlu0 %v12463_v0  ;;  %s8273_s16 = smov 92   ;;  %s8274_s17 = smov 91   ;;  %v348_v14 = vrot.slane %v12463_v0, 4  ;;  %vm417_vm3 = vcmask 752640   ;;  %vm394_vm4 = vcmask 891904   ;;  %vm405_vm5 = vcmask 883712  }
   0xd   : > { %s12507_s10 = smov (!%p323_p3, %s7310_s10), 1  ;;  %8163 = vset.pattern.permute.xlu2 %v12463_v0  ;;  %s8275_s18 = smov 109   ;;  %vm384_vm6 = vcmask 900096   ;;  %vm372_vm7 = vcmask 1031168   ;;  %vm360_vm8 = vcmask 1039360   ;;  %vm551_vm9 = vcmask 154624  }
   0xe   : > { %s8125_s12 = smul.u32 24, %s12507_s10  ;;  %s8276_s19 = smov 108   ;;  %vm579_vm10 = vcmask 588800   ;;  %vm2407_vm11 = vcmask 867328   ;;  %vm2401_vm12 = vcmask 875520   ;;  %vm2454_vm13 = vcmask 89088  }
   0xf   : > { %s8277_s20 = smov 126   ;;  %s8278_s21 = smov 110   ;;  %vm2472_vm14 = vcmask 130048   ;;  %vm2390_vm15 = vcmask 949248  }
  0x10   : > { %s327_s15 = scalar_lea.vmem %s12449_s0, %s8125_s12  ;;  %s8279_s22 = smov 127  }
  0x11   : > { %v336_v1 = vld [vmem:[%s327_s15 + $0x10] sm:$0xff]  ;;  %v334_v2 = vld [vmem:[%s327_s15] sm:$0xff]  ;;  %v335_v3 = vld [vmem:[%s327_s15 + $0x8] sm:$0xff]  ;;  %s8280_s23 = smov 19   ;;  %s8282_s28 = smov 106  }
  0x12   : > { %v338_v4 = vpack.c.bf16 %v336_v1, %v336_v1  ;;  %v337_v5 = vpack.c.bf16 %v335_v3, %v334_v2  ;;  %s8283_s13 = smov 107   ;;  %s8284_s14 = smov 117  }
  0x13   : > { %s8285_s15 = smov 11   ;;  %s8286_s24 = smov 116  }
  0x14   : > { %v343_v6 = vunpack.c.l.b16 %v338_v4  ;;  %v341_v7 = vunpack.c.l.b16 %v337_v5  ;;  %v342_v10 = vunpack.c.h.b16 %v337_v5  ;;  %s12459_s25 = smov 118   ;;  %s8288_s12 = smov 122  }
  0x15   : > { %s8297_s27 = smov 119  }
  0x16   : > { %v8366_v8 = vpack.c.b16 %v343_v6, %v343_v6  ;;  %v8368_v9 = vpack.c.b16 %v341_v7, %v341_v7  ;;  %v8376_v11 = vpack.c.b16 %v342_v10, %v342_v10 }
  0x18   : > { %437 = vrot.lane.b32.xlu1 %v8366_v8, %s8272_s11  ;;  %409 = vrot.lane.b32.xlu2 %v8368_v9, %s8273_s16  ;;  %v351_v12 = vrot.slane %v8366_v8, 4  ;;  %v349_v13 = vrot.slane %v8368_v9, 4  ;;  %v350_v15 = vrot.slane %v8376_v11, 4 }
  0x19   : > { %433 = vrot.lane.b32.xlu0 %v8368_v9, %s8272_s11 }
  0x20   : > { %415 = vrot.lane.b32.xlu1 %v12463_v0, %s8273_s16  ;;  %411 = vrot.lane.b32.xlu2 %v8376_v11, %s8273_s16 }
  0x21   : > { %435 = vrot.lane.b32.xlu0 %v8376_v11, %s8272_s11 }
  0x28   : > { %425 = vrot.lane.b32.xlu1 %v351_v12, %s8274_s17  ;;  %421 = vrot.lane.b32.xlu2 %v349_v13, %s8274_s17 }
  0x29   : > { %413 = vrot.lane.b32.xlu0 %v8366_v8, %s8273_s16 }
  0x30   : > { %390 = vrot.lane.b32.xlu1 %v8376_v11, %s8275_s18  ;;  %427 = vrot.lane.b32.xlu2 %v348_v14, %s8274_s17 }
  0x31   : > { %423 = vrot.lane.b32.xlu0 %v350_v15, %s8274_s17 }
  0x38   : > { %399 = vrot.lane.b32.xlu1 %v350_v15, %s8276_s19  ;;  %392 = vrot.lane.b32.xlu2 %v8366_v8, %s8275_s18 }
  0x39   : > { %388 = vrot.lane.b32.xlu0 %v8368_v9, %s8275_s18 }
  0x40   : > { %364 = vrot.lane.b32.xlu1 %v12463_v0, %s8277_s20  ;;  %401 = vrot.lane.b32.xlu2 %v351_v12, %s8276_s19 }
  0x41   : > { %397 = vrot.lane.b32.xlu0 %v349_v13, %s8276_s19 }
  0x48   : > { %370 = vrot.lane.b32.xlu1 %v8366_v8, %s8277_s20  ;;  %366 = vrot.lane.b32.xlu2 %v8368_v9, %s8277_s20 }
  0x49   : > { %403 = vrot.lane.b32.xlu0 %v348_v14, %s8276_s19 }
  0x50   : > { %380 = vrot.lane.b32.xlu1 %v350_v15, %s8278_s21  ;;  %376 = vrot.lane.b32.xlu2 %v348_v14, %s8278_s21 }
  0x51   : > { %368 = vrot.lane.b32.xlu0 %v8376_v11, %s8277_s20 }
  0x58   : > { %354 = vrot.lane.b32.xlu1 %v349_v13, %s8279_s22  ;;  %382 = vrot.lane.b32.xlu2 %v351_v12, %s8278_s21 }
  0x59   : > { %378 = vrot.lane.b32.xlu0 %v349_v13, %s8278_s21 }
  0x60   : > { %356 = vrot.lane.b32.xlu2 %v350_v15, %s8279_s22 }
  0x61   : > { %352 = vrot.lane.b32.xlu0 %v348_v14, %s8279_s22 }
  0x69   : > { %358 = vrot.lane.b32.xlu0 %v351_v12, %s8279_s22 }
  0x72   : > { %v410_v16 = vpop.permute.xlu2 %409 }
  0x7a   : > { %v412_v17 = vpop.permute.xlu2 %411 }
  0x7b   : > { %v418_v51 = vsel %vm417_vm3, %v410_v16, %v412_v17 }
  0x7e   : > { %v8420_v18 = vpop.permute.xlu1 %439 }
  0x82   : > { %v422_v19 = vpop.permute.xlu2 %421 }
  0x83   : > { %v484_v32 = vsel %vm445_vm1, %v410_v16, %v422_v19 }
  0x8a   : > { %v438_v20 = vpop.permute.xlu1 %437  ;;  %v8422_v21 = vpop.permute.xlu2 %427 }
  0x8b   : > { %v434_v22 = vpop.permute.xlu0 %433  ;;  %v444_v26 = vsel %vm441_vm0, %v438_v20, %v8420_v18 }
  0x8c   : > { %543 = vrot.lane.b32.xlu1 %v434_v22, %s8280_s23 }
  0x92   : > { %v8425_v23 = vpop.permute.xlu1 %415  ;;  %v393_v24 = vpop.permute.xlu2 %392 }
  0x93   : > { %v436_v25 = vpop.permute.xlu0 %435 }
  0x94   : > { %549 = vrot.lane.b32.xlu1 %v444_v26, %s8280_s23  ;;  %v443_v27 = vsel %vm441_vm0, %v436_v25, %v438_v20  ;;  %v442_v28 = vsel %vm441_vm0, %v434_v22, %v436_v25 }
  0x95   : > { %547 = vrot.lane.b32.xlu0 %v443_v27, %s8280_s23  ;;  %545 = vrot.lane.b32.xlu2 %v442_v28, %s8280_s23 }
  0x9a   : > { %v426_v29 = vpop.permute.xlu1 %425  ;;  %v402_v30 = vpop.permute.xlu2 %401 }
  0x9b   : > { %v414_v31 = vpop.permute.xlu0 %413  ;;  %v432_v33 = vsel %vm429_vm2, %v426_v29, %v8422_v21 }
  0x9c   : > { %v420_v34 = vsel %vm417_vm3, %v414_v31, %v8425_v23  ;;  %v419_v57 = vsel %vm417_vm3, %v412_v17, %v414_v31 }
  0x9d   : > { %535 = vrot.lane.b32.xlu2 %v484_v32, %s8280_s23  ;;  %v493_v37 = vsel %vm445_vm1, %v420_v34, %v432_v33 }
  0xa2   : > { %v391_v35 = vpop.permute.xlu1 %390  ;;  %v367_v38 = vpop.permute.xlu2 %366 }
  0xa3   : > { %v424_v36 = vpop.permute.xlu0 %423  ;;  %v396_v40 = vsel %vm394_vm4, %v391_v35, %v393_v24 }
  0xa4   : > { %v430_v49 = vsel %vm429_vm2, %v422_v19, %v424_v36  ;;  %v431_v55 = vsel %vm429_vm2, %v424_v36, %v426_v29 }
  0xa5   : > { %541 = vrot.lane.b32.xlu2 %v493_v37, %s8280_s23  ;;  %v487_v54 = vsel %vm445_vm1, %v418_v51, %v430_v49  ;;  %v490_v59 = vsel %vm445_vm1, %v419_v57, %v431_v55 }
  0xaa   : > { %v400_v39 = vpop.permute.xlu1 %399  ;;  %v8446_v44 = vpop.permute.xlu2 %376 }
  0xab   : > { %v407_v41 = vsel %vm405_vm5, %v400_v39, %v402_v30  ;;  %v389_v42 = vpop.permute.xlu0 %388 }
  0xac   : > { %v478_v43 = vsel %vm445_vm1, %v396_v40, %v407_v41  ;;  %v395_v2 = vsel %vm394_vm4, %v389_v42, %v391_v35 }
  0xad   : > { %531 = vrot.lane.b32.xlu2 %v478_v43, %s8280_s23  ;;  %v631_v43 = vld [vmem:[%s12451_s2] sm:$0xff] }
  0xb2   : > { %v8448_v45 = vpop.permute.xlu1 %364  ;;  %v383_v48 = vpop.permute.xlu2 %382 }
  0xb3   : > { %12481 = vst [vmem:[#allocation2_spill] sm:$0xff] %v8448_v45  ;;  %v398_v46 = vpop.permute.xlu0 %397  ;;  %v373_v16 = vsel %vm372_vm7, %v8448_v45, %v367_v38 }
  0xb4   : > { %v472_v47 = vsel %vm445_vm1, %v389_v42, %v398_v46  ;;  %v406_v62 = vsel %vm405_vm5, %v398_v46, %v400_v39 }
  0xb5   : > { %527 = vrot.lane.b32.xlu0 %v472_v47, %s8280_s23  ;;  %v475_v4 = vsel %vm445_vm1, %v395_v2, %v406_v62  ;;  %v12461_v47 = vmov 1   ;;  %v494_v2 = vld [vmem:[%s12450_s1] sm:$0xf] }
  0xb6   : > { %8162 = vset.pattern.permute.xlu1 %v12461_v47 }
  0xba   : > { %v371_v50 = vpop.permute.xlu1 %370  ;;  %v357_v12 = vpop.permute.xlu2 %356 }
  0xbb   : > { %v8454_v52 = vpop.permute.xlu0 %403  ;;  %v469_v53 = vsel %vm445_vm1, %v371_v50, %v383_v48 }
  0xbc   : > { %525 = vrot.lane.b32.xlu1 %v469_v53, %s8280_s23  ;;  %v408_v56 = vsel %vm405_vm5, %v402_v30, %v8454_v52 }
  0xbd   : > { %537 = vrot.lane.b32.xlu0 %v487_v54, %s8280_s23  ;;  %v481_v61 = vsel %vm445_vm1, %v393_v24, %v408_v56 }
  0xc2   : > { %v381_v60 = vpop.permute.xlu1 %380 }
  0xc3   : > { %v369_v58 = vpop.permute.xlu0 %368  ;;  %v387_v63 = vsel %vm384_vm6, %v381_v60, %v383_v48 }
  0xc4   : > { %539 = vrot.lane.b32.xlu1 %v490_v59, %s8280_s23  ;;  %v375_v1 = vsel %vm372_vm7, %v369_v58, %v371_v50  ;;  %v374_v5 = vsel %vm372_vm7, %v367_v38, %v369_v58 }
  0xc5   : > { %533 = vrot.lane.b32.xlu0 %v481_v61, %s8280_s23  ;;  %v466_v7 = vsel %vm445_vm1, %v375_v1, %v387_v63 }
  0xca   : > { %v355_v10 = vpop.permute.xlu1 %354 }
  0xcb   : > { %v379_v3 = vpop.permute.xlu0 %378  ;;  %v362_v14 = vsel %vm360_vm8, %v355_v10, %v357_v12 }
  0xcc   : > { %v386_v6 = vsel %vm384_vm6, %v379_v3, %v381_v60  ;;  %529 = vrot.lane.b32.xlu1 %v475_v4, %s8280_s23  ;;  %v385_v15 = vsel %vm384_vm6, %v8446_v44, %v379_v3  ;;  %v451_v17 = vsel %vm445_vm1, %v8368_v9, %v362_v14 }
  0xcd   : > { %523 = vrot.lane.b32.xlu0 %v466_v7, %s8280_s23  ;;  %v463_v13 = vsel %vm445_vm1, %v374_v5, %v386_v6  ;;  %v460_v20 = vsel %vm445_vm1, %v373_v16, %v385_v15  ;;  %v650_v15 = vld [vmem:[%s12452_s3] sm:$0x7] }
  0xce   : > { %521 = vrot.lane.b32.xlu2 %v463_v13, %s8280_s23 }
  0xd3   : > { %v8487_v19 = vpop.permute.xlu0 %352 }
  0xd4   : > { %519 = vrot.lane.b32.xlu1 %v460_v20, %s8280_s23  ;;  %v361_v22 = vsel %vm360_vm8, %v8487_v19, %v355_v10  ;;  %v8536_v20 = vperm.slane %v650_v15, 0 }
  0xd5   : > { %513 = vrot.lane.b32.xlu0 %v451_v17, %s8280_s23  ;;  %v448_v24 = vsel %vm445_vm1, 0, %v361_v22 }
  0xd6   : > { %511 = vrot.lane.b32.xlu2 %v448_v24, %s8280_s23 }
  0xdb   : > { %v359_v25 = vpop.permute.xlu0 %358 }
  0xdc   : > { %v363_v26 = vsel %vm360_vm8, %v357_v12, %v359_v25  ;;  %v457_v9 = vsel %vm445_vm1, %v8366_v8, %v359_v25  ;;  %v8538_v25 = vperm.slane %v650_v15, 1 }
  0xdd   : > { %v454_v27 = vsel %vm445_vm1, %v8376_v11, %v363_v26  ;;  %634 = vperm.xlu0 %8161, %v631_v43  }
  0xde   : > { %517 = vrot.lane.b32.xlu2 %v457_v9, %s8280_s23  ;;  %515 = vrot.lane.b32.xlu1 %v454_v27, %s8280_s23 }
  0xe5   : > { %8164 = vset.pattern.permute.xlu0 %v12461_v47 }
  0xe6   : > { %641 = vperm.xlu1 %8162, %v631_v43  }
  0xee   : > { %8165 = vset.pattern.permute.xlu1 %v12463_v0 }
  0xef   : > { %v546_v28 = vpop.permute.xlu2 %545 }
  0xf7   : > { %v536_v36 = vpop.permute.xlu2 %535 }
  0xfe   : > { %v544_v29 = vpop.permute.xlu1 %543 }
  0xff   : > { %v564_v30 = vsel %vm551_vm9, %v544_v29, %v546_v28  ;;  %v542_v38 = vpop.permute.xlu2 %541 }
 0x100   : > { %v584_v31 = vsel %vm445_vm1, %v564_v30, 0 }
 0x101   : > { %595 = vmatpush.bf16.msra.mxu0 %v584_v31 }
 0x106   : > { %v550_v32 = vpop.permute.xlu1 %549 }
 0x107   : > { %v548_v33 = vpop.permute.xlu0 %547  ;;  %v532_v42 = vpop.permute.xlu2 %531 }
 0x108   : > { %v565_v34 = vsel %vm551_vm9, %v546_v28, %v548_v33  ;;  %v566_v8 = vsel %vm551_vm9, %v548_v33, %v550_v32 }
 0x109   : > { %v587_v11 = vsel %vm445_vm1, %v565_v34, 0  ;;  %v590_v35 = vsel %vm445_vm1, %v566_v8, 0 }
 0x10a   : > { %608 = vmatpush.bf16.msra.mxu1 %v587_v11  ;;  %621 = vmatpush.bf16.msra.mxu2 %v590_v35 }
 0x127   : > { %v528_v37 = vpop.permute.xlu0 %527 }
 0x128   : > { %v522_v53 = vpop.permute.xlu2 %521 }
 0x12e   : > { %v526_v39 = vpop.permute.xlu1 %525 }
 0x12f   : > { %v538_v40 = vpop.permute.xlu0 %537 }
 0x130   : > { %v561_v41 = vsel %vm551_vm9, %v536_v36, %v538_v40  ;;  %v512_v60 = vpop.permute.xlu2 %511 }
 0x131   : > { %596 = vmatpush.bf16.msra.mxu0 %v561_v41 }
 0x136   : > { %v540_v46 = vpop.permute.xlu1 %539 }
 0x137   : > { %v534_v48 = vpop.permute.xlu0 %533  ;;  %v562_v49 = vsel %vm551_vm9, %v538_v40, %v540_v46  ;;  %v563_v50 = vsel %vm551_vm9, %v540_v46, %v542_v38  ;;  %v8558_v38 = vperm.slane %v650_v15, 2 }
 0x138   : > { %609 = vmatpush.bf16.msra.mxu1 %v562_v49  ;;  %622 = vmatpush.bf16.msra.mxu2 %v563_v50  ;;  %v560_v51 = vsel %vm551_vm9, %v532_v42, %v534_v48  ;;  %v518_v3 = vpop.permute.xlu2 %517 }
 0x13c   : > { %623 = vmatpush.bf16.msra.mxu2 %v560_v51 }
 0x13e   : > { %v530_v54 = vpop.permute.xlu1 %529 }
 0x13f   : > { %v524_v55 = vpop.permute.xlu0 %523  ;;  %v558_v56 = vsel %vm551_vm9, %v528_v37, %v530_v54  ;;  %v559_v57 = vsel %vm551_vm9, %v530_v54, %v532_v42 }
 0x140   : > { %597 = vmatpush.bf16.msra.mxu0 %v558_v56  ;;  %610 = vmatpush.bf16.msra.mxu1 %v559_v57  ;;  %v557_v58 = vsel %vm551_vm9, %v524_v55, %v526_v39  ;;  %v556_v59 = vsel %vm551_vm9, %v522_v53, %v524_v55 }
 0x141   : > { %624 = vmatpush.bf16.msra.mxu2 %v557_v58 }
 0x144   : > { %611 = vmatpush.bf16.msra.mxu1 %v556_v59 }
 0x146   : > { %v520_v61 = vpop.permute.xlu1 %519 }
 0x147   : > { %v555_v62 = vsel %vm551_vm9, %v520_v61, %v522_v53  ;;  %v514_v63 = vpop.permute.xlu0 %513 }
 0x148   : > { %598 = vmatpush.bf16.msra.mxu0 %v555_v62  ;;  %v552_v1 = vsel %vm551_vm9, %v512_v60, %v514_v63 }
 0x14c   : > { %599 = vmatpush.bf16.msra.mxu0 %v552_v1 }
 0x14f   : > { %7318 = vmatmul.msk.bf16.vlgmr.msra.gmra.mxu0 %vm579_vm10, %v494_v2  ;;  %v635_v7 = vpop.permute.xlu0 %634 }
 0x150   : > { %v516_v4 = vpop.permute.xlu1 %515 }
 0x151   : > { %v553_v5 = vsel %vm551_vm9, %v514_v63, %v516_v4  ;;  %v554_v6 = vsel %vm551_vm9, %v516_v4, %v518_v3 }
 0x152   : > { %612 = vmatpush.bf16.msra.mxu1 %v553_v5  ;;  %625 = vmatpush.bf16.msra.mxu2 %v554_v6 }
 0x155   : > { %7319 = vmatmul.msk.bf16.vlgmr.msra.gmra.mxu1 %vm579_vm10, %v494_v2  ;;  %7320 = vmatmul.msk.bf16.vlgmr.msra.gmra.mxu2 %vm579_vm10, %v494_v2 }
 0x158   : > { %v642_v12 = vpop.permute.xlu1 %641 }
 0x1cc   : > { %v601_v10 = vpop.f32.mrf.mxu0 }
 0x1cd   : > { %v637_v13 = vmul.f32 %v635_v7, %v601_v10 }
 0x1cf   : > { %v644_v14 = vadd.f32 %v642_v12, %v637_v13 }
 0x1d1   : > { %v647_v22 = vmax.f32 %v644_v14, 0.0 }
 0x1d2   : > { %v614_v16 = vpop.f32.mrf.mxu1 }
 0x1d3   : > { %v638_v17 = vmul.f32 %v635_v7, %v614_v16  ;;  %v8541_v27 = vmul.f32 %v8536_v20, %v647_v22 }
 0x1d4   : > { %v603_v24 = vpop.f32.mrf.mxu0 }
 0x1d5   : > { %v645_v26 = vadd.f32 %v642_v12, %v638_v17 }
 0x1d7   : > { %v648_v9 = vmax.f32 %v645_v26, 0.0 }
 0x1d8   : > { %v627_v28 = vpop.f32.mrf.mxu2 }
 0x1d9   : > { %v8544_v29 = vmul.f32 %v8538_v25, %v648_v9  ;;  %v639_v11 = vmul.f32 %v635_v7, %v627_v28 }
 0x1da   : > { %v616_v30 = vpop.f32.mrf.mxu1 }
 0x1db   : > { %v661_v31 = vpack.c.bf16 %v8544_v29, %v8541_v27  ;;  %v646_v36 = vadd.f32 %v642_v12, %v639_v11 }
 0x1dd   : > { %v665_v32 = vunpack.c.l.b16 %v661_v31  ;;  %v666_v33 = vunpack.c.h.b16 %v661_v31  ;;  %v649_v37 = vmax.f32 %v646_v36, 0.0 }
 0x1df   : > { %v8548_v34 = vpack.c.b16 %v665_v32, %v665_v32  ;;  %v8550_v8 = vpack.c.b16 %v666_v33, %v666_v33  ;;  %v8567_v40 = vmul.f32 %v8558_v38, %v649_v37 }
 0x1e0   : > { %v629_v35 = vpop.f32.mrf.mxu2 }
 0x1e1   : > { %720 = vrot.lane.b32.xlu0 %v8550_v8, %s8273_s16  ;;  %738 = vrot.lane.b32.xlu1 %v8550_v8, %s8272_s11  ;;  %v671_v39 = vrot.slane %v8548_v34, 4  ;;  %v662_v41 = vpack.c.bf16 %v8567_v40, %v8567_v40  ;;  %v672_v46 = vrot.slane %v8550_v8, 4 }
 0x1e2   : > { %736 = vrot.lane.b32.xlu2 %v8548_v34, %s8272_s11 }
 0x1e3   : > { %v667_v42 = vunpack.c.l.b16 %v662_v41 }
 0x1e5   : > { %v8576_v43 = vpack.c.b16 %v667_v42, %v667_v42 }
 0x1e7   : > { %v673_v48 = vrot.slane %v8576_v43, 4 }
 0x1e9   : > { %701 = vrot.lane.b32.xlu1 %v8548_v34, %s8275_s18  ;;  %709 = vrot.lane.b32.xlu0 %v671_v39, %s8276_s19 }
 0x1ea   : > { %718 = vrot.lane.b32.xlu2 %v8548_v34, %s8273_s16 }
 0x1f1   : > { %683 = vrot.lane.b32.xlu1 %v8548_v34, %s8277_s20  ;;  %692 = vrot.lane.b32.xlu0 %v671_v39, %s8278_s21 }
 0x1f2   : > { %703 = vrot.lane.b32.xlu2 %v8550_v8, %s8275_s18 }
 0x1f9   : > { %727 = vrot.lane.b32.xlu1 %v671_v39, %s8274_s17  ;;  %740 = vrot.lane.b32.xlu0 %v8576_v43, %s8272_s11 }
 0x1fa   : > { %685 = vrot.lane.b32.xlu2 %v8550_v8, %s8277_s20 }
 0x201   : > { %711 = vrot.lane.b32.xlu1 %v672_v46, %s8276_s19  ;;  %687 = vrot.lane.b32.xlu0 %v8576_v43, %s8277_s20 }
 0x202   : > { %729 = vrot.lane.b32.xlu2 %v672_v46, %s8274_s17 }
 0x209   : > { %694 = vrot.lane.b32.xlu1 %v672_v46, %s8278_s21  ;;  %731 = vrot.lane.b32.xlu0 %v673_v48, %s8274_s17 }
 0x20a   : > { %676 = vrot.lane.b32.xlu2 %v672_v46, %s8279_s22 }
 0x211   : > { %674 = vrot.lane.b32.xlu1 %v671_v39, %s8279_s22  ;;  %713 = vrot.lane.b32.xlu0 %v673_v48, %s8276_s19 }
 0x212   : > { %722 = vrot.lane.b32.xlu2 %v8576_v43, %s8273_s16 }
 0x219   : > { %696 = vrot.lane.b32.xlu1 %v673_v48, %s8278_s21 }
 0x21a   : > { %705 = vrot.lane.b32.xlu2 %v8576_v43, %s8275_s18 }
 0x222   : > { %678 = vrot.lane.b32.xlu2 %v673_v48, %s8279_s22 }
 0x23c   : > { %v737_v49 = vpop.permute.xlu2 %736 }
 0x23d   : > { %841 = vrot.lane.b32.xlu0 %v737_v49, %s8280_s23 }
 0x244   : > { %v719_v50 = vpop.permute.xlu2 %718 }
 0x24c   : > { %v704_v55 = vpop.permute.xlu2 %703 }
 0x253   : > { %v8601_v51 = vpop.permute.xlu0 %720  ;;  %v739_v53 = vpop.permute.xlu1 %738 }
 0x254   : > { %v742_v54 = vsel %vm441_vm0, %v737_v49, %v739_v53  ;;  %v686_v59 = vpop.permute.xlu2 %685  ;;  %v724_v2 = vsel %vm417_vm3, %v719_v50, %v8601_v51 }
 0x255   : > { %843 = vrot.lane.b32.xlu1 %v742_v54, %s8280_s23 }
 0x25b   : > { %v702_v56 = vpop.permute.xlu1 %701  ;;  %v710_v57 = vpop.permute.xlu0 %709 }
 0x25c   : > { %v770_v58 = vsel %vm445_vm1, %v702_v56, %v710_v57  ;;  %v730_v62 = vpop.permute.xlu2 %729  ;;  %v707_v10 = vsel %vm394_vm4, %v702_v56, %v704_v55 }
 0x25d   : > { %825 = vrot.lane.b32.xlu0 %v770_v58, %s8280_s23 }
 0x263   : > { %v684_v60 = vpop.permute.xlu1 %683  ;;  %v693_v61 = vpop.permute.xlu0 %692 }
 0x264   : > { %v677_v14 = vpop.permute.xlu2 %676  ;;  %v689_v15 = vsel %vm372_vm7, %v8448_v45, %v684_v60  ;;  %v698_v16 = vsel %vm384_vm6, %v8446_v44, %v693_v61  ;;  %v690_v22 = vsel %vm372_vm7, %v684_v60, %v686_v59 }
 0x265   : > { %v758_v9 = vsel %vm445_vm1, %v689_v15, %v698_v16 }
 0x26b   : > { %v728_v63 = vpop.permute.xlu1 %727  ;;  %v741_v1 = vpop.permute.xlu0 %740 }
 0x26c   : > { %v733_v3 = vsel %vm429_vm2, %v728_v63, %v730_v62  ;;  %v782_v4 = vsel %vm445_vm1, %v719_v50, %v728_v63  ;;  %v723_v30 = vpop.permute.xlu2 %722  ;;  %v743_v11 = vsel %vm441_vm0, %v739_v53, %v741_v1 }
 0x26d   : > { %833 = vrot.lane.b32.xlu2 %v782_v4, %s8280_s23  ;;  %v785_v5 = vsel %vm445_vm1, %v724_v2, %v733_v3  ;;  %v726_v46 = vsel %vm417_vm3, %v723_v30, %v8425_v23 }
 0x26e   : > { %835 = vrot.lane.b32.xlu0 %v785_v5, %s8280_s23 }
 0x273   : > { %v712_v6 = vpop.permute.xlu1 %711  ;;  %v688_v7 = vpop.permute.xlu0 %687 }
 0x274   : > { %v715_v12 = vsel %vm405_vm5, %v710_v57, %v712_v6  ;;  %v706_v42 = vpop.permute.xlu2 %705  ;;  %v725_v57 = vsel %vm417_vm3, %v8601_v51, %v723_v30  ;;  %v691_v58 = vsel %vm372_vm7, %v686_v59, %v688_v7 }
 0x275   : > { %v773_v13 = vsel %vm445_vm1, %v707_v10, %v715_v12  ;;  %v708_v60 = vsel %vm394_vm4, %v704_v55, %v706_v42 }
 0x276   : > { %827 = vrot.lane.b32.xlu1 %v773_v13, %s8280_s23 }
 0x27b   : > { %v695_v17 = vpop.permute.xlu1 %694  ;;  %v732_v26 = vpop.permute.xlu0 %731 }
 0x27c   : > { %v699_v24 = vsel %vm384_vm6, %v693_v61, %v695_v17  ;;  %v735_v41 = vsel %vm429_vm2, %v732_v26, %v8422_v21  ;;  %v734_v53 = vsel %vm429_vm2, %v730_v62, %v732_v26 }
 0x27d   : > { %v761_v28 = vsel %vm445_vm1, %v690_v22, %v699_v24  ;;  %v791_v49 = vsel %vm445_vm1, %v726_v46, %v735_v41  ;;  %v788_v61 = vsel %vm445_vm1, %v725_v57, %v734_v53  ;;  %v927_v24 = vld [vmem:[%s12451_s2 + $0x8] sm:$0xff] }
 0x27e   : > { %817 = vrot.lane.b32.xlu1 %v758_v9, %s8280_s23  ;;  %819 = vrot.lane.b32.xlu2 %v761_v28, %s8280_s23 }
 0x283   : > { %v675_v31 = vpop.permute.xlu1 %674  ;;  %v714_v37 = vpop.permute.xlu0 %713 }
 0x284   : > { %v681_v32 = vsel %vm360_vm8, %v675_v31, %v677_v14  ;;  %v680_v33 = vsel %vm360_vm8, %v8487_v19, %v675_v31  ;;  %v717_v39 = vsel %vm405_vm5, %v714_v37, %v8454_v52  ;;  %v716_v56 = vsel %vm405_vm5, %v712_v6, %v714_v37 }
 0x285   : > { %v746_v35 = vsel %vm445_vm1, 0, %v680_v33  ;;  %v749_v36 = vsel %vm445_vm1, %v8548_v34, %v681_v32  ;;  %v744_v34 = vsel %vm441_vm0, %v741_v1, %v8420_v18  ;;  %v779_v48 = vsel %vm445_vm1, %v706_v42, %v717_v39  ;;  %v679_v1 = vpop.permute.xlu2 %678 }
 0x286   : > { %845 = vrot.lane.b32.xlu1 %v743_v11, %s8280_s23  ;;  %809 = vrot.lane.b32.xlu2 %v746_v35, %s8280_s23  ;;  %v776_v62 = vsel %vm445_vm1, %v708_v60, %v716_v56  ;;  %v682_v2 = vsel %vm360_vm8, %v677_v14, %v679_v1  ;;  %v755_v55 = vsel %vm445_vm1, %v8576_v43, %v679_v1  ;;  %v792_v35 = vld [vmem:[%s12450_s1 + $0x28] sm:$0xf] }
 0x287   : > { %811 = vrot.lane.b32.xlu0 %v749_v36, %s8280_s23  ;;  %v752_v59 = vsel %vm445_vm1, %v8550_v8, %v682_v2 }
 0x28b   : > { %v697_v50 = vpop.permute.xlu1 %696 }
 0x28c   : > { %v700_v54 = vsel %vm384_vm6, %v695_v17, %v697_v50  ;;  %v767_v51 = vsel %vm445_vm1, %v688_v7, %v697_v50 }
 0x28d   : > { %v764_v63 = vsel %vm445_vm1, %v691_v58, %v700_v54 }
 0x28e   : > { %847 = vrot.lane.b32.xlu2 %v744_v34, %s8280_s23  ;;  %831 = vrot.lane.b32.xlu1 %v779_v48, %s8280_s23 }
 0x28f   : > { %839 = vrot.lane.b32.xlu0 %v791_v49, %s8280_s23 }
 0x296   : > { %837 = vrot.lane.b32.xlu2 %v788_v61, %s8280_s23  ;;  %821 = vrot.lane.b32.xlu1 %v764_v63, %s8280_s23 }
 0x297   : > { %829 = vrot.lane.b32.xlu0 %v776_v62, %s8280_s23 }
 0x29e   : > { %823 = vrot.lane.b32.xlu2 %v767_v51, %s8280_s23  ;;  %815 = vrot.lane.b32.xlu1 %v755_v55, %s8280_s23 }
 0x29f   : > { %813 = vrot.lane.b32.xlu0 %v752_v59, %s8280_s23 }
 0x2a6   : > { %930 = vperm.xlu2 %8163, %v927_v24  }
 0x2a7   : > { %937 = vperm.xlu0 %8164, %v927_v24  }
 0x2ae   : > { %8166 = vset.pattern.permute.xlu2 %v12461_v47 }
 0x2af   : > { %v842_v3 = vpop.permute.xlu0 %841 }
 0x2c7   : > { %v844_v4 = vpop.permute.xlu1 %843  ;;  %v834_v7 = vpop.permute.xlu2 %833 }
 0x2c8   : > { %v861_v5 = vsel %vm551_vm9, %v842_v3, %v844_v4 }
 0x2c9   : > { %v880_v6 = vsel %vm445_vm1, %v861_v5, 0 }
 0x2ca   : > { %891 = vmatpush.bf16.msra.mxu3 %v880_v6 }
 0x2cf   : > { %v826_v10 = vpop.permute.xlu0 %825 }
 0x2d8   : > { %v820_v12 = vpop.permute.xlu2 %819 }
 0x2e0   : > { %v836_v43 = vpop.permute.xlu0 %835  ;;  %v810_v14 = vpop.permute.xlu2 %809 }
 0x2e1   : > { %v858_v13 = vsel %vm551_vm9, %v834_v7, %v836_v43 }
 0x2e2   : > { %892 = vmatpush.bf16.msra.mxu3 %v858_v13 }
 0x2e8   : > { %v828_v15 = vpop.permute.xlu1 %827  ;;  %v848_v17 = vpop.permute.xlu2 %847 }
 0x2e9   : > { %v855_v8 = vsel %vm551_vm9, %v826_v10, %v828_v15 }
 0x2ea   : > { %893 = vmatpush.bf16.msra.mxu3 %v855_v8 }
 0x2f0   : > { %v818_v16 = vpop.permute.xlu1 %817  ;;  %v838_v11 = vpop.permute.xlu2 %837 }
 0x2f1   : > { %v852_v22 = vsel %vm551_vm9, %v818_v16, %v820_v12  ;;  %v859_v36 = vsel %vm551_vm9, %v836_v43, %v838_v11 }
 0x2f2   : > { %894 = vmatpush.bf16.msra.mxu3 %v852_v22 }
 0x2f8   : > { %v846_v26 = vpop.permute.xlu1 %845  ;;  %v824_v49 = vpop.permute.xlu2 %823 }
 0x2f9   : > { %v812_v9 = vpop.permute.xlu0 %811  ;;  %v862_v28 = vsel %vm551_vm9, %v844_v4, %v846_v26  ;;  %v863_v30 = vsel %vm551_vm9, %v846_v26, %v848_v17 }
 0x2fa   : > { %v849_v31 = vsel %vm551_vm9, %v810_v14, %v812_v9  ;;  %v883_v32 = vsel %vm445_vm1, %v862_v28, 0  ;;  %v886_v33 = vsel %vm445_vm1, %v863_v30, 0 }
 0x2fb   : > { %895 = vmatpush.bf16.msra.mxu3 %v849_v31  ;;  %904 = vmatpush.bf16.msrb.mxu0 %v883_v32 }
 0x2fc   : > { %917 = vmatpush.bf16.msrb.mxu1 %v886_v33 }
 0x2fe   : > { %7321 = vmatmul.msk.bf16.vlgmr.msra.gmra.mxu3 %vm579_vm10, %v792_v35 }
 0x2ff   : > { %905 = vmatpush.bf16.msrb.mxu0 %v859_v36 }
 0x300   : > { %v832_v37 = vpop.permute.xlu1 %831  ;;  %v931_v63 = vpop.permute.xlu2 %930 }
 0x301   : > { %v840_v39 = vpop.permute.xlu0 %839 }
 0x302   : > { %v860_v41 = vsel %vm551_vm9, %v838_v11, %v840_v39 }
 0x303   : > { %918 = vmatpush.bf16.msrb.mxu1 %v860_v41 }
 0x308   : > { %v822_v42 = vpop.permute.xlu1 %821 }
 0x309   : > { %v830_v46 = vpop.permute.xlu0 %829  ;;  %v853_v50 = vsel %vm551_vm9, %v820_v12, %v822_v42  ;;  %v854_v53 = vsel %vm551_vm9, %v822_v42, %v824_v49 }
 0x30a   : > { %v856_v34 = vsel %vm551_vm9, %v828_v15, %v830_v46  ;;  %v857_v48 = vsel %vm551_vm9, %v830_v46, %v832_v37 }
 0x30b   : > { %906 = vmatpush.bf16.msrb.mxu0 %v856_v34  ;;  %919 = vmatpush.bf16.msrb.mxu1 %v857_v48 }
 0x30f   : > { %907 = vmatpush.bf16.msrb.mxu0 %v853_v50  ;;  %920 = vmatpush.bf16.msrb.mxu1 %v854_v53 }
 0x310   : > { %v816_v54 = vpop.permute.xlu1 %815 }
 0x311   : > { %v814_v56 = vpop.permute.xlu0 %813 }
 0x312   : > { %v850_v57 = vsel %vm551_vm9, %v812_v9, %v814_v56  ;;  %v851_v58 = vsel %vm551_vm9, %v814_v56, %v816_v54 }
 0x313   : > { %908 = vmatpush.bf16.msrb.mxu0 %v850_v57  ;;  %921 = vmatpush.bf16.msrb.mxu1 %v851_v58 }
 0x316   : > { %7322 = vmatmul.msk.bf16.vlgmr.msrb.gmra.mxu0 %vm579_vm10, %v792_v35  ;;  %7323 = vmatmul.msk.bf16.vlgmr.msrb.gmra.mxu1 %vm579_vm10, %v792_v35 }
 0x319   : > { %v938_v1 = vpop.permute.xlu0 %937 }
 0x381   : > { %v897_v60 = vpop.f32.mrf.mxu3 }
 0x382   : > { %v933_v62 = vmul.f32 %v931_v63, %v897_v60 }
 0x384   : > { %v940_v2 = vadd.f32 %v938_v1, %v933_v62 }
 0x386   : > { %v943_v4 = vmax.f32 %v940_v2, 0.0 }
 0x388   : > { %v946_v10 = vmul.f32 %v943_v4, %v8536_v20 }
 0x389   : > { %v899_v61 = vpop.f32.mrf.mxu3 }
 0x393   : > { %v910_v51 = vpop.f32.mrf.mxu0  ;;  %v923_v55 = vpop.f32.mrf.mxu1 }
 0x394   : > { %v934_v59 = vmul.f32 %v931_v63, %v910_v51  ;;  %v935_v3 = vmul.f32 %v931_v63, %v923_v55 }
 0x396   : > { %v941_v5 = vadd.f32 %v938_v1, %v934_v59  ;;  %v942_v6 = vadd.f32 %v938_v1, %v935_v3 }
 0x398   : > { %v944_v7 = vmax.f32 %v941_v5, 0.0  ;;  %v945_v12 = vmax.f32 %v942_v6, 0.0 }
 0x39a   : > { %v947_v43 = vmul.f32 %v944_v7, %v8538_v25  ;;  %v948_v8 = vmul.f32 %v945_v12, %v8558_v38 }
 0x39b   : > { %v912_v13 = vpop.f32.mrf.mxu0  ;;  %v925_v14 = vpop.f32.mrf.mxu1 }
 0x39c   : > { %v949_v15 = vpack.c.bf16 %v947_v43, %v946_v10  ;;  %v950_v26 = vpack.c.bf16 %v948_v8, %v948_v8 }
 0x39e   : > { %v953_v16 = vunpack.c.l.b16 %v949_v15  ;;  %v954_v17 = vunpack.c.h.b16 %v949_v15  ;;  %v955_v9 = vunpack.c.l.b16 %v950_v26 }
 0x3a0   : > { %v8704_v22 = vpack.c.b16 %v953_v16, %v953_v16  ;;  %v8706_v24 = vpack.c.b16 %v954_v17, %v954_v17  ;;  %v8714_v28 = vpack.c.b16 %v955_v9, %v955_v9 }
 0x3a2   : > { %1008 = vrot.lane.b32.xlu0 %v8706_v24, %s8273_s16  ;;  %1026 = vrot.lane.b32.xlu2 %v8706_v24, %s8272_s11  ;;  %v960_v30 = vrot.slane %v8706_v24, 4  ;;  %v959_v31 = vrot.slane %v8704_v22, 4  ;;  %v961_v32 = vrot.slane %v8714_v28, 4 }
 0x3a3   : > { %1024 = vrot.lane.b32.xlu1 %v8704_v22, %s8272_s11 }
 0x3aa   : > { %991 = vrot.lane.b32.xlu0 %v8706_v24, %s8275_s18  ;;  %1006 = vrot.lane.b32.xlu2 %v8704_v22, %s8273_s16 }
 0x3ab   : > { %1028 = vrot.lane.b32.xlu1 %v8714_v28, %s8272_s11 }
 0x3b2   : > { %973 = vrot.lane.b32.xlu0 %v8706_v24, %s8277_s20  ;;  %989 = vrot.lane.b32.xlu2 %v8704_v22, %s8275_s18 }
 0x3b3   : > { %1010 = vrot.lane.b32.xlu1 %v8714_v28, %s8273_s16 }
 0x3ba   : > { %1017 = vrot.lane.b32.xlu0 %v960_v30, %s8274_s17  ;;  %971 = vrot.lane.b32.xlu2 %v8704_v22, %s8277_s20 }
 0x3bb   : > { %993 = vrot.lane.b32.xlu1 %v8714_v28, %s8275_s18 }
 0x3c2   : > { %999 = vrot.lane.b32.xlu0 %v960_v30, %s8276_s19  ;;  %1015 = vrot.lane.b32.xlu2 %v959_v31, %s8274_s17 }
 0x3c3   : > { %975 = vrot.lane.b32.xlu1 %v8714_v28, %s8277_s20 }
 0x3ca   : > { %982 = vrot.lane.b32.xlu0 %v960_v30, %s8278_s21  ;;  %997 = vrot.lane.b32.xlu2 %v959_v31, %s8276_s19 }
 0x3cb   : > { %1019 = vrot.lane.b32.xlu1 %v961_v32, %s8274_s17 }
 0x3d2   : > { %964 = vrot.lane.b32.xlu0 %v960_v30, %s8279_s22  ;;  %980 = vrot.lane.b32.xlu2 %v959_v31, %s8278_s21 }
 0x3d3   : > { %1001 = vrot.lane.b32.xlu1 %v961_v32, %s8276_s19 }
 0x3da   : > { %962 = vrot.lane.b32.xlu2 %v959_v31, %s8279_s22 }
 0x3db   : > { %984 = vrot.lane.b32.xlu1 %v961_v32, %s8278_s21 }
 0x3e3   : > { %966 = vrot.lane.b32.xlu1 %v961_v32, %s8279_s22 }
 0x3fc   : > { %v1027_v33 = vpop.permute.xlu2 %1026 }
 0x404   : > { %v1007_v11 = vpop.permute.xlu2 %1006 }
 0x40c   : > { %v990_v35 = vpop.permute.xlu2 %989 }
 0x414   : > { %v1009_v36 = vpop.permute.xlu0 %1008  ;;  %v972_v37 = vpop.permute.xlu2 %971 }
 0x415   : > { %v1025_v39 = vpop.permute.xlu1 %1024  ;;  %v1012_v60 = vsel %vm417_vm3, %v1007_v11, %v1009_v36 }
 0x416   : > { %1129 = vrot.lane.b32.xlu2 %v1025_v39, %s8280_s23  ;;  %v1030_v41 = vsel %vm441_vm0, %v1025_v39, %v1027_v33 }
 0x417   : > { %1131 = vrot.lane.b32.xlu0 %v1030_v41, %s8280_s23 }
 0x41c   : > { %v992_v42 = vpop.permute.xlu0 %991  ;;  %v1016_v46 = vpop.permute.xlu2 %1015 }
 0x41d   : > { %v1029_v34 = vpop.permute.xlu1 %1028  ;;  %v1070_v57 = vsel %vm445_vm1, %v1007_v11, %v1016_v46  ;;  %v995_v12 = vsel %vm394_vm4, %v990_v35, %v992_v42 }
 0x41e   : > { %v1031_v48 = vsel %vm441_vm0, %v1027_v33, %v1029_v34  ;;  %v1032_v49 = vsel %vm441_vm0, %v1029_v34, %v8420_v18  ;;  %v977_v33 = vsel %vm372_vm7, %v8448_v45, %v972_v37 }
 0x41f   : > { %1133 = vrot.lane.b32.xlu1 %v1031_v48, %s8280_s23  ;;  %1135 = vrot.lane.b32.xlu2 %v1032_v49, %s8280_s23 }
 0x424   : > { %v974_v50 = vpop.permute.xlu0 %973  ;;  %v998_v53 = vpop.permute.xlu2 %997 }
 0x425   : > { %v1011_v54 = vpop.permute.xlu1 %1010  ;;  %v1058_v56 = vsel %vm445_vm1, %v990_v35, %v998_v53  ;;  %v978_v30 = vsel %vm372_vm7, %v972_v37, %v974_v50 }
 0x426   : > { %1113 = vrot.lane.b32.xlu0 %v1058_v56, %s8280_s23  ;;  %v1013_v55 = vsel %vm417_vm3, %v1009_v36, %v1011_v54  ;;  %v1014_v59 = vsel %vm417_vm3, %v1011_v54, %v8425_v23 }
 0x427   : > { %1121 = vrot.lane.b32.xlu2 %v1070_v57, %s8280_s23 }
 0x42c   : > { %v1018_v58 = vpop.permute.xlu0 %1017  ;;  %v981_v14 = vpop.permute.xlu2 %980 }
 0x42d   : > { %v1021_v61 = vsel %vm429_vm2, %v1016_v46, %v1018_v58  ;;  %v994_v63 = vpop.permute.xlu1 %993  ;;  %v986_v26 = vsel %vm384_vm6, %v8446_v44, %v981_v14 }
 0x42e   : > { %v1073_v62 = vsel %vm445_vm1, %v1012_v60, %v1021_v61  ;;  %v996_v43 = vsel %vm394_vm4, %v992_v42, %v994_v63  ;;  %v1046_v36 = vsel %vm445_vm1, %v977_v33, %v986_v26 }
 0x42f   : > { %1123 = vrot.lane.b32.xlu0 %v1073_v62, %s8280_s23 }
 0x434   : > { %v1000_v2 = vpop.permute.xlu0 %999  ;;  %v963_v39 = vpop.permute.xlu2 %962 }
 0x435   : > { %v976_v1 = vpop.permute.xlu1 %975  ;;  %v1003_v7 = vsel %vm405_vm5, %v998_v53, %v1000_v2  ;;  %v968_v46 = vsel %vm360_vm8, %v8487_v19, %v963_v39 }
 0x436   : > { %v1061_v16 = vsel %vm445_vm1, %v995_v12, %v1003_v7  ;;  %v979_v31 = vsel %vm372_vm7, %v974_v50, %v976_v1  ;;  %v1034_v48 = vsel %vm445_vm1, 0, %v968_v46  ;;  %v1215_v12 = vld [vmem:[%s12451_s2 + $0x10] sm:$0xff] }
 0x43c   : > { %v983_v15 = vpop.permute.xlu0 %982 }
 0x43d   : > { %v1020_v51 = vpop.permute.xlu1 %1019  ;;  %v987_v17 = vsel %vm384_vm6, %v981_v14, %v983_v15 }
 0x43e   : > { %v1022_v3 = vsel %vm429_vm2, %v1018_v58, %v1020_v51  ;;  %v1023_v4 = vsel %vm429_vm2, %v1020_v51, %v8422_v21  ;;  %v1049_v35 = vsel %vm445_vm1, %v978_v30, %v987_v17 }
 0x43f   : > { %v1076_v5 = vsel %vm445_vm1, %v1013_v55, %v1022_v3  ;;  %v1079_v6 = vsel %vm445_vm1, %v1014_v59, %v1023_v4 }
 0x440   : > { %1125 = vrot.lane.b32.xlu1 %v1076_v5, %s8280_s23  ;;  %1127 = vrot.lane.b32.xlu0 %v1079_v6, %s8280_s23 }
 0x444   : > { %v965_v41 = vpop.permute.xlu0 %964 }
 0x445   : > { %v1002_v10 = vpop.permute.xlu1 %1001  ;;  %v969_v42 = vsel %vm360_vm8, %v963_v39, %v965_v41 }
 0x446   : > { %v1004_v13 = vsel %vm405_vm5, %v1000_v2, %v1002_v10  ;;  %v1005_v37 = vsel %vm405_vm5, %v1002_v10, %v8454_v52  ;;  %v1037_v34 = vsel %vm445_vm1, %v8704_v22, %v969_v42 }
 0x447   : > { %v1064_v8 = vsel %vm445_vm1, %v996_v43, %v1004_v13  ;;  %v1067_v49 = vsel %vm445_vm1, %v994_v63, %v1005_v37 }
 0x448   : > { %1117 = vrot.lane.b32.xlu2 %v1064_v8, %s8280_s23  ;;  %1115 = vrot.lane.b32.xlu1 %v1061_v16, %s8280_s23 }
 0x44d   : > { %v985_v9 = vpop.permute.xlu1 %984 }
 0x44e   : > { %v988_v32 = vsel %vm384_vm6, %v983_v15, %v985_v9  ;;  %v1055_v56 = vsel %vm445_vm1, %v976_v1, %v985_v9 }
 0x44f   : > { %v1052_v11 = vsel %vm445_vm1, %v979_v31, %v988_v32 }
 0x450   : > { %1109 = vrot.lane.b32.xlu0 %v1052_v11, %s8280_s23  ;;  %1107 = vrot.lane.b32.xlu2 %v1049_v35, %s8280_s23  ;;  %v1080_v11 = vld [vmem:[%s12450_s1 + $0x50] sm:$0xf] }
 0x451   : > { %1105 = vrot.lane.b32.xlu1 %v1046_v36, %s8280_s23 }
 0x455   : > { %v967_v50 = vpop.permute.xlu1 %966 }
 0x456   : > { %v970_v53 = vsel %vm360_vm8, %v965_v41, %v967_v50  ;;  %v1043_v54 = vsel %vm445_vm1, %v8714_v28, %v967_v50 }
 0x457   : > { %v1040_v22 = vsel %vm445_vm1, %v8706_v24, %v970_v53 }
 0x458   : > { %1099 = vrot.lane.b32.xlu0 %v1037_v34, %s8280_s23  ;;  %1097 = vrot.lane.b32.xlu2 %v1034_v48, %s8280_s23 }
 0x459   : > { %1119 = vrot.lane.b32.xlu1 %v1067_v49, %s8280_s23 }
 0x460   : > { %1103 = vrot.lane.b32.xlu0 %v1043_v54, %s8280_s23  ;;  %1111 = vrot.lane.b32.xlu2 %v1055_v56, %s8280_s23 }
 0x461   : > { %1101 = vrot.lane.b32.xlu1 %v1040_v22, %s8280_s23 }
 0x468   : > { %1225 = vperm.xlu2 %8166, %v1215_v12  }
 0x469   : > { %1218 = vperm.xlu1 %8165, %v1215_v12  }
 0x470   : > { %v1130_v57 = vpop.permute.xlu2 %1129  ;;  %8167 = vset.pattern.permute.xlu2 %v12463_v0 }
 0x471   : > { %8169 = vset.pattern.permute.xlu1 %v12461_v47 }
 0x479   : > { %v1136_v63 = vpop.permute.xlu2 %1135 }
 0x481   : > { %v1122_v55 = vpop.permute.xlu2 %1121 }
 0x489   : > { %v1132_v58 = vpop.permute.xlu0 %1131 }
 0x48a   : > { %v1149_v60 = vsel %vm551_vm9, %v1130_v57, %v1132_v58 }
 0x48b   : > { %v1168_v61 = vsel %vm445_vm1, %v1149_v60, 0 }
 0x48c   : > { %1179 = vmatpush.bf16.msrb.mxu2 %v1168_v61 }
 0x491   : > { %v1134_v28 = vpop.permute.xlu1 %1133 }
 0x492   : > { %v1151_v62 = vsel %vm551_vm9, %v1134_v28, %v1136_v63  ;;  %v1150_v1 = vsel %vm551_vm9, %v1132_v58, %v1134_v28 }
 0x493   : > { %v1171_v24 = vsel %vm445_vm1, %v1150_v1, 0  ;;  %v1174_v2 = vsel %vm445_vm1, %v1151_v62, 0 }
 0x494   : > { %1192 = vmatpush.bf16.msrb.mxu3 %v1171_v24  ;;  %1205 = vmatpush.bf16.msra.mxu0 %v1174_v2 }
 0x498   : > { %v1114_v51 = vpop.permute.xlu0 %1113 }
 0x4a1   : > { %v1124_v59 = vpop.permute.xlu0 %1123 }
 0x4a2   : > { %v1146_v3 = vsel %vm551_vm9, %v1122_v55, %v1124_v59  ;;  %v1118_v4 = vpop.permute.xlu2 %1117 }
 0x4a3   : > { %1180 = vmatpush.bf16.msrb.mxu2 %v1146_v3 }
 0x4aa   : > { %v1108_v13 = vpop.permute.xlu2 %1107 }
 0x4b2   : > { %v1126_v5 = vpop.permute.xlu1 %1125  ;;  %v1128_v6 = vpop.permute.xlu0 %1127 }
 0x4b3   : > { %v1147_v7 = vsel %vm551_vm9, %v1124_v59, %v1126_v5  ;;  %v1148_v10 = vsel %vm551_vm9, %v1126_v5, %v1128_v6  ;;  %v1098_v9 = vpop.permute.xlu2 %1097 }
 0x4b4   : > { %1193 = vmatpush.bf16.msrb.mxu3 %v1147_v7  ;;  %1206 = vmatpush.bf16.msra.mxu0 %v1148_v10 }
 0x4ba   : > { %v1116_v43 = vpop.permute.xlu1 %1115 }
 0x4bb   : > { %v1143_v14 = vsel %vm551_vm9, %v1114_v51, %v1116_v43  ;;  %v1144_v15 = vsel %vm551_vm9, %v1116_v43, %v1118_v4  ;;  %v1112_v35 = vpop.permute.xlu2 %1111 }
 0x4bc   : > { %1181 = vmatpush.bf16.msrb.mxu2 %v1143_v14  ;;  %1194 = vmatpush.bf16.msrb.mxu3 %v1144_v15 }
 0x4c2   : > { %v1110_v8 = vpop.permute.xlu0 %1109 }
 0x4c3   : > { %v1106_v16 = vpop.permute.xlu1 %1105  ;;  %v1141_v17 = vsel %vm551_vm9, %v1108_v13, %v1110_v8  ;;  %v1142_v36 = vsel %vm551_vm9, %v1110_v8, %v1112_v35  ;;  %v1226_v50 = vpop.permute.xlu2 %1225 }
 0x4c4   : > { %v1140_v26 = vsel %vm551_vm9, %v1106_v16, %v1108_v13  ;;  %1195 = vmatpush.bf16.msrb.mxu3 %v1141_v17 }
 0x4c5   : > { %1182 = vmatpush.bf16.msrb.mxu2 %v1140_v26 }
 0x4ca   : > { %v1100_v30 = vpop.permute.xlu0 %1099 }
 0x4cb   : > { %v1120_v31 = vpop.permute.xlu1 %1119  ;;  %v1137_v32 = vsel %vm551_vm9, %v1098_v9, %v1100_v30 }
 0x4cc   : > { %1183 = vmatpush.bf16.msrb.mxu2 %v1137_v32  ;;  %v1145_v33 = vsel %vm551_vm9, %v1118_v4, %v1120_v31 }
 0x4cd   : > { %1207 = vmatpush.bf16.msra.mxu0 %v1145_v33 }
 0x4cf   : > { %7324 = vmatmul.msk.bf16.vlgmr.msrb.gmra.mxu2 %vm579_vm10, %v1080_v11 }
 0x4d1   : > { %1208 = vmatpush.bf16.msra.mxu0 %v1142_v36 }
 0x4d2   : > { %v1104_v39 = vpop.permute.xlu0 %1103 }
 0x4d3   : > { %v1102_v41 = vpop.permute.xlu1 %1101 }
 0x4d4   : > { %v1138_v42 = vsel %vm551_vm9, %v1100_v30, %v1102_v41  ;;  %v1139_v46 = vsel %vm551_vm9, %v1102_v41, %v1104_v39 }
 0x4d5   : > { %1196 = vmatpush.bf16.msrb.mxu3 %v1138_v42  ;;  %1209 = vmatpush.bf16.msra.mxu0 %v1139_v46 }
 0x4d8   : > { %7325 = vmatmul.msk.bf16.vlgmr.msrb.gmra.mxu3 %vm579_vm10, %v1080_v11  ;;  %7326 = vmatmul.msk.bf16.vlgmr.msra.gmra.mxu0 %vm579_vm10, %v1080_v11 }
 0x4db   : > { %v1219_v37 = vpop.permute.xlu1 %1218 }
 0x552   : > { %v1185_v34 = vpop.f32.mrf.mxu2 }
 0x553   : > { %v1221_v48 = vmul.f32 %v1219_v37, %v1185_v34 }
 0x555   : > { %v1211_v49 = vpop.f32.mrf.mxu0  ;;  %v1228_v54 = vadd.f32 %v1226_v50, %v1221_v48 }
 0x556   : > { %v1223_v53 = vmul.f32 %v1219_v37, %v1211_v49 }
 0x557   : > { %v1231_v60 = vadd.f32 %v1228_v54, %v8541_v27 }
 0x558   : > { %v1230_v56 = vadd.f32 %v1226_v50, %v1223_v53 }
 0x559   : > { %v1234_v24 = vmax.f32 %v1231_v60, 0.0 }
 0x55a   : > { %v1233_v22 = vadd.f32 %v1230_v56, %v8567_v40  ;;  %v1187_v57 = vpop.f32.mrf.mxu2 }
 0x55b   : > { %v1198_v58 = vpop.f32.mrf.mxu3  ;;  %v8856_v3 = vmul.f32 %v1234_v24, %v8536_v20 }
 0x55c   : > { %v1236_v61 = vmax.f32 %v1233_v22, 0.0  ;;  %v1222_v63 = vmul.f32 %v1219_v37, %v1198_v58 }
 0x55d   : > { %v1213_v28 = vpop.f32.mrf.mxu0 }
 0x55e   : > { %v8850_v62 = vmul.f32 %v1236_v61, %v8558_v38  ;;  %v1229_v1 = vadd.f32 %v1226_v50, %v1222_v63 }
 0x560   : > { %v1241_v2 = vpack.c.bf16 %v8850_v62, %v8850_v62  ;;  %v1232_v51 = vadd.f32 %v1229_v1, %v8544_v29 }
 0x562   : > { %v1246_v55 = vunpack.c.l.b16 %v1241_v2  ;;  %v1235_v59 = vmax.f32 %v1232_v51, 0.0 }
 0x563   : > { %v1200_v40 = vpop.f32.mrf.mxu3 }
 0x564   : > { %v8858_v27 = vpack.c.b16 %v1246_v55, %v1246_v55  ;;  %v8861_v4 = vmul.f32 %v1235_v59, %v8538_v25 }
 0x566   : > { %v1240_v5 = vpack.c.bf16 %v8861_v4, %v8856_v3  ;;  %1319 = vrot.lane.b32.xlu2 %v8858_v27, %s8272_s11  ;;  %v1252_v12 = vrot.slane %v8858_v27, 4 }
 0x568   : > { %v1244_v6 = vunpack.c.l.b16 %v1240_v5  ;;  %v1245_v7 = vunpack.c.h.b16 %v1240_v5 }
 0x56a   : > { %v8867_v29 = vpack.c.b16 %v1244_v6, %v1244_v6  ;;  %v8869_v10 = vpack.c.b16 %v1245_v7, %v1245_v7 }
 0x56c   : > { %1317 = vrot.lane.b32.xlu1 %v8869_v10, %s8272_s11  ;;  %1315 = vrot.lane.b32.xlu0 %v8867_v29, %s8272_s11  ;;  %v1251_v43 = vrot.slane %v8869_v10, 4  ;;  %v1250_v13 = vrot.slane %v8867_v29, 4 }
 0x56e   : > { %1301 = vrot.lane.b32.xlu2 %v8858_v27, %s8273_s16 }
 0x574   : > { %1299 = vrot.lane.b32.xlu1 %v8869_v10, %s8273_s16  ;;  %1297 = vrot.lane.b32.xlu0 %v8867_v29, %s8273_s16 }
 0x576   : > { %1284 = vrot.lane.b32.xlu2 %v8858_v27, %s8275_s18 }
 0x57c   : > { %1282 = vrot.lane.b32.xlu1 %v8869_v10, %s8275_s18  ;;  %1280 = vrot.lane.b32.xlu0 %v8867_v29, %s8275_s18 }
 0x57e   : > { %1266 = vrot.lane.b32.xlu2 %v8858_v27, %s8277_s20 }
 0x584   : > { %1264 = vrot.lane.b32.xlu1 %v8869_v10, %s8277_s20  ;;  %1262 = vrot.lane.b32.xlu0 %v8867_v29, %s8277_s20 }
 0x586   : > { %1310 = vrot.lane.b32.xlu2 %v1252_v12, %s8274_s17 }
 0x58c   : > { %1308 = vrot.lane.b32.xlu1 %v1251_v43, %s8274_s17  ;;  %1306 = vrot.lane.b32.xlu0 %v1250_v13, %s8274_s17 }
 0x58e   : > { %1292 = vrot.lane.b32.xlu2 %v1252_v12, %s8276_s19 }
 0x594   : > { %1290 = vrot.lane.b32.xlu1 %v1251_v43, %s8276_s19  ;;  %1288 = vrot.lane.b32.xlu0 %v1250_v13, %s8276_s19 }
 0x596   : > { %1275 = vrot.lane.b32.xlu2 %v1252_v12, %s8278_s21 }
 0x59c   : > { %1273 = vrot.lane.b32.xlu1 %v1251_v43, %s8278_s21  ;;  %1271 = vrot.lane.b32.xlu0 %v1250_v13, %s8278_s21 }
 0x59e   : > { %1257 = vrot.lane.b32.xlu2 %v1252_v12, %s8279_s22 }
 0x5a4   : > { %1255 = vrot.lane.b32.xlu1 %v1251_v43, %s8279_s22  ;;  %1253 = vrot.lane.b32.xlu0 %v1250_v13, %s8279_s22 }
 0x5c0   : > { %v1320_v14 = vpop.permute.xlu2 %1319 }
 0x5c1   : > { %v1323_v15 = vsel %vm441_vm0, %v1320_v14, %v8420_v18 }
 0x5c2   : > { %1426 = vrot.lane.b32.xlu2 %v1323_v15, %s8280_s23 }
 0x5c8   : > { %v1302_v8 = vpop.permute.xlu2 %1301 }
 0x5c9   : > { %v1305_v31 = vsel %vm417_vm3, %v1302_v8, %v8425_v23 }
 0x5d0   : > { %v1285_v16 = vpop.permute.xlu2 %1284 }
 0x5d8   : > { %v1267_v17 = vpop.permute.xlu2 %1266 }
 0x5de   : > { %v1318_v26 = vpop.permute.xlu1 %1317  ;;  %v1316_v9 = vpop.permute.xlu0 %1315 }
 0x5df   : > { %v1322_v50 = vsel %vm441_vm0, %v1318_v26, %v1320_v14  ;;  %v1321_v53 = vsel %vm441_vm0, %v1316_v9, %v1318_v26 }
 0x5e0   : > { %v1311_v30 = vpop.permute.xlu2 %1310 }
 0x5e1   : > { %v1314_v32 = vsel %vm429_vm2, %v1311_v30, %v8422_v21 }
 0x5e2   : > { %v1370_v33 = vsel %vm445_vm1, %v1305_v31, %v1314_v32 }
 0x5e3   : > { %1418 = vrot.lane.b32.xlu2 %v1370_v33, %s8280_s23 }
 0x5e6   : > { %v1300_v11 = vpop.permute.xlu1 %1299  ;;  %v1298_v35 = vpop.permute.xlu0 %1297 }
 0x5e7   : > { %v1303_v57 = vsel %vm417_vm3, %v1298_v35, %v1300_v11  ;;  %v1304_v24 = vsel %vm417_vm3, %v1300_v11, %v1302_v8 }
 0x5e8   : > { %v1293_v36 = vpop.permute.xlu2 %1292 }
 0x5e9   : > { %v1296_v39 = vsel %vm405_vm5, %v1293_v36, %v8454_v52 }
 0x5ea   : > { %v1358_v41 = vsel %vm445_vm1, %v1285_v16, %v1296_v39 }
 0x5eb   : > { %1410 = vrot.lane.b32.xlu0 %v1358_v41, %s8280_s23  ;;  %v1506_v41 = vld [vmem:[%s12451_s2 + $0x18] sm:$0xff] }
 0x5ee   : > { %v1283_v42 = vpop.permute.xlu1 %1282  ;;  %v1281_v46 = vpop.permute.xlu0 %1280 }
 0x5ef   : > { %v1287_v55 = vsel %vm394_vm4, %v1283_v42, %v1285_v16  ;;  %v1286_v43 = vsel %vm394_vm4, %v1281_v46, %v1283_v42 }
 0x5f0   : > { %v1276_v37 = vpop.permute.xlu2 %1275 }
 0x5f1   : > { %v1346_v34 = vsel %vm445_vm1, %v1267_v17, %v1276_v37 }
 0x5f2   : > { %1402 = vrot.lane.b32.xlu1 %v1346_v34, %s8280_s23 }
 0x5f3   : > { %1420 = vrot.lane.b32.xlu0 %v1316_v9, %s8280_s23 }
 0x5f6   : > { %v1265_v48 = vpop.permute.xlu1 %1264  ;;  %v1263_v49 = vpop.permute.xlu0 %1262 }
 0x5f7   : > { %v1270_v6 = vsel %vm372_vm7, %v1265_v48, %v1267_v17  ;;  %v1269_v16 = vsel %vm372_vm7, %v1263_v49, %v1265_v48 }
 0x5f8   : > { %v1258_v8 = vpop.permute.xlu2 %1257 }
 0x5f9   : > { %v1334_v39 = vsel %vm445_vm1, %v8858_v27, %v1258_v8 }
 0x5fa   : > { %1424 = vrot.lane.b32.xlu1 %v1322_v50, %s8280_s23 }
 0x5fb   : > { %1422 = vrot.lane.b32.xlu0 %v1321_v53, %s8280_s23 }
 0x5fe   : > { %v1309_v54 = vpop.permute.xlu1 %1308  ;;  %v1307_v56 = vpop.permute.xlu0 %1306 }
 0x5ff   : > { %v1312_v22 = vsel %vm429_vm2, %v1307_v56, %v1309_v54  ;;  %v1361_v58 = vsel %vm445_vm1, %v1298_v35, %v1307_v56  ;;  %v1313_v61 = vsel %vm429_vm2, %v1309_v54, %v1311_v30 }
 0x600   : > { %v1364_v60 = vsel %vm445_vm1, %v1303_v57, %v1312_v22  ;;  %v1367_v2 = vsel %vm445_vm1, %v1304_v24, %v1313_v61 }
 0x602   : > { %1412 = vrot.lane.b32.xlu1 %v1361_v58, %s8280_s23 }
 0x603   : > { %1414 = vrot.lane.b32.xlu0 %v1364_v60, %s8280_s23 }
 0x606   : > { %v1291_v63 = vpop.permute.xlu1 %1290  ;;  %v1289_v28 = vpop.permute.xlu0 %1288 }
 0x607   : > { %v1349_v1 = vsel %vm445_vm1, %v1281_v46, %v1289_v28  ;;  %v1295_v51 = vsel %vm405_vm5, %v1291_v63, %v1293_v36  ;;  %v1294_v59 = vsel %vm405_vm5, %v1289_v28, %v1291_v63  ;;  %v1268_v36 = vsel %vm372_vm7, %v8448_v45, %v1263_v49 }
 0x608   : > { %1404 = vrot.lane.b32.xlu2 %v1349_v1, %s8280_s23  ;;  %v1355_v12 = vsel %vm445_vm1, %v1287_v55, %v1295_v51  ;;  %v1352_v14 = vsel %vm445_vm1, %v1286_v43, %v1294_v59 }
 0x60a   : > { %1416 = vrot.lane.b32.xlu1 %v1367_v2, %s8280_s23 }
 0x60e   : > { %v1274_v40 = vpop.permute.xlu1 %1273  ;;  %v1272_v5 = vpop.permute.xlu0 %1271 }
 0x60f   : > { %v1279_v7 = vsel %vm384_vm6, %v1274_v40, %v1276_v37  ;;  %v1278_v15 = vsel %vm384_vm6, %v1272_v5, %v1274_v40  ;;  %v1277_v11 = vsel %vm384_vm6, %v8446_v44, %v1272_v5 }
 0x610   : > { %1408 = vrot.lane.b32.xlu2 %v1355_v12, %s8280_s23  ;;  %v1343_v13 = vsel %vm445_vm1, %v1270_v6, %v1279_v7  ;;  %v1340_v31 = vsel %vm445_vm1, %v1269_v16, %v1278_v15  ;;  %v1371_v16 = vld [vmem:[%s12450_s1 + $0x78] sm:$0xf] }
 0x611   : > { %1400 = vrot.lane.b32.xlu0 %v1343_v13, %s8280_s23 }
 0x612   : > { %1406 = vrot.lane.b32.xlu1 %v1352_v14, %s8280_s23 }
 0x616   : > { %v1256_v17 = vpop.permute.xlu1 %1255  ;;  %v1254_v26 = vpop.permute.xlu0 %1253 }
 0x617   : > { %v1261_v9 = vsel %vm360_vm8, %v1256_v17, %v1258_v8  ;;  %v1260_v30 = vsel %vm360_vm8, %v1254_v26, %v1256_v17  ;;  %v1259_v35 = vsel %vm360_vm8, %v8487_v19, %v1254_v26 }
 0x618   : > { %1398 = vrot.lane.b32.xlu2 %v1340_v31, %s8280_s23  ;;  %v1328_v32 = vsel %vm445_vm1, %v8867_v29, %v1260_v30  ;;  %v1331_v33 = vsel %vm445_vm1, %v8869_v10, %v1261_v9  ;;  %v1337_v29 = vsel %vm445_vm1, %v1268_v36, %v1277_v11  ;;  %v1325_v10 = vsel %vm445_vm1, 0, %v1259_v35 }
 0x619   : > { %1390 = vrot.lane.b32.xlu0 %v1328_v32, %s8280_s23 }
 0x61a   : > { %1392 = vrot.lane.b32.xlu1 %v1331_v33, %s8280_s23 }
 0x61c   : > { %v1427_v27 = vpop.permute.xlu2 %1426 }
 0x620   : > { %1394 = vrot.lane.b32.xlu2 %v1334_v39, %s8280_s23 }
 0x621   : > { %1396 = vrot.lane.b32.xlu0 %v1337_v29, %s8280_s23 }
 0x622   : > { %1388 = vrot.lane.b32.xlu1 %v1325_v10, %s8280_s23 }
 0x628   : > { %1509 = vperm.xlu2 %8167, %v1506_v41  }
 0x629   : > { %1516 = vperm.xlu0 %8164, %v1506_v41  }
 0x631   : > { %8168 = vset.pattern.permute.xlu0 %v12463_v0 }
 0x63d   : > { %v1419_v34 = vpop.permute.xlu2 %1418 }
 0x65d   : > { %v1411_v42 = vpop.permute.xlu0 %1410 }
 0x662   : > { %v1405_v53 = vpop.permute.xlu2 %1404 }
 0x664   : > { %v1403_v46 = vpop.permute.xlu1 %1402 }
 0x665   : > { %v1421_v37 = vpop.permute.xlu0 %1420 }
 0x66a   : > { %v1409_v28 = vpop.permute.xlu2 %1408 }
 0x66b   : > { %v1436_v51 = vsel %vm551_vm9, %v1409_v28, %v1411_v42 }
 0x66c   : > { %v1425_v48 = vpop.permute.xlu1 %1424 }
 0x66d   : > { %v1442_v49 = vsel %vm551_vm9, %v1425_v48, %v1427_v27  ;;  %v1423_v50 = vpop.permute.xlu0 %1422 }
 0x66e   : > { %v1440_v54 = vsel %vm551_vm9, %v1421_v37, %v1423_v50  ;;  %v1441_v56 = vsel %vm551_vm9, %v1423_v50, %v1425_v48  ;;  %v1465_v22 = vsel %vm445_vm1, %v1442_v49, 0 }
 0x66f   : > { %1496 = vmatpush.bf16.msra.mxu3 %v1465_v22  ;;  %v1459_v57 = vsel %vm445_vm1, %v1440_v54, 0  ;;  %v1462_v58 = vsel %vm445_vm1, %v1441_v56, 0 }
 0x670   : > { %1470 = vmatpush.bf16.msra.mxu1 %v1459_v57  ;;  %1483 = vmatpush.bf16.msra.mxu2 %v1462_v58 }
 0x672   : > { %v1399_v55 = vpop.permute.xlu2 %1398 }
 0x674   : > { %v1413_v60 = vpop.permute.xlu1 %1412 }
 0x675   : > { %v1415_v61 = vpop.permute.xlu0 %1414 }
 0x676   : > { %v1437_v63 = vsel %vm551_vm9, %v1413_v60, %v1415_v61 }
 0x677   : > { %1471 = vmatpush.bf16.msra.mxu1 %v1437_v63 }
 0x67a   : > { %v1395_v13 = vpop.permute.xlu2 %1394 }
 0x67c   : > { %v1417_v1 = vpop.permute.xlu1 %1416 }
 0x67d   : > { %v1438_v24 = vsel %vm551_vm9, %v1415_v61, %v1417_v1  ;;  %v1439_v2 = vsel %vm551_vm9, %v1417_v1, %v1419_v34 }
 0x67e   : > { %1484 = vmatpush.bf16.msra.mxu2 %v1438_v24  ;;  %1497 = vmatpush.bf16.msra.mxu3 %v1439_v2 }
 0x682   : > { %1498 = vmatpush.bf16.msra.mxu3 %v1436_v51  ;;  %v1510_v31 = vpop.permute.xlu2 %1509 }
 0x683   : > { %v1401_v59 = vpop.permute.xlu0 %1400 }
 0x684   : > { %v1407_v40 = vpop.permute.xlu1 %1406  ;;  %v1433_v5 = vsel %vm551_vm9, %v1401_v59, %v1403_v46  ;;  %v1432_v12 = vsel %vm551_vm9, %v1399_v55, %v1401_v59 }
 0x685   : > { %v1434_v6 = vsel %vm551_vm9, %v1405_v53, %v1407_v40  ;;  %v1435_v7 = vsel %vm551_vm9, %v1407_v40, %v1409_v28 }
 0x686   : > { %1472 = vmatpush.bf16.msra.mxu1 %v1434_v6  ;;  %1485 = vmatpush.bf16.msra.mxu2 %v1435_v7 }
 0x687   : > { %1499 = vmatpush.bf16.msra.mxu3 %v1433_v5 }
 0x68a   : > { %1486 = vmatpush.bf16.msra.mxu2 %v1432_v12 }
 0x68b   : > { %v1391_v43 = vpop.permute.xlu0 %1390 }
 0x68c   : > { %v1393_v14 = vpop.permute.xlu1 %1392 }
 0x68d   : > { %v1429_v15 = vsel %vm551_vm9, %v1391_v43, %v1393_v14  ;;  %v1430_v8 = vsel %vm551_vm9, %v1393_v14, %v1395_v13 }
 0x68e   : > { %1487 = vmatpush.bf16.msra.mxu2 %v1429_v15  ;;  %1500 = vmatpush.bf16.msra.mxu3 %v1430_v8 }
 0x691   : > { %7328 = vmatmul.msk.bf16.vlgmr.msra.gmra.mxu2 %vm579_vm10, %v1371_v16  ;;  %7329 = vmatmul.msk.bf16.vlgmr.msra.gmra.mxu3 %vm579_vm10, %v1371_v16 }
 0x693   : > { %v1397_v17 = vpop.permute.xlu0 %1396 }
 0x694   : > { %v1431_v26 = vsel %vm551_vm9, %v1397_v17, %v1399_v55  ;;  %v1389_v9 = vpop.permute.xlu1 %1388 }
 0x695   : > { %1473 = vmatpush.bf16.msra.mxu1 %v1431_v26  ;;  %v1428_v30 = vsel %vm551_vm9, %v1389_v9, %v1391_v43 }
 0x699   : > { %1474 = vmatpush.bf16.msra.mxu1 %v1428_v30 }
 0x69b   : > { %v1517_v36 = vpop.permute.xlu0 %1516 }
 0x69c   : > { %7327 = vmatmul.msk.bf16.vlgmr.msra.gmra.mxu1 %vm579_vm10, %v1371_v16 }
 0x714   : > { %v1489_v32 = vpop.f32.mrf.mxu2  ;;  %v1502_v33 = vpop.f32.mrf.mxu3 }
 0x715   : > { %v1513_v11 = vmul.f32 %v1510_v31, %v1489_v32  ;;  %v1514_v35 = vmul.f32 %v1510_v31, %v1502_v33 }
 0x717   : > { %v1521_v39 = vadd.f32 %v1517_v36, %v1514_v35  ;;  %v1520_v29 = vadd.f32 %v1517_v36, %v1513_v11 }
 0x719   : > { %v1524_v10 = vmax.f32 %v1521_v39, 0.0  ;;  %v1476_v41 = vpop.f32.mrf.mxu1  ;;  %v1523_v46 = vmax.f32 %v1520_v29, 0.0 }
 0x71a   : > { %v1512_v42 = vmul.f32 %v1510_v31, %v1476_v41 }
 0x71b   : > { %v1527_v27 = vmul.f32 %v1524_v10, %v8558_v38  ;;  %v1526_v54 = vmul.f32 %v1523_v46, %v8538_v25 }
 0x71c   : > { %v1519_v37 = vadd.f32 %v1517_v36, %v1512_v42  ;;  %v1491_v34 = vpop.f32.mrf.mxu2  ;;  %v1504_v48 = vpop.f32.mrf.mxu3 }
 0x71d   : > { %v1529_v49 = vpack.c.bf16 %v1527_v27, %v1527_v27 }
 0x71e   : > { %v1522_v50 = vmax.f32 %v1519_v37, 0.0 }
 0x71f   : > { %v1534_v53 = vunpack.c.l.b16 %v1529_v49 }
 0x720   : > { %v1525_v56 = vmul.f32 %v1522_v50, %v8536_v20 }
 0x721   : > { %v9008_v22 = vpack.c.b16 %v1534_v53, %v1534_v53  ;;  %v1478_v57 = vpop.f32.mrf.mxu1 }
 0x722   : > { %v1528_v58 = vpack.c.bf16 %v1526_v54, %v1525_v56 }
 0x723   : > { %1607 = vrot.lane.b32.xlu0 %v9008_v22, %s8272_s11  ;;  %v1540_v1 = vrot.slane %v9008_v22, 4 }
 0x724   : > { %v1532_v60 = vunpack.c.l.b16 %v1528_v58  ;;  %v1533_v61 = vunpack.c.h.b16 %v1528_v58 }
 0x726   : > { %v9012_v63 = vpack.c.b16 %v1532_v60, %v1532_v60  ;;  %v9014_v28 = vpack.c.b16 %v1533_v61, %v1533_v61 }
 0x728   : > { %1605 = vrot.lane.b32.xlu2 %v9014_v28, %s8272_s11  ;;  %1603 = vrot.lane.b32.xlu1 %v9012_v63, %s8272_s11  ;;  %v1539_v24 = vrot.slane %v9014_v28, 4  ;;  %v1538_v2 = vrot.slane %v9012_v63, 4 }
 0x72b   : > { %1589 = vrot.lane.b32.xlu0 %v9008_v22, %s8273_s16 }
 0x730   : > { %1587 = vrot.lane.b32.xlu2 %v9014_v28, %s8273_s16  ;;  %1585 = vrot.lane.b32.xlu1 %v9012_v63, %s8273_s16 }
 0x733   : > { %1572 = vrot.lane.b32.xlu0 %v9008_v22, %s8275_s18 }
 0x738   : > { %1570 = vrot.lane.b32.xlu2 %v9014_v28, %s8275_s18  ;;  %1568 = vrot.lane.b32.xlu1 %v9012_v63, %s8275_s18 }
 0x73b   : > { %1554 = vrot.lane.b32.xlu0 %v9008_v22, %s8277_s20 }
 0x740   : > { %1552 = vrot.lane.b32.xlu2 %v9014_v28, %s8277_s20  ;;  %1550 = vrot.lane.b32.xlu1 %v9012_v63, %s8277_s20 }
 0x743   : > { %1598 = vrot.lane.b32.xlu0 %v1540_v1, %s8274_s17 }
 0x748   : > { %1596 = vrot.lane.b32.xlu2 %v1539_v24, %s8274_s17  ;;  %1594 = vrot.lane.b32.xlu1 %v1538_v2, %s8274_s17 }
 0x74b   : > { %1580 = vrot.lane.b32.xlu0 %v1540_v1, %s8276_s19 }
 0x750   : > { %1578 = vrot.lane.b32.xlu2 %v1539_v24, %s8276_s19  ;;  %1576 = vrot.lane.b32.xlu1 %v1538_v2, %s8276_s19 }
 0x753   : > { %1563 = vrot.lane.b32.xlu0 %v1540_v1, %s8278_s21 }
 0x758   : > { %1561 = vrot.lane.b32.xlu2 %v1539_v24, %s8278_s21  ;;  %1559 = vrot.lane.b32.xlu1 %v1538_v2, %s8278_s21 }
 0x75b   : > { %1545 = vrot.lane.b32.xlu0 %v1540_v1, %s8279_s22 }
 0x760   : > { %1543 = vrot.lane.b32.xlu2 %v1539_v24, %s8279_s22  ;;  %1541 = vrot.lane.b32.xlu1 %v1538_v2, %s8279_s22 }
 0x782   : > { %v1606_v51 = vpop.permute.xlu2 %1605 }
 0x78a   : > { %v1588_v6 = vpop.permute.xlu2 %1587 }
 0x792   : > { %v1571_v14 = vpop.permute.xlu2 %1570 }
 0x795   : > { %v1608_v55 = vpop.permute.xlu0 %1607 }
 0x796   : > { %v1610_v59 = vsel %vm441_vm0, %v1606_v51, %v1608_v55  ;;  %v1611_v43 = vsel %vm441_vm0, %v1608_v55, %v8420_v18 }
 0x797   : > { %1712 = vrot.lane.b32.xlu0 %v1610_v59, %s8280_s23 }
 0x79a   : > { %v1604_v40 = vpop.permute.xlu1 %1603  ;;  %v1553_v16 = vpop.permute.xlu2 %1552 }
 0x79b   : > { %1708 = vrot.lane.b32.xlu1 %v1604_v40, %s8280_s23  ;;  %v1609_v5 = vsel %vm441_vm0, %v1604_v40, %v1606_v51 }
 0x79c   : > { %1710 = vrot.lane.b32.xlu2 %v1609_v5, %s8280_s23 }
 0x79d   : > { %v1590_v7 = vpop.permute.xlu0 %1589 }
 0x79e   : > { %v1593_v11 = vsel %vm417_vm3, %v1590_v7, %v8425_v23  ;;  %v1592_v53 = vsel %vm417_vm3, %v1588_v6, %v1590_v7 }
 0x7a2   : > { %v1586_v12 = vpop.permute.xlu1 %1585  ;;  %v1597_v30 = vpop.permute.xlu2 %1596 }
 0x7a3   : > { %1714 = vrot.lane.b32.xlu1 %v1611_v43, %s8280_s23  ;;  %v1591_v46 = vsel %vm417_vm3, %v1586_v12, %v1588_v6 }
 0x7a5   : > { %v1573_v13 = vpop.permute.xlu0 %1572 }
 0x7a6   : > { %v1575_v37 = vsel %vm394_vm4, %v1571_v14, %v1573_v13 }
 0x7aa   : > { %v1569_v15 = vpop.permute.xlu1 %1568  ;;  %v1579_v29 = vpop.permute.xlu2 %1578 }
 0x7ab   : > { %v1574_v2 = vsel %vm394_vm4, %v1569_v15, %v1571_v14 }
 0x7ad   : > { %v1555_v8 = vpop.permute.xlu0 %1554 }
 0x7ae   : > { %v1558_v5 = vsel %vm372_vm7, %v1553_v16, %v1555_v8 }
 0x7b2   : > { %v1551_v17 = vpop.permute.xlu1 %1550  ;;  %v1562_v56 = vpop.permute.xlu2 %1561 }
 0x7b3   : > { %v1557_v60 = vsel %vm372_vm7, %v1551_v17, %v1553_v16  ;;  %v1556_v43 = vsel %vm372_vm7, %v8448_v45, %v1551_v17 }
 0x7b5   : > { %v1599_v26 = vpop.permute.xlu0 %1598 }
 0x7b6   : > { %v1602_v33 = vsel %vm429_vm2, %v1599_v26, %v8422_v21  ;;  %v1601_v34 = vsel %vm429_vm2, %v1597_v30, %v1599_v26 }
 0x7b7   : > { %v1658_v36 = vsel %vm445_vm1, %v1593_v11, %v1602_v33  ;;  %v1655_v54 = vsel %vm445_vm1, %v1592_v53, %v1601_v34 }
 0x7ba   : > { %v1595_v9 = vpop.permute.xlu1 %1594  ;;  %v1544_v14 = vpop.permute.xlu2 %1543 }
 0x7bb   : > { %v1649_v31 = vsel %vm445_vm1, %v1586_v12, %v1595_v9  ;;  %v1600_v42 = vsel %vm429_vm2, %v1595_v9, %v1597_v30 }
 0x7bc   : > { %1700 = vrot.lane.b32.xlu2 %v1649_v31, %s8280_s23  ;;  %v1652_v50 = vsel %vm445_vm1, %v1591_v46, %v1600_v42 }
 0x7bd   : > { %v1581_v32 = vpop.permute.xlu0 %1580 }
 0x7be   : > { %v1583_v27 = vsel %vm405_vm5, %v1579_v29, %v1581_v32  ;;  %v1584_v57 = vsel %vm405_vm5, %v1581_v32, %v8454_v52 }
 0x7bf   : > { %v1643_v49 = vsel %vm445_vm1, %v1575_v37, %v1583_v27  ;;  %v1646_v1 = vsel %vm445_vm1, %v1573_v13, %v1584_v57  ;;  %v1794_v37 = vld [vmem:[%s12451_s2 + $0x20] sm:$0xff] }
 0x7c2   : > { %v1577_v35 = vpop.permute.xlu1 %1576 }
 0x7c3   : > { %v1637_v39 = vsel %vm445_vm1, %v1569_v15, %v1577_v35  ;;  %v1582_v61 = vsel %vm405_vm5, %v1577_v35, %v1579_v29 }
 0x7c4   : > { %1706 = vrot.lane.b32.xlu2 %v1658_v36, %s8280_s23  ;;  %1692 = vrot.lane.b32.xlu0 %v1637_v39, %s8280_s23  ;;  %v1640_v55 = vsel %vm445_vm1, %v1574_v2, %v1582_v61 }
 0x7c5   : > { %v1564_v10 = vpop.permute.xlu0 %1563 }
 0x7c6   : > { %v1634_v41 = vsel %vm445_vm1, %v1555_v8, %v1564_v10  ;;  %v1567_v59 = vsel %vm384_vm6, %v1562_v56, %v1564_v10 }
 0x7c7   : > { %1690 = vrot.lane.b32.xlu1 %v1634_v41, %s8280_s23  ;;  %v1631_v7 = vsel %vm445_vm1, %v1558_v5, %v1567_v59 }
 0x7ca   : > { %v1560_v48 = vpop.permute.xlu1 %1559 }
 0x7cb   : > { %v1566_v58 = vsel %vm384_vm6, %v1560_v48, %v1562_v56  ;;  %v1565_v6 = vsel %vm384_vm6, %v8446_v44, %v1560_v48 }
 0x7cc   : > { %1696 = vrot.lane.b32.xlu2 %v1643_v49, %s8280_s23  ;;  %1702 = vrot.lane.b32.xlu0 %v1652_v50, %s8280_s23  ;;  %v1628_v24 = vsel %vm445_vm1, %v1557_v60, %v1566_v58  ;;  %v1625_v13 = vsel %vm445_vm1, %v1556_v43, %v1565_v6 }
 0x7cd   : > { %v1546_v15 = vpop.permute.xlu0 %1545 }
 0x7ce   : > { %v1549_v16 = vsel %vm360_vm8, %v1544_v14, %v1546_v15  ;;  %v1622_v9 = vsel %vm445_vm1, %v9008_v22, %v1546_v15 }
 0x7cf   : > { %1704 = vrot.lane.b32.xlu1 %v1655_v54, %s8280_s23  ;;  %v1619_v17 = vsel %vm445_vm1, %v9014_v28, %v1549_v16 }
 0x7d2   : > { %v1542_v51 = vpop.permute.xlu1 %1541 }
 0x7d3   : > { %v1547_v40 = vsel %vm360_vm8, %v8487_v19, %v1542_v51  ;;  %v1548_v8 = vsel %vm360_vm8, %v1542_v51, %v1544_v14 }
 0x7d4   : > { %1698 = vrot.lane.b32.xlu0 %v1646_v1, %s8280_s23  ;;  %1686 = vrot.lane.b32.xlu2 %v1628_v24, %s8280_s23  ;;  %v1613_v12 = vsel %vm445_vm1, 0, %v1547_v40  ;;  %v1616_v26 = vsel %vm445_vm1, %v9012_v63, %v1548_v8  ;;  %v1659_v40 = vld [vmem:[%s12450_s1 + $0xa0] sm:$0xf] }
 0x7d7   : > { %1694 = vrot.lane.b32.xlu1 %v1640_v55, %s8280_s23 }
 0x7dc   : > { %1688 = vrot.lane.b32.xlu0 %v1631_v7, %s8280_s23  ;;  %1676 = vrot.lane.b32.xlu2 %v1613_v12, %s8280_s23 }
 0x7df   : > { %1684 = vrot.lane.b32.xlu1 %v1625_v13, %s8280_s23 }
 0x7e4   : > { %1678 = vrot.lane.b32.xlu0 %v1616_v26, %s8280_s23  ;;  %1682 = vrot.lane.b32.xlu2 %v1622_v9, %s8280_s23 }
 0x7e7   : > { %1680 = vrot.lane.b32.xlu1 %v1619_v17, %s8280_s23 }
 0x7ec   : > { %1797 = vperm.xlu0 %8168, %v1794_v37  }
 0x7ef   : > { %1804 = vperm.xlu1 %8169, %v1794_v37  }
 0x7f6   : > { %v1711_v30 = vpop.permute.xlu2 %1710 }
 0x809   : > { %v1713_v31 = vpop.permute.xlu0 %1712 }
 0x80a   : > { %v1729_v32 = vsel %vm551_vm9, %v1711_v30, %v1713_v31 }
 0x80b   : > { %v1750_v33 = vsel %vm445_vm1, %v1729_v32, 0 }
 0x80c   : > { %1771 = vmatpush.bf16.msrb.mxu1 %v1750_v33 }
 0x80d   : > { %v1709_v63 = vpop.permute.xlu1 %1708 }
 0x80e   : > { %v1728_v11 = vsel %vm551_vm9, %v1709_v63, %v1711_v30 }
 0x80f   : > { %v1747_v22 = vsel %vm445_vm1, %v1728_v11, 0 }
 0x810   : > { %1758 = vmatpush.bf16.msrb.mxu0 %v1747_v22 }
 0x815   : > { %v1715_v35 = vpop.permute.xlu1 %1714 }
 0x816   : > { %v1730_v36 = vsel %vm551_vm9, %v1713_v31, %v1715_v35  ;;  %v1701_v39 = vpop.permute.xlu2 %1700 }
 0x817   : > { %v1753_v28 = vsel %vm445_vm1, %v1730_v36, 0 }
 0x818   : > { %1784 = vmatpush.bf16.msrb.mxu2 %v1753_v28 }
 0x81e   : > { %v1707_v29 = vpop.permute.xlu2 %1706 }
 0x826   : > { %v1697_v42 = vpop.permute.xlu2 %1696 }
 0x82e   : > { %v1687_v50 = vpop.permute.xlu2 %1686 }
 0x836   : > { %v1693_v10 = vpop.permute.xlu0 %1692  ;;  %v1677_v61 = vpop.permute.xlu2 %1676 }
 0x839   : > { %v1691_v41 = vpop.permute.xlu1 %1690 }
 0x83e   : > { %v1703_v27 = vpop.permute.xlu0 %1702  ;;  %v1683_v5 = vpop.permute.xlu2 %1682 }
 0x83f   : > { %v1725_v46 = vsel %vm551_vm9, %v1701_v39, %v1703_v27 }
 0x840   : > { %1759 = vmatpush.bf16.msrb.mxu0 %v1725_v46 }
 0x841   : > { %v1705_v34 = vpop.permute.xlu1 %1704 }
 0x842   : > { %v1726_v48 = vsel %vm551_vm9, %v1703_v27, %v1705_v34  ;;  %v1727_v49 = vsel %vm551_vm9, %v1705_v34, %v1707_v29 }
 0x843   : > { %1772 = vmatpush.bf16.msrb.mxu1 %v1726_v48  ;;  %1785 = vmatpush.bf16.msrb.mxu2 %v1727_v49 }
 0x846   : > { %v1699_v53 = vpop.permute.xlu0 %1698 }
 0x847   : > { %v1724_v54 = vsel %vm551_vm9, %v1697_v42, %v1699_v53 }
 0x848   : > { %1786 = vmatpush.bf16.msrb.mxu2 %v1724_v54 }
 0x849   : > { %v1695_v56 = vpop.permute.xlu1 %1694 }
 0x84a   : > { %v1722_v57 = vsel %vm551_vm9, %v1693_v10, %v1695_v56  ;;  %v1723_v58 = vsel %vm551_vm9, %v1695_v56, %v1697_v42 }
 0x84b   : > { %1760 = vmatpush.bf16.msrb.mxu0 %v1722_v57  ;;  %1773 = vmatpush.bf16.msrb.mxu1 %v1723_v58 }
 0x84e   : > { %v1689_v60 = vpop.permute.xlu0 %1688 }
 0x84f   : > { %v1720_v1 = vsel %vm551_vm9, %v1687_v50, %v1689_v60  ;;  %v1721_v24 = vsel %vm551_vm9, %v1689_v60, %v1691_v41 }
 0x850   : > { %1774 = vmatpush.bf16.msrb.mxu1 %v1720_v1  ;;  %1787 = vmatpush.bf16.msrb.mxu2 %v1721_v24 }
 0x851   : > { %v1685_v2 = vpop.permute.xlu1 %1684 }
 0x852   : > { %v1719_v51 = vsel %vm551_vm9, %v1685_v2, %v1687_v50 }
 0x853   : > { %1761 = vmatpush.bf16.msrb.mxu0 %v1719_v51 }
 0x856   : > { %v1679_v55 = vpop.permute.xlu0 %1678 }
 0x857   : > { %v1716_v59 = vsel %vm551_vm9, %v1677_v61, %v1679_v55 }
 0x858   : > { %1762 = vmatpush.bf16.msrb.mxu0 %v1716_v59 }
 0x859   : > { %v1681_v6 = vpop.permute.xlu1 %1680 }
 0x85a   : > { %v1717_v7 = vsel %vm551_vm9, %v1679_v55, %v1681_v6  ;;  %v1718_v12 = vsel %vm551_vm9, %v1681_v6, %v1683_v5 }
 0x85b   : > { %7330 = vmatmul.msk.bf16.vlgmr.msrb.gmra.mxu0 %vm579_vm10, %v1659_v40  ;;  %1775 = vmatpush.bf16.msrb.mxu1 %v1717_v7 }
 0x85c   : > { %1788 = vmatpush.bf16.msrb.mxu2 %v1718_v12 }
 0x85e   : > { %7331 = vmatmul.msk.bf16.vlgmr.msrb.gmra.mxu1 %vm579_vm10, %v1659_v40  ;;  %v1798_v43 = vpop.permute.xlu0 %1797 }
 0x85f   : > { %7332 = vmatmul.msk.bf16.vlgmr.msrb.gmra.mxu2 %vm579_vm10, %v1659_v40 }
 0x861   : > { %v1805_v14 = vpop.permute.xlu1 %1804 }
 0x8d8   : > { %v1764_v13 = vpop.f32.mrf.mxu0 }
 0x8d9   : > { %v1800_v15 = vmul.f32 %v1798_v43, %v1764_v13 }
 0x8db   : > { %v1807_v8 = vadd.f32 %v1805_v14, %v1800_v15  ;;  %v1777_v16 = vpop.f32.mrf.mxu1 }
 0x8dc   : > { %v1801_v26 = vmul.f32 %v1798_v43, %v1777_v16 }
 0x8dd   : > { %v1810_v9 = vadd.f32 %v1807_v8, %v8856_v3 }
 0x8de   : > { %v1808_v17 = vadd.f32 %v1805_v14, %v1801_v26 }
 0x8df   : > { %v1813_v30 = vmax.f32 %v1810_v9, 0.0 }
 0x8e0   : > { %v1811_v31 = vadd.f32 %v1808_v17, %v8861_v4  ;;  %v1766_v32 = vpop.f32.mrf.mxu0 }
 0x8e1   : > { %v1816_v22 = vmul.f32 %v1813_v30, %v8536_v20 }
 0x8e2   : > { %v1814_v33 = vmax.f32 %v1811_v31, 0.0  ;;  %v1790_v63 = vpop.f32.mrf.mxu2 }
 0x8e3   : > { %v1779_v11 = vpop.f32.mrf.mxu1  ;;  %v1802_v28 = vmul.f32 %v1798_v43, %v1790_v63 }
 0x8e4   : > { %v1817_v35 = vmul.f32 %v1814_v33, %v8538_v25 }
 0x8e5   : > { %v1809_v3 = vadd.f32 %v1805_v14, %v1802_v28 }
 0x8e6   : > { %v1819_v36 = vpack.c.bf16 %v1817_v35, %v1816_v22 }
 0x8e7   : > { %v1812_v20 = vadd.f32 %v1809_v3, %v8850_v62 }
 0x8e8   : > { %v1823_v39 = vunpack.c.l.b16 %v1819_v36  ;;  %v1824_v29 = vunpack.c.h.b16 %v1819_v36 }
 0x8e9   : > { %v1815_v25 = vmax.f32 %v1812_v20, 0.0 }
 0x8ea   : > { %v9153_v10 = vpack.c.b16 %v1823_v39, %v1823_v39  ;;  %v9155_v41 = vpack.c.b16 %v1824_v29, %v1824_v29  ;;  %v1792_v42 = vpop.f32.mrf.mxu2 }
 0x8eb   : > { %v1818_v27 = vmul.f32 %v1815_v25, %v8558_v38 }
 0x8ec   : > { %1878 = vrot.lane.b32.xlu0 %v9155_v41, %s8273_s16  ;;  %1896 = vrot.lane.b32.xlu1 %v9155_v41, %s8272_s11  ;;  %v1829_v4 = vrot.slane %v9153_v10, 4  ;;  %v1830_v38 = vrot.slane %v9155_v41, 4 }
 0x8ed   : > { %1894 = vrot.lane.b32.xlu2 %v9153_v10, %s8272_s11  ;;  %v1820_v46 = vpack.c.bf16 %v1818_v27, %v1818_v27 }
 0x8ef   : > { %v1825_v62 = vunpack.c.l.b16 %v1820_v46 }
 0x8f1   : > { %v9176_v37 = vpack.c.b16 %v1825_v62, %v1825_v62 }
 0x8f3   : > { %v1831_v34 = vrot.slane %v9176_v37, 4 }
 0x8f4   : > { %1859 = vrot.lane.b32.xlu1 %v9153_v10, %s8275_s18  ;;  %1867 = vrot.lane.b32.xlu0 %v1829_v4, %s8276_s19 }
 0x8f5   : > { %1876 = vrot.lane.b32.xlu2 %v9153_v10, %s8273_s16 }
 0x8fc   : > { %1841 = vrot.lane.b32.xlu1 %v9153_v10, %s8277_s20  ;;  %1850 = vrot.lane.b32.xlu0 %v1829_v4, %s8278_s21 }
 0x8fd   : > { %1861 = vrot.lane.b32.xlu2 %v9155_v41, %s8275_s18 }
 0x904   : > { %1898 = vrot.lane.b32.xlu0 %v9176_v37, %s8272_s11  ;;  %1885 = vrot.lane.b32.xlu1 %v1829_v4, %s8274_s17  ;;  %s8289_s11 = smov 114  }
 0x905   : > { %1843 = vrot.lane.b32.xlu2 %v9155_v41, %s8277_s20 }
 0x90c   : > { %1845 = vrot.lane.b32.xlu0 %v9176_v37, %s8277_s20  ;;  %1869 = vrot.lane.b32.xlu1 %v1830_v38, %s8276_s19 }
 0x90d   : > { %1887 = vrot.lane.b32.xlu2 %v1830_v38, %s8274_s17 }
 0x914   : > { %1889 = vrot.lane.b32.xlu0 %v1831_v34, %s8274_s17  ;;  %1852 = vrot.lane.b32.xlu1 %v1830_v38, %s8278_s21  ;;  %s8291_s17 = smov 115  }
 0x915   : > { %1834 = vrot.lane.b32.xlu2 %v1830_v38, %s8279_s22 }
 0x91c   : > { %1871 = vrot.lane.b32.xlu0 %v1831_v34, %s8276_s19  ;;  %1832 = vrot.lane.b32.xlu1 %v1829_v4, %s8279_s22 }
 0x91d   : > { %1880 = vrot.lane.b32.xlu2 %v9176_v37, %s8273_s16  ;;  %s8290_s16 = smov 120  }
 0x924   : > { %1854 = vrot.lane.b32.xlu1 %v1831_v34, %s8278_s21 }
 0x925   : > { %1863 = vrot.lane.b32.xlu2 %v9176_v37, %s8275_s18 }
 0x92d   : > { %1836 = vrot.lane.b32.xlu2 %v1831_v34, %s8279_s22 }
 0x947   : > { %v1895_v48 = vpop.permute.xlu2 %1894 }
 0x948   : > { %2005 = vrot.lane.b32.xlu0 %v1895_v48, %s8280_s23 }
 0x94f   : > { %v1877_v49 = vpop.permute.xlu2 %1876 }
 0x957   : > { %v1862_v50 = vpop.permute.xlu2 %1861 }
 0x95e   : > { %v1879_v53 = vpop.permute.xlu0 %1878  ;;  %v1897_v54 = vpop.permute.xlu1 %1896 }
 0x95f   : > { %v1844_v56 = vpop.permute.xlu2 %1843  ;;  %v1900_v57 = vsel %vm441_vm0, %v1895_v48, %v1897_v54  ;;  %v1882_v59 = vsel %vm417_vm3, %v1877_v49, %v1879_v53 }
 0x960   : > { %2007 = vrot.lane.b32.xlu1 %v1900_v57, %s8280_s23  ;;  %v2331_v57 = vld [vmem:[%s12451_s2 + $0x28] sm:$0xff] }
 0x966   : > { %v1860_v58 = vpop.permute.xlu1 %1859  ;;  %v1868_v60 = vpop.permute.xlu0 %1867 }
 0x967   : > { %v1888_v61 = vpop.permute.xlu2 %1887  ;;  %v1865_v14 = vsel %vm394_vm4, %v1860_v58, %v1862_v50  ;;  %v1928_v16 = vsel %vm445_vm1, %v1860_v58, %v1868_v60 }
 0x96e   : > { %v1842_v1 = vpop.permute.xlu1 %1841  ;;  %v1851_v24 = vpop.permute.xlu0 %1850 }
 0x96f   : > { %v1835_v2 = vpop.permute.xlu2 %1834  ;;  %v1847_v9 = vsel %vm372_vm7, %v8448_v45, %v1842_v1  ;;  %v1856_v17 = vsel %vm384_vm6, %v8446_v44, %v1851_v24  ;;  %v1848_v30 = vsel %vm372_vm7, %v1842_v1, %v1844_v56 }
 0x970   : > { %v1916_v11 = vsel %vm445_vm1, %v1847_v9, %v1856_v17  ;;  %v9291_v17 = vld [vmem:[%s12453_s4 + $0x38] sm:$0xff] }
 0x971   : > { %2289 = vmatpush.bf16.msra.mxu2 %v9291_v17 }
 0x976   : > { %v1899_v51 = vpop.permute.xlu0 %1898  ;;  %v1886_v55 = vpop.permute.xlu1 %1885 }
 0x977   : > { %v1891_v40 = vsel %vm429_vm2, %v1886_v55, %v1888_v61  ;;  %v1901_v5 = vsel %vm441_vm0, %v1897_v54, %v1899_v51  ;;  %v1940_v6 = vsel %vm445_vm1, %v1877_v49, %v1886_v55  ;;  %v1881_v12 = vpop.permute.xlu2 %1880  ;;  %v1902_v8 = vsel %vm441_vm0, %v1899_v51, %v8420_v18 }
 0x978   : > { %2009 = vrot.lane.b32.xlu1 %v1901_v5, %s8280_s23  ;;  %1997 = vrot.lane.b32.xlu2 %v1940_v6, %s8280_s23  ;;  %v1943_v7 = vsel %vm445_vm1, %v1882_v59, %v1891_v40  ;;  %v1883_v32 = vsel %vm417_vm3, %v1879_v53, %v1881_v12  ;;  %v1884_v48 = vsel %vm417_vm3, %v1881_v12, %v8425_v23  ;;  %vm2382_vm0 = vcmask 965632  }
 0x979   : > { %1999 = vrot.lane.b32.xlu0 %v1943_v7, %s8280_s23  ;;  %vm3279_vm3 = vcmask 941056  }
 0x97e   : > { %v1846_v43 = vpop.permute.xlu0 %1845  ;;  %v1870_v13 = vpop.permute.xlu1 %1869 }
 0x97f   : > { %v1873_v15 = vsel %vm405_vm5, %v1868_v60, %v1870_v13  ;;  %v1864_v22 = vpop.permute.xlu2 %1863  ;;  %v1849_v38 = vsel %vm372_vm7, %v1844_v56, %v1846_v43 }
 0x980   : > { %2011 = vrot.lane.b32.xlu1 %v1902_v8, %s8280_s23  ;;  %1989 = vrot.lane.b32.xlu2 %v1928_v16, %s8280_s23  ;;  %v1931_v26 = vsel %vm445_vm1, %v1865_v14, %v1873_v15  ;;  %v1866_v39 = vsel %vm394_vm4, %v1862_v50, %v1864_v22  ;;  %vm3264_vm4 = vcmask 982016  }
 0x981   : > { %1991 = vrot.lane.b32.xlu0 %v1931_v26, %s8280_s23 }
 0x986   : > { %v1890_v31 = vpop.permute.xlu0 %1889  ;;  %v1853_v18 = vpop.permute.xlu1 %1852 }
 0x987   : > { %v1892_v33 = vsel %vm429_vm2, %v1888_v61, %v1890_v31  ;;  %v1857_v63 = vsel %vm384_vm6, %v1851_v24, %v1853_v18  ;;  %v1837_v27 = vpop.permute.xlu2 %1836 }
 0x988   : > { %1981 = vrot.lane.b32.xlu2 %v1916_v11, %s8280_s23  ;;  %v1946_v35 = vsel %vm445_vm1, %v1883_v32, %v1892_v33  ;;  %v1919_v36 = vsel %vm445_vm1, %v1848_v30, %v1857_v63  ;;  %v1840_v46 = vsel %vm360_vm8, %v1835_v2, %v1837_v27  ;;  %v1913_v54 = vsel %vm445_vm1, %v9176_v37, %v1837_v27  ;;  %v9297_v30 = vld [vmem:[%s12453_s4 + $0x30] sm:$0xff]  ;;  %v7975_v32 = vld [vmem:[%s12450_s1 + $0xd8] sm:$0xf0]  ;;  %v9310_v63 = vld [vmem:[%s12453_s4 + $0x28] sm:$0xff] }
 0x989   : > { %2001 = vrot.lane.b32.xlu1 %v1946_v35, %s8280_s23  ;;  %1983 = vrot.lane.b32.xlu0 %v1919_v36, %s8280_s23  ;;  %v1910_v49 = vsel %vm445_vm1, %v9155_v41, %v1840_v46  ;;  %v7991_v11 = vld [vmem:[%s12453_s4 + $0x78] sm:$0xff] }
 0x98a   : > { %2290 = vmatpush.bf16.msra.mxu2 %v9297_v30 }
 0x98e   : > { %v1872_v44 = vpop.permute.xlu0 %1871  ;;  %v1833_v28 = vpop.permute.xlu1 %1832  ;;  %2291 = vmatpush.bf16.msra.mxu2 %v9310_v63 }
 0x98f   : > { %v1874_v29 = vsel %vm405_vm5, %v1870_v13, %v1872_v44  ;;  %v1838_v3 = vsel %vm360_vm8, %v8487_v19, %v1833_v28  ;;  %v1839_v42 = vsel %vm360_vm8, %v1833_v28, %v1835_v2  ;;  %v1893_v19 = vsel %vm429_vm2, %v1890_v31, %v8422_v21 }
 0x990   : > { %v1934_v20 = vsel %vm445_vm1, %v1866_v39, %v1874_v29  ;;  %v1907_v25 = vsel %vm445_vm1, %v9153_v10, %v1839_v42  ;;  %v1904_v4 = vsel %vm445_vm1, 0, %v1838_v3  ;;  %v1949_v53 = vsel %vm445_vm1, %v1884_v48, %v1893_v19  ;;  %v9321_v39 = vld [vmem:[%s12453_s4 + $0x20] sm:$0xff]  ;;  %v7990_v29 = vld [vmem:[%s12453_s4 + $0x70] sm:$0xff]  ;;  %v7999_v3 = vld [vmem:[%s12453_s4 + $0xb8] sm:$0xff] }
 0x991   : > { %1993 = vrot.lane.b32.xlu2 %v1934_v20, %s8280_s23  ;;  %1975 = vrot.lane.b32.xlu1 %v1907_v25, %s8280_s23  ;;  %v1875_v21 = vsel %vm405_vm5, %v1872_v44, %v8454_v52  ;;  %v2332_v52 = vld [vmem:[%s12451_s2 + $0x30] sm:$0xff]  ;;  %v9334_v42 = vld [vmem:[%s12453_s4 + $0x18] sm:$0xff]  ;;  %vm2578_vm2 = vcmask 64512  }
 0x992   : > { %1973 = vrot.lane.b32.xlu0 %v1904_v4, %s8280_s23  ;;  %v1937_v23 = vsel %vm445_vm1, %v1864_v22, %v1875_v21  ;;  %2292 = vmatpush.bf16.msra.mxu2 %v9321_v39  ;;  %v7989_v4 = vld [vmem:[%s12453_s4 + $0x68] sm:$0xff]  ;;  %v7987_v21 = vld [vmem:[%s12453_s4 + $0x58] sm:$0xff] }
 0x996   : > { %v1855_v62 = vpop.permute.xlu1 %1854  ;;  %2293 = vmatpush.bf16.msra.mxu2 %v9334_v42 }
 0x997   : > { %v1858_v34 = vsel %vm384_vm6, %v1853_v18, %v1855_v62  ;;  %v1925_v56 = vsel %vm445_vm1, %v1846_v43, %v1855_v62  ;;  %v7335_v18 = vld [vmem:[%s12450_s1 + $0xc8] sm:$0xf]  ;;  %v7998_v62 = vld [vmem:[%s12453_s4 + $0xb0] sm:$0xff]  ;;  %vm3395_vm6 = vcmask 56320  }
 0x998   : > { %v1922_v50 = vsel %vm445_vm1, %v1849_v38, %v1858_v34  ;;  %v7336_v28 = vor.u32 %v7975_v32, %v7335_v18  ;;  %v9348_v38 = vld [vmem:[%s12453_s4 + $0x10] sm:$0xff]  ;;  %v7988_v34 = vld [vmem:[%s12453_s4 + $0x60] sm:$0xff] }
 0x999   : > { %1977 = vrot.lane.b32.xlu1 %v1910_v49, %s8280_s23  ;;  %1985 = vrot.lane.b32.xlu2 %v1922_v50, %s8280_s23  ;;  %v7997_v49 = vld [vmem:[%s12453_s4 + $0xa8] sm:$0xff] }
 0x99a   : > { %2003 = vrot.lane.b32.xlu0 %v1949_v53, %s8280_s23  ;;  %2294 = vmatpush.bf16.msra.mxu2 %v9348_v38  ;;  %v9362_v50 = vld [vmem:[%s12453_s4 + $0x8] sm:$0xff] }
 0x99e   : > { %2295 = vmatpush.bf16.msra.mxu2 %v9362_v50 }
 0x9a1   : > { %1979 = vrot.lane.b32.xlu1 %v1913_v54, %s8280_s23  ;;  %1995 = vrot.lane.b32.xlu2 %v1937_v23, %s8280_s23 }
 0x9a2   : > { %1987 = vrot.lane.b32.xlu0 %v1925_v56, %s8280_s23  ;;  %v7996_v56 = vld [vmem:[%s12453_s4 + $0xa0] sm:$0xff] }
 0x9a9   : > { %2346 = vperm.xlu1 %8169, %v2331_v57   ;;  %2335 = vperm.xlu2 %8167, %v2331_v57   ;;  %v9375_v57 = vld [vmem:[%s12453_s4] sm:$0xff] }
 0x9aa   : > { %2340 = vperm.xlu0 %8168, %v2332_v52   ;;  %2296 = vmatpush.bf16.msra.mxu2 %v9375_v57 }
 0x9ae   : > { %2544 = vmatpush.bf16.msrb.mxu2 %v7991_v11 }
 0x9b1   : > { %8170 = vset.pattern.permute.xlu2 %v12461_v47  ;;  %8171 = vset.pattern.permute.xlu1 %v12463_v0 }
 0x9b2   : > { %2350 = vperm.xlu2 %8170, %v2332_v52   ;;  %2545 = vmatpush.bf16.msrb.mxu2 %v7990_v29 }
 0x9b3   : > { %2405 = vrot.lane.b32.xlu1 %v12463_v0, %s8282_s28 }
 0x9b6   : > { %2546 = vmatpush.bf16.msrb.mxu2 %v7989_v4 }
 0x9ba   : > { %8172 = vset.pattern.permute.xlu2 %v12463_v0  ;;  %v2006_v58 = vpop.permute.xlu0 %2005  ;;  %2547 = vmatpush.bf16.msrb.mxu2 %v7988_v34 }
 0x9be   : > { %2548 = vmatpush.bf16.msrb.mxu2 %v7987_v21 }
 0x9d2   : > { %v2008_v60 = vpop.permute.xlu1 %2007  ;;  %v1998_v24 = vpop.permute.xlu2 %1997 }
 0x9d3   : > { %v2025_v61 = vsel %vm551_vm9, %v2006_v58, %v2008_v60  ;;  %v7995_v58 = vld [vmem:[%s12453_s4 + $0x98] sm:$0xff] }
 0x9d4   : > { %v2044_v1 = vsel %vm445_vm1, %v2025_v61, 0  ;;  %v7986_v61 = vld [vmem:[%s12453_s4 + $0x50] sm:$0xff] }
 0x9d5   : > { %2055 = vmatpush.bf16.msrb.mxu3 %v2044_v1  ;;  %v7993_v1 = vld [vmem:[%s12453_s4 + $0x88] sm:$0xff]  ;;  %2549 = vmatpush.bf16.msrb.mxu2 %v7986_v61 }
 0x9da   : > { %v1990_v2 = vpop.permute.xlu2 %1989 }
 0x9e2   : > { %v1982_v6 = vpop.permute.xlu2 %1981 }
 0x9ea   : > { %v2010_v51 = vpop.permute.xlu1 %2009 }
 0x9eb   : > { %v2026_v55 = vsel %vm551_vm9, %v2008_v60, %v2010_v51  ;;  %v2000_v59 = vpop.permute.xlu0 %1999  ;;  %v1994_v15 = vpop.permute.xlu2 %1993  ;;  %v7994_v60 = vld [vmem:[%s12453_s4 + $0x90] sm:$0xff] }
 0x9ec   : > { %v2022_v40 = vsel %vm551_vm9, %v1998_v24, %v2000_v59  ;;  %v2047_v5 = vsel %vm445_vm1, %v2026_v55, 0  ;;  %v7985_v24 = vld [vmem:[%s12453_s4 + $0x48] sm:$0xff] }
 0x9ed   : > { %2056 = vmatpush.bf16.msrb.mxu3 %v2022_v40  ;;  %2069 = vmatpush.bf16.msra.mxu0 %v2047_v5 }
 0x9ee   : > { %2550 = vmatpush.bf16.msrb.mxu2 %v7985_v24 }
 0x9f2   : > { %v2012_v7 = vpop.permute.xlu1 %2011 }
 0x9f3   : > { %v2027_v12 = vsel %vm551_vm9, %v2010_v51, %v2012_v7  ;;  %v1992_v43 = vpop.permute.xlu0 %1991  ;;  %v1986_v33 = vpop.permute.xlu2 %1985  ;;  %v7984_v51 = vld [vmem:[%s12453_s4 + $0x40] sm:$0xff] }
 0x9f4   : > { %v2050_v13 = vsel %vm445_vm1, %v2027_v12, 0  ;;  %v2019_v14 = vsel %vm551_vm9, %v1990_v2, %v1992_v43  ;;  %v2020_v31 = vsel %vm551_vm9, %v1992_v43, %v1994_v15  ;;  %v7992_v2 = vld [vmem:[%s12453_s4 + $0x80] sm:$0xff]  ;;  %2551 = vmatpush.bf16.msrb.mxu2 %v7984_v51 }
 0x9f5   : > { %2057 = vmatpush.bf16.msrb.mxu3 %v2019_v14  ;;  %2083 = vmatpush.bf16.msra.mxu1 %v2050_v13 }
 0x9fb   : > { %v1984_v8 = vpop.permute.xlu0 %1983  ;;  %v2002_v16 = vpop.permute.xlu1 %2001 }
 0x9fc   : > { %v2016_v26 = vsel %vm551_vm9, %v1982_v6, %v1984_v8  ;;  %v2023_v9 = vsel %vm551_vm9, %v2000_v59, %v2002_v16  ;;  %v2017_v44 = vsel %vm551_vm9, %v1984_v8, %v1986_v33  ;;  %v1996_v19 = vpop.permute.xlu2 %1995 }
 0x9fd   : > { %2058 = vmatpush.bf16.msrb.mxu3 %v2016_v26  ;;  %2070 = vmatpush.bf16.msra.mxu0 %v2023_v9  ;;  %v2021_v48 = vsel %vm551_vm9, %v1994_v15, %v1996_v19 }
 0xa01   : > { %2071 = vmatpush.bf16.msra.mxu0 %v2020_v31 }
 0xa03   : > { %v1976_v35 = vpop.permute.xlu1 %1975 }
 0xa04   : > { %v1974_v22 = vpop.permute.xlu0 %1973  ;;  %v2336_v31 = vpop.permute.xlu2 %2335 }
 0xa05   : > { %v2013_v36 = vsel %vm551_vm9, %v1974_v22, %v1976_v35  ;;  %2072 = vmatpush.bf16.msra.mxu0 %v2017_v44 }
 0xa06   : > { %2059 = vmatpush.bf16.msrb.mxu3 %v2013_v36 }
 0xa09   : > { %7337 = vmatmul.msk.bf16.vlgmr.msrb.gmra.mxu3 %vm579_vm10, %v7336_v28 }
 0xa0a   : > { %2303 = vmatpush.bf16.msra.mxu3 %v7991_v11 }
 0xa0b   : > { %v1978_v25 = vpop.permute.xlu1 %1977 }
 0xa0c   : > { %v2004_v20 = vpop.permute.xlu0 %2003  ;;  %v2014_v27 = vsel %vm551_vm9, %v1976_v35, %v1978_v25 }
 0xa0d   : > { %v2024_v46 = vsel %vm551_vm9, %v2002_v16, %v2004_v20  ;;  %2073 = vmatpush.bf16.msra.mxu0 %v2014_v27 }
 0xa0e   : > { %2304 = vmatpush.bf16.msra.mxu3 %v7990_v29  ;;  %2084 = vmatpush.bf16.msra.mxu1 %v2024_v46  ;;  %v2351_v29 = vpop.permute.xlu2 %2350 }
 0xa10   : > { %7338 = vmatmul.msk.bf16.vlgmr.msra.gmra.mxu0 %vm579_vm10, %v7336_v28 }
 0xa11   : > { %2317 = vmatpush.bf16.msrb.mxu0 %v7999_v3 }
 0xa12   : > { %2305 = vmatpush.bf16.msra.mxu3 %v7989_v4  ;;  %2085 = vmatpush.bf16.msra.mxu1 %v2021_v48 }
 0xa13   : > { %v1980_v23 = vpop.permute.xlu1 %1979 }
 0xa14   : > { %v1988_v53 = vpop.permute.xlu0 %1987  ;;  %v2015_v52 = vsel %vm551_vm9, %v1978_v25, %v1980_v23 }
 0xa15   : > { %2318 = vmatpush.bf16.msrb.mxu0 %v7998_v62  ;;  %v2018_v54 = vsel %vm551_vm9, %v1986_v33, %v1988_v53  ;;  %vm3430_vm9 = vcmask 261120  }
 0xa16   : > { %2306 = vmatpush.bf16.msra.mxu3 %v7988_v34  ;;  %2086 = vmatpush.bf16.msra.mxu1 %v2018_v54 }
 0xa19   : > { %2319 = vmatpush.bf16.msrb.mxu0 %v7997_v49 }
 0xa1a   : > { %2307 = vmatpush.bf16.msra.mxu3 %v7987_v21  ;;  %2087 = vmatpush.bf16.msra.mxu1 %v2015_v52 }
 0xa1b   : > { %v2347_v32 = vpop.permute.xlu1 %2346 }
 0xa1d   : > { %2320 = vmatpush.bf16.msrb.mxu0 %v7996_v56  ;;  %7339 = vmatmul.msk.bf16.vlgmr.msra.gmra.mxu1 %vm579_vm10, %v7336_v28  ;;  %v2341_v28 = vpop.permute.xlu0 %2340  ;;  %vm4899_vm10 = vcmask 1014784  }
 0xa1e   : > { %2308 = vmatpush.bf16.msra.mxu3 %v7986_v61 }
 0xa21   : > { %2321 = vmatpush.bf16.msrb.mxu0 %v7995_v58 }
 0xa22   : > { %2309 = vmatpush.bf16.msra.mxu3 %v7985_v24  ;;  %v8000_v24 = vld [vmem:[%s12450_s1 + $0xf4] sm:$0xf] }
 0xa25   : > { %2322 = vmatpush.bf16.msrb.mxu0 %v7994_v60  ;;  %v9428_v54 = vpop.permute.xlu1 %2405 }
 0xa26   : > { %2310 = vmatpush.bf16.msra.mxu3 %v7984_v51 }
 0xa29   : > { %2323 = vmatpush.bf16.msrb.mxu0 %v7993_v1 }
 0xa2d   : > { %2324 = vmatpush.bf16.msrb.mxu0 %v7992_v2 }
 0xa31   : > { %2557 = vmatpush.bf16.msra.mxu0 %v7999_v3 }
 0xa35   : > { %2558 = vmatpush.bf16.msra.mxu0 %v7998_v62 }
 0xa39   : > { %2559 = vmatpush.bf16.msra.mxu0 %v7997_v49 }
 0xa3d   : > { %2560 = vmatpush.bf16.msra.mxu0 %v7996_v56 }
 0xa41   : > { %2561 = vmatpush.bf16.msra.mxu0 %v7995_v58 }
 0xa45   : > { %2562 = vmatpush.bf16.msra.mxu0 %v7994_v60 }
 0xa49   : > { %2563 = vmatpush.bf16.msra.mxu0 %v7993_v1 }
 0xa4d   : > { %2564 = vmatpush.bf16.msra.mxu0 %v7992_v2  ;;  %v7440_v2 = vld [vmem:[%s12450_s1 + $0x104] sm:$0xf0] }
 0xa8c   : > { %v2061_v55 = vpop.f32.mrf.mxu3 }
 0xa8d   : > { %v2075_v59 = vpop.f32.mrf.mxu0 }
 0xa94   : > { %v2063_v40 = vpop.f32.mrf.mxu3 }
 0xa95   : > { %v2094_v5 = vpack.c.bf16 %v2063_v40, %v2061_v55  ;;  %v2077_v6 = vpop.f32.mrf.mxu0 }
 0xa96   : > { %v2095_v7 = vpack.c.bf16 %v2077_v6, %v2075_v59  ;;  %v7443_v59 = vor.u32 %v8000_v24, %v7440_v2 }
 0xa97   : > { %2297 = vmatmul.bf16.vlgmr.msra.gmra.mxu2 %v2094_v5 }
 0xa98   : > { %2311 = vmatmul.bf16.vlgmr.msra.gmra.mxu3 %v2095_v7 }
 0xa9a   : > { %v2089_v12 = vpop.f32.mrf.mxu1 }
 0xaa2   : > { %v2091_v43 = vpop.f32.mrf.mxu1 }
 0xaa3   : > { %v2096_v13 = vpack.c.bf16 %v2091_v43, %v2089_v12 }
 0xaa5   : > { %2325 = vmatmul.bf16.vlgmr.msrb.gmra.mxu0 %v2096_v13 }
 0xaa7   : > { %2552 = vmatmul.bf16.vlgmr.msrb.gmra.mxu2 %v9155_v41 }
 0xab5   : > { %2565 = vmatmul.bf16.vlgmr.msra.gmra.mxu0 %v9176_v37  ;;  %v9410_v37 = vld [vmem:[%s12452_s3 + $0x3] ss:$0 sm:$0xff] }
 0xb1a   : > { %v2298_v14 = vpop.f32.mrf.mxu2 }
 0xb1b   : > { %v2312_v15 = vpop.f32.mrf.mxu3 }
 0xb1c   : > { %v2313_v8 = vadd.f32 %v2312_v15, %v2298_v14 }
 0xb22   : > { %v2300_v16 = vpop.f32.mrf.mxu2  ;;  %v2326_v26 = vpop.f32.mrf.mxu0 }
 0xb23   : > { %v2327_v9 = vadd.f32 %v2326_v26, %v2313_v8  ;;  %v2314_v33 = vpop.f32.mrf.mxu3 }
 0xb24   : > { %v2315_v22 = vadd.f32 %v2314_v33, %v2300_v16 }
 0xb25   : > { %v2343_v18 = vmul.f32 %v2336_v31, %v2327_v9 }
 0xb27   : > { %v2353_v11 = vadd.f32 %v2347_v32, %v2343_v18 }
 0xb29   : > { %v2355_v36 = vmax.f32 %v2353_v11, 0.0 }
 0xb2a   : > { %v2328_v35 = vpop.f32.mrf.mxu0  ;;  %v9405_v41 = vpop.f32.mrf.mxu2 }
 0xb2b   : > { %v2329_v44 = vadd.f32 %v2328_v35, %v2315_v22  ;;  %v2361_v20 = vmul.f32 %v9410_v37, %v2355_v36  ;;  %v2504_v36 = vld [vmem:[%s12451_s2 + $0x38] sm:$0xff] }
 0xb2d   : > { %v2344_v3 = vmul.f32 %v2341_v28, %v2329_v44  ;;  %v2363_v19 = vpack.c.bf16 %v2361_v20, %v2361_v20  ;;  %v2600_v20 = vld [vmem:[%s12451_s2 + $0x50] sm:$0xff] }
 0xb2f   : > { %v2354_v25 = vadd.f32 %v2351_v29, %v2344_v3  ;;  %v2367_v48 = vunpack.c.l.b16 %v2363_v19  ;;  %v2505_v29 = vld [vmem:[%s12451_s2 + $0x40] sm:$0xff] }
 0xb31   : > { %v2356_v4 = vmax.f32 %v2354_v25, 0.0 }
 0xb32   : > { %v2555_v27 = vpop.f32.mrf.mxu2  ;;  %v9413_v46 = vpop.f32.mrf.mxu0 }
 0xb33   : > { %v2362_v62 = vmul.f32 %v9410_v37, %v2356_v4 }
 0xb35   : > { %v2364_v34 = vpack.c.bf16 %v2362_v62, %v2362_v62  ;;  %v7438_v62 = vld [vmem:[%s12450_s1 + $0xf0] sm:$0xf] }
 0xb37   : > { %v2368_v49 = vunpack.c.l.b16 %v2364_v34  ;;  %v8001_v34 = vld [vmem:[%s12450_s1 + $0x100] sm:$0xf0] }
 0xb39   : > { %v9416_v53 = vpack.c.b16 %v2368_v49, %v2367_v48 }
 0xb3a   : > { %v2568_v21 = vpop.f32.mrf.mxu0 }
 0xb3b   : > { %2397 = vrot.lane.b32.xlu1 %v9416_v53, %s8283_s13  ;;  %2403 = vrot.lane.b32.xlu0 %v9416_v53, %s8282_s28  ;;  %v7439_v21 = vor.u32 %v8001_v34, %v7438_v62 }
 0xb43   : > { %2394 = vrot.lane.b32.xlu1 %v12463_v0, %s8276_s19 }
 0xb4b   : > { %2384 = vrot.lane.b32.xlu1 %v9416_v53, %s8284_s14 }
 0xb53   : > { %2375 = vrot.lane.b32.xlu1 %v9416_v53, %s8277_s20 }
 0xbad   : > { %v2404_v23 = vpop.permute.xlu0 %2403  ;;  %v2398_v56 = vpop.permute.xlu1 %2397 }
 0xbae   : > { %2450 = vrot.lane.b32.xlu2 %v2404_v23, %s8285_s15  ;;  %2446 = vrot.lane.b32.xlu1 %v2398_v56, %s8285_s15  ;;  %v2408_v52 = vsel %vm2407_vm11, %v2404_v23, %v9428_v54 }
 0xbaf   : > { %2452 = vrot.lane.b32.xlu0 %v2408_v52, %s8285_s15 }
 0xbb5   : > { %v9464_v40 = vpop.permute.xlu1 %2394 }
 0xbb6   : > { %2399 = vrot.lane.b32.xlu2 %v12463_v0, %s8283_s13 }
 0xbb7   : > { %2392 = vrot.lane.b32.xlu0 %v9416_v53, %s8276_s19 }
 0xbbd   : > { %v2385_v7 = vpop.permute.xlu1 %2384 }
 0xbbe   : > { %2386 = vrot.lane.b32.xlu2 %v9416_v53, %s8286_s24 }
 0xbbf   : > { %2388 = vrot.lane.b32.xlu0 %v12463_v0, %s8286_s24 }
 0xbc5   : > { %v2376_v43 = vpop.permute.xlu1 %2375 }
 0xbc6   : > { %2378 = vrot.lane.b32.xlu2 %v12463_v0, %s12459_s25  ;;  %v2377_v13 = vsel %vm372_vm7, %v8448_v45, %v2376_v43 }
 0xbc7   : > { %2380 = vrot.lane.b32.xlu0 %v9416_v53, %s12459_s25 }
 0xbce   : > { %2370 = vrot.lane.b32.xlu2 %v12463_v0, %s8279_s22 }
 0xbcf   : > { %2372 = vrot.lane.b32.xlu0 %v9416_v53, %s8279_s22 }
 0xc08   : > { %v2451_v58 = vpop.permute.xlu2 %2450 }
 0xc10   : > { %v9451_v60 = vpop.permute.xlu2 %2399 }
 0xc11   : > { %v2402_v61 = vsel %vm2401_vm12, %v2398_v56, %v9451_v60 }
 0xc12   : > { %2448 = vrot.lane.b32.xlu2 %v2402_v61, %s8285_s15  ;;  %v7447_v61 = vld [vmem:[%s12450_s1 + $0x118] sm:$0xf] }
 0xc18   : > { %v2387_v1 = vpop.permute.xlu2 %2386 }
 0xc1a   : > { %2438 = vrot.lane.b32.xlu2 %v2387_v1, %s8285_s15 }
 0xc21   : > { %v2453_v51 = vpop.permute.xlu0 %2452 }
 0xc22   : > { %v2462_v55 = vsel %vm2454_vm13, %v2451_v58, %v2453_v51 }
 0xc23   : > { %2497 = vmatpush.bf16.msrb.mxu3 %v2462_v55 }
 0xc26   : > { %7444 = vmatmul.msk.bf16.vlgmr.msrb.gmra.mxu3 %vm2472_vm14, %v7443_v59 }
 0xc27   : > { %2531 = vmatpush.bf16.msra.mxu3 %v9291_v17 }
 0xc29   : > { %v2393_v5 = vpop.permute.xlu0 %2392 }
 0xc2a   : > { %2442 = vrot.lane.b32.xlu0 %v2393_v5, %s8285_s15  ;;  %v2396_v6 = vsel %vm405_vm5, %v2393_v5, %v9464_v40 }
 0xc2b   : > { %2532 = vmatpush.bf16.msra.mxu3 %v9297_v30  ;;  %2444 = vrot.lane.b32.xlu1 %v2396_v6, %s8285_s15  ;;  %v9482_v30 = vpop.permute.xlu2 %2378 }
 0xc2c   : > { %12482 = vst [vmem:[#allocation3_spill] sm:$0xff] %v9482_v30 }
 0xc2f   : > { %2533 = vmatpush.bf16.msra.mxu3 %v9310_v63 }
 0xc31   : > { %v9475_v12 = vpop.permute.xlu0 %2388 }
 0xc32   : > { %v2391_v17 = vsel %vm2390_vm15, %v2387_v1, %v9475_v12  ;;  %v8002_v1 = vld [vmem:[%s12450_s1 + $0x128] sm:$0xf0] }
 0xc33   : > { %2534 = vmatpush.bf16.msra.mxu3 %v9321_v39  ;;  %2440 = vrot.lane.b32.xlu0 %v2391_v17, %s8285_s15 }
 0xc34   : > { %2436 = vrot.lane.b32.xlu1 %v2385_v7, %s8285_s15 }
 0xc37   : > { %2535 = vmatpush.bf16.msra.mxu3 %v9334_v42  ;;  %v9493_v42 = vpop.permute.xlu2 %2370 }
 0xc38   : > { %12483 = vst [vmem:[#allocation4_spill] sm:$0xff] %v9493_v42 }
 0xc39   : > { %v2381_v63 = vpop.permute.xlu0 %2380 }
 0xc3a   : > { %v2383_v39 = vsel %vm2382_vm0, %v9482_v30, %v2381_v63 }
 0xc3b   : > { %2536 = vmatpush.bf16.msra.mxu3 %v9348_v38  ;;  %2434 = vrot.lane.b32.xlu0 %v2381_v63, %s8285_s15 }
 0xc3c   : > { %2432 = vrot.lane.b32.xlu2 %v2383_v39, %s8285_s15  ;;  %2428 = vrot.lane.b32.xlu1 %v2377_v13, %s8285_s15 }
 0xc3f   : > { %2537 = vmatpush.bf16.msra.mxu3 %v9362_v50  ;;  %v2599_v50 = vld [vmem:[%s12451_s2 + $0x48] sm:$0xff] }
 0xc41   : > { %v2373_v38 = vpop.permute.xlu0 %2372 }
 0xc42   : > { %v2374_v14 = vsel %vm360_vm8, %v9493_v42, %v2373_v38 }
 0xc43   : > { %2538 = vmatpush.bf16.msra.mxu3 %v9375_v57  ;;  %2424 = vrot.lane.b32.xlu0 %v2374_v14, %s8285_s15 }
 0xc44   : > { %2426 = vrot.lane.b32.xlu1 %v2373_v38, %s8285_s15  ;;  %2430 = vrot.lane.b32.xlu2 %v2376_v43, %s8285_s15 }
 0xc46   : > { %2539 = vmatmul.bf16.vlgmr.msra.gmra.mxu3 %v9153_v10  ;;  %v2447_v10 = vpop.permute.xlu1 %2446 }
 0xc4b   : > { %2422 = vrot.lane.b32.xlu0 %v9416_v53, %s8285_s15 }
 0xc4c   : > { %2420 = vrot.lane.b32.xlu2 %v12463_v0, %s8285_s15  ;;  %2508 = vperm.xlu1 %8171, %v2504_v36  }
 0xc53   : > { %2603 = vperm.xlu0 %8168, %v2599_v50  }
 0xc54   : > { %2513 = vperm.xlu2 %8172, %v2505_v29   ;;  %2608 = vperm.xlu1 %8171, %v2600_v20  }
 0xc5b   : > { %8174 = vset.pattern.permute.xlu0 %v12461_v47 }
 0xc5c   : > { %2523 = vperm.xlu0 %8174, %v2505_v29   ;;  %8173 = vset.pattern.permute.xlu2 %v12461_v47 }
 0xc5d   : > { %2519 = vperm.xlu2 %8173, %v2504_v36   ;;  %8175 = vset.pattern.permute.xlu1 %v12461_v47 }
 0xc5e   : > { %2614 = vperm.xlu1 %8175, %v2599_v50  }
 0xc65   : > { %2618 = vperm.xlu2 %8173, %v2600_v20  }
 0xc66   : > { %8176 = vset.pattern.permute.xlu1 %v12463_v0 }
 0xc6c   : > { %v2449_v57 = vpop.permute.xlu2 %2448 }
 0xc6d   : > { %v2461_v15 = vsel %vm2454_vm13, %v2447_v10, %v2449_v57  ;;  %8177 = vset.pattern.permute.xlu2 %v12463_v0 }
 0xc6e   : > { %2476 = vmatpush.bf16.msrb.mxu1 %v2461_v15 }
 0xc74   : > { %v2439_v9 = vpop.permute.xlu2 %2438 }
 0xc96   : > { %v2433_v33 = vpop.permute.xlu2 %2432 }
 0xc9c   : > { %v2443_v8 = vpop.permute.xlu0 %2442 }
 0xc9d   : > { %v2445_v16 = vpop.permute.xlu1 %2444 }
 0xc9e   : > { %v2460_v26 = vsel %vm2454_vm13, %v2443_v8, %v2445_v16  ;;  %v2431_v44 = vpop.permute.xlu2 %2430 }
 0xc9f   : > { %2477 = vmatpush.bf16.msrb.mxu1 %v2460_v26 }
 0xca5   : > { %v2441_v31 = vpop.permute.xlu0 %2440 }
 0xca6   : > { %v2437_v18 = vpop.permute.xlu1 %2436  ;;  %v2459_v32 = vsel %vm2454_vm13, %v2439_v9, %v2441_v31  ;;  %v9525_v19 = vpop.permute.xlu2 %2420 }
 0xca7   : > { %2478 = vmatpush.bf16.msrb.mxu1 %v2459_v32 }
 0xca9   : > { %v2499_v3 = vpop.f32.mrf.mxu3 }
 0xcab   : > { %2479 = vmatpush.bf16.msrb.mxu1 %v2437_v18 }
 0xcad   : > { %v2435_v11 = vpop.permute.xlu0 %2434 }
 0xcae   : > { %v2429_v22 = vpop.permute.xlu1 %2428  ;;  %v2458_v35 = vsel %vm2454_vm13, %v2433_v33, %v2435_v11  ;;  %v2514_v55 = vpop.permute.xlu2 %2513 }
 0xcaf   : > { %2480 = vmatpush.bf16.msrb.mxu1 %v2458_v35  ;;  %v2457_v28 = vsel %vm2454_vm13, %v2429_v22, %v2431_v44 }
 0xcb1   : > { %v2501_v49 = vpop.f32.mrf.mxu3 }
 0xcb3   : > { %2481 = vmatpush.bf16.msrb.mxu1 %v2457_v28 }
 0xcb5   : > { %v2425_v25 = vpop.permute.xlu0 %2424 }
 0xcb6   : > { %v2427_v4 = vpop.permute.xlu1 %2426 }
 0xcb7   : > { %v2456_v27 = vsel %vm2454_vm13, %v2425_v25, %v2427_v4  ;;  %v2520_v43 = vpop.permute.xlu2 %2519 }
 0xcb8   : > { %2482 = vmatpush.bf16.msrb.mxu1 %v2456_v27 }
 0xcbd   : > { %v2423_v48 = vpop.permute.xlu0 %2422 }
 0xcbe   : > { %v2455_v53 = vsel %vm2454_vm13, %v9525_v19, %v2423_v48  ;;  %v2509_v51 = vpop.permute.xlu1 %2508 }
 0xcbf   : > { %2483 = vmatpush.bf16.msrb.mxu1 %v2455_v53  ;;  %v2619_v9 = vpop.permute.xlu2 %2618 }
 0xcc2   : > { %2484 = vmatmul.bf16.vlgmr.msrb.gmra.mxu1 %v7439_v21 }
 0xcc5   : > { %v2604_v7 = vpop.permute.xlu0 %2603 }
 0xcc6   : > { %v2609_v59 = vpop.permute.xlu1 %2608 }
 0xcc9   : > { %v2540_v23 = vpop.f32.mrf.mxu3 }
 0xcca   : > { %v2554_v56 = vadd.f32 %v9405_v41, %v2540_v23  ;;  %v7448_v41 = vor.u32 %v8002_v1, %v7447_v61  ;;  %v2750_v61 = vld [vmem:[%s12451_s2 + $0x58] sm:$0xff] }
 0xccc   : > { %v2567_v52 = vadd.f32 %v9413_v46, %v2554_v56 }
 0xcce   : > { %v2572_v58 = vpack.c.bf16 %v2567_v52, %v2567_v52  ;;  %v2524_v15 = vpop.permute.xlu0 %2523 }
 0xcd0   : > { %v2583_v24 = vsel %vm445_vm1, %v2572_v58, 0  ;;  %v2615_v39 = vpop.permute.xlu1 %2614  ;;  %vm3251_vm1 = vcmask 998400  }
 0xcd1   : > { %v2542_v2 = vpop.f32.mrf.mxu3  ;;  %2592 = vmatpush.bf16.msra.mxu1 %v2583_v24 }
 0xcd4   : > { %7449 = vmatmul.msk.bf16.vlgmr.msra.gmra.mxu1 %vm2578_vm2, %v7448_v41 }
 0xd3f   : > { %v2485_v46 = vpop.f32.mrf.mxu1 }
 0xd40   : > { %v2500_v6 = vadd.f32 %v2499_v3, %v2485_v46 }
 0xd42   : > { %v2516_v17 = vmul.f32 %v2509_v51, %v2500_v6 }
 0xd44   : > { %v2526_v38 = vadd.f32 %v2520_v43, %v2516_v17 }
 0xd47   : > { %v2487_v5 = vpop.f32.mrf.mxu1 }
 0xd48   : > { %v2502_v14 = vadd.f32 %v2501_v49, %v2487_v5 }
 0xd4a   : > { %v2517_v57 = vmul.f32 %v2514_v55, %v2502_v14 }
 0xd4c   : > { %v2527_v31 = vadd.f32 %v2524_v15, %v2517_v57  ;;  %v7452_v15 = vld [vmem:[%s12450_s1 + $0x140] sm:$0xf] }
 0xd51   : > { %v2594_v63 = vpop.f32.mrf.mxu1 }
 0xd52   : > { %v2611_v13 = vmul.f32 %v2604_v7, %v2594_v63  ;;  %v2751_v7 = vld [vmem:[%s12451_s2 + $0x60] sm:$0xff] }
 0xd54   : > { %v2621_v50 = vadd.f32 %v2615_v39, %v2611_v13 }
 0xd56   : > { %v2623_v10 = vadd.f32 %v2621_v50, %v2526_v38 }
 0xd58   : > { %v2625_v16 = vmax.f32 %v2623_v10, 0.0 }
 0xd59   : > { %v2596_v8 = vpop.f32.mrf.mxu1 }
 0xd5a   : > { %v2612_v26 = vmul.f32 %v2609_v59, %v2596_v8  ;;  %v9549_v32 = vmul.f32 %v9410_v37, %v2625_v16  ;;  %v8004_v8 = vld [vmem:[%s12450_s1 + $0x150] sm:$0xf0] }
 0xd5c   : > { %v2622_v18 = vadd.f32 %v2619_v9, %v2612_v26  ;;  %v2629_v22 = vpack.c.bf16 %v9549_v32, %v9549_v32  ;;  %v7453_v26 = vor.u32 %v8004_v8, %v7452_v15  ;;  %v8003_v9 = vld [vmem:[%s12450_s1 + $0x144] sm:$0xf] }
 0xd5e   : > { %v2624_v33 = vadd.f32 %v2622_v18, %v2527_v31  ;;  %v2633_v44 = vunpack.c.l.b16 %v2629_v22  ;;  %v7454_v31 = vld [vmem:[%s12450_s1 + $0x154] sm:$0xf0] }
 0xd5f   : > { %v7457_v22 = vor.u32 %v8003_v9, %v7454_v31 }
 0xd60   : > { %v2626_v11 = vmax.f32 %v2624_v33, 0.0 }
 0xd62   : > { %v9554_v35 = vmul.f32 %v9410_v37, %v2626_v11 }
 0xd64   : > { %v2630_v36 = vpack.c.bf16 %v9554_v35, %v9554_v35 }
 0xd66   : > { %v2634_v28 = vunpack.c.l.b16 %v2630_v36 }
 0xd68   : > { %v2635_v29 = vpack.c.b16 %v2634_v28, %v2633_v44 }
 0xd6a   : > { %2647 = vrot.lane.b32.xlu0 %v2635_v29, %s8286_s24  ;;  %2650 = vrot.lane.b32.xlu2 %v2635_v29, %s8276_s19 }
 0xd6b   : > { %2653 = vrot.lane.b32.xlu1 %v2635_v29, %s8283_s13 }
 0xd72   : > { %2639 = vrot.lane.b32.xlu0 %v2635_v29, %s8277_s20  ;;  %2642 = vrot.lane.b32.xlu2 %v2635_v29, %s12459_s25 }
 0xd73   : > { %2645 = vrot.lane.b32.xlu1 %v2635_v29, %s8284_s14 }
 0xd7a   : > { %2656 = vrot.lane.b32.xlu2 %v2635_v29, %s8282_s28 }
 0xd7b   : > { %2636 = vrot.lane.b32.xlu1 %v2635_v29, %s8279_s22 }
 0xdc4   : > { %v2651_v3 = vpop.permute.xlu2 %2650 }
 0xdc5   : > { %2690 = vrot.lane.b32.xlu2 %v2651_v3, %s8285_s15  ;;  %v2652_v48 = vsel %vm405_vm5, %v2651_v3, %v9464_v40 }
 0xdcc   : > { %v2643_v62 = vpop.permute.xlu2 %2642 }
 0xdcd   : > { %v2644_v53 = vsel %vm2382_vm0, %v9482_v30, %v2643_v62 }
 0xdd4   : > { %v2657_v52 = vpop.permute.xlu2 %2656 }
 0xdd5   : > { %v2658_v58 = vsel %vm2407_vm11, %v2657_v52, %v9428_v54 }
 0xddc   : > { %v2648_v20 = vpop.permute.xlu0 %2647 }
 0xddd   : > { %v2654_v25 = vpop.permute.xlu1 %2653  ;;  %v2649_v4 = vsel %vm2390_vm15, %v2648_v20, %v9475_v12 }
 0xdde   : > { %2694 = vrot.lane.b32.xlu0 %v2654_v25, %s8285_s15  ;;  %2688 = vrot.lane.b32.xlu2 %v2649_v4, %s8285_s15  ;;  %v2655_v27 = vsel %vm2401_vm12, %v2654_v25, %v9451_v60 }
 0xddf   : > { %2696 = vrot.lane.b32.xlu1 %v2655_v27, %s8285_s15 }
 0xde4   : > { %v2640_v23 = vpop.permute.xlu0 %2639 }
 0xde5   : > { %v2646_v34 = vpop.permute.xlu1 %2645  ;;  %v2641_v56 = vsel %vm372_vm7, %v8448_v45, %v2640_v23 }
 0xde6   : > { %2692 = vrot.lane.b32.xlu0 %v2652_v48, %s8285_s15  ;;  %2682 = vrot.lane.b32.xlu2 %v2643_v62, %s8285_s15 }
 0xde7   : > { %2686 = vrot.lane.b32.xlu1 %v2648_v20, %s8285_s15 }
 0xded   : > { %v2637_v49 = vpop.permute.xlu1 %2636 }
 0xdee   : > { %2684 = vrot.lane.b32.xlu0 %v2646_v34, %s8285_s15  ;;  %v2638_v21 = vsel %vm360_vm8, %v9493_v42, %v2637_v49 }
 0xdef   : > { %2680 = vrot.lane.b32.xlu1 %v2644_v53, %s8285_s15  ;;  %2672 = vrot.lane.b32.xlu2 %v2638_v21, %s8285_s15 }
 0xdf6   : > { %2676 = vrot.lane.b32.xlu0 %v2641_v56, %s8285_s15 }
 0xdf7   : > { %2678 = vrot.lane.b32.xlu1 %v2640_v23, %s8285_s15  ;;  %2698 = vrot.lane.b32.xlu2 %v2657_v52, %s8285_s15 }
 0xdfe   : > { %2674 = vrot.lane.b32.xlu0 %v2637_v49, %s8285_s15 }
 0xdff   : > { %2670 = vrot.lane.b32.xlu1 %v2635_v29, %s8285_s15  ;;  %2759 = vperm.xlu2 %8177, %v2751_v7  }
 0xe06   : > { %2700 = vrot.lane.b32.xlu0 %v2658_v58, %s8285_s15 }
 0xe07   : > { %2754 = vperm.xlu1 %8176, %v2750_v61  }
 0xe0e   : > { %2765 = vperm.xlu0 %8174, %v2750_v61  }
 0xe0f   : > { %8178 = vset.pattern.permute.xlu1 %v12461_v47 }
 0xe10   : > { %2769 = vperm.xlu1 %8178, %v2751_v7  }
 0xe16   : > { %8179 = vset.pattern.permute.xlu0 %v12463_v0 }
 0xe1f   : > { %v2691_v2 = vpop.permute.xlu2 %2690 }
 0xe38   : > { %v2689_v59 = vpop.permute.xlu2 %2688 }
 0xe40   : > { %v2683_v43 = vpop.permute.xlu2 %2682 }
 0xe49   : > { %v2673_v14 = vpop.permute.xlu2 %2672 }
 0xe50   : > { %v2695_v1 = vpop.permute.xlu0 %2694 }
 0xe51   : > { %v2697_v24 = vpop.permute.xlu1 %2696  ;;  %v2699_v18 = vpop.permute.xlu2 %2698 }
 0xe52   : > { %v2708_v41 = vsel %vm2454_vm13, %v2695_v1, %v2697_v24 }
 0xe53   : > { %2722 = vmatpush.bf16.msrb.mxu3 %v2708_v41 }
 0xe58   : > { %v2693_v51 = vpop.permute.xlu0 %2692 }
 0xe59   : > { %v2687_v46 = vpop.permute.xlu1 %2686  ;;  %v2707_v55 = vsel %vm2454_vm13, %v2691_v2, %v2693_v51  ;;  %v2760_v4 = vpop.permute.xlu2 %2759 }
 0xe5a   : > { %2723 = vmatpush.bf16.msrb.mxu3 %v2707_v55  ;;  %v2706_v5 = vsel %vm2454_vm13, %v2687_v46, %v2689_v59 }
 0xe5e   : > { %2724 = vmatpush.bf16.msrb.mxu3 %v2706_v5 }
 0xe60   : > { %v2685_v6 = vpop.permute.xlu0 %2684 }
 0xe61   : > { %v2681_v17 = vpop.permute.xlu1 %2680 }
 0xe62   : > { %2725 = vmatpush.bf16.msrb.mxu3 %v2685_v6  ;;  %v2705_v63 = vsel %vm2454_vm13, %v2681_v17, %v2683_v43 }
 0xe66   : > { %2726 = vmatpush.bf16.msrb.mxu3 %v2705_v63 }
 0xe68   : > { %v2677_v39 = vpop.permute.xlu0 %2676 }
 0xe69   : > { %v2679_v13 = vpop.permute.xlu1 %2678 }
 0xe6a   : > { %v2704_v38 = vsel %vm2454_vm13, %v2677_v39, %v2679_v13 }
 0xe6b   : > { %2727 = vmatpush.bf16.msrb.mxu3 %v2704_v38 }
 0xe70   : > { %v2675_v50 = vpop.permute.xlu0 %2674 }
 0xe71   : > { %v2703_v10 = vsel %vm2454_vm13, %v2673_v14, %v2675_v50  ;;  %v2671_v57 = vpop.permute.xlu1 %2670  ;;  %v2899_v14 = vld [vmem:[%s12451_s2 + $0x68] sm:$0xff] }
 0xe72   : > { %2728 = vmatpush.bf16.msrb.mxu3 %v2703_v10  ;;  %v2702_v16 = vsel %vm2454_vm13, %v9525_v19, %v2671_v57 }
 0xe76   : > { %2729 = vmatpush.bf16.msrb.mxu3 %v2702_v16 }
 0xe78   : > { %v2701_v33 = vpop.permute.xlu0 %2700 }
 0xe79   : > { %v2709_v11 = vsel %vm2454_vm13, %v2699_v18, %v2701_v33  ;;  %2730 = vmatmul.bf16.vlgmr.msrb.gmra.mxu3 %v7453_v26  ;;  %v2755_v28 = vpop.permute.xlu1 %2754 }
 0xe7a   : > { %2743 = vmatpush.bf16.msrb.mxu1 %v2709_v11 }
 0xe7d   : > { %7458 = vmatmul.msk.bf16.vlgmr.msrb.gmra.mxu1 %vm2472_vm14, %v7457_v22  ;;  %v2900_v22 = vld [vmem:[%s12451_s2 + $0x70] sm:$0xff] }
 0xe80   : > { %v2766_v20 = vpop.permute.xlu0 %2765 }
 0xe82   : > { %v2770_v49 = vpop.permute.xlu1 %2769 }
 0xefa   : > { %v2745_v36 = vpop.f32.mrf.mxu1 }
 0xefc   : > { %v2731_v44 = vpop.f32.mrf.mxu3 }
 0xefd   : > { %v2746_v29 = vadd.f32 %v2745_v36, %v2731_v44 }
 0xeff   : > { %v2762_v3 = vmul.f32 %v2755_v28, %v2746_v29 }
 0xf01   : > { %v2772_v25 = vadd.f32 %v2766_v20, %v2762_v3 }
 0xf02   : > { %v2747_v27 = vpop.f32.mrf.mxu1 }
 0xf03   : > { %v2774_v34 = vmax.f32 %v2772_v25, 0.0 }
 0xf04   : > { %v2733_v62 = vpop.f32.mrf.mxu3 }
 0xf05   : > { %v2748_v48 = vadd.f32 %v2747_v27, %v2733_v62  ;;  %v2776_v21 = vmul.f32 %v9410_v37, %v2774_v34  ;;  %v7461_v62 = vld [vmem:[%s12450_s1 + $0x168] sm:$0xf]  ;;  %v8006_v34 = vld [vmem:[%s12450_s1 + $0x178] sm:$0xf0] }
 0xf07   : > { %v2763_v53 = vmul.f32 %v2760_v4, %v2748_v48  ;;  %v2778_v52 = vpack.c.bf16 %v2776_v21, %v2776_v21  ;;  %v7463_v21 = vld [vmem:[%s12450_s1 + $0x17c] sm:$0xf0] }
 0xf09   : > { %v2773_v23 = vadd.f32 %v2770_v49, %v2763_v53  ;;  %v2782_v1 = vunpack.c.l.b16 %v2778_v52  ;;  %v7462_v49 = vor.u32 %v8006_v34, %v7461_v62  ;;  %v8005_v53 = vld [vmem:[%s12450_s1 + $0x16c] sm:$0xf] }
 0xf0b   : > { %v2775_v56 = vmax.f32 %v2773_v23, 0.0 }
 0xf0d   : > { %v2777_v58 = vmul.f32 %v9410_v37, %v2775_v56 }
 0xf0f   : > { %v2779_v61 = vpack.c.bf16 %v2777_v58, %v2777_v58  ;;  %v7466_v58 = vor.u32 %v8005_v53, %v7463_v21 }
 0xf11   : > { %v2783_v24 = vunpack.c.l.b16 %v2779_v61 }
 0xf13   : > { %v2784_v2 = vpack.c.b16 %v2783_v24, %v2782_v1 }
 0xf15   : > { %2796 = vrot.lane.b32.xlu1 %v2784_v2, %s8286_s24  ;;  %2799 = vrot.lane.b32.xlu0 %v2784_v2, %s8276_s19 }
 0xf16   : > { %2802 = vrot.lane.b32.xlu2 %v2784_v2, %s8283_s13 }
 0xf1d   : > { %2788 = vrot.lane.b32.xlu1 %v2784_v2, %s8277_s20  ;;  %2791 = vrot.lane.b32.xlu0 %v2784_v2, %s12459_s25 }
 0xf1e   : > { %2794 = vrot.lane.b32.xlu2 %v2784_v2, %s8284_s14 }
 0xf25   : > { %2805 = vrot.lane.b32.xlu0 %v2784_v2, %s8282_s28 }
 0xf26   : > { %2785 = vrot.lane.b32.xlu2 %v2784_v2, %s8279_s22 }
 0xf70   : > { %v2803_v41 = vpop.permute.xlu2 %2802 }
 0xf71   : > { %2843 = vrot.lane.b32.xlu1 %v2803_v41, %s8285_s15  ;;  %v2804_v51 = vsel %vm2401_vm12, %v2803_v41, %v9451_v60 }
 0xf72   : > { %2845 = vrot.lane.b32.xlu2 %v2804_v51, %s8285_s15 }
 0xf78   : > { %v2795_v7 = vpop.permute.xlu2 %2794 }
 0xf80   : > { %v2786_v39 = vpop.permute.xlu2 %2785 }
 0xf81   : > { %v2787_v13 = vsel %vm360_vm8, %v9493_v42, %v2786_v39 }
 0xf87   : > { %v2797_v46 = vpop.permute.xlu1 %2796  ;;  %v2800_v55 = vpop.permute.xlu0 %2799 }
 0xf88   : > { %2839 = vrot.lane.b32.xlu0 %v2800_v55, %s8285_s15  ;;  %2835 = vrot.lane.b32.xlu2 %v2797_v46, %s8285_s15  ;;  %v2801_v59 = vsel %vm405_vm5, %v2800_v55, %v9464_v40  ;;  %v2798_v6 = vsel %vm2390_vm15, %v2797_v46, %v9475_v12 }
 0xf89   : > { %2841 = vrot.lane.b32.xlu1 %v2801_v59, %s8285_s15 }
 0xf8f   : > { %v2792_v5 = vpop.permute.xlu0 %2791  ;;  %v2789_v43 = vpop.permute.xlu1 %2788 }
 0xf90   : > { %2837 = vrot.lane.b32.xlu0 %v2798_v6, %s8285_s15  ;;  %v2793_v17 = vsel %vm2382_vm0, %v9482_v30, %v2792_v5  ;;  %v2790_v63 = vsel %vm372_vm7, %v8448_v45, %v2789_v43 }
 0xf91   : > { %2829 = vrot.lane.b32.xlu2 %v2793_v17, %s8285_s15  ;;  %2833 = vrot.lane.b32.xlu1 %v2795_v7, %s8285_s15 }
 0xf97   : > { %v2806_v38 = vpop.permute.xlu0 %2805 }
 0xf98   : > { %2831 = vrot.lane.b32.xlu0 %v2792_v5, %s8285_s15  ;;  %v2807_v50 = vsel %vm2407_vm11, %v2806_v38, %v9428_v54 }
 0xf99   : > { %2827 = vrot.lane.b32.xlu2 %v2789_v43, %s8285_s15  ;;  %2825 = vrot.lane.b32.xlu1 %v2790_v63, %s8285_s15 }
 0xfa0   : > { %2821 = vrot.lane.b32.xlu0 %v2787_v13, %s8285_s15 }
 0xfa1   : > { %2819 = vrot.lane.b32.xlu2 %v2784_v2, %s8285_s15  ;;  %2823 = vrot.lane.b32.xlu1 %v2786_v39, %s8285_s15 }
 0xfa8   : > { %2847 = vrot.lane.b32.xlu0 %v2806_v38, %s8285_s15 }
 0xfa9   : > { %2903 = vperm.xlu2 %8177, %v2899_v14   ;;  %2849 = vrot.lane.b32.xlu1 %v2807_v50, %s8285_s15 }
 0xfb0   : > { %2908 = vperm.xlu0 %8179, %v2900_v22  }
 0xfb1   : > { %2914 = vperm.xlu1 %8178, %v2899_v14   ;;  %8180 = vset.pattern.permute.xlu2 %v12461_v47 }
 0xfb2   : > { %2918 = vperm.xlu2 %8180, %v2900_v22  }
 0xfb8   : > { %8183 = vset.pattern.permute.xlu0 %v12461_v47 }
 0xfb9   : > { %8181 = vset.pattern.permute.xlu1 %v12463_v0 }
 0xfba   : > { %8182 = vset.pattern.permute.xlu2 %v12463_v0 }
 0xfcc   : > { %v2846_v10 = vpop.permute.xlu2 %2845 }
 0xfe2   : > { %v2836_v8 = vpop.permute.xlu2 %2835 }
 0xfe3   : > { %v2844_v57 = vpop.permute.xlu1 %2843 }
 0xfe4   : > { %v2857_v15 = vsel %vm2454_vm13, %v2844_v57, %v2846_v10 }
 0xfe5   : > { %2871 = vmatpush.bf16.msra.mxu2 %v2857_v15 }
 0xfeb   : > { %v2830_v31 = vpop.permute.xlu2 %2829 }
 0xff3   : > { %v2828_v44 = vpop.permute.xlu2 %2827 }
 0xffa   : > { %v2840_v16 = vpop.permute.xlu0 %2839 }
 0xffb   : > { %v2842_v26 = vpop.permute.xlu1 %2841  ;;  %v2820_v27 = vpop.permute.xlu2 %2819 }
 0xffc   : > { %v2856_v9 = vsel %vm2454_vm13, %v2840_v16, %v2842_v26  ;;  %v2851_v48 = vsel %vm2454_vm13, %v9525_v19, %v2820_v27 }
 0xffd   : > { %2872 = vmatpush.bf16.msra.mxu2 %v2856_v9 }
0x1002   : > { %v2838_v18 = vpop.permute.xlu0 %2837 }
0x1003   : > { %v2834_v33 = vpop.permute.xlu1 %2833  ;;  %v2855_v11 = vsel %vm2454_vm13, %v2836_v8, %v2838_v18  ;;  %v2904_v2 = vpop.permute.xlu2 %2903 }
0x1004   : > { %2873 = vmatpush.bf16.msra.mxu2 %v2855_v11 }
0x1008   : > { %2874 = vmatpush.bf16.msra.mxu2 %v2834_v33 }
0x100a   : > { %v2832_v36 = vpop.permute.xlu0 %2831 }
0x100b   : > { %v2826_v28 = vpop.permute.xlu1 %2825  ;;  %v2854_v29 = vsel %vm2454_vm13, %v2830_v31, %v2832_v36 }
0x100c   : > { %2875 = vmatpush.bf16.msra.mxu2 %v2854_v29  ;;  %v2853_v3 = vsel %vm2454_vm13, %v2826_v28, %v2828_v44  ;;  %v2919_v17 = vpop.permute.xlu2 %2918 }
0x1010   : > { %2876 = vmatpush.bf16.msra.mxu2 %v2853_v3 }
0x1012   : > { %v2822_v20 = vpop.permute.xlu0 %2821 }
0x1013   : > { %v2824_v25 = vpop.permute.xlu1 %2823 }
0x1014   : > { %v2852_v4 = vsel %vm2454_vm13, %v2822_v20, %v2824_v25 }
0x1015   : > { %2877 = vmatpush.bf16.msra.mxu2 %v2852_v4 }
0x1019   : > { %2878 = vmatpush.bf16.msra.mxu2 %v2851_v48 }
0x101a   : > { %v2848_v23 = vpop.permute.xlu0 %2847 }
0x101b   : > { %v2850_v56 = vpop.permute.xlu1 %2849 }
0x101c   : > { %v2858_v52 = vsel %vm2454_vm13, %v2848_v23, %v2850_v56  ;;  %2879 = vmatmul.bf16.vlgmr.msra.gmra.mxu2 %v7462_v49 }
0x101d   : > { %2892 = vmatpush.bf16.msrb.mxu0 %v2858_v52 }
0x1020   : > { %7467 = vmatmul.msk.bf16.vlgmr.msrb.gmra.mxu0 %vm2472_vm14, %v7466_v58  ;;  %v8018_v58 = vld [vmem:[%s12454_s5 + $0x38] sm:$0xff] }
0x1021   : > { %3140 = vmatpush.bf16.msra.mxu0 %v8018_v58 }
0x1022   : > { %v2909_v59 = vpop.permute.xlu0 %2908 }
0x1023   : > { %v2915_v51 = vpop.permute.xlu1 %2914 }
0x109d   : > { %v2894_v61 = vpop.f32.mrf.mxu0 }
0x109f   : > { %v2880_v1 = vpop.f32.mrf.mxu2 }
0x10a0   : > { %v2895_v24 = vadd.f32 %v2894_v61, %v2880_v1  ;;  %v8007_v61 = vld [vmem:[%s12450_s1 + $0x194] sm:$0xf]  ;;  %v7472_v1 = vld [vmem:[%s12450_s1 + $0x1a4] sm:$0xf0] }
0x10a2   : > { %v2911_v41 = vmul.f32 %v2904_v2, %v2895_v24  ;;  %v8017_v24 = vld [vmem:[%s12454_s5 + $0x30] sm:$0xff] }
0x10a3   : > { %3141 = vmatpush.bf16.msra.mxu0 %v8017_v24 }
0x10a4   : > { %v2921_v46 = vadd.f32 %v2915_v51, %v2911_v41 }
0x10a5   : > { %v2896_v5 = vpop.f32.mrf.mxu0 }
0x10a6   : > { %v2923_v55 = vadd.f32 %v2921_v46, %v9549_v32  ;;  %v7475_v46 = vor.u32 %v8007_v61, %v7472_v1 }
0x10a7   : > { %v2882_v6 = vpop.f32.mrf.mxu2 }
0x10a8   : > { %v2897_v7 = vadd.f32 %v2896_v5, %v2882_v6  ;;  %v2925_v43 = vmax.f32 %v2923_v55, 0.0 }
0x10aa   : > { %v2912_v63 = vmul.f32 %v2909_v59, %v2897_v7  ;;  %v2927_v13 = vmul.f32 %v9410_v37, %v2925_v43  ;;  %v8016_v59 = vld [vmem:[%s12454_s5 + $0x28] sm:$0xff]  ;;  %v7470_v7 = vld [vmem:[%s12450_s1 + $0x190] sm:$0xf]  ;;  %v8015_v43 = vld [vmem:[%s12454_s5 + $0x20] sm:$0xff] }
0x10ab   : > { %3142 = vmatpush.bf16.msra.mxu0 %v8016_v59 }
0x10ac   : > { %v2922_v39 = vadd.f32 %v2919_v17, %v2912_v63  ;;  %v2929_v50 = vpack.c.bf16 %v2927_v13, %v2927_v13  ;;  %v8008_v17 = vld [vmem:[%s12450_s1 + $0x1a0] sm:$0xf0] }
0x10ad   : > { %v7471_v13 = vor.u32 %v8008_v17, %v7470_v7 }
0x10ae   : > { %v2924_v38 = vadd.f32 %v2922_v39, %v9554_v35  ;;  %v2933_v15 = vunpack.c.l.b16 %v2929_v50 }
0x10af   : > { %3143 = vmatpush.bf16.msra.mxu0 %v8015_v43 }
0x10b0   : > { %v2926_v14 = vmax.f32 %v2924_v38, 0.0  ;;  %v8009_v38 = vld [vmem:[%s12450_s1 + $0x1bc] sm:$0xf] }
0x10b2   : > { %v2928_v10 = vmul.f32 %v9410_v37, %v2926_v14  ;;  %v7480_v14 = vld [vmem:[%s12450_s1 + $0x1cc] sm:$0xf0] }
0x10b3   : > { %v7483_v50 = vor.u32 %v8009_v38, %v7480_v14 }
0x10b4   : > { %v2930_v57 = vpack.c.bf16 %v2928_v10, %v2928_v10  ;;  %v7478_v10 = vld [vmem:[%s12450_s1 + $0x1b8] sm:$0xf] }
0x10b6   : > { %v2934_v8 = vunpack.c.l.b16 %v2930_v57 }
0x10b8   : > { %v9702_v32 = vpack.c.b16 %v2934_v8, %v2933_v15  ;;  %v8014_v15 = vld [vmem:[%s12454_s5 + $0x18] sm:$0xff]  ;;  %v8013_v8 = vld [vmem:[%s12454_s5 + $0x10] sm:$0xff] }
0x10b9   : > { %3144 = vmatpush.bf16.msra.mxu0 %v8014_v15 }
0x10ba   : > { %2947 = vrot.lane.b32.xlu0 %v9702_v32, %s8286_s24  ;;  %2950 = vrot.lane.b32.xlu2 %v9702_v32, %s8276_s19  ;;  %s8295_s19 = smov 5  }
0x10bb   : > { %2953 = vrot.lane.b32.xlu1 %v9702_v32, %s8283_s13  ;;  %s8293_s13 = smov 7  }
0x10bd   : > { %3145 = vmatpush.bf16.msra.mxu0 %v8013_v8 }
0x10c2   : > { %2939 = vrot.lane.b32.xlu0 %v9702_v32, %s8277_s20  ;;  %2942 = vrot.lane.b32.xlu2 %v9702_v32, %s12459_s25  ;;  %s8294_s25 = smov 124  }
0x10c3   : > { %2945 = vrot.lane.b32.xlu1 %v9702_v32, %s8284_s14  ;;  %s8296_s14 = smov 123  }
0x10ca   : > { %2936 = vrot.lane.b32.xlu2 %v9702_v32, %s8279_s22 }
0x10cb   : > { %2956 = vrot.lane.b32.xlu1 %v9702_v32, %s8282_s28  ;;  %s8292_s28 = smov 121  }
0x1114   : > { %v2951_v37 = vpop.permute.xlu2 %2950 }
0x1115   : > { %3001 = vrot.lane.b32.xlu2 %v2951_v37, %s8285_s15  ;;  %v2952_v22 = vsel %vm405_vm5, %v2951_v37, %v9464_v40  ;;  %v8012_v37 = vld [vmem:[%s12454_s5 + $0x8] sm:$0xff]  ;;  %vm3288_vm5 = vcmask 932864  }
0x1116   : > { %3146 = vmatpush.bf16.msra.mxu0 %v8012_v37 }
0x111c   : > { %v2943_v35 = vpop.permute.xlu2 %2942 }
0x111d   : > { %2993 = vrot.lane.b32.xlu2 %v2943_v35, %s8285_s15  ;;  %v2944_v36 = vsel %vm2382_vm0, %v9482_v30, %v2943_v35  ;;  %v8011_v35 = vld [vmem:[%s12454_s5] sm:$0xff] }
0x111e   : > { %3147 = vmatpush.bf16.msra.mxu0 %v8011_v35 }
0x1122   : > { %3543 = vmatpush.bf16.msrb.mxu0 %v8018_v58 }
0x1126   : > { %3544 = vmatpush.bf16.msrb.mxu0 %v8017_v24 }
0x112a   : > { %3545 = vmatpush.bf16.msrb.mxu0 %v8016_v59 }
0x112c   : > { %v2948_v16 = vpop.permute.xlu0 %2947 }
0x112d   : > { %v2954_v26 = vpop.permute.xlu1 %2953  ;;  %2997 = vrot.lane.b32.xlu1 %v2948_v16, %s8285_s15  ;;  %v2949_v9 = vsel %vm2390_vm15, %v2948_v16, %v9475_v12  ;;  %v3161_v16 = vld [vmem:[%s12451_s2 + $0x88] sm:$0xff] }
0x112e   : > { %3005 = vrot.lane.b32.xlu0 %v2954_v26, %s8285_s15  ;;  %2999 = vrot.lane.b32.xlu2 %v2949_v9, %s8285_s15  ;;  %v2955_v31 = vsel %vm2401_vm12, %v2954_v26, %v9451_v60  ;;  %v2937_v60 = vpop.permute.xlu2 %2936  ;;  %v3162_v26 = vld [vmem:[%s12451_s2 + $0x90] sm:$0xff]  ;;  %v3160_v9 = vld [vmem:[%s12451_s2 + $0x80] sm:$0xff]  ;;  %vm4946_vm12 = vcmask 973824  }
0x112f   : > { %v2938_v40 = vsel %vm360_vm8, %v9493_v42, %v2937_v60  ;;  %3546 = vmatpush.bf16.msrb.mxu0 %v8015_v43 }
0x1133   : > { %3547 = vmatpush.bf16.msrb.mxu0 %v8014_v15 }
0x1134   : > { %v2940_v33 = vpop.permute.xlu0 %2939 }
0x1135   : > { %v2946_v18 = vpop.permute.xlu1 %2945  ;;  %3007 = vrot.lane.b32.xlu1 %v2955_v31, %s8285_s15  ;;  %v2941_v44 = vsel %vm372_vm7, %v8448_v45, %v2940_v33  ;;  %v3159_v31 = vld [vmem:[%s12451_s2 + $0x78] sm:$0xff] }
0x1136   : > { %2995 = vrot.lane.b32.xlu0 %v2946_v18, %s8285_s15 }
0x1137   : > { %3548 = vmatpush.bf16.msrb.mxu0 %v8013_v8 }
0x113b   : > { %3549 = vmatpush.bf16.msrb.mxu0 %v8012_v37 }
0x113d   : > { %v2957_v11 = vpop.permute.xlu1 %2956  ;;  %2989 = vrot.lane.b32.xlu1 %v2940_v33, %s8285_s15 }
0x113e   : > { %3003 = vrot.lane.b32.xlu0 %v2952_v22, %s8285_s15  ;;  %3009 = vrot.lane.b32.xlu2 %v2957_v11, %s8285_s15  ;;  %v2958_v28 = vsel %vm2407_vm11, %v2957_v11, %v9428_v54  ;;  %vm5217_vm11 = vcmask 39936  }
0x113f   : > { %3550 = vmatpush.bf16.msrb.mxu0 %v8011_v35 }
0x1145   : > { %2991 = vrot.lane.b32.xlu1 %v2944_v36, %s8285_s15 }
0x1146   : > { %2987 = vrot.lane.b32.xlu0 %v2941_v44, %s8285_s15  ;;  %2985 = vrot.lane.b32.xlu2 %v2937_v60, %s8285_s15 }
0x114d   : > { %2983 = vrot.lane.b32.xlu1 %v2938_v40, %s8285_s15 }
0x114e   : > { %3011 = vrot.lane.b32.xlu0 %v2958_v28, %s8285_s15  ;;  %3180 = vperm.xlu2 %8182, %v3162_v26  }
0x1155   : > { %3175 = vperm.xlu1 %8181, %v3161_v16  }
0x1156   : > { %2981 = vrot.lane.b32.xlu0 %v9702_v32, %s8285_s15  ;;  %3165 = vperm.xlu2 %8182, %v3159_v31  }
0x115d   : > { %8184 = vset.pattern.permute.xlu1 %v12461_v47 }
0x115e   : > { %3196 = vperm.xlu0 %8183, %v3161_v16   ;;  %3200 = vperm.xlu1 %8184, %v3162_v26  }
0x115f   : > { %8186 = vset.pattern.permute.xlu2 %v12461_v47 }
0x1160   : > { %3188 = vperm.xlu2 %8186, %v3159_v31  }
0x1166   : > { %3192 = vperm.xlu0 %8183, %v3160_v9   ;;  %8185 = vset.pattern.permute.xlu1 %v12463_v0 }
0x1167   : > { %3170 = vperm.xlu1 %8185, %v3160_v9  }
0x1168   : > { %8188 = vset.pattern.permute.xlu2 %v12463_v0 }
0x1169   : > { %3275 = vrot.lane.b32.xlu2 %v12463_v0, %s8291_s17 }
0x116e   : > { %8187 = vset.pattern.permute.xlu0 %v12463_v0 }
0x116f   : > { %v3002_v3 = vpop.permute.xlu2 %3001  ;;  %3245 = vrot.lane.b32.xlu1 %v12463_v0, %s8288_s12  ;;  %3260 = vrot.lane.b32.xlu0 %v12463_v0, %s8290_s16 }
0x1177   : > { %v2994_v62 = vpop.permute.xlu2 %2993  ;;  %3284 = vrot.lane.b32.xlu1 %v12463_v0, %s8289_s11 }
0x1188   : > { %v3000_v53 = vpop.permute.xlu2 %2999 }
0x1198   : > { %v3010_v56 = vpop.permute.xlu2 %3009 }
0x119f   : > { %v2998_v29 = vpop.permute.xlu1 %2997 }
0x11a0   : > { %v3006_v20 = vpop.permute.xlu0 %3005  ;;  %v3017_v54 = vsel %vm2454_vm13, %v2998_v29, %v3000_v53  ;;  %v2986_v5 = vpop.permute.xlu2 %2985 }
0x11a7   : > { %v3008_v25 = vpop.permute.xlu1 %3007 }
0x11a8   : > { %v2996_v4 = vpop.permute.xlu0 %2995  ;;  %v3019_v27 = vsel %vm2454_vm13, %v3006_v20, %v3008_v25 }
0x11a9   : > { %3036 = vmatpush.bf16.msra.mxu1 %v3019_v27  ;;  %v3181_v27 = vpop.permute.xlu2 %3180 }
0x11af   : > { %v2990_v34 = vpop.permute.xlu1 %2989 }
0x11b0   : > { %v3004_v48 = vpop.permute.xlu0 %3003 }
0x11b1   : > { %v3018_v49 = vsel %vm2454_vm13, %v3002_v3, %v3004_v48 }
0x11b2   : > { %3037 = vmatpush.bf16.msra.mxu1 %v3018_v49 }
0x11b6   : > { %3038 = vmatpush.bf16.msra.mxu1 %v3017_v54 }
0x11b7   : > { %v2992_v23 = vpop.permute.xlu1 %2991 }
0x11b8   : > { %v2988_v21 = vpop.permute.xlu0 %2987  ;;  %v3016_v52 = vsel %vm2454_vm13, %v2992_v23, %v2994_v62 }
0x11b9   : > { %v3015_v51 = vsel %vm2454_vm13, %v2988_v21, %v2990_v34  ;;  %v3166_v34 = vpop.permute.xlu2 %3165 }
0x11ba   : > { %3039 = vmatpush.bf16.msra.mxu1 %v2996_v4 }
0x11be   : > { %3040 = vmatpush.bf16.msra.mxu1 %v3016_v52  ;;  %v9839_v52 = vld [vmem:[%s12452_s3 + $0x4] ss:$0 sm:$0xff] }
0x11bf   : > { %v2984_v55 = vpop.permute.xlu1 %2983 }
0x11c0   : > { %v3012_v2 = vpop.permute.xlu0 %3011  ;;  %v3014_v6 = vsel %vm2454_vm13, %v2984_v55, %v2986_v5 }
0x11c1   : > { %v3020_v41 = vsel %vm2454_vm13, %v3010_v56, %v3012_v2  ;;  %v3189_v54 = vpop.permute.xlu2 %3188 }
0x11c2   : > { %3041 = vmatpush.bf16.msra.mxu1 %v3015_v51  ;;  %3062 = vmatpush.bf16.msra.mxu3 %v3020_v41 }
0x11c5   : > { %7484 = vmatmul.msk.bf16.vlgmr.msra.gmra.mxu3 %vm2472_vm14, %v7475_v46 }
0x11c6   : > { %3042 = vmatpush.bf16.msra.mxu1 %v3014_v6 }
0x11c7   : > { %v3176_v62 = vpop.permute.xlu1 %3175 }
0x11c8   : > { %v2982_v63 = vpop.permute.xlu0 %2981 }
0x11c9   : > { %v3013_v39 = vsel %vm2454_vm13, %v9525_v19, %v2982_v63  ;;  %v8010_v19 = vld [vmem:[%s12450_s1 + $0x1c8] sm:$0xf0]  ;;  %v9871_v35 = vpop.permute.xlu2 %3275  ;;  %vm5286_vm13 = vcmask 523264  }
0x11ca   : > { %3043 = vmatpush.bf16.msra.mxu1 %v3013_v39  ;;  %v7479_v57 = vor.u32 %v8010_v19, %v7478_v10 }
0x11cd   : > { %3044 = vmatmul.bf16.vlgmr.msra.gmra.mxu1 %v7471_v13 }
0x11d0   : > { %v3201_v48 = vpop.permute.xlu1 %3200  ;;  %v3197_v49 = vpop.permute.xlu0 %3196 }
0x11d5   : > { %7485 = vmatmul.msk.bf16.gmra.mxu3 %vm2472_vm14, %v7483_v50 }
0x11d8   : > { %v3193_v24 = vpop.permute.xlu0 %3192 }
0x11d9   : > { %v3171_v56 = vpop.permute.xlu1 %3170 }
0x11dd   : > { %3049 = vmatmul.bf16.gmra.mxu1 %v7479_v57 }
0x11e1   : > { %v9874_v26 = vpop.permute.xlu1 %3245  ;;  %v9876_v9 = vpop.permute.xlu0 %3260 }
0x11e2   : > { %12484 = vst [vmem:[#allocation5_spill] sm:$0xff] %v9874_v26 }
0x11e3   : > { %12485 = vst [vmem:[#allocation6_spill] sm:$0xff] %v9876_v9 }
0x11e9   : > { %v9878_v31 = vpop.permute.xlu1 %3284 }
0x1248   : > { %v3064_v18 = vpop.f32.mrf.mxu3 }
0x124a   : > { %v3045_v33 = vpop.f32.mrf.mxu1 }
0x124b   : > { %v3065_v36 = vadd.f32 %v3064_v18, %v3045_v33 }
0x1250   : > { %v3066_v11 = vpop.f32.mrf.mxu3 }
0x1252   : > { %v3047_v22 = vpop.f32.mrf.mxu1 }
0x1253   : > { %v3067_v60 = vadd.f32 %v3066_v11, %v3047_v22 }
0x1255   : > { %v3074_v44 = vpack.c.bf16 %v3067_v60, %v3065_v36 }
0x1257   : > { %3148 = vmatmul.bf16.vlgmr.msra.gmra.mxu0 %v3074_v44 }
0x1258   : > { %v3069_v40 = vpop.f32.mrf.mxu3 }
0x125a   : > { %v3050_v28 = vpop.f32.mrf.mxu1 }
0x125b   : > { %v3070_v3 = vadd.f32 %v3069_v40, %v3050_v28 }
0x1260   : > { %v3071_v29 = vpop.f32.mrf.mxu3 }
0x1262   : > { %v3052_v20 = vpop.f32.mrf.mxu1 }
0x1263   : > { %v3072_v25 = vadd.f32 %v3071_v29, %v3052_v20 }
0x1265   : > { %v3075_v4 = vpack.c.bf16 %v3072_v25, %v3070_v3 }
0x1267   : > { %3153 = vmatmul.bf16.gmra.mxu0 %v3075_v4 }
0x1277   : > { %3551 = vmatmul.bf16.vlgmr.msrb.gmra.mxu0 %v9702_v32 }
0x12d4   : > { %v3149_v53 = vpop.f32.mrf.mxu0 }
0x12d5   : > { %v3183_v21 = vmul.f32 %v3166_v34, %v3149_v53 }
0x12d7   : > { %v3203_v23 = vadd.f32 %v3189_v54, %v3183_v21 }
0x12d9   : > { %v3207_v58 = vmax.f32 %v3203_v23, 0.0 }
0x12db   : > { %v3215_v32 = vmul.f32 %v9839_v52, %v3207_v58 }
0x12dc   : > { %v3151_v61 = vpop.f32.mrf.mxu0 }
0x12dd   : > { %v3184_v1 = vmul.f32 %v3171_v56, %v3151_v61  ;;  %v3219_v51 = vpack.c.bf16 %v3215_v32, %v3215_v32  ;;  %v9945_v32 = vld [vmem:[%s12451_s2 + $0xb0] sm:$0xff] }
0x12df   : > { %v3204_v2 = vadd.f32 %v3193_v24, %v3184_v1  ;;  %v3227_v6 = vunpack.c.l.b16 %v3219_v51  ;;  %v9955_v51 = vld [vmem:[%s12451_s2 + $0xd0] sm:$0xff] }
0x12e1   : > { %v3208_v41 = vmax.f32 %v3204_v2, 0.0 }
0x12e3   : > { %v3216_v46 = vmul.f32 %v9839_v52, %v3208_v41 }
0x12e4   : > { %v3154_v55 = vpop.f32.mrf.mxu0 }
0x12e5   : > { %v3220_v59 = vpack.c.bf16 %v3216_v46, %v3216_v46  ;;  %v3185_v5 = vmul.f32 %v3176_v62, %v3154_v55 }
0x12e7   : > { %v3228_v7 = vunpack.c.l.b16 %v3220_v59  ;;  %v3205_v17 = vadd.f32 %v3197_v49, %v3185_v5 }
0x12e9   : > { %v9843_v43 = vpack.c.b16 %v3228_v7, %v3227_v6  ;;  %v3209_v63 = vmax.f32 %v3205_v17, 0.0 }
0x12eb   : > { %3233 = vrot.lane.b32.xlu1 %v9843_v43, %s8279_s22  ;;  %3239 = vrot.lane.b32.xlu2 %v9843_v43, %s8277_s20  ;;  %v3217_v38 = vmul.f32 %v9839_v52, %v3209_v63 }
0x12ec   : > { %3247 = vrot.lane.b32.xlu0 %v9843_v43, %s8288_s12  ;;  %v3156_v39 = vpop.f32.mrf.mxu0 }
0x12ed   : > { %v3186_v13 = vmul.f32 %v3181_v27, %v3156_v39  ;;  %v3221_v10 = vpack.c.bf16 %v3217_v38, %v3217_v38 }
0x12ef   : > { %v3206_v14 = vadd.f32 %v3201_v48, %v3186_v13  ;;  %v3229_v15 = vunpack.c.l.b16 %v3221_v10 }
0x12f1   : > { %v3210_v50 = vmax.f32 %v3206_v14, 0.0 }
0x12f3   : > { %v3218_v19 = vmul.f32 %v9839_v52, %v3210_v50  ;;  %3273 = vrot.lane.b32.xlu1 %v9843_v43, %s8291_s17  ;;  %3282 = vrot.lane.b32.xlu2 %v9843_v43, %s8289_s11 }
0x12f4   : > { %3267 = vrot.lane.b32.xlu0 %v9843_v43, %s8286_s24 }
0x12f5   : > { %v3222_v57 = vpack.c.bf16 %v3218_v19, %v3218_v19 }
0x12f7   : > { %v3230_v8 = vunpack.c.l.b16 %v3222_v57  ;;  %v3552_v57 = vpop.f32.mrf.mxu0 }
0x12f9   : > { %v3232_v37 = vpack.c.b16 %v3230_v8, %v3229_v15 }
0x12fb   : > { %3258 = vrot.lane.b32.xlu1 %v9843_v43, %s8290_s16  ;;  %3249 = vrot.lane.b32.xlu2 %v3232_v37, %s8288_s12 }
0x12fc   : > { %3254 = vrot.lane.b32.xlu0 %v9843_v43, %s8292_s28 }
0x1303   : > { %3241 = vrot.lane.b32.xlu1 %v3232_v37, %s8277_s20  ;;  %3269 = vrot.lane.b32.xlu2 %v3232_v37, %s8286_s24 }
0x1304   : > { %3235 = vrot.lane.b32.xlu0 %v3232_v37, %s8279_s22 }
0x130b   : > { %3262 = vrot.lane.b32.xlu1 %v3232_v37, %s8290_s16  ;;  %3286 = vrot.lane.b32.xlu2 %v3232_v37, %s8289_s11 }
0x130c   : > { %3277 = vrot.lane.b32.xlu0 %v3232_v37, %s8291_s17 }
0x1314   : > { %3256 = vrot.lane.b32.xlu0 %v3232_v37, %s8292_s28 }
0x1345   : > { %v3240_v16 = vpop.permute.xlu2 %3239 }
0x1346   : > { %3345 = vrot.lane.b32.xlu2 %v3240_v16, %s8293_s13  ;;  %v3243_v60 = vsel %vm372_vm7, %v8448_v45, %v3240_v16 }
0x134d   : > { %v9880_v18 = vpop.permute.xlu2 %3282 }
0x134e   : > { %v3289_v2 = vsel %vm3288_vm5, %v9880_v18, %v9878_v31 }
0x1355   : > { %v3250_v28 = vpop.permute.xlu2 %3249 }
0x1356   : > { %v3253_v3 = vsel %vm3251_vm1, %v9874_v26, %v3250_v28 }
0x135d   : > { %v3234_v33 = vpop.permute.xlu1 %3233  ;;  %v3270_v49 = vpop.permute.xlu2 %3269 }
0x135e   : > { %v3248_v11 = vpop.permute.xlu0 %3247  ;;  %3337 = vrot.lane.b32.xlu1 %v3234_v33, %s8293_s13  ;;  %v3237_v40 = vsel %vm360_vm8, %v9493_v42, %v3234_v33  ;;  %v3272_v21 = vsel %vm2390_vm15, %v3270_v49, %v9475_v12 }
0x135f   : > { %3353 = vrot.lane.b32.xlu0 %v3248_v11, %s8293_s13  ;;  %v3252_v22 = vsel %vm3251_vm1, %v9874_v26, %v3248_v11 }
0x1360   : > { %3351 = vrot.lane.b32.xlu2 %v3252_v22, %s8293_s13 }
0x1365   : > { %v3274_v36 = vpop.permute.xlu1 %3273  ;;  %v3287_v1 = vpop.permute.xlu2 %3286 }
0x1366   : > { %v3268_v44 = vpop.permute.xlu0 %3267  ;;  %3343 = vrot.lane.b32.xlu1 %v3243_v60, %s8293_s13  ;;  %v3280_v53 = vsel %vm3279_vm3, %v3274_v36, %v9871_v35  ;;  %v3290_v24 = vsel %vm3288_vm5, %v3287_v1, %v9878_v31  ;;  %v3554_v60 = vpop.f32.mrf.mxu0 }
0x1367   : > { %3335 = vrot.lane.b32.xlu0 %v3237_v40, %s8293_s13  ;;  %v3271_v54 = vsel %vm2390_vm15, %v3268_v44, %v9475_v12  ;;  %v8020_v40 = vld [vmem:[%s12450_s1 + $0x1f0] sm:$0xf0] }
0x1368   : > { %3357 = vrot.lane.b32.xlu2 %v3250_v28, %s8293_s13  ;;  %v3599_v28 = vld [vmem:[%s12451_s2 + $0xc8] sm:$0xff] }
0x136d   : > { %v3259_v29 = vpop.permute.xlu1 %3258 }
0x136e   : > { %v3255_v20 = vpop.permute.xlu0 %3254  ;;  %3355 = vrot.lane.b32.xlu1 %v3253_v3, %s8293_s13  ;;  %v3265_v61 = vsel %vm3264_vm4, %v3259_v29, %v9876_v9  ;;  %v3561_v3 = vpack.c.bf16 %v3554_v60, %v3552_v57  ;;  %v7540_v60 = vld [vmem:[%s12450_s1 + $0x210] sm:$0xf] }
0x1375   : > { %v3242_v25 = vpop.permute.xlu1 %3241 }
0x1376   : > { %v3236_v4 = vpop.permute.xlu0 %3235  ;;  %3333 = vrot.lane.b32.xlu1 %v3232_v37, %s8293_s13  ;;  %3349 = vrot.lane.b32.xlu0 %v3242_v25, %s8293_s13  ;;  %v3244_v62 = vsel %vm372_vm7, %v8448_v45, %v3242_v25 }
0x1377   : > { %3341 = vrot.lane.b32.xlu2 %v3236_v4, %s8293_s13  ;;  %v3238_v27 = vsel %vm360_vm8, %v9493_v42, %v3236_v4  ;;  %v3496_v4 = vld [vmem:[%s12451_s2 + $0xa8] sm:$0xff] }
0x137d   : > { %v3263_v23 = vpop.permute.xlu1 %3262 }
0x137e   : > { %3339 = vrot.lane.b32.xlu1 %v3238_v27, %s8293_s13  ;;  %3329 = vrot.lane.b32.xlu0 %v12463_v0, %s8293_s13  ;;  %v3278_v34 = vpop.permute.xlu0 %3277  ;;  %v3266_v56 = vsel %vm3264_vm4, %v3263_v23, %v9876_v9 }
0x137f   : > { %3347 = vrot.lane.b32.xlu2 %v3244_v62, %s8293_s13  ;;  %v3281_v48 = vsel %vm3279_vm3, %v3278_v34, %v9871_v35 }
0x1386   : > { %3385 = vrot.lane.b32.xlu1 %v3281_v48, %s8293_s13  ;;  %3383 = vrot.lane.b32.xlu0 %v3278_v34, %s8293_s13  ;;  %v3257_v58 = vpop.permute.xlu0 %3256 }
0x1387   : > { %3331 = vrot.lane.b32.xlu2 %v9843_v43, %s8293_s13 }
0x138e   : > { %3375 = vrot.lane.b32.xlu1 %v3270_v49, %s8293_s13  ;;  %3381 = vrot.lane.b32.xlu0 %v3280_v53, %s8293_s13  ;;  %v3494_v53 = vld [vmem:[%s12451_s2 + $0x98] sm:$0xff] }
0x138f   : > { %3379 = vrot.lane.b32.xlu2 %v3274_v36, %s8293_s13 }
0x1396   : > { %3373 = vrot.lane.b32.xlu1 %v3271_v54, %s8293_s13  ;;  %3371 = vrot.lane.b32.xlu0 %v3268_v44, %s8293_s13  ;;  %v7520_v44 = vld [vmem:[%s12450_s1 + $0x1e0] sm:$0xf]  ;;  %v3597_v54 = vld [vmem:[%s12451_s2 + $0xb8] sm:$0xff] }
0x1397   : > { %3377 = vrot.lane.b32.xlu2 %v3272_v21, %s8293_s13  ;;  %v7521_v25 = vor.u32 %v8020_v40, %v7520_v44  ;;  %v8024_v44 = vld [vmem:[%s12450_s1 + $0x220] sm:$0xf0] }
0x1398   : > { %v7541_v40 = vor.u32 %v8024_v44, %v7540_v60 }
0x139e   : > { %3363 = vrot.lane.b32.xlu1 %v3259_v29, %s8293_s13  ;;  %3369 = vrot.lane.b32.xlu0 %v3266_v56, %s8293_s13 }
0x139f   : > { %3367 = vrot.lane.b32.xlu2 %v3263_v23, %s8293_s13 }
0x13a0   : > { %v3346_v41 = vpop.permute.xlu2 %3345 }
0x13a6   : > { %3359 = vrot.lane.b32.xlu1 %v3255_v20, %s8293_s13  ;;  %3361 = vrot.lane.b32.xlu0 %v3257_v58, %s8293_s13  ;;  %v7532_v58 = vld [vmem:[%s12450_s1 + $0x208] sm:$0xf] }
0x13a7   : > { %3365 = vrot.lane.b32.xlu2 %v3265_v61, %s8293_s13  ;;  %v8023_v61 = vld [vmem:[%s12450_s1 + $0x218] sm:$0xf0] }
0x13ae   : > { %3387 = vrot.lane.b32.xlu1 %v9880_v18, %s8293_s13  ;;  %3393 = vrot.lane.b32.xlu0 %v3290_v24, %s8293_s13  ;;  %v7533_v24 = vor.u32 %v8023_v61, %v7532_v58 }
0x13af   : > { %3391 = vrot.lane.b32.xlu2 %v3287_v1, %s8293_s13  ;;  %v3598_v1 = vld [vmem:[%s12451_s2 + $0xc0] sm:$0xff] }
0x13b6   : > { %3515 = vperm.xlu1 %8185, %v9945_v32   ;;  %3510 = vperm.xlu0 %8187, %v3496_v4  }
0x13b7   : > { %3389 = vrot.lane.b32.xlu2 %v3289_v2, %s8293_s13 }
0x13ba   : > { %v3352_v46 = vpop.permute.xlu2 %3351 }
0x13be   : > { %3618 = vperm.xlu1 %8185, %v9955_v51   ;;  %3603 = vperm.xlu0 %8187, %v3597_v54  }
0x13bf   : > { %3613 = vperm.xlu2 %8188, %v3599_v28  }
0x13c2   : > { %v3358_v55 = vpop.permute.xlu2 %3357 }
0x13c6   : > { %8190 = vset.pattern.permute.xlu1 %v12461_v47  ;;  %8193 = vset.pattern.permute.xlu0 %v12461_v47 }
0x13c7   : > { %3634 = vperm.xlu1 %8190, %v3599_v28   ;;  %8189 = vset.pattern.permute.xlu2 %v12461_v47 }
0x13c8   : > { %3531 = vperm.xlu2 %8189, %v3496_v4   ;;  %3535 = vperm.xlu0 %8193, %v9945_v32   ;;  %v3495_v32 = vld [vmem:[%s12451_s2 + $0xa0] sm:$0xff] }
0x13cf   : > { %8191 = vset.pattern.permute.xlu1 %v12463_v0 }
0x13d0   : > { %v3338_v59 = vpop.permute.xlu1 %3337  ;;  %3500 = vperm.xlu1 %8191, %v3494_v53   ;;  %3638 = vperm.xlu2 %8189, %v9955_v51  }
0x13d1   : > { %v3342_v5 = vpop.permute.xlu2 %3341  ;;  %v3354_v6 = vpop.permute.xlu0 %3353  ;;  %3630 = vperm.xlu0 %8193, %v3598_v1  }
0x13d2   : > { %v3402_v13 = vsel %vm3395_vm6, %v3352_v46, %v3354_v6  ;;  %v8019_v6 = vld [vmem:[%s12450_s1 + $0x1e4] sm:$0xf] }
0x13d8   : > { %v3344_v7 = vpop.permute.xlu1 %3343  ;;  %3608 = vperm.xlu1 %8191, %v3598_v1   ;;  %8192 = vset.pattern.permute.xlu2 %v12463_v0 }
0x13d9   : > { %v3348_v17 = vpop.permute.xlu2 %3347  ;;  %v3336_v43 = vpop.permute.xlu0 %3335  ;;  %v3400_v19 = vsel %vm3395_vm6, %v3344_v7, %v3346_v41  ;;  %3505 = vperm.xlu2 %8192, %v3495_v32   ;;  %8197 = vset.pattern.permute.xlu0 %v12463_v0 }
0x13da   : > { %v3398_v18 = vsel %vm3395_vm6, %v3336_v43, %v3338_v59  ;;  %v7546_v43 = vld [vmem:[%s12450_s1 + $0x230] sm:$0xf] }
0x13e0   : > { %v3356_v63 = vpop.permute.xlu1 %3355  ;;  %8195 = vset.pattern.permute.xlu1 %v12461_v47 }
0x13e1   : > { %v3403_v39 = vsel %vm3395_vm6, %v3356_v63, %v3358_v55  ;;  %v3332_v38 = vpop.permute.xlu2 %3331  ;;  %v8025_v63 = vld [vmem:[%s12450_s1 + $0x240] sm:$0xf0]  ;;  %3527 = vperm.xlu1 %8195, %v3495_v32   ;;  %8194 = vset.pattern.permute.xlu2 %v12461_v47 }
0x13e2   : > { %3437 = vmatpush.bf16.msrb.mxu2 %v3403_v39  ;;  %3523 = vperm.xlu2 %8194, %v3494_v53  }
0x13e6   : > { %3438 = vmatpush.bf16.msrb.mxu2 %v3402_v13  ;;  %v7547_v13 = vor.u32 %v8025_v63, %v7546_v43 }
0x13e8   : > { %v3350_v14 = vpop.permute.xlu0 %3349  ;;  %v3334_v50 = vpop.permute.xlu1 %3333 }
0x13e9   : > { %v3401_v10 = vsel %vm3395_vm6, %v3348_v17, %v3350_v14  ;;  %v3380_v37 = vpop.permute.xlu2 %3379  ;;  %v7522_v17 = vld [vmem:[%s12450_s1 + $0x1f4] sm:$0xf0] }
0x13ea   : > { %3439 = vmatpush.bf16.msrb.mxu2 %v3401_v10  ;;  %v7525_v39 = vor.u32 %v8019_v6, %v7522_v17  ;;  %v7528_v10 = vld [vmem:[%s12450_s1 + $0x1e8] sm:$0xf]  ;;  %3626 = vperm.xlu2 %8194, %v3597_v54  }
0x13ee   : > { %3440 = vmatpush.bf16.msrb.mxu2 %v3400_v19  ;;  %v8021_v19 = vld [vmem:[%s12450_s1 + $0x1f8] sm:$0xf0] }
0x13f0   : > { %v9963_v15 = vpop.permute.xlu0 %3329  ;;  %v3340_v8 = vpop.permute.xlu1 %3339 }
0x13f1   : > { %v3399_v16 = vsel %vm3395_vm6, %v3340_v8, %v3342_v5  ;;  %v3397_v36 = vsel %vm3395_vm6, %v9963_v15, %v3334_v50  ;;  %v3378_v29 = vpop.permute.xlu2 %3377  ;;  %v3396_v20 = vsel %vm3395_vm6, %v9963_v15, %v3332_v38 }
0x13f2   : > { %3441 = vmatpush.bf16.msrb.mxu2 %v3399_v16  ;;  %v8022_v16 = vld [vmem:[%s12450_s1 + $0x20c] sm:$0xf]  ;;  %8196 = vset.pattern.permute.xlu2 %v12463_v0 }
0x13f6   : > { %3442 = vmatpush.bf16.msrb.mxu2 %v3398_v18  ;;  %v7534_v18 = vld [vmem:[%s12450_s1 + $0x21c] sm:$0xf0] }
0x13f8   : > { %v3384_v33 = vpop.permute.xlu0 %3383  ;;  %v3386_v11 = vpop.permute.xlu1 %3385 }
0x13f9   : > { %v3409_v22 = vsel %vm3395_vm6, %v3384_v33, %v3386_v11  ;;  %v3368_v48 = vpop.permute.xlu2 %3367  ;;  %v7550_v33 = vld [vmem:[%s12450_s1 + $0x258] sm:$0xf]  ;;  %v8026_v11 = vld [vmem:[%s12450_s1 + $0x268] sm:$0xf0] }
0x13fa   : > { %3443 = vmatpush.bf16.msrb.mxu2 %v3397_v36  ;;  %3456 = vmatpush.bf16.msrb.mxu3 %v3409_v22  ;;  %v7537_v22 = vor.u32 %v8022_v16, %v7534_v18  ;;  %v7551_v36 = vor.u32 %v8026_v11, %v7550_v33 }
0x13fe   : > { %3444 = vmatpush.bf16.msrb.mxu2 %v3396_v20 }
0x1400   : > { %v3382_v27 = vpop.permute.xlu0 %3381  ;;  %v3376_v62 = vpop.permute.xlu1 %3375 }
0x1401   : > { %3445 = vmatmul.bf16.vlgmr.msrb.gmra.mxu2 %v7521_v25  ;;  %v3408_v34 = vsel %vm3395_vm6, %v3380_v37, %v3382_v27  ;;  %v3407_v49 = vsel %vm3395_vm6, %v3376_v62, %v3378_v29  ;;  %v3366_v2 = vpop.permute.xlu2 %3365  ;;  %v7529_v37 = vor.u32 %v8021_v19, %v7528_v10 }
0x1402   : > { %3585 = vmatpush.bf16.msra.mxu2 %v3561_v3  ;;  %3457 = vmatpush.bf16.msrb.mxu3 %v3408_v34 }
0x1406   : > { %3458 = vmatpush.bf16.msrb.mxu3 %v3407_v49 }
0x1408   : > { %v3372_v21 = vpop.permute.xlu0 %3371  ;;  %v3374_v23 = vpop.permute.xlu1 %3373 }
0x1409   : > { %v3406_v56 = vsel %vm3395_vm6, %v3372_v21, %v3374_v23  ;;  %v3392_v7 = vpop.permute.xlu2 %3391 }
0x140a   : > { %3459 = vmatpush.bf16.msrb.mxu3 %v3406_v56 }
0x1410   : > { %v3370_v41 = vpop.permute.xlu0 %3369  ;;  %v3364_v46 = vpop.permute.xlu1 %3363 }
0x1411   : > { %3450 = vmatmul.bf16.gmra.mxu2 %v7533_v24  ;;  %v3405_v55 = vsel %vm3395_vm6, %v3368_v48, %v3370_v41  ;;  %v3404_v59 = vsel %vm3395_vm6, %v3364_v46, %v3366_v2  ;;  %v3390_v57 = vpop.permute.xlu2 %3389 }
0x1412   : > { %3460 = vmatpush.bf16.msrb.mxu3 %v3405_v55 }
0x1416   : > { %3461 = vmatpush.bf16.msrb.mxu3 %v3404_v59 }
0x1418   : > { %v3362_v51 = vpop.permute.xlu0 %3361  ;;  %v3360_v5 = vpop.permute.xlu1 %3359 }
0x1419   : > { %v3614_v28 = vpop.permute.xlu2 %3613 }
0x141a   : > { %3462 = vmatpush.bf16.msrb.mxu3 %v3362_v51 }
0x141e   : > { %3463 = vmatpush.bf16.msrb.mxu3 %v3360_v5 }
0x1420   : > { %v3394_v38 = vpop.permute.xlu0 %3393  ;;  %v3388_v50 = vpop.permute.xlu1 %3387 }
0x1421   : > { %v3411_v14 = vsel %vm3395_vm6, %v3392_v7, %v3394_v38  ;;  %3464 = vmatmul.bf16.vlgmr.msrb.gmra.mxu3 %v7525_v39  ;;  %7552 = vmatmul.msk.bf16.vlgmr.msra.gmra.mxu2 %vm2472_vm14, %v7547_v13  ;;  %v3410_v8 = vsel %vm3395_vm6, %v3388_v50, %v3390_v57 }
0x1422   : > { %3481 = vmatpush.bf16.msrb.mxu1 %v3411_v14  ;;  %v3532_v29 = vpop.permute.xlu2 %3531 }
0x1426   : > { %3482 = vmatpush.bf16.msrb.mxu1 %v3410_v8 }
0x1428   : > { %v10059_v3 = vpop.permute.xlu1 %3515  ;;  %v3511_v62 = vpop.permute.xlu0 %3510 }
0x1429   : > { %7542 = vmatmul.msk.bf16.vlgmr.msrb.gmra.mxu1 %vm3430_vm9, %v7529_v37 }
0x142a   : > { %v10061_v25 = vpop.permute.xlu2 %3638 }
0x1430   : > { %v3619_v4 = vpop.permute.xlu1 %3618  ;;  %v3604_v21 = vpop.permute.xlu0 %3603 }
0x1431   : > { %3469 = vmatmul.bf16.gmra.mxu3 %v7537_v22  ;;  %7553 = vmatmul.msk.bf16.gmra.mxu2 %vm2472_vm14, %v7551_v36 }
0x1433   : > { %v3506_v49 = vpop.permute.xlu2 %3505 }
0x1439   : > { %7543 = vmatmul.msk.bf16.gmra.mxu1 %vm3430_vm9, %v7541_v40  ;;  %v3635_v34 = vpop.permute.xlu1 %3634 }
0x143a   : > { %v3536_v46 = vpop.permute.xlu0 %3535 }
0x143c   : > { %v3524_v23 = vpop.permute.xlu2 %3523 }
0x1442   : > { %v3501_v54 = vpop.permute.xlu1 %3500 }
0x1443   : > { %v3631_v50 = vpop.permute.xlu0 %3630 }
0x1444   : > { %v3627_v55 = vpop.permute.xlu2 %3626 }
0x144a   : > { %v3609_v24 = vpop.permute.xlu1 %3608 }
0x1453   : > { %v3528_v13 = vpop.permute.xlu1 %3527 }
0x1484   : > { %v3446_v20 = vpop.f32.mrf.mxu2 }
0x148c   : > { %v3448_v27 = vpop.f32.mrf.mxu2 }
0x1494   : > { %v3451_v48 = vpop.f32.mrf.mxu2 }
0x149c   : > { %v3453_v53 = vpop.f32.mrf.mxu2 }
0x14a4   : > { %v3465_v56 = vpop.f32.mrf.mxu3  ;;  %v3587_v58 = vpop.f32.mrf.mxu2 }
0x14a5   : > { %v3466_v61 = vadd.f32 %v3465_v56, %v3446_v20  ;;  %v3621_v2 = vmul.f32 %v3604_v21, %v3587_v58 }
0x14a6   : > { %v3484_v1 = vpop.f32.mrf.mxu1 }
0x14a7   : > { %v3485_v41 = vadd.f32 %v3484_v1, %v3466_v61  ;;  %v3641_v51 = vadd.f32 %v3627_v55, %v3621_v2 }
0x14a9   : > { %v3518_v59 = vmul.f32 %v3501_v54, %v3485_v41 }
0x14ab   : > { %v3538_v5 = vadd.f32 %v3524_v23, %v3518_v59 }
0x14ac   : > { %v3467_v6 = vpop.f32.mrf.mxu3  ;;  %v3589_v32 = vpop.f32.mrf.mxu2 }
0x14ad   : > { %v3645_v7 = vadd.f32 %v3641_v51, %v3538_v5  ;;  %v3468_v17 = vadd.f32 %v3467_v6, %v3448_v27  ;;  %v3622_v63 = vmul.f32 %v3609_v24, %v3589_v32 }
0x14ae   : > { %v3486_v43 = vpop.f32.mrf.mxu1 }
0x14af   : > { %v3487_v39 = vadd.f32 %v3486_v43, %v3468_v17  ;;  %v3649_v38 = vmax.f32 %v3645_v7, 0.0  ;;  %v3642_v10 = vadd.f32 %v3631_v50, %v3622_v63 }
0x14b1   : > { %v3519_v14 = vmul.f32 %v3506_v49, %v3487_v39  ;;  %v10064_v37 = vmul.f32 %v9839_v52, %v3649_v38 }
0x14b3   : > { %v3539_v19 = vadd.f32 %v3528_v13, %v3519_v14  ;;  %v3657_v60 = vpack.c.bf16 %v10064_v37, %v10064_v37 }
0x14b4   : > { %v3470_v57 = vpop.f32.mrf.mxu3  ;;  %v3592_v8 = vpop.f32.mrf.mxu2 }
0x14b5   : > { %v3646_v16 = vadd.f32 %v3642_v10, %v3539_v19  ;;  %v3471_v18 = vadd.f32 %v3470_v57, %v3451_v48  ;;  %v3623_v22 = vmul.f32 %v3614_v28, %v3592_v8  ;;  %v3665_v23 = vunpack.c.l.b16 %v3657_v60 }
0x14b6   : > { %v3489_v33 = vpop.f32.mrf.mxu1 }
0x14b7   : > { %v3650_v11 = vmax.f32 %v3646_v16, 0.0  ;;  %v3490_v36 = vadd.f32 %v3489_v33, %v3471_v18  ;;  %v3643_v27 = vadd.f32 %v3635_v34, %v3623_v22 }
0x14b9   : > { %v10069_v44 = vmul.f32 %v9839_v52, %v3650_v11  ;;  %v3520_v40 = vmul.f32 %v3511_v62, %v3490_v36 }
0x14bb   : > { %v3658_v20 = vpack.c.bf16 %v10069_v44, %v10069_v44  ;;  %v3540_v49 = vadd.f32 %v3532_v29, %v3520_v40 }
0x14bc   : > { %v3472_v54 = vpop.f32.mrf.mxu3  ;;  %v3594_v21 = vpop.f32.mrf.mxu2 }
0x14bd   : > { %v3666_v48 = vunpack.c.l.b16 %v3658_v20  ;;  %v3647_v56 = vadd.f32 %v3643_v27, %v3540_v49  ;;  %v3473_v58 = vadd.f32 %v3472_v54, %v3453_v53  ;;  %v3624_v1 = vmul.f32 %v3619_v4, %v3594_v21 }
0x14be   : > { %v3491_v28 = vpop.f32.mrf.mxu1 }
0x14bf   : > { %v10073_v61 = vpack.c.b16 %v3666_v48, %v3665_v23  ;;  %v3492_v24 = vadd.f32 %v3491_v28, %v3473_v58  ;;  %v3651_v2 = vmax.f32 %v3647_v56, 0.0  ;;  %v3644_v29 = vadd.f32 %v10061_v25, %v3624_v1  ;;  %v3918_v23 = vld [vmem:[%s12451_s2 + $0xe8] sm:$0xff] }
0x14c1   : > { %v3521_v41 = vmul.f32 %v10059_v3, %v3492_v24  ;;  %3677 = vrot.lane.b32.xlu1 %v10073_v61, %s8277_s20  ;;  %3705 = vrot.lane.b32.xlu0 %v10073_v61, %s8291_s17  ;;  %v10084_v34 = vmul.f32 %v9839_v52, %v3651_v2 }
0x14c2   : > { %3683 = vrot.lane.b32.xlu2 %v10073_v61, %s8288_s12 }
0x14c3   : > { %v3541_v62 = vadd.f32 %v3536_v46, %v3521_v41  ;;  %v3659_v3 = vpack.c.bf16 %v10084_v34, %v10084_v34 }
0x14c5   : > { %v3648_v4 = vadd.f32 %v3644_v29, %v3541_v62  ;;  %v3667_v46 = vunpack.c.l.b16 %v3659_v3 }
0x14c7   : > { %v3652_v53 = vmax.f32 %v3648_v4, 0.0 }
0x14c9   : > { %v10089_v55 = vmul.f32 %v9839_v52, %v3652_v53  ;;  %3699 = vrot.lane.b32.xlu1 %v10073_v61, %s8286_s24 }
0x14ca   : > { %3671 = vrot.lane.b32.xlu2 %v10073_v61, %s8279_s22 }
0x14cb   : > { %v3660_v25 = vpack.c.bf16 %v10089_v55, %v10089_v55 }
0x14cd   : > { %v3668_v59 = vunpack.c.l.b16 %v3660_v25 }
0x14cf   : > { %v3670_v51 = vpack.c.b16 %v3668_v59, %v3667_v46 }
0x14d1   : > { %3693 = vrot.lane.b32.xlu1 %v10073_v61, %s8290_s16  ;;  %3673 = vrot.lane.b32.xlu0 %v3670_v51, %s8279_s22 }
0x14d2   : > { %3711 = vrot.lane.b32.xlu2 %v10073_v61, %s8289_s11 }
0x14d9   : > { %3689 = vrot.lane.b32.xlu1 %v10073_v61, %s8292_s28  ;;  %3695 = vrot.lane.b32.xlu0 %v3670_v51, %s8290_s16 }
0x14da   : > { %3679 = vrot.lane.b32.xlu2 %v3670_v51, %s8277_s20 }
0x14e1   : > { %3685 = vrot.lane.b32.xlu1 %v3670_v51, %s8288_s12  ;;  %3713 = vrot.lane.b32.xlu0 %v3670_v51, %s8289_s11 }
0x14e2   : > { %3701 = vrot.lane.b32.xlu2 %v3670_v51, %s8286_s24 }
0x14e9   : > { %3707 = vrot.lane.b32.xlu1 %v3670_v51, %s8291_s17 }
0x14ea   : > { %3691 = vrot.lane.b32.xlu2 %v3670_v51, %s8292_s28 }
0x14f1   : > { %3757 = vrot.lane.b32.xlu1 %v3670_v51, %s8293_s13 }
0x151c   : > { %v3684_v52 = vpop.permute.xlu2 %3683 }
0x151d   : > { %3777 = vrot.lane.b32.xlu0 %v3684_v52, %s8293_s13  ;;  %v3687_v38 = vsel %vm3251_vm1, %v9874_v26, %v3684_v52 }
0x1524   : > { %v3672_v5 = vpop.permute.xlu2 %3671 }
0x1525   : > { %v3675_v39 = vsel %vm360_vm8, %v9493_v42, %v3672_v5 }
0x152c   : > { %v3712_v6 = vpop.permute.xlu2 %3711 }
0x152d   : > { %v3715_v21 = vsel %vm3288_vm5, %v3712_v6, %v9878_v31 }
0x1533   : > { %v3678_v32 = vpop.permute.xlu1 %3677  ;;  %v3706_v7 = vpop.permute.xlu0 %3705 }
0x1534   : > { %3803 = vrot.lane.b32.xlu2 %v3706_v7, %s8293_s13  ;;  %v3709_v17 = vsel %vm3279_vm3, %v3706_v7, %v9871_v35  ;;  %v3680_v43 = vpop.permute.xlu2 %3679  ;;  %v3681_v57 = vsel %vm372_vm7, %v8448_v45, %v3678_v32 }
0x1535   : > { %3805 = vrot.lane.b32.xlu0 %v3709_v17, %s8293_s13  ;;  %v3682_v22 = vsel %vm372_vm7, %v8448_v45, %v3680_v43 }
0x153b   : > { %v3700_v63 = vpop.permute.xlu1 %3699 }
0x153c   : > { %3795 = vrot.lane.b32.xlu1 %v3700_v63, %s8293_s13  ;;  %3769 = vrot.lane.b32.xlu2 %v3678_v32, %s8293_s13  ;;  %v3702_v14 = vpop.permute.xlu2 %3701  ;;  %v3703_v19 = vsel %vm2390_vm15, %v3700_v63, %v9475_v12 }
0x153d   : > { %3759 = vrot.lane.b32.xlu0 %v3675_v39, %s8293_s13  ;;  %v3704_v40 = vsel %vm2390_vm15, %v3702_v14, %v9475_v12 }
0x1543   : > { %v3694_v13 = vpop.permute.xlu1 %3693  ;;  %v3674_v50 = vpop.permute.xlu0 %3673 }
0x1544   : > { %3775 = vrot.lane.b32.xlu2 %v3687_v38, %s8293_s13  ;;  %3761 = vrot.lane.b32.xlu1 %v3672_v5, %s8293_s13  ;;  %v3676_v36 = vsel %vm360_vm8, %v9493_v42, %v3674_v50  ;;  %v3697_v60 = vsel %vm3264_vm4, %v3694_v13, %v9876_v9  ;;  %v3692_v27 = vpop.permute.xlu2 %3691 }
0x1545   : > { %3799 = vrot.lane.b32.xlu0 %v3702_v14, %s8293_s13  ;;  %v3919_v14 = vld [vmem:[%s12451_s2 + $0xf0] sm:$0xff] }
0x154b   : > { %v3690_v10 = vpop.permute.xlu1 %3689  ;;  %v3696_v8 = vpop.permute.xlu0 %3695 }
0x154c   : > { %3797 = vrot.lane.b32.xlu2 %v3703_v19, %s8293_s13  ;;  %3767 = vrot.lane.b32.xlu1 %v3681_v57, %s8293_s13  ;;  %v3698_v20 = vsel %vm3264_vm4, %v3696_v8, %v9876_v9  ;;  %v3916_v57 = vld [vmem:[%s12451_s2 + $0xd8] sm:$0xff] }
0x154d   : > { %3765 = vrot.lane.b32.xlu0 %v3674_v50, %s8293_s13 }
0x1553   : > { %v3686_v16 = vpop.permute.xlu1 %3685  ;;  %v3714_v49 = vpop.permute.xlu0 %3713 }
0x1554   : > { %3791 = vrot.lane.b32.xlu2 %v3696_v8, %s8293_s13  ;;  %3781 = vrot.lane.b32.xlu1 %v3686_v16, %s8293_s13  ;;  %v3688_v18 = vsel %vm3251_vm1, %v9874_v26, %v3686_v16  ;;  %v3716_v54 = vsel %vm3288_vm5, %v3714_v49, %v9878_v31 }
0x1555   : > { %3779 = vrot.lane.b32.xlu0 %v3688_v18, %s8293_s13 }
0x155b   : > { %v3708_v33 = vpop.permute.xlu1 %3707 }
0x155c   : > { %3807 = vrot.lane.b32.xlu1 %v3708_v33, %s8293_s13  ;;  %v3710_v11 = vsel %vm3279_vm3, %v3708_v33, %v9871_v35 }
0x155d   : > { %3809 = vrot.lane.b32.xlu2 %v3710_v11, %s8293_s13  ;;  %3771 = vrot.lane.b32.xlu0 %v3682_v22, %s8293_s13 }
0x1563   : > { %v3758_v28 = vpop.permute.xlu1 %3757 }
0x1564   : > { %3773 = vrot.lane.b32.xlu1 %v3680_v43, %s8293_s13  ;;  %v3820_v11 = vsel %vm3395_vm6, %v9963_v15, %v3758_v28 }
0x1565   : > { %3763 = vrot.lane.b32.xlu2 %v3676_v36, %s8293_s13  ;;  %3789 = vrot.lane.b32.xlu0 %v3697_v60, %s8293_s13  ;;  %v7556_v36 = vld [vmem:[%s12450_s1 + $0x280] sm:$0xf]  ;;  %v8028_v60 = vld [vmem:[%s12450_s1 + $0x290] sm:$0xf0] }
0x156c   : > { %3801 = vrot.lane.b32.xlu1 %v3704_v40, %s8293_s13 }
0x156d   : > { %3787 = vrot.lane.b32.xlu2 %v3694_v13, %s8293_s13  ;;  %3793 = vrot.lane.b32.xlu0 %v3698_v20, %s8293_s13 }
0x1574   : > { %3755 = vrot.lane.b32.xlu1 %v10073_v61, %s8293_s13 }
0x1575   : > { %3815 = vrot.lane.b32.xlu0 %v3714_v49, %s8293_s13  ;;  %3785 = vrot.lane.b32.xlu2 %v3692_v27, %s8293_s13  ;;  %v7557_v49 = vor.u32 %v8028_v60, %v7556_v36 }
0x157c   : > { %3817 = vrot.lane.b32.xlu1 %v3716_v54, %s8293_s13  ;;  %v3917_v54 = vld [vmem:[%s12451_s2 + $0xe0] sm:$0xff] }
0x157d   : > { %3811 = vrot.lane.b32.xlu0 %v3712_v6, %s8293_s13  ;;  %3783 = vrot.lane.b32.xlu2 %v3690_v10, %s8293_s13 }
0x1584   : > { %3813 = vrot.lane.b32.xlu1 %v3715_v21, %s8293_s13 }
0x1585   : > { %3932 = vperm.xlu2 %8196, %v3918_v23   ;;  %3937 = vperm.xlu0 %8197, %v3919_v14  }
0x158c   : > { %3953 = vperm.xlu1 %8195, %v3918_v23  }
0x158d   : > { %8198 = vset.pattern.permute.xlu2 %v12461_v47  ;;  %8201 = vset.pattern.permute.xlu0 %v12461_v47 }
0x158e   : > { %v3804_v48 = vpop.permute.xlu2 %3803  ;;  %3957 = vperm.xlu2 %8198, %v3919_v14   ;;  %3945 = vperm.xlu0 %8201, %v3916_v57  }
0x158f   : > { %v3778_v56 = vpop.permute.xlu0 %3777 }
0x1594   : > { %8199 = vset.pattern.permute.xlu1 %v12463_v0 }
0x1595   : > { %3922 = vperm.xlu1 %8199, %v3916_v57  }
0x1596   : > { %v3770_v58 = vpop.permute.xlu2 %3769  ;;  %8200 = vset.pattern.permute.xlu2 %v12463_v0  ;;  %8203 = vset.pattern.permute.xlu0 %v12463_v0 }
0x1597   : > { %3927 = vperm.xlu2 %8200, %v3917_v54  }
0x159d   : > { %8202 = vset.pattern.permute.xlu1 %v12461_v47 }
0x159e   : > { %v3776_v1 = vpop.permute.xlu2 %3775  ;;  %3949 = vperm.xlu1 %8202, %v3917_v54  }
0x159f   : > { %v3825_v52 = vsel %vm3395_vm6, %v3776_v1, %v3778_v56  ;;  %v8027_v56 = vld [vmem:[%s12450_s1 + $0x284] sm:$0xf]  ;;  %v7564_v1 = vld [vmem:[%s12450_s1 + $0x288] sm:$0xf]  ;;  %8205 = vset.pattern.permute.xlu2 %v12461_v47 }
0x15a6   : > { %v3798_v29 = vpop.permute.xlu2 %3797  ;;  %8204 = vset.pattern.permute.xlu1 %v12463_v0 }
0x15a7   : > { %v3806_v61 = vpop.permute.xlu0 %3805 }
0x15a8   : > { %v3831_v7 = vsel %vm3395_vm6, %v3804_v48, %v3806_v61 }
0x15ae   : > { %v3796_v24 = vpop.permute.xlu1 %3795  ;;  %v3792_v3 = vpop.permute.xlu2 %3791 }
0x15af   : > { %v3760_v2 = vpop.permute.xlu0 %3759  ;;  %v3829_v18 = vsel %vm3395_vm6, %v3796_v24, %v3798_v29  ;;  %v8029_v24 = vld [vmem:[%s12450_s1 + $0x298] sm:$0xf0] }
0x15b6   : > { %v3762_v41 = vpop.permute.xlu1 %3761 }
0x15b7   : > { %v3800_v62 = vpop.permute.xlu0 %3799  ;;  %v3810_v51 = vpop.permute.xlu2 %3809  ;;  %v3821_v16 = vsel %vm3395_vm6, %v3760_v2, %v3762_v41 }
0x15be   : > { %v3768_v4 = vpop.permute.xlu1 %3767 }
0x15bf   : > { %v3766_v53 = vpop.permute.xlu0 %3765  ;;  %v3764_v17 = vpop.permute.xlu2 %3763  ;;  %v3823_v13 = vsel %vm3395_vm6, %v3768_v4, %v3770_v58  ;;  %v7558_v58 = vld [vmem:[%s12450_s1 + $0x294] sm:$0xf0]  ;;  %v7568_v4 = vld [vmem:[%s12450_s1 + $0x2a8] sm:$0xf] }
0x15c0   : > { %v3822_v10 = vsel %vm3395_vm6, %v3764_v17, %v3766_v53  ;;  %v7561_v61 = vor.u32 %v8027_v56, %v7558_v58  ;;  %v8031_v53 = vld [vmem:[%s12450_s1 + $0x2b8] sm:$0xf0] }
0x15c6   : > { %v3782_v25 = vpop.permute.xlu1 %3781 }
0x15c7   : > { %v3780_v46 = vpop.permute.xlu0 %3779  ;;  %v3788_v50 = vpop.permute.xlu2 %3787 }
0x15c8   : > { %v3826_v59 = vsel %vm3395_vm6, %v3780_v46, %v3782_v25  ;;  %v8030_v25 = vld [vmem:[%s12450_s1 + $0x2ac] sm:$0xf]  ;;  %v7570_v46 = vld [vmem:[%s12450_s1 + $0x2bc] sm:$0xf0] }
0x15c9   : > { %3859 = vmatpush.bf16.msra.mxu3 %v3826_v59  ;;  %v7573_v59 = vor.u32 %v8030_v25, %v7570_v46 }
0x15cd   : > { %3860 = vmatpush.bf16.msra.mxu3 %v3825_v52  ;;  %v8032_v52 = vld [vmem:[%s12450_s1 + $0x2c0] sm:$0xf0] }
0x15ce   : > { %v3808_v5 = vpop.permute.xlu1 %3807 }
0x15cf   : > { %v3832_v6 = vsel %vm3395_vm6, %v3808_v5, %v3810_v51  ;;  %v3772_v32 = vpop.permute.xlu0 %3771  ;;  %v3786_v40 = vpop.permute.xlu2 %3785  ;;  %v7576_v51 = vld [vmem:[%s12450_s1 + $0x2b0] sm:$0xf] }
0x15d0   : > { %3878 = vmatpush.bf16.msra.mxu1 %v3832_v6  ;;  %v7577_v5 = vor.u32 %v8032_v52, %v7576_v51 }
0x15d4   : > { %3879 = vmatpush.bf16.msra.mxu1 %v3831_v7 }
0x15d6   : > { %v3774_v43 = vpop.permute.xlu1 %3773 }
0x15d7   : > { %v3824_v63 = vsel %vm3395_vm6, %v3772_v32, %v3774_v43  ;;  %v3790_v39 = vpop.permute.xlu0 %3789  ;;  %v3784_v28 = vpop.permute.xlu2 %3783 }
0x15d8   : > { %3861 = vmatpush.bf16.msra.mxu3 %v3824_v63  ;;  %v3827_v27 = vsel %vm3395_vm6, %v3788_v50, %v3790_v39 }
0x15dc   : > { %3862 = vmatpush.bf16.msra.mxu3 %v3823_v13 }
0x15de   : > { %v3802_v38 = vpop.permute.xlu1 %3801 }
0x15df   : > { %v3830_v19 = vsel %vm3395_vm6, %v3800_v62, %v3802_v38  ;;  %v3794_v8 = vpop.permute.xlu0 %3793  ;;  %v7565_v62 = vor.u32 %v8029_v24, %v7564_v1  ;;  %v3933_v6 = vpop.permute.xlu2 %3932 }
0x15e0   : > { %3863 = vmatpush.bf16.msra.mxu3 %v3822_v10  ;;  %3880 = vmatpush.bf16.msra.mxu1 %v3830_v19  ;;  %v3828_v22 = vsel %vm3395_vm6, %v3792_v3, %v3794_v8  ;;  %v7569_v3 = vor.u32 %v8031_v53, %v7568_v4 }
0x15e4   : > { %3864 = vmatpush.bf16.msra.mxu3 %v3821_v16  ;;  %3881 = vmatpush.bf16.msra.mxu1 %v3829_v18 }
0x15e6   : > { %v3756_v33 = vpop.permute.xlu1 %3755 }
0x15e7   : > { %v3819_v20 = vsel %vm3395_vm6, %v9963_v15, %v3756_v33  ;;  %v3816_v21 = vpop.permute.xlu0 %3815 }
0x15e8   : > { %3865 = vmatpush.bf16.msra.mxu3 %v3820_v11  ;;  %3882 = vmatpush.bf16.msra.mxu1 %v3828_v22  ;;  %v3958_v39 = vpop.permute.xlu2 %3957 }
0x15ec   : > { %3866 = vmatpush.bf16.msra.mxu3 %v3819_v20  ;;  %3883 = vmatpush.bf16.msra.mxu1 %v3827_v27  ;;  %v10251_v27 = vld [vmem:[%s12452_s3 + $0x4] ss:$0 sm:$0xff] }
0x15ee   : > { %v3818_v23 = vpop.permute.xlu1 %3817 }
0x15ef   : > { %v3834_v48 = vsel %vm3395_vm6, %v3816_v21, %v3818_v23  ;;  %3867 = vmatmul.bf16.vlgmr.msra.gmra.mxu3 %v7557_v49  ;;  %v3812_v2 = vpop.permute.xlu0 %3811 }
0x15f0   : > { %3884 = vmatpush.bf16.msra.mxu1 %v3786_v40  ;;  %3903 = vmatpush.bf16.msra.mxu0 %v3834_v48 }
0x15f1   : > { %v3928_v33 = vpop.permute.xlu2 %3927 }
0x15f4   : > { %3885 = vmatpush.bf16.msra.mxu1 %v3784_v28 }
0x15f6   : > { %v3814_v41 = vpop.permute.xlu1 %3813 }
0x15f7   : > { %3886 = vmatmul.bf16.vlgmr.msra.gmra.mxu1 %v7561_v61  ;;  %v3833_v29 = vsel %vm3395_vm6, %v3812_v2, %v3814_v41  ;;  %v3938_v7 = vpop.permute.xlu0 %3937 }
0x15f8   : > { %3904 = vmatpush.bf16.msra.mxu0 %v3833_v29 }
0x15fb   : > { %7578 = vmatmul.msk.bf16.vlgmr.msra.gmra.mxu0 %vm3430_vm9, %v7565_v62 }
0x15fe   : > { %v3954_v32 = vpop.permute.xlu1 %3953 }
0x15ff   : > { %3872 = vmatmul.bf16.gmra.mxu3 %v7569_v3 }
0x1600   : > { %v3946_v10 = vpop.permute.xlu0 %3945 }
0x1607   : > { %3891 = vmatmul.bf16.gmra.mxu1 %v7573_v59  ;;  %v3923_v38 = vpop.permute.xlu1 %3922 }
0x160b   : > { %7579 = vmatmul.msk.bf16.gmra.mxu0 %vm3430_vm9, %v7577_v5 }
0x1610   : > { %v3950_v36 = vpop.permute.xlu1 %3949 }
0x1672   : > { %v3868_v17 = vpop.f32.mrf.mxu3 }
0x1674   : > { %v3887_v43 = vpop.f32.mrf.mxu1 }
0x1675   : > { %v3888_v63 = vadd.f32 %v3887_v43, %v3868_v17 }
0x1678   : > { %v3906_v13 = vpop.f32.mrf.mxu0 }
0x1679   : > { %v3907_v14 = vadd.f32 %v3906_v13, %v3888_v63 }
0x167a   : > { %v3870_v50 = vpop.f32.mrf.mxu3 }
0x167b   : > { %v3940_v19 = vmul.f32 %v3923_v38, %v3907_v14 }
0x167c   : > { %v3889_v57 = vpop.f32.mrf.mxu1 }
0x167d   : > { %v3960_v8 = vadd.f32 %v3946_v10, %v3940_v19  ;;  %v3890_v16 = vadd.f32 %v3889_v57, %v3870_v50 }
0x167f   : > { %v3964_v11 = vmax.f32 %v3960_v8, 0.0 }
0x1680   : > { %v3908_v18 = vpop.f32.mrf.mxu0 }
0x1681   : > { %v3909_v22 = vadd.f32 %v3908_v18, %v3890_v16  ;;  %v3968_v49 = vmul.f32 %v10251_v27, %v3964_v11 }
0x1682   : > { %v3873_v60 = vpop.f32.mrf.mxu3 }
0x1683   : > { %v3941_v40 = vmul.f32 %v3928_v33, %v3909_v22  ;;  %v3972_v56 = vpack.c.bf16 %v3968_v49, %v3968_v49 }
0x1684   : > { %v3892_v20 = vpop.f32.mrf.mxu1 }
0x1685   : > { %v3961_v54 = vadd.f32 %v3950_v36, %v3941_v40  ;;  %v3893_v21 = vadd.f32 %v3892_v20, %v3873_v60  ;;  %v3980_v41 = vunpack.c.l.b16 %v3972_v56 }
0x1687   : > { %v3965_v23 = vmax.f32 %v3961_v54, 0.0 }
0x1688   : > { %v3911_v48 = vpop.f32.mrf.mxu0 }
0x1689   : > { %v3969_v58 = vmul.f32 %v10251_v27, %v3965_v23  ;;  %v3912_v28 = vadd.f32 %v3911_v48, %v3893_v21 }
0x168a   : > { %v3875_v61 = vpop.f32.mrf.mxu3 }
0x168b   : > { %v3973_v1 = vpack.c.bf16 %v3969_v58, %v3969_v58  ;;  %v3942_v24 = vmul.f32 %v3933_v6, %v3912_v28 }
0x168c   : > { %v3894_v2 = vpop.f32.mrf.mxu1 }
0x168d   : > { %v3981_v29 = vunpack.c.l.b16 %v3973_v1  ;;  %v3962_v62 = vadd.f32 %v3954_v32, %v3942_v24  ;;  %v3895_v4 = vadd.f32 %v3894_v2, %v3875_v61 }
0x168f   : > { %v10255_v53 = vpack.c.b16 %v3981_v29, %v3980_v41  ;;  %v3966_v25 = vmax.f32 %v3962_v62, 0.0 }
0x1690   : > { %v3913_v3 = vpop.f32.mrf.mxu0 }
0x1691   : > { %v3914_v46 = vadd.f32 %v3913_v3, %v3895_v4  ;;  %4014 = vrot.lane.b32.xlu1 %v10255_v53, %s8286_s24  ;;  %4020 = vrot.lane.b32.xlu0 %v10255_v53, %s8291_s17  ;;  %v3970_v51 = vmul.f32 %v10251_v27, %v3966_v25 }
0x1692   : > { %3998 = vrot.lane.b32.xlu2 %v10255_v53, %s8288_s12 }
0x1693   : > { %v3943_v59 = vmul.f32 %v3938_v7, %v3914_v46  ;;  %v3974_v6 = vpack.c.bf16 %v3970_v51, %v3970_v51 }
0x1695   : > { %v3963_v52 = vadd.f32 %v3958_v39, %v3943_v59  ;;  %v3982_v43 = vunpack.c.l.b16 %v3974_v6 }
0x1697   : > { %v3967_v5 = vmax.f32 %v3963_v52, 0.0 }
0x1699   : > { %v3971_v32 = vmul.f32 %v10251_v27, %v3967_v5  ;;  %3986 = vrot.lane.b32.xlu1 %v10255_v53, %s8279_s22  ;;  %3992 = vrot.lane.b32.xlu0 %v10255_v53, %s8277_s20 }
0x169a   : > { %4008 = vrot.lane.b32.xlu2 %v10255_v53, %s8290_s16 }
0x169b   : > { %v3975_v17 = vpack.c.bf16 %v3971_v32, %v3971_v32 }
0x169d   : > { %v3983_v63 = vunpack.c.l.b16 %v3975_v17 }
0x169f   : > { %v3985_v7 = vpack.c.b16 %v3983_v63, %v3982_v43 }
0x16a1   : > { %4004 = vrot.lane.b32.xlu1 %v10255_v53, %s8292_s28  ;;  %4026 = vrot.lane.b32.xlu0 %v10255_v53, %s8289_s11 }
0x16a2   : > { %4000 = vrot.lane.b32.xlu2 %v3985_v7, %s8288_s12 }
0x16a9   : > { %4022 = vrot.lane.b32.xlu1 %v3985_v7, %s8291_s17  ;;  %4010 = vrot.lane.b32.xlu0 %v3985_v7, %s8290_s16 }
0x16aa   : > { %4016 = vrot.lane.b32.xlu2 %v3985_v7, %s8286_s24 }
0x16b1   : > { %3994 = vrot.lane.b32.xlu1 %v3985_v7, %s8277_s20  ;;  %4006 = vrot.lane.b32.xlu0 %v3985_v7, %s8292_s28 }
0x16b2   : > { %3988 = vrot.lane.b32.xlu2 %v3985_v7, %s8279_s22 }
0x16ba   : > { %4028 = vrot.lane.b32.xlu2 %v3985_v7, %s8289_s11 }
0x16ec   : > { %v3999_v39 = vpop.permute.xlu2 %3998 }
0x16ed   : > { %4092 = vrot.lane.b32.xlu0 %v3999_v39, %s8293_s13  ;;  %v4002_v16 = vsel %vm3251_vm1, %v9874_v26, %v3999_v39 }
0x16f4   : > { %v4009_v14 = vpop.permute.xlu2 %4008 }
0x16f5   : > { %v4012_v28 = vsel %vm3264_vm4, %v4009_v14, %v9876_v9 }
0x16fc   : > { %v4001_v57 = vpop.permute.xlu2 %4000 }
0x16fd   : > { %v4003_v40 = vsel %vm3251_vm1, %v9874_v26, %v4001_v57 }
0x1703   : > { %v4015_v13 = vpop.permute.xlu1 %4014  ;;  %v4021_v38 = vpop.permute.xlu0 %4020 }
0x1704   : > { %4118 = vrot.lane.b32.xlu1 %v4021_v38, %s8293_s13  ;;  %4110 = vrot.lane.b32.xlu0 %v4015_v13, %s8293_s13  ;;  %v4018_v18 = vsel %vm2390_vm15, %v4015_v13, %v9475_v12  ;;  %v4017_v33 = vpop.permute.xlu2 %4016  ;;  %v4024_v22 = vsel %vm3279_vm3, %v4021_v38, %v9871_v35 }
0x1705   : > { %v4019_v56 = vsel %vm2390_vm15, %v4017_v33, %v9475_v12 }
0x170b   : > { %v3987_v50 = vpop.permute.xlu1 %3986  ;;  %v3993_v10 = vpop.permute.xlu0 %3992 }
0x170c   : > { %4084 = vrot.lane.b32.xlu2 %v3993_v10, %s8293_s13  ;;  %v3996_v19 = vsel %vm372_vm7, %v8448_v45, %v3993_v10  ;;  %v3989_v60 = vpop.permute.xlu2 %3988  ;;  %v3990_v20 = vsel %vm360_vm8, %v9493_v42, %v3987_v50 }
0x170d   : > { %4082 = vrot.lane.b32.xlu1 %v3996_v19, %s8293_s13  ;;  %v3991_v48 = vsel %vm360_vm8, %v9493_v42, %v3989_v60 }
0x1713   : > { %v4005_v8 = vpop.permute.xlu1 %4004  ;;  %v4027_v49 = vpop.permute.xlu0 %4026 }
0x1714   : > { %4090 = vrot.lane.b32.xlu2 %v4002_v16, %s8293_s13  ;;  %v4029_v1 = vpop.permute.xlu2 %4028  ;;  %v4030_v2 = vsel %vm3288_vm5, %v4027_v49, %v9878_v31 }
0x1715   : > { %4112 = vrot.lane.b32.xlu1 %v4018_v18, %s8293_s13  ;;  %v4031_v24 = vsel %vm3288_vm5, %v4029_v1, %v9878_v31 }
0x171b   : > { %v4023_v11 = vpop.permute.xlu1 %4022  ;;  %v4011_v23 = vpop.permute.xlu0 %4010 }
0x171c   : > { %4120 = vrot.lane.b32.xlu2 %v4024_v22, %s8293_s13  ;;  %4122 = vrot.lane.b32.xlu0 %v4023_v11, %s8293_s13  ;;  %v4025_v54 = vsel %vm3279_vm3, %v4023_v11, %v9871_v35  ;;  %v4013_v58 = vsel %vm3264_vm4, %v4011_v23, %v9876_v9  ;;  %v4234_v11 = vld [vmem:[%s12451_s2 + $0x110] sm:$0xff]  ;;  %v4233_v22 = vld [vmem:[%s12451_s2 + $0x108] sm:$0xff] }
0x1723   : > { %v3995_v36 = vpop.permute.xlu1 %3994  ;;  %v4007_v61 = vpop.permute.xlu0 %4006 }
0x1724   : > { %4088 = vrot.lane.b32.xlu1 %v3995_v36, %s8293_s13  ;;  %4096 = vrot.lane.b32.xlu2 %v4001_v57, %s8293_s13  ;;  %v3997_v21 = vsel %vm372_vm7, %v8448_v45, %v3995_v36 }
0x1725   : > { %4080 = vrot.lane.b32.xlu0 %v3989_v60, %s8293_s13 }
0x172c   : > { %4094 = vrot.lane.b32.xlu1 %v4003_v40, %s8293_s13  ;;  %4114 = vrot.lane.b32.xlu2 %v4017_v33, %s8293_s13 }
0x172d   : > { %4074 = vrot.lane.b32.xlu0 %v3990_v20, %s8293_s13 }
0x1734   : > { %4124 = vrot.lane.b32.xlu1 %v4025_v54, %s8293_s13  ;;  %4102 = vrot.lane.b32.xlu2 %v4009_v14, %s8293_s13 }
0x1735   : > { %4086 = vrot.lane.b32.xlu0 %v3997_v21, %s8293_s13  ;;  %v4232_v21 = vld [vmem:[%s12451_s2 + $0x100] sm:$0xff] }
0x173c   : > { %4106 = vrot.lane.b32.xlu1 %v4011_v23, %s8293_s13  ;;  %4078 = vrot.lane.b32.xlu2 %v3991_v48, %s8293_s13  ;;  %v4231_v48 = vld [vmem:[%s12451_s2 + $0xf8] sm:$0xff] }
0x173d   : > { %4116 = vrot.lane.b32.xlu0 %v4019_v56, %s8293_s13 }
0x1744   : > { %4076 = vrot.lane.b32.xlu1 %v3987_v50, %s8293_s13  ;;  %4108 = vrot.lane.b32.xlu2 %v4013_v58, %s8293_s13 }
0x1745   : > { %4104 = vrot.lane.b32.xlu0 %v4012_v28, %s8293_s13 }
0x174c   : > { %4072 = vrot.lane.b32.xlu1 %v3985_v7, %s8293_s13  ;;  %4100 = vrot.lane.b32.xlu2 %v4007_v61, %s8293_s13  ;;  %v7582_v61 = vld [vmem:[%s12450_s1 + $0x2d0] sm:$0xf] }
0x174d   : > { %4070 = vrot.lane.b32.xlu0 %v10255_v53, %s8293_s13 }
0x1754   : > { %4098 = vrot.lane.b32.xlu1 %v4005_v8, %s8293_s13  ;;  %4130 = vrot.lane.b32.xlu2 %v4029_v1, %s8293_s13  ;;  %v8034_v1 = vld [vmem:[%s12450_s1 + $0x2e0] sm:$0xf0] }
0x1755   : > { %4132 = vrot.lane.b32.xlu0 %v4031_v24, %s8293_s13 }
0x175c   : > { %4126 = vrot.lane.b32.xlu1 %v4027_v49, %s8293_s13  ;;  %4128 = vrot.lane.b32.xlu2 %v4030_v2, %s8293_s13  ;;  %v7583_v2 = vor.u32 %v8034_v1, %v7582_v61 }
0x175d   : > { %4247 = vperm.xlu0 %8203, %v4233_v22  }
0x175f   : > { %v4093_v4 = vpop.permute.xlu0 %4092 }
0x1764   : > { %4252 = vperm.xlu1 %8204, %v4234_v11   ;;  %4268 = vperm.xlu2 %8205, %v4233_v22  }
0x1765   : > { %4242 = vperm.xlu0 %8203, %v4232_v21  }
0x1766   : > { %v4085_v41 = vpop.permute.xlu2 %4084 }
0x176c   : > { %8206 = vset.pattern.permute.xlu1 %v12461_v47  ;;  %8207 = vset.pattern.permute.xlu2 %v12463_v0 }
0x176d   : > { %4272 = vperm.xlu1 %8206, %v4234_v11   ;;  %4237 = vperm.xlu2 %8207, %v4231_v48  }
0x176e   : > { %v4091_v29 = vpop.permute.xlu2 %4090  ;;  %8210 = vset.pattern.permute.xlu0 %v12461_v47 }
0x176f   : > { %v4140_v7 = vsel %vm3395_vm6, %v4091_v29, %v4093_v4  ;;  %v7584_v29 = vld [vmem:[%s12450_s1 + $0x2e4] sm:$0xf0] }
0x1775   : > { %4260 = vperm.xlu1 %8206, %v4231_v48   ;;  %8208 = vset.pattern.permute.xlu2 %v12461_v47 }
0x1776   : > { %v4119_v62 = vpop.permute.xlu1 %4118  ;;  %v4121_v53 = vpop.permute.xlu2 %4120  ;;  %4264 = vperm.xlu2 %8208, %v4232_v21  }
0x1777   : > { %v4111_v25 = vpop.permute.xlu0 %4110  ;;  %v4146_v10 = vsel %vm3395_vm6, %v4119_v62, %v4121_v53 }
0x177d   : > { %8209 = vset.pattern.permute.xlu1 %v12463_v0 }
0x177e   : > { %v4097_v46 = vpop.permute.xlu2 %4096 }
0x177f   : > { %v4083_v3 = vpop.permute.xlu1 %4082 }
0x1780   : > { %v4138_v19 = vsel %vm3395_vm6, %v4083_v3, %v4085_v41  ;;  %v8033_v41 = vld [vmem:[%s12450_s1 + $0x2d4] sm:$0xf] }
0x1781   : > { %v7587_v53 = vor.u32 %v8033_v41, %v7584_v29 }
0x1786   : > { %v4115_v52 = vpop.permute.xlu2 %4114 }
0x1787   : > { %v4113_v59 = vpop.permute.xlu1 %4112 }
0x1788   : > { %v4144_v36 = vsel %vm3395_vm6, %v4111_v25, %v4113_v59  ;;  %v8035_v59 = vld [vmem:[%s12450_s1 + $0x2e8] sm:$0xf0] }
0x178e   : > { %v4123_v51 = vpop.permute.xlu0 %4122  ;;  %v4103_v32 = vpop.permute.xlu2 %4102 }
0x1796   : > { %v4089_v5 = vpop.permute.xlu1 %4088  ;;  %v4079_v39 = vpop.permute.xlu2 %4078 }
0x1797   : > { %v4081_v6 = vpop.permute.xlu0 %4080 }
0x1798   : > { %v4137_v18 = vsel %vm3395_vm6, %v4079_v39, %v4081_v6 }
0x179e   : > { %v4095_v17 = vpop.permute.xlu1 %4094  ;;  %v4109_v16 = vpop.permute.xlu2 %4108 }
0x179f   : > { %v4141_v43 = vsel %vm3395_vm6, %v4095_v17, %v4097_v46  ;;  %v4075_v63 = vpop.permute.xlu0 %4074  ;;  %v7590_v46 = vld [vmem:[%s12450_s1 + $0x2d8] sm:$0xf]  ;;  %v8037_v17 = vld [vmem:[%s12450_s1 + $0x308] sm:$0xf0] }
0x17a0   : > { %4174 = vmatpush.bf16.msrb.mxu2 %v4141_v43  ;;  %v7591_v6 = vor.u32 %v8035_v59, %v7590_v46 }
0x17a4   : > { %4175 = vmatpush.bf16.msrb.mxu2 %v4140_v7  ;;  %v7596_v7 = vld [vmem:[%s12450_s1 + $0x30c] sm:$0xf0] }
0x17a6   : > { %v4125_v13 = vpop.permute.xlu1 %4124  ;;  %v4101_v54 = vpop.permute.xlu2 %4100 }
0x17a7   : > { %v4147_v38 = vsel %vm3395_vm6, %v4123_v51, %v4125_v13  ;;  %v4087_v14 = vpop.permute.xlu0 %4086  ;;  %v7602_v13 = vld [vmem:[%s12450_s1 + $0x300] sm:$0xf] }
0x17a8   : > { %v4139_v50 = vsel %vm3395_vm6, %v4087_v14, %v4089_v5  ;;  %4193 = vmatpush.bf16.msrb.mxu3 %v4147_v38  ;;  %v8038_v38 = vld [vmem:[%s12450_s1 + $0x310] sm:$0xf0] }
0x17a9   : > { %4176 = vmatpush.bf16.msrb.mxu2 %v4139_v50  ;;  %v7603_v14 = vor.u32 %v8038_v38, %v7602_v13 }
0x17ac   : > { %4194 = vmatpush.bf16.msrb.mxu3 %v4146_v10 }
0x17ad   : > { %4177 = vmatpush.bf16.msrb.mxu2 %v4138_v19 }
0x17ae   : > { %v4107_v57 = vpop.permute.xlu1 %4106  ;;  %v4131_v62 = vpop.permute.xlu2 %4130 }
0x17af   : > { %v4117_v8 = vpop.permute.xlu0 %4116  ;;  %v4143_v49 = vsel %vm3395_vm6, %v4107_v57, %v4109_v16 }
0x17b0   : > { %v4145_v33 = vsel %vm3395_vm6, %v4115_v52, %v4117_v8 }
0x17b1   : > { %4178 = vmatpush.bf16.msrb.mxu2 %v4137_v18  ;;  %4195 = vmatpush.bf16.msrb.mxu3 %v4145_v33 }
0x17b5   : > { %4196 = vmatpush.bf16.msrb.mxu3 %v4144_v36 }
0x17b6   : > { %v4077_v60 = vpop.permute.xlu1 %4076  ;;  %v4129_v51 = vpop.permute.xlu2 %4128 }
0x17b7   : > { %v4105_v40 = vpop.permute.xlu0 %4104  ;;  %v4136_v20 = vsel %vm3395_vm6, %v4075_v63, %v4077_v60  ;;  %v8036_v63 = vld [vmem:[%s12450_s1 + $0x2fc] sm:$0xf] }
0x17b8   : > { %4179 = vmatpush.bf16.msrb.mxu2 %v4136_v20  ;;  %v4142_v23 = vsel %vm3395_vm6, %v4103_v32, %v4105_v40  ;;  %v7594_v32 = vld [vmem:[%s12450_s1 + $0x2f8] sm:$0xf]  ;;  %v7599_v39 = vor.u32 %v8036_v63, %v7596_v7 }
0x17b9   : > { %4197 = vmatpush.bf16.msrb.mxu3 %v4143_v49  ;;  %v7595_v43 = vor.u32 %v8037_v17, %v7594_v32 }
0x17bd   : > { %4198 = vmatpush.bf16.msrb.mxu3 %v4142_v23 }
0x17be   : > { %v4073_v56 = vpop.permute.xlu1 %4072  ;;  %v4269_v10 = vpop.permute.xlu2 %4268 }
0x17bf   : > { %v4071_v58 = vpop.permute.xlu0 %4070  ;;  %v4135_v28 = vsel %vm3395_vm6, %v9963_v15, %v4073_v56 }
0x17c0   : > { %4180 = vmatpush.bf16.msrb.mxu2 %v4135_v28  ;;  %v4134_v24 = vsel %vm3395_vm6, %v9963_v15, %v4071_v58 }
0x17c1   : > { %4199 = vmatpush.bf16.msrb.mxu3 %v4101_v54 }
0x17c4   : > { %4181 = vmatpush.bf16.msrb.mxu2 %v4134_v24 }
0x17c6   : > { %v4099_v4 = vpop.permute.xlu1 %4098 }
0x17c7   : > { %v4133_v3 = vpop.permute.xlu0 %4132  ;;  %4182 = vmatmul.bf16.vlgmr.msrb.gmra.mxu2 %v7583_v2  ;;  %4200 = vmatpush.bf16.msrb.mxu3 %v4099_v4  ;;  %v4238_v11 = vpop.permute.xlu2 %4237 }
0x17c8   : > { %v4149_v25 = vsel %vm3395_vm6, %v4131_v62, %v4133_v3 }
0x17c9   : > { %4218 = vmatpush.bf16.msrb.mxu0 %v4149_v25 }
0x17ca   : > { %4201 = vmatmul.bf16.vlgmr.msrb.gmra.mxu3 %v7587_v53 }
0x17ce   : > { %v4127_v52 = vpop.permute.xlu1 %4126 }
0x17cf   : > { %v4148_v5 = vsel %vm3395_vm6, %v4127_v52, %v4129_v51  ;;  %v4248_v18 = vpop.permute.xlu0 %4247 }
0x17d0   : > { %4219 = vmatpush.bf16.msrb.mxu0 %v4148_v5  ;;  %v4265_v58 = vpop.permute.xlu2 %4264 }
0x17d3   : > { %7604 = vmatmul.msk.bf16.vlgmr.msrb.gmra.mxu0 %vm3430_vm9, %v7591_v6 }
0x17d6   : > { %v4253_v50 = vpop.permute.xlu1 %4252 }
0x17d7   : > { %4187 = vmatmul.bf16.gmra.mxu2 %v7595_v43  ;;  %v4243_v48 = vpop.permute.xlu0 %4242 }
0x17da   : > { %4206 = vmatmul.bf16.gmra.mxu3 %v7599_v39 }
0x17df   : > { %v4273_v19 = vpop.permute.xlu1 %4272 }
0x17e3   : > { %7605 = vmatmul.msk.bf16.gmra.mxu0 %vm3430_vm9, %v7603_v14 }
0x17e7   : > { %v4261_v60 = vpop.permute.xlu1 %4260 }
0x184a   : > { %v4183_v57 = vpop.f32.mrf.mxu2 }
0x184d   : > { %v4202_v8 = vpop.f32.mrf.mxu3 }
0x184e   : > { %v4203_v16 = vadd.f32 %v4202_v8, %v4183_v57 }
0x1850   : > { %v4221_v33 = vpop.f32.mrf.mxu0 }
0x1851   : > { %v4222_v22 = vadd.f32 %v4221_v33, %v4203_v16 }
0x1852   : > { %v4185_v36 = vpop.f32.mrf.mxu2 }
0x1853   : > { %v4255_v40 = vmul.f32 %v4238_v11, %v4222_v22 }
0x1855   : > { %v4275_v20 = vadd.f32 %v4261_v60, %v4255_v40  ;;  %v4204_v49 = vpop.f32.mrf.mxu3 }
0x1856   : > { %v4205_v54 = vadd.f32 %v4204_v49, %v4185_v36 }
0x1857   : > { %v4279_v21 = vadd.f32 %v4275_v20, %v10064_v37 }
0x1858   : > { %v4223_v23 = vpop.f32.mrf.mxu0 }
0x1859   : > { %v4224_v56 = vadd.f32 %v4223_v23, %v4205_v54  ;;  %v4283_v61 = vmax.f32 %v4279_v21, 0.0 }
0x185a   : > { %v4188_v28 = vpop.f32.mrf.mxu2 }
0x185b   : > { %v4256_v1 = vmul.f32 %v4243_v48, %v4224_v56  ;;  %v4287_v29 = vmul.f32 %v10251_v27, %v4283_v61 }
0x185d   : > { %v4276_v24 = vadd.f32 %v4265_v58, %v4256_v1  ;;  %v4207_v2 = vpop.f32.mrf.mxu3  ;;  %v4291_v25 = vpack.c.bf16 %v4287_v29, %v4287_v29 }
0x185e   : > { %v4208_v41 = vadd.f32 %v4207_v2, %v4188_v28 }
0x185f   : > { %v4280_v62 = vadd.f32 %v4276_v24, %v10069_v44  ;;  %v4299_v32 = vunpack.c.l.b16 %v4291_v25 }
0x1860   : > { %v4226_v4 = vpop.f32.mrf.mxu0 }
0x1861   : > { %v4284_v53 = vmax.f32 %v4280_v62, 0.0  ;;  %v4227_v3 = vadd.f32 %v4226_v4, %v4208_v41 }
0x1862   : > { %v4190_v59 = vpop.f32.mrf.mxu2 }
0x1863   : > { %v4288_v37 = vmul.f32 %v10251_v27, %v4284_v53  ;;  %v4257_v46 = vmul.f32 %v4248_v18, %v4227_v3 }
0x1865   : > { %v4292_v51 = vpack.c.bf16 %v4288_v37, %v4288_v37  ;;  %v4277_v52 = vadd.f32 %v4269_v10, %v4257_v46  ;;  %v4209_v5 = vpop.f32.mrf.mxu3  ;;  %v10526_v37 = vld [vmem:[%s12451_s2 + $0x148] sm:$0xff] }
0x1866   : > { %v4210_v6 = vadd.f32 %v4209_v5, %v4190_v59 }
0x1867   : > { %v4300_v17 = vunpack.c.l.b16 %v4292_v51  ;;  %v4281_v43 = vadd.f32 %v4277_v52, %v10084_v34 }
0x1868   : > { %v4228_v63 = vpop.f32.mrf.mxu0 }
0x1869   : > { %v10422_v7 = vpack.c.b16 %v4300_v17, %v4299_v32  ;;  %v4229_v44 = vadd.f32 %v4228_v63, %v4210_v6  ;;  %v4285_v39 = vmax.f32 %v4281_v43, 0.0 }
0x186b   : > { %v4258_v13 = vmul.f32 %v4253_v50, %v4229_v44  ;;  %4327 = vrot.lane.b32.xlu0 %v10422_v7, %s8290_s16  ;;  %4333 = vrot.lane.b32.xlu2 %v10422_v7, %s8286_s24  ;;  %v4289_v14 = vmul.f32 %v10251_v27, %v4285_v39 }
0x186c   : > { %4339 = vrot.lane.b32.xlu1 %v10422_v7, %s8291_s17 }
0x186d   : > { %v4278_v38 = vadd.f32 %v4273_v19, %v4258_v13  ;;  %v4293_v57 = vpack.c.bf16 %v4289_v14, %v4289_v14 }
0x186f   : > { %v4282_v34 = vadd.f32 %v4278_v38, %v10089_v55  ;;  %v4301_v16 = vunpack.c.l.b16 %v4293_v57 }
0x1871   : > { %v4286_v10 = vmax.f32 %v4282_v34, 0.0 }
0x1873   : > { %v4290_v8 = vmul.f32 %v10251_v27, %v4286_v10  ;;  %4345 = vrot.lane.b32.xlu0 %v10422_v7, %s8289_s11  ;;  %4311 = vrot.lane.b32.xlu2 %v10422_v7, %s8277_s20 }
0x1874   : > { %4317 = vrot.lane.b32.xlu1 %v10422_v7, %s8288_s12 }
0x1875   : > { %v4294_v50 = vpack.c.bf16 %v4290_v8, %v4290_v8 }
0x1877   : > { %v4302_v19 = vunpack.c.l.b16 %v4294_v50 }
0x1879   : > { %v10439_v18 = vpack.c.b16 %v4302_v19, %v4301_v16 }
0x187b   : > { %4341 = vrot.lane.b32.xlu0 %v10439_v18, %s8291_s17  ;;  %4305 = vrot.lane.b32.xlu2 %v10422_v7, %s8279_s22 }
0x187c   : > { %4329 = vrot.lane.b32.xlu1 %v10439_v18, %s8290_s16 }
0x1883   : > { %4335 = vrot.lane.b32.xlu0 %v10439_v18, %s8286_s24  ;;  %4323 = vrot.lane.b32.xlu2 %v10422_v7, %s8292_s28  ;;  %s12487_s24 = smov 118  }
0x1884   : > { %4307 = vrot.lane.b32.xlu1 %v10439_v18, %s8279_s22 }
0x188b   : > { %4313 = vrot.lane.b32.xlu0 %v10439_v18, %s8277_s20  ;;  %4319 = vrot.lane.b32.xlu2 %v10439_v18, %s8288_s12 }
0x188c   : > { %4347 = vrot.lane.b32.xlu1 %v10439_v18, %s8289_s11 }
0x1893   : > { %4325 = vrot.lane.b32.xlu0 %v10439_v18, %s8292_s28  ;;  %s7974_s28 = sshll.u32 %s12507_s10, 5 }
0x1894   : > { %s332_s21 = scalar_lea.vmem %s12458_s9, %s7974_s28 }
0x18c5   : > { %v4334_v55 = vpop.permute.xlu2 %4333 }
0x18c6   : > { %4467 = vrot.lane.b32.xlu2 %v4334_v55, %s8293_s13  ;;  %v4337_v48 = vsel %vm2390_vm15, %v4334_v55, %v9475_v12 }
0x18cd   : > { %v4312_v27 = vpop.permute.xlu2 %4311 }
0x18ce   : > { %v4315_v33 = vsel %vm372_vm7, %v8448_v45, %v4312_v27 }
0x18cf   : > { %4439 = vrot.lane.b32.xlu2 %v4315_v33, %s8293_s13 }
0x18d5   : > { %v4306_v20 = vpop.permute.xlu2 %4305 }
0x18d6   : > { %v4309_v41 = vsel %vm360_vm8, %v9493_v42, %v4306_v20 }
0x18dd   : > { %v4328_v11 = vpop.permute.xlu0 %4327  ;;  %v4324_v21 = vpop.permute.xlu2 %4323 }
0x18de   : > { %v4340_v22 = vpop.permute.xlu1 %4339  ;;  %v4331_v36 = vsel %vm3264_vm4, %v4328_v11, %v9876_v9 }
0x18df   : > { %4475 = vrot.lane.b32.xlu0 %v4340_v22, %s8293_s13  ;;  %4461 = vrot.lane.b32.xlu2 %v4331_v36, %s8293_s13  ;;  %v4343_v56 = vsel %vm3279_vm3, %v4340_v22, %v9871_v35 }
0x18e5   : > { %v4346_v60 = vpop.permute.xlu0 %4345  ;;  %v4320_v28 = vpop.permute.xlu2 %4319 }
0x18e6   : > { %v4318_v40 = vpop.permute.xlu1 %4317  ;;  %v4322_v24 = vsel %vm3251_vm1, %v9874_v26, %v4320_v28  ;;  %v4349_v25 = vsel %vm3288_vm5, %v4346_v60, %v9878_v31 }
0x18e7   : > { %4441 = vrot.lane.b32.xlu0 %v4312_v27, %s8293_s13  ;;  %4449 = vrot.lane.b32.xlu1 %v4318_v40, %s8293_s13  ;;  %v4321_v54 = vsel %vm3251_vm1, %v9874_v26, %v4318_v40 }
0x18ed   : > { %v4342_v49 = vpop.permute.xlu0 %4341 }
0x18ee   : > { %v4330_v61 = vpop.permute.xlu1 %4329  ;;  %v4344_v1 = vsel %vm3279_vm3, %v4342_v49, %v9871_v35 }
0x18ef   : > { %4447 = vrot.lane.b32.xlu0 %v4321_v54, %s8293_s13  ;;  %4459 = vrot.lane.b32.xlu1 %v4328_v11, %s8293_s13 }
0x18f5   : > { %v4336_v23 = vpop.permute.xlu0 %4335 }
0x18f6   : > { %v4308_v2 = vpop.permute.xlu1 %4307  ;;  %v4338_v35 = vsel %vm2390_vm15, %v4336_v23, %v9475_v12  ;;  %v4332_v12 = vsel %vm3264_vm4, %v4330_v61, %v9876_v9 }
0x18f7   : > { %4469 = vrot.lane.b32.xlu0 %v4337_v48, %s8293_s13  ;;  %4477 = vrot.lane.b32.xlu1 %v4343_v56, %s8293_s13  ;;  %v4310_v29 = vsel %vm360_vm8, %v9493_v42, %v4308_v2 }
0x18fd   : > { %v4314_v58 = vpop.permute.xlu0 %4313 }
0x18fe   : > { %4445 = vrot.lane.b32.xlu2 %v4314_v58, %s8293_s13  ;;  %v4348_v62 = vpop.permute.xlu1 %4347  ;;  %v4316_v53 = vsel %vm372_vm7, %v8448_v45, %v4314_v58 }
0x18ff   : > { %4453 = vrot.lane.b32.xlu0 %v4320_v28, %s8293_s13  ;;  %4479 = vrot.lane.b32.xlu1 %v4342_v49, %s8293_s13  ;;  %v4350_v3 = vsel %vm3288_vm5, %v4348_v62, %v9878_v31 }
0x1905   : > { %v4326_v4 = vpop.permute.xlu0 %4325 }
0x1906   : > { %4481 = vrot.lane.b32.xlu2 %v4344_v1, %s8293_s13 }
0x1907   : > { %4471 = vrot.lane.b32.xlu1 %v4336_v23, %s8293_s13  ;;  %4463 = vrot.lane.b32.xlu0 %v4330_v61, %s8293_s13 }
0x190e   : > { %4451 = vrot.lane.b32.xlu2 %v4322_v24, %s8293_s13 }
0x190f   : > { %4431 = vrot.lane.b32.xlu0 %v4309_v41, %s8293_s13  ;;  %4437 = vrot.lane.b32.xlu1 %v4308_v2, %s8293_s13  ;;  %v7608_v2 = vld [vmem:[%s12450_s1 + $0x320] sm:$0xf] }
0x1916   : > { %4473 = vrot.lane.b32.xlu2 %v4338_v35, %s8293_s13  ;;  %v8040_v35 = vld [vmem:[%s12450_s1 + $0x330] sm:$0xf0] }
0x1917   : > { %4435 = vrot.lane.b32.xlu0 %v4310_v29, %s8293_s13  ;;  %4433 = vrot.lane.b32.xlu1 %v4306_v20, %s8293_s13  ;;  %v8039_v29 = vld [vmem:[%s12450_s1 + $0x324] sm:$0xf] }
0x191e   : > { %4457 = vrot.lane.b32.xlu2 %v4326_v4, %s8293_s13 }
0x191f   : > { %4443 = vrot.lane.b32.xlu1 %v4316_v53, %s8293_s13  ;;  %4489 = vrot.lane.b32.xlu0 %v4350_v3, %s8293_s13  ;;  %v7609_v53 = vor.u32 %v8040_v35, %v7608_v2  ;;  %v4721_v2 = vld [vmem:[%s12451_s2 + $0x118] sm:$0xff] }
0x1920   : > { %v4468_v46 = vpop.permute.xlu2 %4467 }
0x1926   : > { %4487 = vrot.lane.b32.xlu2 %v4348_v62, %s8293_s13  ;;  %v7610_v62 = vld [vmem:[%s12450_s1 + $0x334] sm:$0xf0] }
0x1927   : > { %4465 = vrot.lane.b32.xlu1 %v4332_v12, %s8293_s13  ;;  %4483 = vrot.lane.b32.xlu0 %v4346_v60, %s8293_s13  ;;  %v7613_v3 = vor.u32 %v8039_v29, %v7610_v62  ;;  %v7616_v12 = vld [vmem:[%s12450_s1 + $0x328] sm:$0xf]  ;;  %v4722_v29 = vld [vmem:[%s12451_s2 + $0x120] sm:$0xff] }
0x1929   : > { %v4440_v59 = vpop.permute.xlu2 %4439 }
0x192e   : > { %4429 = vrot.lane.b32.xlu2 %v10439_v18, %s8293_s13 }
0x192f   : > { %4455 = vrot.lane.b32.xlu1 %v4324_v21, %s8293_s13 }
0x1936   : > { %4427 = vrot.lane.b32.xlu2 %v10422_v7, %s8293_s13 }
0x1937   : > { %4485 = vrot.lane.b32.xlu1 %v4349_v25, %s8293_s13  ;;  %v8041_v25 = vld [vmem:[%s12450_s1 + $0x338] sm:$0xf0] }
0x1939   : > { %v4462_v52 = vpop.permute.xlu2 %4461 }
0x193e   : > { %4802 = vperm.xlu2 %8208, %v10526_v37  }
0x1946   : > { %8212 = vset.pattern.permute.xlu2 %v12463_v0 }
0x1951   : > { %v4476_v51 = vpop.permute.xlu0 %4475 }
0x1958   : > { %v4446_v6 = vpop.permute.xlu2 %4445 }
0x1959   : > { %v4442_v5 = vpop.permute.xlu0 %4441  ;;  %v4450_v31 = vpop.permute.xlu1 %4449 }
0x195a   : > { %v4495_v21 = vsel %vm3395_vm6, %v4440_v59, %v4442_v5  ;;  %v8043_v5 = vld [vmem:[%s12450_s1 + $0x358] sm:$0xf0] }
0x1960   : > { %v4482_v43 = vpop.permute.xlu2 %4481 }
0x1961   : > { %v4448_v32 = vpop.permute.xlu0 %4447  ;;  %v4460_v17 = vpop.permute.xlu1 %4459 }
0x1962   : > { %v4497_v10 = vsel %vm3395_vm6, %v4448_v32, %v4450_v31  ;;  %v4499_v61 = vsel %vm3395_vm6, %v4460_v17, %v4462_v52  ;;  %v7617_v52 = vor.u32 %v8041_v25, %v7616_v12  ;;  %v8042_v31 = vld [vmem:[%s12450_s1 + $0x34c] sm:$0xf] }
0x1968   : > { %v4452_v39 = vpop.permute.xlu2 %4451 }
0x1969   : > { %v4470_v63 = vpop.permute.xlu0 %4469  ;;  %v4478_v44 = vpop.permute.xlu1 %4477 }
0x196a   : > { %v4503_v57 = vsel %vm3395_vm6, %v4476_v51, %v4478_v44  ;;  %v4501_v55 = vsel %vm3395_vm6, %v4468_v46, %v4470_v63  ;;  %v8044_v63 = vld [vmem:[%s12450_s1 + $0x360] sm:$0xf0] }
0x1970   : > { %v4474_v8 = vpop.permute.xlu2 %4473 }
0x1971   : > { %v4454_v13 = vpop.permute.xlu0 %4453  ;;  %v4480_v38 = vpop.permute.xlu1 %4479 }
0x1972   : > { %v4498_v14 = vsel %vm3395_vm6, %v4452_v39, %v4454_v13  ;;  %v4504_v34 = vsel %vm3395_vm6, %v4480_v38, %v4482_v43  ;;  %v7628_v43 = vld [vmem:[%s12450_s1 + $0x350] sm:$0xf]  ;;  %v10589_v39 = vld [vmem:[%s12455_s6 + $0x38] sm:$0xff] }
0x1973   : > { %4537 = vmatpush.bf16.msrb.mxu1 %v4498_v14  ;;  %4566 = vmatpush.bf16.msra.mxu2 %v4504_v34  ;;  %v7629_v44 = vor.u32 %v8044_v63, %v7628_v43  ;;  %v4728_v13 = vld [vmem:[%s12451_s2 + $0x150] sm:$0xff]  ;;  %v8046_v34 = vld [vmem:[%s12450_s1 + $0x380] sm:$0xf0] }
0x1974   : > { %4766 = vperm.xlu1 %8209, %v4728_v13   ;;  %4806 = vperm.xlu0 %8210, %v4728_v13   ;;  %v10598_v38 = vld [vmem:[%s12455_s6 + $0x30] sm:$0xff] }
0x1975   : > { %4692 = vmatpush.bf16.msra.mxu0 %v10589_v39  ;;  %v7632_v14 = vld [vmem:[%s12450_s1 + $0x370] sm:$0xf] }
0x1977   : > { %4538 = vmatpush.bf16.msrb.mxu1 %v4497_v10  ;;  %4567 = vmatpush.bf16.msra.mxu2 %v4503_v57  ;;  %v8045_v10 = vld [vmem:[%s12450_s1 + $0x374] sm:$0xf]  ;;  %v7634_v57 = vld [vmem:[%s12450_s1 + $0x384] sm:$0xf0] }
0x1978   : > { %v4458_v11 = vpop.permute.xlu2 %4457 }
0x1979   : > { %v4464_v50 = vpop.permute.xlu0 %4463  ;;  %v4472_v16 = vpop.permute.xlu1 %4471  ;;  %4693 = vmatpush.bf16.msra.mxu0 %v10598_v38 }
0x197a   : > { %v4502_v19 = vsel %vm3395_vm6, %v4472_v16, %v4474_v8  ;;  %v7633_v8 = vor.u32 %v8046_v34, %v7632_v14  ;;  %v7640_v16 = vld [vmem:[%s12450_s1 + $0x378] sm:$0xf] }
0x197b   : > { %4568 = vmatpush.bf16.msra.mxu2 %v4502_v19  ;;  %v8047_v19 = vld [vmem:[%s12450_s1 + $0x388] sm:$0xf0] }
0x197c   : > { %8211 = vset.pattern.permute.xlu0 %v12463_v0 }
0x197d   : > { %4761 = vperm.xlu0 %8211, %v10526_v37   ;;  %v7646_v37 = vld [vmem:[%s12450_s1 + $0x3ac] sm:$0xf0] }
0x197f   : > { %4569 = vmatpush.bf16.msra.mxu2 %v4501_v55  ;;  %v7641_v55 = vor.u32 %v8047_v19, %v7640_v16 }
0x1980   : > { %v4488_v60 = vpop.permute.xlu2 %4487 }
0x1981   : > { %v4432_v27 = vpop.permute.xlu0 %4431  ;;  %v4438_v33 = vpop.permute.xlu1 %4437 }
0x1988   : > { %v4430_v23 = vpop.permute.xlu2 %4429 }
0x1989   : > { %v4436_v22 = vpop.permute.xlu0 %4435  ;;  %v4434_v36 = vpop.permute.xlu1 %4433  ;;  %v4492_v24 = vsel %vm3395_vm6, %v9963_v15, %v4430_v23  ;;  %v10659_v23 = vld [vmem:[%s12455_s6 + $0x18] sm:$0xff] }
0x198a   : > { %v4494_v56 = vsel %vm3395_vm6, %v4436_v22, %v4438_v33  ;;  %v4493_v28 = vsel %vm3395_vm6, %v4432_v27, %v4434_v36  ;;  %v7644_v27 = vld [vmem:[%s12450_s1 + $0x398] sm:$0xf]  ;;  %v8049_v33 = vld [vmem:[%s12450_s1 + $0x3a8] sm:$0xf0] }
0x198b   : > { %v7645_v22 = vor.u32 %v8049_v33, %v7644_v27 }
0x1990   : > { %v4428_v41 = vpop.permute.xlu2 %4427 }
0x1991   : > { %v4490_v40 = vpop.permute.xlu0 %4489  ;;  %v4444_v20 = vpop.permute.xlu1 %4443  ;;  %v4491_v4 = vsel %vm3395_vm6, %v9963_v15, %v4428_v41  ;;  %v7620_v15 = vld [vmem:[%s12450_s1 + $0x348] sm:$0xf] }
0x1992   : > { %v4506_v49 = vsel %vm3395_vm6, %v4488_v60, %v4490_v40  ;;  %v4496_v54 = vsel %vm3395_vm6, %v4444_v20, %v4446_v6  ;;  %v7622_v6 = vld [vmem:[%s12450_s1 + $0x35c] sm:$0xf0]  ;;  %v7621_v32 = vor.u32 %v8043_v5, %v7620_v15  ;;  %v8050_v40 = vld [vmem:[%s12450_s1 + $0x3b0] sm:$0xf0] }
0x1993   : > { %4539 = vmatpush.bf16.msrb.mxu1 %v4496_v54  ;;  %4601 = vmatpush.bf16.msra.mxu3 %v4506_v49  ;;  %v7625_v17 = vor.u32 %v8042_v31, %v7622_v6  ;;  %v7652_v60 = vld [vmem:[%s12450_s1 + $0x3a0] sm:$0xf]  ;;  %v10644_v49 = vld [vmem:[%s12455_s6 + $0x28] sm:$0xff]  ;;  %v4725_v54 = vld [vmem:[%s12451_s2 + $0x138] sm:$0xff] }
0x1994   : > { %v7653_v20 = vor.u32 %v8050_v40, %v7652_v60  ;;  %4694 = vmatpush.bf16.msra.mxu0 %v10644_v49  ;;  %4751 = vperm.xlu1 %8209, %v4725_v54  }
0x1997   : > { %4540 = vmatpush.bf16.msrb.mxu1 %v4495_v21  ;;  %v10653_v21 = vld [vmem:[%s12455_s6 + $0x20] sm:$0xff] }
0x1998   : > { %4695 = vmatpush.bf16.msra.mxu0 %v10653_v21 }
0x1999   : > { %v4466_v48 = vpop.permute.xlu1 %4465  ;;  %v4484_v46 = vpop.permute.xlu0 %4483 }
0x199a   : > { %v4500_v58 = vsel %vm3395_vm6, %v4464_v50, %v4466_v48  ;;  %v7637_v50 = vor.u32 %v8045_v10, %v7634_v57  ;;  %v10666_v48 = vld [vmem:[%s12455_s6 + $0x10] sm:$0xff] }
0x199b   : > { %4541 = vmatpush.bf16.msrb.mxu1 %v4494_v56  ;;  %4570 = vmatpush.bf16.msra.mxu2 %v4500_v58  ;;  %v10672_v56 = vld [vmem:[%s12455_s6 + $0x8] sm:$0xff]  ;;  %v4724_v58 = vld [vmem:[%s12451_s2 + $0x130] sm:$0xff] }
0x199c   : > { %4696 = vmatpush.bf16.msra.mxu0 %v10659_v23  ;;  %8213 = vset.pattern.permute.xlu1 %v12461_v47 }
0x199d   : > { %4794 = vperm.xlu1 %8213, %v4725_v54  }
0x199f   : > { %4542 = vmatpush.bf16.msrb.mxu1 %v4493_v28  ;;  %4571 = vmatpush.bf16.msra.mxu2 %v4499_v61  ;;  %v10682_v28 = vld [vmem:[%s12455_s6] sm:$0xff] }
0x19a0   : > { %4697 = vmatpush.bf16.msra.mxu0 %v10666_v48  ;;  %v4726_v61 = vld [vmem:[%s12451_s2 + $0x140] sm:$0xff] }
0x19a1   : > { %v4456_v1 = vpop.permute.xlu1 %4455  ;;  %4756 = vperm.xlu2 %8212, %v4726_v61  }
0x19a3   : > { %4543 = vmatpush.bf16.msrb.mxu1 %v4492_v24  ;;  %4572 = vmatpush.bf16.msra.mxu2 %v4458_v11  ;;  %v8048_v11 = vld [vmem:[%s12450_s1 + $0x39c] sm:$0xf]  ;;  %v4723_v24 = vld [vmem:[%s12451_s2 + $0x128] sm:$0xff] }
0x19a4   : > { %v7649_v36 = vor.u32 %v8048_v11, %v7646_v37  ;;  %4698 = vmatpush.bf16.msra.mxu0 %v10672_v56  ;;  %4741 = vperm.xlu0 %8211, %v4723_v24  }
0x19a5   : > { %8215 = vset.pattern.permute.xlu1 %v12463_v0 }
0x19a6   : > { %4746 = vperm.xlu1 %8215, %v4724_v58  }
0x19a7   : > { %4544 = vmatpush.bf16.msrb.mxu1 %v4491_v4  ;;  %4573 = vmatpush.bf16.msra.mxu2 %v4456_v1 }
0x19a8   : > { %4699 = vmatpush.bf16.msra.mxu0 %v10682_v28 }
0x19a9   : > { %v4486_v59 = vpop.permute.xlu1 %4485  ;;  %8214 = vset.pattern.permute.xlu2 %v12461_v47 }
0x19aa   : > { %4545 = vmatmul.bf16.vlgmr.msrb.gmra.mxu1 %v7609_v53  ;;  %4574 = vmatmul.bf16.vlgmr.msra.gmra.mxu2 %v7613_v3  ;;  %v4505_v51 = vsel %vm3395_vm6, %v4484_v46, %v4486_v59 }
0x19ab   : > { %4602 = vmatpush.bf16.msra.mxu3 %v4505_v51  ;;  %4798 = vperm.xlu2 %8214, %v4726_v61  }
0x19ac   : > { %4736 = vperm.xlu0 %8211, %v4722_v29  }
0x19ae   : > { %7654 = vmatmul.msk.bf16.vlgmr.msra.gmra.mxu3 %vm3430_vm9, %v7617_v52  ;;  %8216 = vset.pattern.permute.xlu1 %v12461_v47 }
0x19af   : > { %4790 = vperm.xlu1 %8216, %v4724_v58  }
0x19b3   : > { %4786 = vperm.xlu2 %8214, %v4723_v24   ;;  %v4803_v24 = vpop.permute.xlu2 %4802 }
0x19b4   : > { %8223 = vset.pattern.permute.xlu0 %v12461_v47 }
0x19b5   : > { %4889 = vrot.lane.b32.xlu0 %v12463_v0, %s8294_s25 }
0x19b7   : > { %4778 = vperm.xlu1 %8216, %v4721_v2  }
0x19ba   : > { %4550 = vmatmul.bf16.gmra.mxu1 %v7621_v32  ;;  %4579 = vmatmul.bf16.gmra.mxu2 %v7625_v17 }
0x19bb   : > { %8217 = vset.pattern.permute.xlu2 %v12463_v0 }
0x19bc   : > { %4731 = vperm.xlu2 %8217, %v4721_v2  }
0x19be   : > { %7655 = vmatmul.msk.bf16.gmra.mxu3 %vm3430_vm9, %v7629_v44 }
0x19bf   : > { %8219 = vset.pattern.permute.xlu1 %v12463_v0 }
0x19c4   : > { %8218 = vset.pattern.permute.xlu2 %v12461_v47 }
0x19c5   : > { %4782 = vperm.xlu2 %8218, %v4722_v29  }
0x19ca   : > { %4555 = vmatmul.bf16.gmra.mxu1 %v7633_v8  ;;  %4584 = vmatmul.bf16.gmra.mxu2 %v7637_v50 }
0x19cd   : > { %8220 = vset.pattern.permute.xlu2 %v12463_v0 }
0x19ce   : > { %7656 = vmatmul.msk.bf16.gmra.mxu3 %vm3430_vm9, %v7641_v55 }
0x19da   : > { %4560 = vmatmul.bf16.gmra.mxu1 %v7645_v22  ;;  %4589 = vmatmul.bf16.gmra.mxu2 %v7649_v36 }
0x19de   : > { %7657 = vmatmul.msk.bf16.gmra.mxu3 %vm3430_vm9, %v7653_v20 }
0x1a27   : > { %v4546_v1 = vpop.f32.mrf.mxu1 }
0x1a2d   : > { %v4575_v41 = vpop.f32.mrf.mxu2 }
0x1a2e   : > { %v4576_v53 = vadd.f32 %v4575_v41, %v4546_v1  ;;  %v4767_v1 = vpop.permute.xlu1 %4766  ;;  %v4807_v41 = vpop.permute.xlu0 %4806 }
0x1a2f   : > { %v4548_v35 = vpop.f32.mrf.mxu1 }
0x1a31   : > { %v4604_v62 = vpop.f32.mrf.mxu3 }
0x1a32   : > { %v4605_v46 = vadd.f32 %v4604_v62, %v4576_v53 }
0x1a35   : > { %v4577_v4 = vpop.f32.mrf.mxu2 }
0x1a36   : > { %v4578_v12 = vadd.f32 %v4577_v4, %v4548_v35  ;;  %v4752_v2 = vpop.permute.xlu1 %4751  ;;  %v4757_v35 = vpop.permute.xlu2 %4756 }
0x1a37   : > { %v4551_v3 = vpop.f32.mrf.mxu1  ;;  %v4762_v4 = vpop.permute.xlu0 %4761 }
0x1a39   : > { %v4606_v25 = vpop.f32.mrf.mxu3 }
0x1a3a   : > { %v4607_v59 = vadd.f32 %v4606_v25, %v4578_v12 }
0x1a3c   : > { %v4624_v51 = vpack.c.bf16 %v4607_v59, %v4605_v46 }
0x1a3d   : > { %v4580_v52 = vpop.f32.mrf.mxu2 }
0x1a3e   : > { %4700 = vmatmul.bf16.vlgmr.msra.gmra.mxu0 %v4624_v51  ;;  %v4581_v6 = vadd.f32 %v4580_v52, %v4551_v3  ;;  %v4795_v62 = vpop.permute.xlu1 %4794  ;;  %v4799_v53 = vpop.permute.xlu2 %4798 }
0x1a3f   : > { %v4553_v15 = vpop.f32.mrf.mxu1  ;;  %v4742_v25 = vpop.permute.xlu0 %4741 }
0x1a41   : > { %v4609_v5 = vpop.f32.mrf.mxu3 }
0x1a42   : > { %v4610_v63 = vadd.f32 %v4609_v5, %v4581_v6 }
0x1a45   : > { %v4582_v31 = vpop.f32.mrf.mxu2 }
0x1a46   : > { %v4583_v32 = vadd.f32 %v4582_v31, %v4553_v15  ;;  %v4747_v12 = vpop.permute.xlu1 %4746  ;;  %v4787_v51 = vpop.permute.xlu2 %4786  ;;  %v8258_v31 = vld [vmem:[%s12452_s3 + $0x5] ss:$0 sm:$0xff] }
0x1a47   : > { %v4556_v17 = vpop.f32.mrf.mxu1 }
0x1a49   : > { %v4611_v43 = vpop.f32.mrf.mxu3 }
0x1a4a   : > { %v4612_v44 = vadd.f32 %v4611_v43, %v4583_v32 }
0x1a4c   : > { %v4625_v13 = vpack.c.bf16 %v4612_v44, %v4610_v63 }
0x1a4d   : > { %v4585_v14 = vpop.f32.mrf.mxu2 }
0x1a4e   : > { %4705 = vmatmul.bf16.gmra.mxu0 %v4625_v13  ;;  %v4586_v8 = vadd.f32 %v4585_v14, %v4556_v17  ;;  %v4791_v32 = vpop.permute.xlu1 %4790 }
0x1a4f   : > { %v4558_v10 = vpop.f32.mrf.mxu1 }
0x1a51   : > { %v4614_v34 = vpop.f32.mrf.mxu3 }
0x1a52   : > { %v4615_v19 = vadd.f32 %v4614_v34, %v4586_v8 }
0x1a55   : > { %v4587_v57 = vpop.f32.mrf.mxu2 }
0x1a56   : > { %v4588_v50 = vadd.f32 %v4587_v57, %v4558_v10 }
0x1a57   : > { %v4561_v33 = vpop.f32.mrf.mxu1 }
0x1a59   : > { %v4616_v16 = vpop.f32.mrf.mxu3 }
0x1a5a   : > { %v4617_v55 = vadd.f32 %v4616_v16, %v4588_v50 }
0x1a5c   : > { %v4626_v27 = vpack.c.bf16 %v4617_v55, %v4615_v19 }
0x1a5d   : > { %v4590_v11 = vpop.f32.mrf.mxu2 }
0x1a5e   : > { %4710 = vmatmul.bf16.gmra.mxu0 %v4626_v27  ;;  %v4591_v36 = vadd.f32 %v4590_v11, %v4561_v33 }
0x1a5f   : > { %v4563_v60 = vpop.f32.mrf.mxu1 }
0x1a61   : > { %v4619_v37 = vpop.f32.mrf.mxu3 }
0x1a62   : > { %v4620_v54 = vadd.f32 %v4619_v37, %v4591_v36 }
0x1a65   : > { %v4592_v22 = vpop.f32.mrf.mxu2 }
0x1a66   : > { %v4593_v40 = vadd.f32 %v4592_v22, %v4563_v60  ;;  %v4732_v22 = vpop.permute.xlu2 %4731 }
0x1a69   : > { %v4621_v20 = vpop.f32.mrf.mxu3 }
0x1a6a   : > { %v4622_v58 = vadd.f32 %v4621_v20, %v4593_v40 }
0x1a6c   : > { %v4627_v61 = vpack.c.bf16 %v4622_v58, %v4620_v54  ;;  %v4737_v58 = vpop.permute.xlu0 %4736 }
0x1a6e   : > { %4715 = vmatmul.bf16.gmra.mxu0 %v4627_v61 }
0x1abb   : > { %v4701_v29 = vpop.f32.mrf.mxu0 }
0x1ac3   : > { %v4703_v3 = vpop.f32.mrf.mxu0 }
0x1acb   : > { %v4706_v46 = vpop.f32.mrf.mxu0 }
0x1acc   : > { %v4771_v59 = vmul.f32 %v4742_v25, %v4706_v46  ;;  %v4783_v46 = vpop.permute.xlu2 %4782 }
0x1ace   : > { %v4811_v52 = vadd.f32 %v4787_v51, %v4771_v59  ;;  %v4769_v59 = vmul.f32 %v4732_v22, %v4701_v29 }
0x1ad0   : > { %v4819_v15 = vmax.f32 %v4811_v52, 0.0 }
0x1ad2   : > { %v4831_v17 = vmul.f32 %v8258_v31, %v4819_v15 }
0x1ad3   : > { %v4708_v5 = vpop.f32.mrf.mxu0 }
0x1ad4   : > { %v4772_v6 = vmul.f32 %v4747_v12, %v4708_v5  ;;  %v4839_v44 = vpack.c.bf16 %v4831_v17, %v4831_v17  ;;  %v4770_v12 = vmul.f32 %v4737_v58, %v4703_v3 }
0x1ad6   : > { %v4812_v43 = vadd.f32 %v4791_v32, %v4772_v6  ;;  %v4855_v57 = vunpack.c.l.b16 %v4839_v44  ;;  %v4810_v52 = vadd.f32 %v4783_v46, %v4770_v12 }
0x1ad8   : > { %v4820_v63 = vmax.f32 %v4812_v43, 0.0 }
0x1ada   : > { %v4832_v13 = vmul.f32 %v8258_v31, %v4820_v63 }
0x1adb   : > { %v4711_v14 = vpop.f32.mrf.mxu0 }
0x1adc   : > { %v4840_v34 = vpack.c.bf16 %v4832_v13, %v4832_v13  ;;  %v4773_v10 = vmul.f32 %v4752_v2, %v4711_v14 }
0x1ade   : > { %v4856_v8 = vunpack.c.l.b16 %v4840_v34  ;;  %v4813_v50 = vadd.f32 %v4795_v62, %v4773_v10 }
0x1ae0   : > { %v10709_v16 = vpack.c.b16 %v4856_v8, %v4855_v57  ;;  %v4821_v19 = vmax.f32 %v4813_v50, 0.0 }
0x1ae2   : > { %4893 = vrot.lane.b32.xlu0 %v10709_v16, %s8294_s25  ;;  %v4833_v33 = vmul.f32 %v8258_v31, %v4821_v19 }
0x1ae3   : > { %v4713_v55 = vpop.f32.mrf.mxu0 }
0x1ae4   : > { %v4774_v27 = vmul.f32 %v4757_v35, %v4713_v55  ;;  %v4841_v36 = vpack.c.bf16 %v4833_v33, %v4833_v33  ;;  %v4779_v35 = vpop.permute.xlu1 %4778 }
0x1ae5   : > { %v4809_v15 = vadd.f32 %v4779_v35, %v4769_v59 }
0x1ae6   : > { %v4814_v11 = vadd.f32 %v4799_v53, %v4774_v27  ;;  %v4857_v61 = vunpack.c.l.b16 %v4841_v36 }
0x1ae7   : > { %v4817_v32 = vmax.f32 %v4809_v15, 0.0 }
0x1ae8   : > { %v4822_v37 = vmax.f32 %v4814_v11, 0.0 }
0x1ae9   : > { %v4829_v44 = vmul.f32 %v8258_v31, %v4817_v32 }
0x1aea   : > { %v4834_v60 = vmul.f32 %v8258_v31, %v4822_v37 }
0x1aeb   : > { %v4716_v40 = vpop.f32.mrf.mxu0  ;;  %v4837_v57 = vpack.c.bf16 %v4829_v44, %v4829_v44 }
0x1aec   : > { %v4842_v20 = vpack.c.bf16 %v4834_v60, %v4834_v60  ;;  %v4775_v54 = vmul.f32 %v4762_v4, %v4716_v40 }
0x1aee   : > { %v4858_v2 = vunpack.c.l.b16 %v4842_v20  ;;  %v4815_v62 = vadd.f32 %v4803_v24, %v4775_v54  ;;  %v4818_v24 = vmax.f32 %v4810_v52, 0.0 }
0x1af0   : > { %v10713_v25 = vpack.c.b16 %v4858_v2, %v4857_v61  ;;  %v4823_v51 = vmax.f32 %v4815_v62, 0.0  ;;  %v4830_v29 = vmul.f32 %v8258_v31, %v4818_v24 }
0x1af2   : > { %4895 = vrot.lane.b32.xlu2 %v10713_v25, %s8294_s25  ;;  %4881 = vrot.lane.b32.xlu0 %v10713_v25, %s8277_s20  ;;  %v4835_v5 = vmul.f32 %v8258_v31, %v4823_v51  ;;  %v4838_v34 = vpack.c.bf16 %v4830_v29, %v4830_v29 }
0x1af3   : > { %v4718_v53 = vpop.f32.mrf.mxu0 }
0x1af4   : > { %v4776_v4 = vmul.f32 %v4767_v1, %v4718_v53  ;;  %v4843_v17 = vpack.c.bf16 %v4835_v5, %v4835_v5  ;;  %v4854_v1 = vunpack.c.l.b16 %v4838_v34  ;;  %v8059_v34 = vld [vmem:[%s12450_s1 + $0x3c4] sm:$0xf] }
0x1af6   : > { %v4816_v6 = vadd.f32 %v4807_v41, %v4776_v4  ;;  %v4859_v13 = vunpack.c.l.b16 %v4843_v17  ;;  %v4853_v41 = vunpack.c.l.b16 %v4837_v57  ;;  %v7694_v57 = vld [vmem:[%s12450_s1 + $0x3d4] sm:$0xf0] }
0x1af8   : > { %v4824_v3 = vmax.f32 %v4816_v6, 0.0  ;;  %v10725_v8 = vpack.c.b16 %v4854_v1, %v4853_v41 }
0x1afa   : > { %v4836_v43 = vmul.f32 %v8258_v31, %v4824_v3  ;;  %v10733_v31 = vpop.permute.xlu0 %4889 }
0x1afb   : > { %12486 = vst [vmem:[#allocation7_spill] sm:$0xff] %v10733_v31 }
0x1afc   : > { %v4844_v63 = vpack.c.bf16 %v4836_v43, %v4836_v43 }
0x1afe   : > { %v4860_v14 = vunpack.c.l.b16 %v4844_v63 }
0x1b00   : > { %v10719_v10 = vpack.c.b16 %v4860_v14, %v4859_v13 }
0x1b02   : > { %4897 = vrot.lane.b32.xlu1 %v10719_v10, %s8294_s25  ;;  %4883 = vrot.lane.b32.xlu2 %v10719_v10, %s8277_s20 }
0x1b0a   : > { %4877 = vrot.lane.b32.xlu2 %v10725_v8, %s8277_s20  ;;  %4891 = vrot.lane.b32.xlu1 %v10725_v8, %s8294_s25 }
0x1b12   : > { %4879 = vrot.lane.b32.xlu1 %v10709_v16, %s8277_s20 }
0x1b4c   : > { %v4896_v50 = vpop.permute.xlu2 %4895 }
0x1b4d   : > { %5139 = vrot.lane.b32.xlu0 %v4896_v50, %s8295_s19  ;;  %v4902_v27 = vsel %vm4899_vm10, %v10733_v31, %v4896_v50 }
0x1b54   : > { %v4894_v19 = vpop.permute.xlu0 %4893 }
0x1b55   : > { %5135 = vrot.lane.b32.xlu2 %v4894_v19, %s8295_s19  ;;  %v4901_v55 = vsel %vm4899_vm10, %v10733_v31, %v4894_v19  ;;  %v7697_v19 = vor.u32 %v8059_v34, %v7694_v57 }
0x1b56   : > { %5133 = vrot.lane.b32.xlu1 %v4901_v55, %s8295_s19 }
0x1b5c   : > { %v4884_v33 = vpop.permute.xlu2 %4883 }
0x1b5d   : > { %5137 = vrot.lane.b32.xlu2 %v4902_v27, %s8295_s19  ;;  %v4888_v11 = vsel %vm372_vm7, %v8448_v45, %v4884_v33 }
0x1b64   : > { %v4882_v37 = vpop.permute.xlu0 %4881  ;;  %v4878_v22 = vpop.permute.xlu2 %4877 }
0x1b65   : > { %5125 = vrot.lane.b32.xlu2 %v4888_v11, %s8295_s19  ;;  %v4885_v60 = vsel %vm372_vm7, %v8448_v45, %v4878_v22  ;;  %v4887_v58 = vsel %vm372_vm7, %v8448_v45, %v4882_v37 }
0x1b6d   : > { %5123 = vrot.lane.b32.xlu2 %v4882_v37, %s8295_s19 }
0x1b74   : > { %v4898_v36 = vpop.permute.xlu1 %4897 }
0x1b75   : > { %5113 = vrot.lane.b32.xlu2 %v4885_v60, %s8295_s19  ;;  %5143 = vrot.lane.b32.xlu1 %v4898_v36, %s8295_s19  ;;  %v4903_v40 = vsel %vm4899_vm10, %v10733_v31, %v4898_v36 }
0x1b76   : > { %5141 = vrot.lane.b32.xlu0 %v4903_v40, %s8295_s19 }
0x1b7c   : > { %v4892_v20 = vpop.permute.xlu1 %4891 }
0x1b7d   : > { %4871 = vrot.lane.b32.xlu2 %v10719_v10, %s8279_s22  ;;  %5131 = vrot.lane.b32.xlu1 %v4892_v20, %s8295_s19  ;;  %v4900_v54 = vsel %vm4899_vm10, %v10733_v31, %v4892_v20  ;;  %v8069_v20 = vld [vmem:[%s12450_s1 + $0x414] sm:$0xf] }
0x1b7e   : > { %5129 = vrot.lane.b32.xlu0 %v4900_v54, %s8295_s19 }
0x1b84   : > { %v4880_v61 = vpop.permute.xlu1 %4879 }
0x1b85   : > { %4914 = vrot.lane.b32.xlu2 %v10709_v16, %s8288_s12  ;;  %5121 = vrot.lane.b32.xlu1 %v4887_v58, %s8295_s19  ;;  %v4886_v2 = vsel %vm372_vm7, %v8448_v45, %v4880_v61 }
0x1b86   : > { %5127 = vrot.lane.b32.xlu0 %v4884_v33, %s8295_s19 }
0x1b8d   : > { %4865 = vrot.lane.b32.xlu2 %v10725_v8, %s8279_s22  ;;  %5119 = vrot.lane.b32.xlu1 %v4880_v61, %s8295_s19 }
0x1b8e   : > { %5117 = vrot.lane.b32.xlu0 %v4886_v2, %s8295_s19  ;;  %v7754_v2 = vld [vmem:[%s12450_s1 + $0x44c] sm:$0xf0] }
0x1b95   : > { %4906 = vrot.lane.b32.xlu2 %v10709_v16, %s8296_s14  ;;  %4918 = vrot.lane.b32.xlu1 %v10719_v10, %s8288_s12 }
0x1b96   : > { %5115 = vrot.lane.b32.xlu0 %v4878_v22, %s8295_s19 }
0x1b9d   : > { %4869 = vrot.lane.b32.xlu1 %v10713_v25, %s8279_s22 }
0x1b9e   : > { %4916 = vrot.lane.b32.xlu0 %v10713_v25, %s8288_s12 }
0x1ba5   : > { %4912 = vrot.lane.b32.xlu1 %v10725_v8, %s8288_s12 }
0x1ba6   : > { %4867 = vrot.lane.b32.xlu0 %v10709_v16, %s8279_s22 }
0x1bad   : > { %4908 = vrot.lane.b32.xlu1 %v10713_v25, %s8296_s14 }
0x1bae   : > { %4910 = vrot.lane.b32.xlu0 %v10719_v10, %s8296_s14 }
0x1baf   : > { %v5136_v62 = vpop.permute.xlu2 %5135 }
0x1bb6   : > { %4904 = vrot.lane.b32.xlu0 %v10725_v8, %s8296_s14 }
0x1bb7   : > { %v5138_v59 = vpop.permute.xlu2 %5137 }
0x1bbf   : > { %v5140_v46 = vpop.permute.xlu0 %5139  ;;  %v5126_v5 = vpop.permute.xlu2 %5125 }
0x1bc0   : > { %v5232_v52 = vsel %vm5217_vm11, %v5138_v59, %v5140_v46 }
0x1bc7   : > { %v5124_v43 = vpop.permute.xlu2 %5123 }
0x1bc8   : > { %v5134_v12 = vpop.permute.xlu1 %5133 }
0x1bc9   : > { %v5231_v6 = vsel %vm5217_vm11, %v5134_v12, %v5136_v62 }
0x1bcf   : > { %v5114_v14 = vpop.permute.xlu2 %5113 }
0x1bd7   : > { %v4872_v55 = vpop.permute.xlu2 %4871 }
0x1bdf   : > { %v4915_v22 = vpop.permute.xlu2 %4914 }
0x1be0   : > { %v4921_v60 = vsel %vm3251_vm1, %v4915_v22, %v9874_v26 }
0x1be7   : > { %v5144_v51 = vpop.permute.xlu1 %5143 }
0x1be8   : > { %v5142_v35 = vpop.permute.xlu0 %5141 }
0x1be9   : > { %v5233_v53 = vsel %vm5217_vm11, %v5142_v35, %v5144_v51  ;;  %v4876_v51 = vsel %vm360_vm8, %v9493_v42, %v4872_v55 }
0x1bea   : > { %5328 = vmatpush.bf16.msrb.mxu2 %v5233_v53 }
0x1bee   : > { %5329 = vmatpush.bf16.msrb.mxu2 %v5232_v52 }
0x1bef   : > { %v5132_v4 = vpop.permute.xlu1 %5131 }
0x1bf0   : > { %v5130_v15 = vpop.permute.xlu0 %5129 }
0x1bf1   : > { %v5230_v24 = vsel %vm5217_vm11, %v5130_v15, %v5132_v4 }
0x1bf2   : > { %5330 = vmatpush.bf16.msrb.mxu2 %v5231_v6 }
0x1bf6   : > { %5331 = vmatpush.bf16.msrb.mxu2 %v5230_v24 }
0x1bf7   : > { %v5122_v3 = vpop.permute.xlu1 %5121 }
0x1bf8   : > { %v5128_v32 = vpop.permute.xlu0 %5127  ;;  %v5228_v29 = vsel %vm5217_vm11, %v5122_v3, %v5124_v43 }
0x1bf9   : > { %v5229_v17 = vsel %vm5217_vm11, %v5126_v5, %v5128_v32 }
0x1bfa   : > { %5332 = vmatpush.bf16.msrb.mxu2 %v5229_v17 }
0x1bfe   : > { %5333 = vmatpush.bf16.msrb.mxu2 %v5228_v29 }
0x1bff   : > { %v5120_v63 = vpop.permute.xlu1 %5119 }
0x1c00   : > { %v5118_v44 = vpop.permute.xlu0 %5117 }
0x1c01   : > { %v5227_v13 = vsel %vm5217_vm11, %v5118_v44, %v5120_v63 }
0x1c02   : > { %5334 = vmatpush.bf16.msrb.mxu2 %v5227_v13 }
0x1c07   : > { %v10804_v1 = vpop.permute.xlu1 %4918 }
0x1c08   : > { %v5116_v41 = vpop.permute.xlu0 %5115  ;;  %5165 = vrot.lane.b32.xlu1 %v10804_v1, %s8295_s19  ;;  %v4923_v35 = vsel %vm3251_vm1, %v10804_v1, %v9874_v26 }
0x1c09   : > { %v5226_v50 = vsel %vm5217_vm11, %v5114_v14, %v5116_v41 }
0x1c0a   : > { %5335 = vmatpush.bf16.msrb.mxu2 %v5226_v50 }
0x1c0d   : > { %5336 = vmatmul.bf16.vlgmr.msrb.gmra.mxu2 %v7697_v19 }
0x1c0e   : > { %5542 = vmatpush.bf16.msra.mxu2 %v10589_v39  ;;  %v8064_v39 = vld [vmem:[%s12450_s1 + $0x3ec] sm:$0xf] }
0x1c0f   : > { %v4870_v11 = vpop.permute.xlu1 %4869 }
0x1c10   : > { %v4917_v27 = vpop.permute.xlu0 %4916  ;;  %5111 = vrot.lane.b32.xlu1 %v4872_v55, %s8295_s19  ;;  %v4875_v37 = vsel %vm360_vm8, %v9493_v42, %v4870_v11 }
0x1c11   : > { %5161 = vrot.lane.b32.xlu2 %v4917_v27, %s8295_s19  ;;  %v4922_v33 = vsel %vm3251_vm1, %v4917_v27, %v9874_v26 }
0x1c12   : > { %5543 = vmatpush.bf16.msra.mxu2 %v10598_v38  ;;  %5163 = vrot.lane.b32.xlu0 %v4922_v33, %s8295_s19  ;;  %v7714_v38 = vld [vmem:[%s12450_s1 + $0x3fc] sm:$0xf0] }
0x1c16   : > { %5544 = vmatpush.bf16.msra.mxu2 %v10644_v49  ;;  %v7717_v49 = vor.u32 %v8064_v39, %v7714_v38 }
0x1c17   : > { %v4913_v40 = vpop.permute.xlu1 %4912 }
0x1c18   : > { %5105 = vrot.lane.b32.xlu1 %v4875_v37, %s8295_s19  ;;  %v4868_v36 = vpop.permute.xlu0 %4867  ;;  %v4920_v54 = vsel %vm3251_vm1, %v4913_v40, %v9874_v26 }
0x1c19   : > { %5107 = vrot.lane.b32.xlu2 %v4870_v11, %s8295_s19 }
0x1c1a   : > { %5545 = vmatpush.bf16.msra.mxu2 %v10653_v21  ;;  %5157 = vrot.lane.b32.xlu0 %v4915_v22, %s8295_s19  ;;  %v4874_v21 = vsel %vm360_vm8, %v9493_v42, %v4868_v36 }
0x1c1d   : > { %5341 = vmatmul.bf16.gmra.mxu2 %v7717_v49 }
0x1c1e   : > { %5546 = vmatpush.bf16.msra.mxu2 %v10659_v23  ;;  %v4866_v23 = vpop.permute.xlu2 %4865 }
0x1c1f   : > { %v4909_v62 = vpop.permute.xlu1 %4908 }
0x1c20   : > { %5159 = vrot.lane.b32.xlu1 %v4921_v60, %s8295_s19  ;;  %v4911_v61 = vpop.permute.xlu0 %4910 }
0x1c21   : > { %5101 = vrot.lane.b32.xlu2 %v4874_v21, %s8295_s19 }
0x1c22   : > { %5547 = vmatpush.bf16.msra.mxu2 %v10666_v48  ;;  %5103 = vrot.lane.b32.xlu0 %v4868_v36, %s8295_s19  ;;  %v7734_v48 = vld [vmem:[%s12450_s1 + $0x424] sm:$0xf0] }
0x1c23   : > { %v7737_v58 = vor.u32 %v8069_v20, %v7734_v48  ;;  %v7700_v48 = vld [vmem:[%s12450_s1 + $0x3c8] sm:$0xf] }
0x1c26   : > { %5548 = vmatpush.bf16.msra.mxu2 %v10672_v56  ;;  %v4873_v56 = vsel %vm360_vm8, %v9493_v42, %v4866_v23  ;;  %v4907_v46 = vpop.permute.xlu2 %4906 }
0x1c28   : > { %5153 = vrot.lane.b32.xlu1 %v4913_v40, %s8295_s19  ;;  %v4905_v59 = vpop.permute.xlu0 %4904 }
0x1c29   : > { %5155 = vrot.lane.b32.xlu2 %v4920_v54, %s8295_s19  ;;  %v8062_v54 = vld [vmem:[%s12450_s1 + $0x3d8] sm:$0xf0] }
0x1c2a   : > { %5549 = vmatpush.bf16.msra.mxu2 %v10682_v28  ;;  %5097 = vrot.lane.b32.xlu0 %v4873_v56, %s8295_s19  ;;  %v8074_v28 = vld [vmem:[%s12450_s1 + $0x43c] sm:$0xf] }
0x1c2b   : > { %v7757_v12 = vor.u32 %v8074_v28, %v7754_v2 }
0x1c2d   : > { %5346 = vmatmul.bf16.gmra.mxu2 %v7737_v58 }
0x1c30   : > { %5099 = vrot.lane.b32.xlu1 %v4866_v23, %s8295_s19 }
0x1c31   : > { %5151 = vrot.lane.b32.xlu2 %v4911_v61, %s8295_s19  ;;  %v7701_v61 = vor.u32 %v8062_v54, %v7700_v48  ;;  %v7732_v54 = vld [vmem:[%s12450_s1 + $0x410] sm:$0xf] }
0x1c32   : > { %5087 = vrot.lane.b32.xlu0 %v12463_v0, %s8295_s19 }
0x1c38   : > { %5095 = vrot.lane.b32.xlu1 %v10719_v10, %s8295_s19 }
0x1c39   : > { %5149 = vrot.lane.b32.xlu2 %v4909_v62, %s8295_s19 }
0x1c3a   : > { %5093 = vrot.lane.b32.xlu0 %v10713_v25, %s8295_s19 }
0x1c3d   : > { %5351 = vmatmul.bf16.gmra.mxu2 %v7757_v12 }
0x1c40   : > { %5147 = vrot.lane.b32.xlu1 %v4907_v46, %s8295_s19 }
0x1c41   : > { %4938 = vrot.lane.b32.xlu2 %v12463_v0, %s8297_s27 }
0x1c42   : > { %4944 = vrot.lane.b32.xlu0 %v10719_v10, %s8297_s27 }
0x1c48   : > { %5091 = vrot.lane.b32.xlu1 %v10709_v16, %s8295_s19 }
0x1c49   : > { %5145 = vrot.lane.b32.xlu2 %v4905_v59, %s8295_s19 }
0x1c4a   : > { %5109 = vrot.lane.b32.xlu0 %v4876_v51, %s8295_s19 }
0x1c4d   : > { %5550 = vmatmul.bf16.vlgmr.msra.gmra.mxu2 %v10422_v7 }
0x1c50   : > { %5089 = vrot.lane.b32.xlu1 %v10725_v8, %s8295_s19 }
0x1c51   : > { %5167 = vrot.lane.b32.xlu2 %v4923_v35, %s8295_s19 }
0x1c52   : > { %4942 = vrot.lane.b32.xlu0 %v10713_v25, %s8297_s27 }
0x1c58   : > { %4930 = vrot.lane.b32.xlu1 %v10719_v10, %s8290_s16 }
0x1c59   : > { %4940 = vrot.lane.b32.xlu2 %v10709_v16, %s8297_s27 }
0x1c5a   : > { %4936 = vrot.lane.b32.xlu0 %v10725_v8, %s8297_s27 }
0x1c5d   : > { %5555 = vmatmul.bf16.gmra.mxu2 %v10439_v18 }
0x1c60   : > { %4955 = vrot.lane.b32.xlu1 %v10713_v25, %s12487_s24 }
0x1c61   : > { %4957 = vrot.lane.b32.xlu2 %v10719_v10, %s12487_s24 }
0x1c62   : > { %4928 = vrot.lane.b32.xlu0 %v10713_v25, %s8290_s16 }
0x1c68   : > { %4924 = vrot.lane.b32.xlu1 %v10725_v8, %s8290_s16 }
0x1c69   : > { %4926 = vrot.lane.b32.xlu2 %v10709_v16, %s8290_s16 }
0x1c6a   : > { %4953 = vrot.lane.b32.xlu0 %v10709_v16, %s12487_s24 }
0x1c6b   : > { %v5162_v7 = vpop.permute.xlu2 %5161 }
0x1c71   : > { %4951 = vrot.lane.b32.xlu2 %v10725_v8, %s12487_s24 }
0x1c73   : > { %v5108_v18 = vpop.permute.xlu2 %5107 }
0x1c7a   : > { %v5166_v53 = vpop.permute.xlu1 %5165 }
0x1c7b   : > { %v5102_v52 = vpop.permute.xlu2 %5101 }
0x1c82   : > { %v5112_v10 = vpop.permute.xlu1 %5111 }
0x1c83   : > { %v5156_v4 = vpop.permute.xlu2 %5155 }
0x1c84   : > { %v5164_v15 = vpop.permute.xlu0 %5163 }
0x1c85   : > { %v5236_v55 = vsel %vm5217_vm11, %v5162_v7, %v5164_v15  ;;  %v8061_v15 = vld [vmem:[%s12450_s1 + $0x3d0] sm:$0xf0] }
0x1c8a   : > { %v5106_v25 = vpop.permute.xlu1 %5105 }
0x1c8b   : > { %v5152_v5 = vpop.permute.xlu2 %5151  ;;  %v5224_v21 = vsel %vm5217_vm11, %v5106_v25, %v5108_v18 }
0x1c8c   : > { %v5158_v6 = vpop.permute.xlu0 %5157 }
0x1c90   : > { %v10909_v24 = vpop.f32.mrf.mxu2 }
0x1c92   : > { %v5160_v3 = vpop.permute.xlu1 %5159 }
0x1c93   : > { %v5150_v32 = vpop.permute.xlu2 %5149  ;;  %v5235_v39 = vsel %vm5217_vm11, %v5158_v6, %v5160_v3 }
0x1c94   : > { %v5104_v17 = vpop.permute.xlu0 %5103 }
0x1c95   : > { %v5223_v20 = vsel %vm5217_vm11, %v5102_v52, %v5104_v17  ;;  %v8067_v52 = vld [vmem:[%s12450_s1 + $0x400] sm:$0xf0] }
0x1c98   : > { %v10911_v43 = vpop.f32.mrf.mxu2 }
0x1c9a   : > { %v5154_v16 = vpop.permute.xlu1 %5153 }
0x1c9b   : > { %v10913_v29 = vpop.permute.xlu2 %4938  ;;  %v5234_v37 = vsel %vm5217_vm11, %v5154_v16, %v5156_v4  ;;  %v7692_v4 = vld [vmem:[%s12450_s1 + $0x3c0] sm:$0xf] }
0x1c9c   : > { %12488 = vst [vmem:[#allocation8_spill] sm:$0xff] %v10913_v29  ;;  %v5098_v8 = vpop.permute.xlu0 %5097  ;;  %v7693_v3 = vor.u32 %v8061_v15, %v7692_v4  ;;  %v5639_v4 = vld [vmem:[%s12451_s2 + $0x1d0] sm:$0xff]  ;;  %v7780_v15 = vld [vmem:[%s12450_s1 + $0x488] sm:$0xf] }
0x1ca0   : > { %v10915_v63 = vpop.f32.mrf.mxu2 }
0x1ca2   : > { %v5100_v44 = vpop.permute.xlu1 %5099 }
0x1ca3   : > { %v5146_v13 = vpop.permute.xlu2 %5145  ;;  %v5222_v28 = vsel %vm5217_vm11, %v5098_v8, %v5100_v44 }
0x1ca4   : > { %v10917_v14 = vpop.permute.xlu0 %5087 }
0x1ca5   : > { %12489 = vst [vmem:[#allocation9_spill] sm:$0xff] %v10917_v14 }
0x1ca8   : > { %v10919_v34 = vpop.f32.mrf.mxu2 }
0x1caa   : > { %v5096_v57 = vpop.permute.xlu1 %5095 }
0x1cab   : > { %v5168_v1 = vpop.permute.xlu2 %5167  ;;  %v5221_v46 = vsel %vm5217_vm11, %v10917_v14, %v5096_v57 }
0x1cac   : > { %v5237_v41 = vsel %vm5217_vm11, %v5166_v53, %v5168_v1  ;;  %v5094_v50 = vpop.permute.xlu0 %5093  ;;  %v7720_v53 = vld [vmem:[%s12450_s1 + $0x3f0] sm:$0xf]  ;;  %v7740_v1 = vld [vmem:[%s12450_s1 + $0x418] sm:$0xf] }
0x1cad   : > { %5357 = vmatpush.bf16.msrb.mxu3 %v5237_v41  ;;  %v5220_v35 = vsel %vm5217_vm11, %v10917_v14, %v5094_v50  ;;  %v8072_v41 = vld [vmem:[%s12450_s1 + $0x428] sm:$0xf0] }
0x1cb0   : > { %v10922_v19 = vpop.f32.mrf.mxu2 }
0x1cb1   : > { %5358 = vmatpush.bf16.msrb.mxu3 %v5236_v55  ;;  %v7712_v55 = vld [vmem:[%s12450_s1 + $0x3e8] sm:$0xf] }
0x1cb2   : > { %v5148_v27 = vpop.permute.xlu1 %5147 }
0x1cb3   : > { %v4941_v33 = vpop.permute.xlu2 %4940 }
0x1cb4   : > { %v10925_v11 = vpop.permute.xlu0 %4944  ;;  %5189 = vrot.lane.b32.xlu1 %v4941_v33, %s8295_s19  ;;  %v4948_v62 = vsel %vm4946_vm12, %v4941_v33, %v10913_v29 }
0x1cb5   : > { %5197 = vrot.lane.b32.xlu0 %v10925_v11, %s8295_s19  ;;  %5359 = vmatpush.bf16.msrb.mxu3 %v5235_v39  ;;  %v4950_v17 = vsel %vm4946_vm12, %v10925_v11, %v10913_v29  ;;  %v7741_v11 = vor.u32 %v8072_v41, %v7740_v1 }
0x1cb8   : > { %v10931_v38 = vpop.f32.mrf.mxu2 }
0x1cb9   : > { %5360 = vmatpush.bf16.msrb.mxu3 %v5234_v37 }
0x1cba   : > { %v5092_v49 = vpop.permute.xlu1 %5091 }
0x1cbb   : > { %v4958_v18 = vpop.permute.xlu2 %4957 }
0x1cbc   : > { %v5110_v22 = vpop.permute.xlu0 %5109 }
0x1cbd   : > { %v5225_v36 = vsel %vm5217_vm11, %v5110_v22, %v5112_v10  ;;  %5361 = vmatpush.bf16.msrb.mxu3 %v5152_v5  ;;  %v5219_v10 = vsel %vm5217_vm11, %v10917_v14, %v5092_v49  ;;  %v7721_v5 = vor.u32 %v8067_v52, %v7720_v53  ;;  %v4962_v22 = vsel %vm2382_vm0, %v4958_v18, %v9482_v30  ;;  %v5450_v52 = vld [vmem:[%s12451_s2 + $0x188] sm:$0xff] }
0x1cbe   : > { %5299 = vmatpush.bf16.msra.mxu1 %v5225_v36 }
0x1cc0   : > { %v10935_v60 = vpop.f32.mrf.mxu2 }
0x1cc1   : > { %5362 = vmatpush.bf16.msrb.mxu3 %v5150_v32 }
0x1cc2   : > { %5300 = vmatpush.bf16.msra.mxu1 %v5224_v21  ;;  %v5090_v56 = vpop.permute.xlu1 %5089 }
0x1cc3   : > { %v5218_v6 = vsel %vm5217_vm11, %v10917_v14, %v5090_v56  ;;  %v4927_v44 = vpop.permute.xlu2 %4926  ;;  %v8071_v56 = vld [vmem:[%s12450_s1 + $0x420] sm:$0xf0] }
0x1cc4   : > { %v4943_v40 = vpop.permute.xlu0 %4942 }
0x1cc5   : > { %5193 = vrot.lane.b32.xlu2 %v4943_v40, %s8295_s19  ;;  %5363 = vmatpush.bf16.msrb.mxu3 %v5148_v27  ;;  %v4949_v23 = vsel %vm4946_vm12, %v4943_v40, %v10913_v29  ;;  %v8066_v27 = vld [vmem:[%s12450_s1 + $0x3f8] sm:$0xf0] }
0x1cc6   : > { %5195 = vrot.lane.b32.xlu0 %v4949_v23, %s8295_s19  ;;  %5301 = vmatpush.bf16.msra.mxu1 %v5223_v20  ;;  %v7713_v37 = vor.u32 %v8066_v27, %v7712_v55  ;;  %v7760_v23 = vld [vmem:[%s12450_s1 + $0x440] sm:$0xf]  ;;  %v8077_v20 = vld [vmem:[%s12450_s1 + $0x450] sm:$0xf0]  ;;  %v7788_v55 = vld [vmem:[%s12450_s1 + $0x4d8] sm:$0xf] }
0x1cc7   : > { %v8082_v27 = vld [vmem:[%s12450_s1 + $0x4e8] sm:$0xf0] }
0x1cc8   : > { %v10949_v58 = vpop.f32.mrf.mxu2 }
0x1cc9   : > { %5364 = vmatpush.bf16.msrb.mxu3 %v5146_v13  ;;  %v4933_v13 = vsel %vm3264_vm4, %v4927_v44, %v9876_v9 }
0x1cca   : > { %5302 = vmatpush.bf16.msra.mxu1 %v5222_v28  ;;  %v4931_v51 = vpop.permute.xlu1 %4930 }
0x1ccb   : > { %v4935_v50 = vsel %vm3264_vm4, %v4931_v51, %v9876_v9  ;;  %v4952_v28 = vpop.permute.xlu2 %4951 }
0x1ccc   : > { %v4937_v2 = vpop.permute.xlu0 %4936  ;;  %5365 = vmatmul.bf16.vlgmr.msrb.gmra.mxu3 %v7701_v61  ;;  %v7761_v61 = vor.u32 %v8077_v20, %v7760_v23  ;;  %v5633_v23 = vld [vmem:[%s12451_s2 + $0x1a0] sm:$0xff] }
0x1ccd   : > { %5191 = vrot.lane.b32.xlu2 %v4948_v62, %s8295_s19  ;;  %v4947_v12 = vsel %vm4946_vm12, %v4937_v2, %v10913_v29  ;;  %v4959_v62 = vsel %vm2382_vm0, %v4952_v28, %v9482_v30 }
0x1cce   : > { %5185 = vrot.lane.b32.xlu0 %v4937_v2, %s8295_s19  ;;  %5187 = vrot.lane.b32.xlu1 %v4947_v12, %s8295_s19  ;;  %v7733_v2 = vor.u32 %v8071_v56, %v7732_v54  ;;  %v5638_v12 = vld [vmem:[%s12451_s2 + $0x1c8] sm:$0xff] }
0x1ccf   : > { %5303 = vmatpush.bf16.msra.mxu1 %v5221_v46  ;;  %v5451_v46 = vld [vmem:[%s12451_s2 + $0x190] sm:$0xff] }
0x1cd0   : > { %v5551_v59 = vpop.f32.mrf.mxu2 }
0x1cd2   : > { %v4956_v32 = vpop.permute.xlu1 %4955 }
0x1cd3   : > { %5304 = vmatpush.bf16.msra.mxu1 %v5220_v35  ;;  %v4961_v16 = vsel %vm2382_vm0, %v4956_v32, %v9482_v30  ;;  %v7752_v35 = vld [vmem:[%s12450_s1 + $0x438] sm:$0xf] }
0x1cd4   : > { %v4929_v7 = vpop.permute.xlu0 %4928 }
0x1cd5   : > { %5181 = vrot.lane.b32.xlu2 %v4931_v51, %s8295_s19  ;;  %v4934_v57 = vsel %vm3264_vm4, %v4929_v7, %v9876_v9  ;;  %v8079_v51 = vld [vmem:[%s12450_s1 + $0x470] sm:$0xf0] }
0x1cd6   : > { %5177 = vrot.lane.b32.xlu0 %v4929_v7, %s8295_s19  ;;  %5213 = vrot.lane.b32.xlu1 %v4958_v18, %s8295_s19  ;;  %v8076_v7 = vld [vmem:[%s12450_s1 + $0x448] sm:$0xf0] }
0x1cd7   : > { %5305 = vmatpush.bf16.msra.mxu1 %v5219_v10  ;;  %v7753_v53 = vor.u32 %v8076_v7, %v7752_v35  ;;  %v5634_v10 = vld [vmem:[%s12451_s2 + $0x1a8] sm:$0xff] }
0x1cd8   : > { %v5553_v25 = vpop.f32.mrf.mxu2 }
0x1cd9   : > { %v5569_v49 = vpack.c.bf16 %v5553_v25, %v5551_v59  ;;  %v7776_v59 = vld [vmem:[%s12450_s1 + $0x460] sm:$0xf]  ;;  %v8080_v25 = vld [vmem:[%s12450_s1 + $0x498] sm:$0xf0] }
0x1cda   : > { %v4925_v21 = vpop.permute.xlu1 %4924  ;;  %v7777_v18 = vor.u32 %v8079_v51, %v7776_v59  ;;  %v5632_v59 = vld [vmem:[%s12451_s2 + $0x198] sm:$0xff] }
0x1cdb   : > { %5306 = vmatpush.bf16.msra.mxu1 %v5218_v6  ;;  %v4932_v48 = vsel %vm3264_vm4, %v4925_v21, %v9876_v9  ;;  %v7781_v6 = vor.u32 %v8080_v25, %v7780_v15 }
0x1cdc   : > { %5370 = vmatmul.bf16.gmra.mxu3 %v7721_v5  ;;  %v4954_v36 = vpop.permute.xlu0 %4953  ;;  %v5448_v5 = vld [vmem:[%s12451_s2 + $0x178] sm:$0xff] }
0x1cdd   : > { %5209 = vrot.lane.b32.xlu2 %v4956_v32, %s8295_s19  ;;  %v4960_v40 = vsel %vm2382_vm0, %v4954_v36, %v9482_v30  ;;  %v5636_v32 = vld [vmem:[%s12451_s2 + $0x1b8] sm:$0xff] }
0x1cde   : > { %5307 = vmatmul.bf16.vlgmr.msra.gmra.mxu1 %v7693_v3  ;;  %5199 = vrot.lane.b32.xlu1 %v4950_v17, %s8295_s19  ;;  %v5449_v3 = vld [vmem:[%s12451_s2 + $0x180] sm:$0xff] }
0x1cdf   : > { %5211 = vrot.lane.b32.xlu0 %v4961_v16, %s8295_s19  ;;  %v7784_v16 = vld [vmem:[%s12450_s1 + $0x4b0] sm:$0xf] }
0x1ce0   : > { %v5556_v8 = vpop.f32.mrf.mxu2 }
0x1ce5   : > { %5175 = vrot.lane.b32.xlu2 %v4933_v13, %s8295_s19 }
0x1ce6   : > { %5179 = vrot.lane.b32.xlu1 %v4934_v57, %s8295_s19  ;;  %v5637_v57 = vld [vmem:[%s12451_s2 + $0x1c0] sm:$0xff] }
0x1ce7   : > { %5183 = vrot.lane.b32.xlu0 %v4935_v50, %s8295_s19  ;;  %v5446_v50 = vld [vmem:[%s12451_s2 + $0x168] sm:$0xff] }
0x1ce8   : > { %v5558_v33 = vpop.f32.mrf.mxu2 }
0x1ce9   : > { %v5570_v39 = vpack.c.bf16 %v5558_v33, %v5556_v8  ;;  %v8081_v8 = vld [vmem:[%s12450_s1 + $0x4c0] sm:$0xf0] }
0x1cea   : > { %v7785_v13 = vor.u32 %v8081_v8, %v7784_v16 }
0x1ceb   : > { %5609 = vmatpush.bf16.msra.mxu3 %v5570_v39 }
0x1cec   : > { %5375 = vmatmul.bf16.gmra.mxu3 %v7741_v11  ;;  %v5447_v11 = vld [vmem:[%s12451_s2 + $0x170] sm:$0xff] }
0x1ced   : > { %5215 = vrot.lane.b32.xlu2 %v4962_v22, %s8295_s19  ;;  %v7789_v22 = vor.u32 %v8082_v27, %v7788_v55 }
0x1cee   : > { %5312 = vmatmul.bf16.gmra.mxu1 %v7713_v37  ;;  %5173 = vrot.lane.b32.xlu1 %v4927_v44, %s8295_s19 }
0x1cef   : > { %5205 = vrot.lane.b32.xlu0 %v4954_v36, %s8295_s19  ;;  %5610 = vmatpush.bf16.msra.mxu3 %v5569_v49  ;;  %v5635_v49 = vld [vmem:[%s12451_s2 + $0x1b0] sm:$0xff] }
0x1cf5   : > { %5169 = vrot.lane.b32.xlu2 %v4925_v21, %s8295_s19 }
0x1cf6   : > { %5207 = vrot.lane.b32.xlu1 %v4960_v40, %s8295_s19 }
0x1cf7   : > { %5171 = vrot.lane.b32.xlu0 %v4932_v48, %s8295_s19 }
0x1cfc   : > { %5380 = vmatmul.bf16.gmra.mxu3 %v7761_v61  ;;  %v5444_v61 = vld [vmem:[%s12451_s2 + $0x158] sm:$0xff] }
0x1cfd   : > { %5203 = vrot.lane.b32.xlu2 %v4959_v62, %s8295_s19 }
0x1cfe   : > { %5317 = vmatmul.bf16.gmra.mxu1 %v7733_v2  ;;  %5201 = vrot.lane.b32.xlu1 %v4952_v28, %s8295_s19 }
0x1cff   : > { %5713 = vperm.xlu0 %8223, %v5638_v12  }
0x1d05   : > { %5672 = vperm.xlu2 %8220, %v5638_v12  }
0x1d06   : > { %5489 = vperm.xlu1 %8219, %v5451_v46  }
0x1d07   : > { %5697 = vperm.xlu0 %8223, %v5634_v10  }
0x1d0c   : > { %7790 = vmatmul.msk.bf16.vlgmr.msra.gmra.mxu3 %vm3430_vm9, %v7777_v18 }
0x1d0d   : > { %8222 = vset.pattern.permute.xlu2 %v12461_v47 }
0x1d0e   : > { %5322 = vmatmul.bf16.gmra.mxu1 %v7753_v53  ;;  %8221 = vset.pattern.permute.xlu1 %v12461_v47 }
0x1d0f   : > { %5525 = vperm.xlu1 %8221, %v5450_v52   ;;  %5529 = vperm.xlu2 %8222, %v5451_v46   ;;  %v5445_v46 = vld [vmem:[%s12451_s2 + $0x160] sm:$0xff] }
0x1d10   : > { %8232 = vset.pattern.permute.xlu0 %v12463_v0 }
0x1d11   : > { %5484 = vperm.xlu0 %8232, %v5450_v52  }
0x1d17   : > { %5717 = vperm.xlu1 %8221, %v5639_v4   ;;  %8224 = vset.pattern.permute.xlu2 %v12463_v0 }
0x1d18   : > { %5474 = vperm.xlu2 %8224, %v5448_v5  }
0x1d19   : > { %5677 = vperm.xlu0 %8232, %v5639_v4  }
0x1d1c   : > { %7791 = vmatmul.msk.bf16.gmra.mxu3 %vm3430_vm9, %v7781_v6 }
0x1d1f   : > { %v11087_v17 = vpop.permute.xlu2 %5193  ;;  %8225 = vset.pattern.permute.xlu1 %v12463_v0 }
0x1d20   : > { %5479 = vperm.xlu1 %8225, %v5449_v3   ;;  %5662 = vperm.xlu2 %8224, %v5636_v32  }
0x1d21   : > { %5667 = vperm.xlu0 %8232, %v5637_v57  }
0x1d26   : > { %v5190_v39 = vpop.permute.xlu1 %5189 }
0x1d27   : > { %v11096_v44 = vpop.permute.xlu2 %5191  ;;  %v5198_v41 = vpop.permute.xlu0 %5197 }
0x1d28   : > { %8226 = vset.pattern.permute.xlu1 %v12461_v47  ;;  %8227 = vset.pattern.permute.xlu2 %v12461_v47  ;;  %v5243_v53 = vsel %vm5217_vm11, %v5190_v39, %v11096_v44  ;;  %v8063_v39 = vld [vmem:[%s12450_s1 + $0x3e0] sm:$0xf0] }
0x1d29   : > { %5517 = vperm.xlu1 %8226, %v5448_v5   ;;  %5521 = vperm.xlu2 %8227, %v5449_v3  }
0x1d2a   : > { %5464 = vperm.xlu0 %8232, %v5446_v50  }
0x1d2c   : > { %7792 = vmatmul.msk.bf16.gmra.mxu3 %vm3430_vm9, %v7785_v13 }
0x1d2f   : > { %v11104_v1 = vpop.permute.xlu2 %5181 }
0x1d31   : > { %5705 = vperm.xlu1 %8226, %v5636_v32   ;;  %5709 = vperm.xlu2 %8227, %v5637_v57  }
0x1d32   : > { %5657 = vperm.xlu0 %8232, %v5635_v49  }
0x1d37   : > { %v5210_v33 = vpop.permute.xlu2 %5209 }
0x1d38   : > { %v5196_v37 = vpop.permute.xlu0 %5195 }
0x1d39   : > { %8228 = vset.pattern.permute.xlu1 %v12463_v0  ;;  %8229 = vset.pattern.permute.xlu2 %v12463_v0  ;;  %v5244_v35 = vsel %vm5217_vm11, %v11087_v17, %v5196_v37 }
0x1d3a   : > { %5469 = vperm.xlu1 %8228, %v5447_v11   ;;  %5652 = vperm.xlu2 %8229, %v5634_v10  }
0x1d3b   : > { %5647 = vperm.xlu0 %8232, %v5633_v23  }
0x1d3c   : > { %7793 = vmatmul.msk.bf16.gmra.mxu3 %vm3430_vm9, %v7789_v22 }
0x1d3f   : > { %v5176_v36 = vpop.permute.xlu2 %5175 }
0x1d40   : > { %v5186_v21 = vpop.permute.xlu0 %5185  ;;  %v5188_v40 = vpop.permute.xlu1 %5187 }
0x1d41   : > { %v5242_v15 = vsel %vm5217_vm11, %v5186_v21, %v5188_v40 }
0x1d42   : > { %8230 = vset.pattern.permute.xlu1 %v12461_v47  ;;  %8231 = vset.pattern.permute.xlu2 %v12461_v47 }
0x1d43   : > { %5509 = vperm.xlu1 %8230, %v5446_v50   ;;  %5513 = vperm.xlu2 %8231, %v5447_v11   ;;  %v7708_v11 = vld [vmem:[%s12450_s1 + $0x3d0] sm:$0xf] }
0x1d44   : > { %v7709_v21 = vor.u32 %v8063_v39, %v7708_v11 }
0x1d47   : > { %v5216_v20 = vpop.permute.xlu2 %5215 }
0x1d48   : > { %v5178_v48 = vpop.permute.xlu0 %5177  ;;  %v5214_v54 = vpop.permute.xlu1 %5213 }
0x1d49   : > { %v5249_v56 = vsel %vm5217_vm11, %v5214_v54, %v5216_v20  ;;  %v8065_v20 = vld [vmem:[%s12450_s1 + $0x3f4] sm:$0xf] }
0x1d4a   : > { %5419 = vmatpush.bf16.msrb.mxu1 %v5249_v56 }
0x1d4b   : > { %5701 = vperm.xlu1 %8230, %v5635_v49   ;;  %8233 = vset.pattern.permute.xlu2 %v12463_v0 }
0x1d4c   : > { %5454 = vperm.xlu2 %8233, %v5444_v61  }
0x1d4f   : > { %v5366_v2 = vpop.f32.mrf.mxu3  ;;  %v5170_v16 = vpop.permute.xlu2 %5169 }
0x1d50   : > { %v5200_v28 = vpop.permute.xlu1 %5199 }
0x1d51   : > { %v5212_v62 = vpop.permute.xlu0 %5211  ;;  %v5245_v12 = vsel %vm5217_vm11, %v5198_v41, %v5200_v28  ;;  %v7702_v41 = vld [vmem:[%s12450_s1 + $0x3dc] sm:$0xf0]  ;;  %v7728_v28 = vld [vmem:[%s12450_s1 + $0x3f8] sm:$0xf] }
0x1d52   : > { %5386 = vmatpush.bf16.msrb.mxu0 %v5245_v12  ;;  %v5248_v51 = vsel %vm5217_vm11, %v5210_v33, %v5212_v62 }
0x1d53   : > { %5420 = vmatpush.bf16.msrb.mxu1 %v5248_v51  ;;  %8234 = vset.pattern.permute.xlu1 %v12463_v0  ;;  %v8070_v51 = vld [vmem:[%s12450_s1 + $0x41c] sm:$0xf] }
0x1d54   : > { %5459 = vperm.xlu1 %8234, %v5445_v46   ;;  %5642 = vperm.xlu2 %8233, %v5632_v59  }
0x1d56   : > { %5387 = vmatpush.bf16.msrb.mxu0 %v5244_v35  ;;  %v7742_v35 = vld [vmem:[%s12450_s1 + $0x42c] sm:$0xf0] }
0x1d57   : > { %v11147_v52 = vpop.f32.mrf.mxu3  ;;  %v5204_v49 = vpop.permute.xlu2 %5203 }
0x1d58   : > { %v5180_v7 = vpop.permute.xlu1 %5179 }
0x1d59   : > { %v5184_v18 = vpop.permute.xlu0 %5183  ;;  %v5240_v17 = vsel %vm5217_vm11, %v5178_v48, %v5180_v7  ;;  %v7722_v48 = vld [vmem:[%s12450_s1 + $0x404] sm:$0xf0] }
0x1d5a   : > { %5388 = vmatpush.bf16.msrb.mxu0 %v5243_v53  ;;  %v5241_v3 = vsel %vm5217_vm11, %v11104_v1, %v5184_v18  ;;  %v8060_v1 = vld [vmem:[%s12450_s1 + $0x3cc] sm:$0xf] }
0x1d5b   : > { %v5308_v10 = vpop.f32.mrf.mxu1  ;;  %v7705_v33 = vor.u32 %v8060_v1, %v7702_v41 }
0x1d5c   : > { %v5338_v4 = vadd.f32 %v10909_v24, %v5308_v10  ;;  %8235 = vset.pattern.permute.xlu1 %v12461_v47  ;;  %8236 = vset.pattern.permute.xlu2 %v12461_v47  ;;  %v7745_v10 = vor.u32 %v8070_v51, %v7742_v35 }
0x1d5d   : > { %5501 = vperm.xlu1 %8235, %v5444_v61   ;;  %5505 = vperm.xlu2 %8236, %v5445_v46   ;;  %v7725_v61 = vor.u32 %v8065_v20, %v7722_v48 }
0x1d5e   : > { %5389 = vmatpush.bf16.msrb.mxu0 %v5242_v15  ;;  %v11153_v25 = vadd.f32 %v5366_v2, %v5338_v4  ;;  %v8068_v2 = vld [vmem:[%s12450_s1 + $0x408] sm:$0xf0]  ;;  %v7748_v15 = vld [vmem:[%s12450_s1 + $0x420] sm:$0xf] }
0x1d5f   : > { %v5371_v24 = vpop.f32.mrf.mxu3  ;;  %v7729_v12 = vor.u32 %v8068_v2, %v7728_v28  ;;  %v11214_v4 = vpop.permute.xlu2 %5672 }
0x1d60   : > { %v5174_v5 = vpop.permute.xlu1 %5173 }
0x1d61   : > { %v5206_v6 = vpop.permute.xlu0 %5205  ;;  %v5239_v44 = vsel %vm5217_vm11, %v5174_v5, %v5176_v36  ;;  %v8073_v5 = vld [vmem:[%s12450_s1 + $0x430] sm:$0xf0] }
0x1d62   : > { %5390 = vmatpush.bf16.msrb.mxu0 %v5241_v3  ;;  %v7749_v3 = vor.u32 %v8073_v5, %v7748_v15 }
0x1d63   : > { %v11157_v32 = vpop.f32.mrf.mxu1 }
0x1d65   : > { %5689 = vperm.xlu1 %8235, %v5632_v59   ;;  %5693 = vperm.xlu2 %8236, %v5633_v23  }
0x1d66   : > { %5391 = vmatpush.bf16.msrb.mxu0 %v5240_v17  ;;  %v8075_v17 = vld [vmem:[%s12450_s1 + $0x444] sm:$0xf] }
0x1d67   : > { %v11179_v22 = vpop.f32.mrf.mxu3 }
0x1d68   : > { %v5208_v8 = vpop.permute.xlu1 %5207 }
0x1d69   : > { %v5247_v13 = vsel %vm5217_vm11, %v5206_v6, %v5208_v8  ;;  %v5172_v57 = vpop.permute.xlu0 %5171 }
0x1d6a   : > { %5392 = vmatpush.bf16.msrb.mxu0 %v5239_v44  ;;  %5421 = vmatpush.bf16.msrb.mxu1 %v5247_v13  ;;  %v5238_v27 = vsel %vm5217_vm11, %v5170_v16, %v5172_v57  ;;  %v7762_v16 = vld [vmem:[%s12450_s1 + $0x454] sm:$0xf0]  ;;  %v7768_v13 = vld [vmem:[%s12450_s1 + $0x448] sm:$0xf]  ;;  %v8078_v57 = vld [vmem:[%s12450_s1 + $0x458] sm:$0xf0] }
0x1d6b   : > { %v5313_v50 = vpop.f32.mrf.mxu1  ;;  %v7765_v44 = vor.u32 %v8075_v17, %v7762_v16  ;;  %v7769_v1 = vor.u32 %v8078_v57, %v7768_v13 }
0x1d6c   : > { %v5343_v55 = vadd.f32 %v10915_v63, %v5313_v50 }
0x1d6d   : > { %8237 = vset.pattern.permute.xlu1 %v12463_v0 }
0x1d6e   : > { %5393 = vmatpush.bf16.msrb.mxu0 %v5238_v27  ;;  %v11177_v37 = vadd.f32 %v5371_v24, %v5343_v55 }
0x1d6f   : > { %v5376_v23 = vpop.f32.mrf.mxu3 }
0x1d70   : > { %v5202_v63 = vpop.permute.xlu1 %5201 }
0x1d71   : > { %5394 = vmatmul.bf16.vlgmr.msrb.gmra.mxu0 %v7705_v33  ;;  %v5246_v36 = vsel %vm5217_vm11, %v5202_v63, %v5204_v49  ;;  %v11252_v33 = vpop.permute.xlu0 %5713 }
0x1d72   : > { %5422 = vmatpush.bf16.msrb.mxu1 %v5246_v36  ;;  %12492 = vst [vmem:[#allocation12_spill] sm:$0xff] %v11252_v33 }
0x1d73   : > { %v11182_v40 = vpop.f32.mrf.mxu1 }
0x1d75   : > { %7770 = vmatmul.msk.bf16.vlgmr.msrb.gmra.mxu1 %vm5286_vm13, %v7709_v21 }
0x1d77   : > { %v11200_v46 = vpop.f32.mrf.mxu3 }
0x1d79   : > { %v5698_v49 = vpop.permute.xlu0 %5697 }
0x1d7b   : > { %v5318_v54 = vpop.f32.mrf.mxu1 }
0x1d7c   : > { %v5348_v56 = vadd.f32 %v10922_v19, %v5318_v54  ;;  %v11205_v19 = vpop.permute.xlu1 %5489 }
0x1d7e   : > { %v11198_v62 = vadd.f32 %v5376_v23, %v5348_v56 }
0x1d7f   : > { %v5381_v53 = vpop.f32.mrf.mxu3 }
0x1d81   : > { %5399 = vmatmul.bf16.gmra.mxu0 %v7725_v61 }
0x1d83   : > { %v11202_v59 = vpop.f32.mrf.mxu1  ;;  %v11262_v21 = vpop.permute.xlu0 %5484 }
0x1d84   : > { %v11224_v24 = vpop.permute.xlu1 %5525 }
0x1d85   : > { %7771 = vmatmul.msk.bf16.gmra.mxu1 %vm5286_vm13, %v7729_v12 }
0x1d87   : > { %v11270_v61 = vpop.f32.mrf.mxu3 }
0x1d8b   : > { %v5323_v7 = vpop.f32.mrf.mxu1  ;;  %v11264_v48 = vpop.permute.xlu0 %5677 }
0x1d8c   : > { %v5353_v18 = vadd.f32 %v10935_v60, %v5323_v7  ;;  %v11227_v60 = vpop.permute.xlu2 %5529  ;;  %v11235_v8 = vpop.permute.xlu1 %5717 }
0x1d8d   : > { %12490 = vst [vmem:[#allocation10_spill] sm:$0xff] %v11227_v60 }
0x1d8e   : > { %v11222_v6 = vadd.f32 %v5381_v53, %v5353_v18  ;;  %12491 = vst [vmem:[#allocation11_spill] sm:$0xff] %v11235_v8 }
0x1d8f   : > { %v5612_v51 = vpop.f32.mrf.mxu3 }
0x1d91   : > { %5404 = vmatmul.bf16.gmra.mxu0 %v7745_v10 }
0x1d93   : > { %v11272_v28 = vpop.permute.xlu0 %5667  ;;  %v11274_v18 = vpop.f32.mrf.mxu1 }
0x1d94   : > { %v11243_v41 = vpop.permute.xlu2 %5474  ;;  %v11246_v50 = vpop.permute.xlu1 %5479 }
0x1d95   : > { %7772 = vmatmul.msk.bf16.gmra.mxu1 %vm5286_vm13, %v7749_v3 }
0x1d97   : > { %v5614_v10 = vpop.f32.mrf.mxu3 }
0x1d9c   : > { %v11248_v55 = vpop.permute.xlu2 %5662  ;;  %v11250_v27 = vpop.permute.xlu1 %5517 }
0x1d9d   : > { %v5465_v35 = vpop.permute.xlu0 %5464 }
0x1d9f   : > { %v5617_v0 = vpop.f32.mrf.mxu3 }
0x1da1   : > { %5409 = vmatmul.bf16.gmra.mxu0 %v7765_v44  ;;  %v5340_v44 = vadd.f32 %v10911_v43, %v11157_v32 }
0x1da3   : > { %v5369_v45 = vadd.f32 %v11147_v52, %v5340_v44 }
0x1da4   : > { %v11254_v11 = vpop.permute.xlu2 %5521  ;;  %v11256_v39 = vpop.permute.xlu1 %5705 }
0x1da5   : > { %7773 = vmatmul.msk.bf16.gmra.mxu1 %vm5286_vm13, %v7769_v1  ;;  %v5658_v15 = vpop.permute.xlu0 %5657 }
0x1dac   : > { %v11258_v63 = vpop.permute.xlu2 %5709  ;;  %v11260_v36 = vpop.permute.xlu1 %5469 }
0x1dad   : > { %v5648_v26 = vpop.permute.xlu0 %5647 }
0x1db4   : > { %v5653_v23 = vpop.permute.xlu2 %5652 }
0x1db5   : > { %v5510_v20 = vpop.permute.xlu1 %5509 }
0x1dbc   : > { %v11266_v54 = vpop.permute.xlu2 %5513 }
0x1dbd   : > { %v11268_v56 = vpop.permute.xlu1 %5701 }
0x1dc4   : > { %v5455_v2 = vpop.permute.xlu2 %5454 }
0x1dc6   : > { %v5460_v12 = vpop.permute.xlu1 %5459 }
0x1dcc   : > { %v5643_v7 = vpop.permute.xlu2 %5642 }
0x1dcd   : > { %v5680_v13 = vmul.f32 %v5643_v7, %v5612_v51  ;;  %v5619_v7 = vpop.f32.mrf.mxu3 }
0x1dcf   : > { %v5502_v53 = vpop.permute.xlu1 %5501 }
0x1dd4   : > { %v5506_v17 = vpop.permute.xlu2 %5505 }
0x1dd7   : > { %v5690_v1 = vpop.permute.xlu1 %5689 }
0x1dd8   : > { %v5720_v30 = vadd.f32 %v5690_v1, %v5680_v13 }
0x1ddc   : > { %v5694_v33 = vpop.permute.xlu2 %5693 }
0x1dee   : > { %v5395_v5 = vpop.f32.mrf.mxu0 }
0x1def   : > { %v5396_v3 = vadd.f32 %v5395_v5, %v11153_v25  ;;  %v5681_v25 = vmul.f32 %v5648_v26, %v5614_v10 }
0x1df1   : > { %v5721_v32 = vadd.f32 %v5694_v33, %v5681_v25 }
0x1df2   : > { %v5424_v16 = vpop.f32.mrf.mxu1 }
0x1df3   : > { %v5425_v57 = vadd.f32 %v5424_v16, %v5396_v3 }
0x1df5   : > { %v5492_v47 = vmul.f32 %v5455_v2, %v5425_v57  ;;  %v11283_v2 = vld [vmem:[%s12452_s3 + $0x5] ss:$0 sm:$0xff] }
0x1df6   : > { %v5397_v14 = vpop.f32.mrf.mxu0 }
0x1df7   : > { %v5532_v9 = vadd.f32 %v5502_v53, %v5492_v47  ;;  %v5398_v31 = vadd.f32 %v5397_v14, %v5369_v45 }
0x1df9   : > { %v5728_v29 = vadd.f32 %v5720_v30, %v5532_v9  ;;  %v5682_v9 = vmul.f32 %v5653_v23, %v5617_v0  ;;  %v5622_v23 = vpop.f32.mrf.mxu3 }
0x1dfa   : > { %v5426_v42 = vpop.f32.mrf.mxu1 }
0x1dfb   : > { %v5427_v5 = vadd.f32 %v5426_v42, %v5398_v31  ;;  %v5736_v60 = vmax.f32 %v5728_v29, 0.0  ;;  %v5345_v42 = vadd.f32 %v10919_v34, %v11182_v40 }
0x1dfd   : > { %v5493_v8 = vmul.f32 %v5460_v12, %v5427_v5  ;;  %v11286_v47 = vmul.f32 %v11283_v2, %v5736_v60  ;;  %v5722_v60 = vadd.f32 %v5698_v49, %v5682_v9  ;;  %v5374_v53 = vadd.f32 %v11179_v22, %v5345_v42 }
0x1dfe   : > { %v5400_v43 = vpop.f32.mrf.mxu0  ;;  %v5684_v5 = vmul.f32 %v11248_v55, %v5622_v23 }
0x1dff   : > { %v5533_v51 = vadd.f32 %v5506_v17, %v5493_v8  ;;  %v5401_v45 = vadd.f32 %v5400_v43, %v11177_v37  ;;  %v5752_v14 = vpack.c.bf16 %v11286_v47, %v11286_v47  ;;  %v5683_v17 = vmul.f32 %v5658_v15, %v5619_v7 }
0x1e01   : > { %v5729_v30 = vadd.f32 %v5721_v32, %v5533_v51  ;;  %v5768_v10 = vunpack.c.l.b16 %v5752_v14  ;;  %v5723_v22 = vadd.f32 %v11268_v56, %v5683_v17  ;;  %v5624_v51 = vpop.f32.mrf.mxu3 }
0x1e02   : > { %v5429_v26 = vpop.f32.mrf.mxu1 }
0x1e03   : > { %v5737_v31 = vmax.f32 %v5729_v30, 0.0  ;;  %v5430_v29 = vadd.f32 %v5429_v26, %v5401_v45 }
0x1e05   : > { %v11294_v52 = vmul.f32 %v11283_v2, %v5737_v31  ;;  %v5494_v8 = vmul.f32 %v5465_v35, %v5430_v29  ;;  %v5685_v31 = vmul.f32 %v11272_v28, %v5624_v51 }
0x1e06   : > { %v5402_v33 = vpop.f32.mrf.mxu0 }
0x1e07   : > { %v5753_v12 = vpack.c.bf16 %v11294_v52, %v11294_v52  ;;  %v5534_v37 = vadd.f32 %v5510_v20, %v5494_v8  ;;  %v5403_v40 = vadd.f32 %v5402_v33, %v5374_v53 }
0x1e09   : > { %v5769_v34 = vunpack.c.l.b16 %v5753_v12  ;;  %v5730_v0 = vadd.f32 %v5722_v60, %v5534_v37 }
0x1e0a   : > { %v5431_v3 = vpop.f32.mrf.mxu1 }
0x1e0b   : > { %v5776_v16 = vpack.c.b16 %v5769_v34, %v5768_v10  ;;  %v5432_v44 = vadd.f32 %v5431_v3, %v5403_v40  ;;  %v5738_v13 = vmax.f32 %v5730_v0, 0.0 }
0x1e0d   : > { %v5495_v35 = vmul.f32 %v11260_v36, %v5432_v44  ;;  %5792 = vrot.lane.b32.xlu1 %v5776_v16, %s8277_s20  ;;  %5804 = vrot.lane.b32.xlu2 %v5776_v16, %s8294_s25  ;;  %v11306_v57 = vmul.f32 %v11283_v2, %v5738_v13  ;;  %v5350_v36 = vadd.f32 %v10931_v38, %v11202_v59 }
0x1e0e   : > { %5780 = vrot.lane.b32.xlu0 %v5776_v16, %s8279_s22  ;;  %v5405_v49 = vpop.f32.mrf.mxu0 }
0x1e0f   : > { %v5535_v20 = vadd.f32 %v11266_v54, %v5495_v35  ;;  %v5406_v1 = vadd.f32 %v5405_v49, %v11198_v62  ;;  %v5754_v56 = vpack.c.bf16 %v11306_v57, %v11306_v57  ;;  %v5724_v62 = vadd.f32 %v11256_v39, %v5684_v5  ;;  %v5627_v39 = vpop.f32.mrf.mxu3 }
0x1e10   : > { %v5379_v30 = vadd.f32 %v11200_v46, %v5350_v36 }
0x1e11   : > { %v5731_v15 = vadd.f32 %v5723_v22, %v5535_v20  ;;  %v5770_v45 = vunpack.c.l.b16 %v5754_v56  ;;  %v12493_v20 = vld [vmem:[#allocation11_spill] sm:$0xff] }
0x1e12   : > { %v5434_v25 = vpop.f32.mrf.mxu1 }
0x1e13   : > { %v5739_v43 = vmax.f32 %v5731_v15, 0.0  ;;  %v5435_v32 = vadd.f32 %v5434_v25, %v5406_v1  ;;  %v12495_v25 = vld [vmem:[#allocation12_spill] sm:$0xff] }
0x1e15   : > { %v11315_v54 = vmul.f32 %v11283_v2, %v5739_v43  ;;  %v5496_v7 = vmul.f32 %v11243_v41, %v5435_v32  ;;  %5860 = vrot.lane.b32.xlu1 %v5776_v16, %s12487_s24  ;;  %5848 = vrot.lane.b32.xlu2 %v5776_v16, %s8297_s27 }
0x1e16   : > { %5996 = vrot.lane.b32.xlu0 %v5776_v16, %s8295_s19  ;;  %v5407_v38 = vpop.f32.mrf.mxu0 }
0x1e17   : > { %v5755_v59 = vpack.c.bf16 %v11315_v54, %v11315_v54  ;;  %v5536_v55 = vadd.f32 %v11250_v27, %v5496_v7  ;;  %v5408_v41 = vadd.f32 %v5407_v38, %v5379_v30  ;;  %v5725_v27 = vadd.f32 %v11258_v63, %v5685_v31 }
0x1e19   : > { %v5771_v26 = vunpack.c.l.b16 %v5755_v59  ;;  %v5732_v42 = vadd.f32 %v5724_v62, %v5536_v55 }
0x1e1a   : > { %v5436_v9 = vpop.f32.mrf.mxu1 }
0x1e1b   : > { %v5777_v29 = vpack.c.b16 %v5771_v26, %v5770_v45  ;;  %v5437_v14 = vadd.f32 %v5436_v9, %v5408_v41  ;;  %v5740_v8 = vmax.f32 %v5732_v42, 0.0  ;;  %v12496_v45 = vld [vmem:[#allocation4_spill] sm:$0xff]  ;;  %v12497_v9 = vld [vmem:[#allocation7_spill] sm:$0xff] }
0x1e1d   : > { %v5497_v33 = vmul.f32 %v11246_v50, %v5437_v14  ;;  %5806 = vrot.lane.b32.xlu1 %v5777_v29, %s8294_s25  ;;  %5824 = vrot.lane.b32.xlu2 %v5776_v16, %s8288_s12  ;;  %v11334_v12 = vmul.f32 %v11283_v2, %v5740_v8  ;;  %v5355_v50 = vadd.f32 %v10949_v58, %v11274_v18  ;;  %v5629_v18 = vpop.f32.mrf.mxu3 }
0x1e1e   : > { %5816 = vrot.lane.b32.xlu0 %v5776_v16, %s8296_s14  ;;  %v5410_v46 = vpop.f32.mrf.mxu0  ;;  %v5687_v13 = vmul.f32 %v11264_v48, %v5629_v18 }
0x1e1f   : > { %v5537_v60 = vadd.f32 %v11254_v11, %v5497_v33  ;;  %v5411_v10 = vadd.f32 %v5410_v46, %v11222_v6  ;;  %v5756_v34 = vpack.c.bf16 %v11334_v12, %v11334_v12  ;;  %v5384_v58 = vadd.f32 %v11270_v61, %v5355_v50  ;;  %v12498_v46 = vld [vmem:[#allocation8_spill] sm:$0xff] }
0x1e20   : > { %v5727_v15 = vadd.f32 %v12493_v20, %v5687_v13 }
0x1e21   : > { %v5733_v28 = vadd.f32 %v5725_v27, %v5537_v60  ;;  %v5772_v23 = vunpack.c.l.b16 %v5756_v34 }
0x1e22   : > { %v5439_v37 = vpop.f32.mrf.mxu1 }
0x1e23   : > { %v5741_v53 = vmax.f32 %v5733_v28, 0.0  ;;  %v5440_v11 = vadd.f32 %v5439_v37, %v5411_v10 }
0x1e25   : > { %v11342_v0 = vmul.f32 %v11283_v2, %v5741_v53  ;;  %5850 = vrot.lane.b32.xlu1 %v5777_v29, %s8297_s27  ;;  %5836 = vrot.lane.b32.xlu2 %v5776_v16, %s8290_s16  ;;  %v5498_v17 = vmul.f32 %v11262_v21, %v5440_v11  ;;  %v5686_v16 = vmul.f32 %v11214_v4, %v5627_v39  ;;  %v12494_v21 = vld [vmem:[#allocation10_spill] sm:$0xff] }
0x1e26   : > { %v5412_v63 = vpop.f32.mrf.mxu0 }
0x1e27   : > { %v5757_v40 = vpack.c.bf16 %v11342_v0, %v11342_v0  ;;  %v5413_v3 = vadd.f32 %v5412_v63, %v5384_v58  ;;  %v5538_v61 = vadd.f32 %v11224_v24, %v5498_v17  ;;  %v5726_v48 = vadd.f32 %v12495_v25, %v5686_v16 }
0x1e29   : > { %v5773_v6 = vunpack.c.l.b16 %v5757_v40  ;;  %v5734_v5 = vadd.f32 %v5726_v48, %v5538_v61 }
0x1e2a   : > { %v5441_v44 = vpop.f32.mrf.mxu1 }
0x1e2b   : > { %v5778_v35 = vpack.c.b16 %v5773_v6, %v5772_v23  ;;  %v5442_v49 = vadd.f32 %v5441_v44, %v5413_v3  ;;  %v12499_v44 = vld [vmem:[#allocation5_spill] sm:$0xff] }
0x1e2d   : > { %v5499_v22 = vmul.f32 %v11205_v19, %v5442_v49  ;;  %5826 = vrot.lane.b32.xlu1 %v5777_v29, %s8288_s12  ;;  %5782 = vrot.lane.b32.xlu2 %v5777_v29, %s8279_s22  ;;  %v5742_v19 = vmax.f32 %v5734_v5, 0.0 }
0x1e2e   : > { %5852 = vrot.lane.b32.xlu0 %v5778_v35, %s8297_s27 }
0x1e2f   : > { %v5539_v1 = vadd.f32 %v12494_v21, %v5499_v22  ;;  %v11367_v24 = vmul.f32 %v11283_v2, %v5742_v19 }
0x1e31   : > { %v5735_v36 = vadd.f32 %v5727_v15, %v5539_v1  ;;  %v5758_v51 = vpack.c.bf16 %v11367_v24, %v11367_v24 }
0x1e33   : > { %v5743_v43 = vmax.f32 %v5735_v36, 0.0  ;;  %v5774_v7 = vunpack.c.l.b16 %v5758_v51  ;;  %v12500_v36 = vld [vmem:[#allocation2_spill] sm:$0xff] }
0x1e35   : > { %5794 = vrot.lane.b32.xlu1 %v5777_v29, %s8277_s20  ;;  %5998 = vrot.lane.b32.xlu2 %v5777_v29, %s8295_s19  ;;  %v11364_v4 = vmul.f32 %v11283_v2, %v5743_v43 }
0x1e36   : > { %5828 = vrot.lane.b32.xlu0 %v5778_v35, %s8288_s12 }
0x1e37   : > { %v5759_v32 = vpack.c.bf16 %v11364_v4, %v11364_v4 }
0x1e39   : > { %v5775_v56 = vunpack.c.l.b16 %v5759_v32 }
0x1e3b   : > { %v5779_v38 = vpack.c.b16 %v5775_v56, %v5774_v7 }
0x1e3d   : > { %5818 = vrot.lane.b32.xlu1 %v5777_v29, %s8296_s14  ;;  %5838 = vrot.lane.b32.xlu2 %v5777_v29, %s8290_s16 }
0x1e3e   : > { %5864 = vrot.lane.b32.xlu0 %v5778_v35, %s12487_s24 }
0x1e45   : > { %5784 = vrot.lane.b32.xlu1 %v5778_v35, %s8279_s22  ;;  %5862 = vrot.lane.b32.xlu2 %v5777_v29, %s12487_s24 }
0x1e46   : > { %5786 = vrot.lane.b32.xlu0 %v5779_v38, %s8279_s22 }
0x1e4d   : > { %5808 = vrot.lane.b32.xlu1 %v5778_v35, %s8294_s25  ;;  %5840 = vrot.lane.b32.xlu2 %v5778_v35, %s8290_s16 }
0x1e4e   : > { %6002 = vrot.lane.b32.xlu0 %v5779_v38, %s8295_s19 }
0x1e55   : > { %6000 = vrot.lane.b32.xlu1 %v5778_v35, %s8295_s19  ;;  %5854 = vrot.lane.b32.xlu2 %v5779_v38, %s8297_s27 }
0x1e56   : > { %5798 = vrot.lane.b32.xlu0 %v5779_v38, %s8277_s20 }
0x1e5d   : > { %5796 = vrot.lane.b32.xlu1 %v5778_v35, %s8277_s20  ;;  %5830 = vrot.lane.b32.xlu2 %v5779_v38, %s8288_s12 }
0x1e5e   : > { %5842 = vrot.lane.b32.xlu0 %v5779_v38, %s8290_s16 }
0x1e65   : > { %5820 = vrot.lane.b32.xlu1 %v5778_v35, %s8296_s14 }
0x1e66   : > { %5822 = vrot.lane.b32.xlu0 %v5779_v38, %s8296_s14 }
0x1e67   : > { %v5805_v2 = vpop.permute.xlu2 %5804 }
0x1e68   : > { %v5812_v31 = vsel %vm4899_vm10, %v12497_v9, %v5805_v2 }
0x1e6d   : > { %5810 = vrot.lane.b32.xlu1 %v5779_v38, %s8294_s25 }
0x1e6e   : > { %5866 = vrot.lane.b32.xlu0 %v5779_v38, %s12487_s24  ;;  %v12501_v38 = vld [vmem:[#allocation6_spill] sm:$0xff] }
0x1e6f   : > { %v11392_v62 = vpop.permute.xlu2 %5848 }
0x1e70   : > { %v5856_v32 = vsel %vm4946_vm12, %v11392_v62, %v12498_v46 }
0x1e77   : > { %v11394_v59 = vpop.permute.xlu2 %5824 }
0x1e78   : > { %v5832_v43 = vsel %vm3251_vm1, %v11394_v59, %v12499_v44 }
0x1e7f   : > { %v11396_v55 = vpop.permute.xlu1 %5792  ;;  %v11402_v42 = vpop.permute.xlu2 %5836 }
0x1e80   : > { %v5781_v30 = vpop.permute.xlu0 %5780 }
0x1e81   : > { %6006 = vrot.lane.b32.xlu0 %v5781_v30, %s8295_s19  ;;  %v5788_v26 = vsel %vm360_vm8, %v12496_v45, %v5781_v30 }
0x1e82   : > { %6004 = vrot.lane.b32.xlu2 %v5788_v26, %s8295_s19 }
0x1e87   : > { %v11404_v41 = vpop.permute.xlu1 %5860  ;;  %v5783_v29 = vpop.permute.xlu2 %5782 }
0x1e88   : > { %v5789_v8 = vsel %vm360_vm8, %v12496_v45, %v5783_v29  ;;  %v11414_v33 = vpop.permute.xlu0 %5996 }
0x1e89   : > { %6038 = vrot.lane.b32.xlu0 %v5805_v2, %s8295_s19 }
0x1e8a   : > { %6036 = vrot.lane.b32.xlu2 %v5812_v31, %s8295_s19 }
0x1e8f   : > { %v5807_v14 = vpop.permute.xlu1 %5806  ;;  %v11426_v50 = vpop.permute.xlu2 %5998 }
0x1e90   : > { %v5813_v60 = vsel %vm4899_vm10, %v12497_v9, %v5807_v14  ;;  %v11423_v37 = vpop.permute.xlu0 %5816 }
0x1e91   : > { %6010 = vrot.lane.b32.xlu0 %v5783_v29, %s8295_s19 }
0x1e92   : > { %6008 = vrot.lane.b32.xlu2 %v5789_v8, %s8295_s19 }
0x1e97   : > { %v5851_v39 = vpop.permute.xlu1 %5850  ;;  %v11431_v34 = vpop.permute.xlu2 %5838 }
0x1e98   : > { %v5857_v27 = vsel %vm4946_vm12, %v5851_v39, %v12498_v46 }
0x1e99   : > { %6042 = vrot.lane.b32.xlu0 %v5807_v14, %s8295_s19  ;;  %6098 = vrot.lane.b32.xlu1 %v5857_v27, %s8295_s19 }
0x1e9a   : > { %6040 = vrot.lane.b32.xlu2 %v5813_v60, %s8295_s19 }
0x1e9f   : > { %v5827_v28 = vpop.permute.xlu1 %5826  ;;  %v11438_v58 = vpop.permute.xlu2 %5862 }
0x1ea0   : > { %v5853_v10 = vpop.permute.xlu0 %5852  ;;  %v5833_v21 = vsel %vm3251_vm1, %v5827_v28, %v12499_v44 }
0x1ea1   : > { %6096 = vrot.lane.b32.xlu0 %v5851_v39, %s8295_s19  ;;  %v5858_v61 = vsel %vm4946_vm12, %v5853_v10, %v12498_v46 }
0x1ea7   : > { %v11428_v53 = vpop.permute.xlu1 %5794  ;;  %v5841_v6 = vpop.permute.xlu2 %5840 }
0x1ea8   : > { %v5829_v18 = vpop.permute.xlu0 %5828  ;;  %v5801_v51 = vsel %vm372_vm7, %v12500_v36, %v11428_v53  ;;  %v5846_v2 = vsel %vm3264_vm4, %v5841_v6, %v12501_v38 }
0x1ea9   : > { %6100 = vrot.lane.b32.xlu0 %v5853_v10, %s8295_s19  ;;  %v5834_v13 = vsel %vm3251_vm1, %v5829_v18, %v12499_v44 }
0x1eaf   : > { %v11433_v11 = vpop.permute.xlu1 %5818  ;;  %v5855_v49 = vpop.permute.xlu2 %5854 }
0x1eb0   : > { %v11443_v3 = vpop.permute.xlu0 %5864  ;;  %v5859_v39 = vsel %vm4946_vm12, %v5855_v49, %v12498_v46 }
0x1eb7   : > { %v5785_v63 = vpop.permute.xlu1 %5784  ;;  %v5831_v20 = vpop.permute.xlu2 %5830 }
0x1eb8   : > { %6014 = vrot.lane.b32.xlu1 %v5785_v63, %s8295_s19  ;;  %v5790_v40 = vsel %vm360_vm8, %v12496_v45, %v5785_v63  ;;  %v5787_v16 = vpop.permute.xlu0 %5786 }
0x1eb9   : > { %6012 = vrot.lane.b32.xlu0 %v5790_v40, %s8295_s19  ;;  %v5791_v25 = vsel %vm360_vm8, %v12496_v45, %v5787_v16 }
0x1ebf   : > { %v5809_v23 = vpop.permute.xlu1 %5808 }
0x1ec0   : > { %6046 = vrot.lane.b32.xlu2 %v5809_v23, %s8295_s19  ;;  %6068 = vrot.lane.b32.xlu1 %v5829_v18, %s8295_s19  ;;  %v5814_v35 = vsel %vm4899_vm10, %v12497_v9, %v5809_v23  ;;  %v11463_v48 = vpop.permute.xlu0 %6002  ;;  %v5844_v18 = vsel %vm3264_vm4, %v11402_v42, %v12501_v38 }
0x1ec7   : > { %v11445_v17 = vpop.permute.xlu1 %6000 }
0x1ec8   : > { %6070 = vrot.lane.b32.xlu2 %v5834_v13, %s8295_s19  ;;  %6044 = vrot.lane.b32.xlu1 %v5814_v35, %s8295_s19  ;;  %v5799_v19 = vpop.permute.xlu0 %5798  ;;  %v12502_v35 = vld [vmem:[#allocation3_spill] sm:$0xff] }
0x1ecf   : > { %v5797_v22 = vpop.permute.xlu1 %5796 }
0x1ed0   : > { %6102 = vrot.lane.b32.xlu1 %v5858_v61, %s8295_s19  ;;  %6018 = vrot.lane.b32.xlu2 %v5787_v16, %s8295_s19  ;;  %v5802_v5 = vsel %vm372_vm7, %v12500_v36, %v5797_v22  ;;  %v5843_v56 = vpop.permute.xlu0 %5842 }
0x1ed1   : > { %v5847_v40 = vsel %vm3264_vm4, %v5843_v56, %v12501_v38 }
0x1ed7   : > { %v5821_v15 = vpop.permute.xlu1 %5820 }
0x1ed8   : > { %6072 = vrot.lane.b32.xlu1 %v5831_v20, %s8295_s19  ;;  %6066 = vrot.lane.b32.xlu2 %v5833_v21, %s8295_s19  ;;  %v5823_v30 = vpop.permute.xlu0 %5822  ;;  %v5868_v21 = vsel %vm2382_vm0, %v11404_v41, %v12502_v35 }
0x1edc   : > { %v11485_v7 = vpop.permute.xlu2 %6004 }
0x1edf   : > { %v5811_v1 = vpop.permute.xlu1 %5810 }
0x1ee0   : > { %6050 = vrot.lane.b32.xlu0 %v5811_v1, %s8295_s19  ;;  %6016 = vrot.lane.b32.xlu1 %v5791_v25, %s8295_s19  ;;  %v5867_v31 = vpop.permute.xlu0 %5866  ;;  %v6355_v25 = vld [vmem:[%s12451_s2 + $0x208] sm:$0xff] }
0x1ee1   : > { %6028 = vrot.lane.b32.xlu2 %v5802_v5, %s8295_s19 }
0x1ee4   : > { %v11494_v26 = vpop.permute.xlu2 %6036 }
0x1ee8   : > { %6104 = vrot.lane.b32.xlu0 %v5855_v49, %s8295_s19  ;;  %6064 = vrot.lane.b32.xlu1 %v5827_v28, %s8295_s19  ;;  %v5835_v28 = vsel %vm3251_vm1, %v5831_v20, %v12499_v44  ;;  %v5871_v49 = vsel %vm2382_vm0, %v5867_v31, %v12502_v35  ;;  %v5869_v20 = vsel %vm2382_vm0, %v11438_v58, %v12502_v35 }
0x1ee9   : > { %6062 = vrot.lane.b32.xlu2 %v5832_v43, %s8295_s19 }
0x1eec   : > { %v11503_v29 = vpop.permute.xlu2 %6008 }
0x1ef0   : > { %6094 = vrot.lane.b32.xlu1 %v5856_v32, %s8295_s19  ;;  %6034 = vrot.lane.b32.xlu0 %v5799_v19, %s8295_s19 }
0x1ef1   : > { %6024 = vrot.lane.b32.xlu2 %v5801_v51, %s8295_s19 }
0x1ef3   : > { %v11511_v14 = vpop.permute.xlu0 %6006 }
0x1ef4   : > { %v11519_v8 = vpop.permute.xlu2 %6040 }
0x1ef8   : > { %6060 = vrot.lane.b32.xlu1 %v11394_v59, %s8295_s19  ;;  %6092 = vrot.lane.b32.xlu0 %v11392_v62, %s8295_s19  ;;  %v5800_v59 = vsel %vm372_vm7, %v12500_v36, %v11396_v55  ;;  %v5845_v62 = vsel %vm3264_vm4, %v11431_v34, %v12501_v38 }
0x1ef9   : > { %6086 = vrot.lane.b32.xlu2 %v5846_v2, %s8295_s19 }
0x1efb   : > { %v11527_v27 = vpop.permute.xlu0 %6038 }
0x1f00   : > { %6084 = vrot.lane.b32.xlu1 %v5841_v6, %s8295_s19  ;;  %6030 = vrot.lane.b32.xlu0 %v5797_v22, %s8295_s19 }
0x1f01   : > { %6022 = vrot.lane.b32.xlu2 %v11396_v55, %s8295_s19  ;;  %v5815_v55 = vsel %vm4899_vm10, %v12497_v9, %v5811_v1 }
0x1f03   : > { %v6011_v63 = vpop.permute.xlu0 %6010 }
0x1f08   : > { %6020 = vrot.lane.b32.xlu1 %v5800_v59, %s8295_s19  ;;  %6088 = vrot.lane.b32.xlu0 %v5843_v56, %s8295_s19 }
0x1f09   : > { %6120 = vrot.lane.b32.xlu2 %v5867_v31, %s8295_s19 }
0x1f0b   : > { %v11551_v13 = vpop.permute.xlu0 %6042 }
0x1f10   : > { %6082 = vrot.lane.b32.xlu1 %v5845_v62, %s8295_s19  ;;  %6026 = vrot.lane.b32.xlu0 %v11428_v53, %s8295_s19  ;;  %v11537_v53 = vpop.permute.xlu1 %6098 }
0x1f11   : > { %6048 = vrot.lane.b32.xlu2 %v5815_v55, %s8295_s19 }
0x1f13   : > { %v11566_v61 = vpop.permute.xlu0 %6096 }
0x1f18   : > { %6106 = vrot.lane.b32.xlu1 %v5859_v39, %s8295_s19  ;;  %6058 = vrot.lane.b32.xlu0 %v5823_v30, %s8295_s19  ;;  %v11610_v30 = vld [vmem:[%s12451_s2 + $0x1e0] sm:$0xff]  ;;  %v6129_v39 = vsel %vm5217_vm11, %v11503_v29, %v6011_v63 }
0x1f19   : > { %6076 = vrot.lane.b32.xlu2 %v11402_v42, %s8295_s19  ;;  %v5870_v42 = vsel %vm2382_vm0, %v11443_v3, %v12502_v35 }
0x1f1a   : > { %v11529_v60 = vpop.permute.xlu2 %6046 }
0x1f20   : > { %6056 = vrot.lane.b32.xlu1 %v5821_v15, %s8295_s19  ;;  %6080 = vrot.lane.b32.xlu0 %v11431_v34, %s8295_s19  ;;  %v5803_v34 = vsel %vm372_vm7, %v12500_v36, %v5799_v19  ;;  %v12503_v19 = vmov 0  }
0x1f21   : > { %6074 = vrot.lane.b32.xlu2 %v5835_v28, %s8295_s19  ;;  %v6128_v28 = vsel %vm5217_vm11, %v11485_v7, %v11511_v14 }
0x1f22   : > { %v11539_v10 = vpop.permute.xlu2 %6070 }
0x1f28   : > { %6090 = vrot.lane.b32.xlu1 %v5847_v40, %s8295_s19  ;;  %6078 = vrot.lane.b32.xlu0 %v5844_v18, %s8295_s19  ;;  %v12504_v40 = vmov 1  }
0x1f29   : > { %6032 = vrot.lane.b32.xlu2 %v5803_v34, %s8295_s19 }
0x1f2a   : > { %v6015_v23 = vpop.permute.xlu1 %6014  ;;  %v6019_v6 = vpop.permute.xlu2 %6018 }
0x1f30   : > { %6116 = vrot.lane.b32.xlu1 %v11443_v3, %s8295_s19  ;;  %6122 = vrot.lane.b32.xlu0 %v5871_v49, %s8295_s19 }
0x1f31   : > { %6118 = vrot.lane.b32.xlu2 %v5870_v42, %s8295_s19 }
0x1f32   : > { %v11562_v16 = vpop.permute.xlu1 %6068  ;;  %v11564_v22 = vpop.permute.xlu2 %6066 }
0x1f38   : > { %6112 = vrot.lane.b32.xlu1 %v11438_v58, %s8295_s19  ;;  %6054 = vrot.lane.b32.xlu0 %v11433_v11, %s8295_s19  ;;  %v11586_v11 = vpop.permute.xlu0 %6100 }
0x1f39   : > { %6114 = vrot.lane.b32.xlu2 %v5869_v20, %s8295_s19 }
0x1f3a   : > { %v6045_v3 = vpop.permute.xlu1 %6044 }
0x1f3b   : > { %v11576_v15 = vpop.permute.xlu2 %6028 }
0x1f40   : > { %6108 = vrot.lane.b32.xlu1 %v11404_v41, %s8295_s19  ;;  %6052 = vrot.lane.b32.xlu0 %v11423_v37, %s8295_s19  ;;  %v6013_v5 = vpop.permute.xlu0 %6012  ;;  %v11600_v41 = vld [vmem:[%s12451_s2 + $0x1e8] sm:$0xff] }
0x1f41   : > { %6110 = vrot.lane.b32.xlu2 %v5868_v21, %s8295_s19  ;;  %v6130_v59 = vsel %vm5217_vm11, %v6013_v5, %v6015_v23 }
0x1f42   : > { %v11588_v58 = vpop.permute.xlu1 %6102 }
0x1f43   : > { %v11590_v1 = vpop.permute.xlu2 %6062 }
0x1f48   : > { %6389 = vperm.xlu0 %8232, %v6355_v25  }
0x1f49   : > { %6430 = vperm.xlu2 %8236, %v6355_v25  }
0x1f4a   : > { %v6073_v37 = vpop.permute.xlu1 %6072 }
0x1f4b   : > { %v11595_v43 = vpop.permute.xlu2 %6024 }
0x1f50   : > { %6369 = vperm.xlu0 %8232, %v11600_v41  }
0x1f51   : > { %8238 = vset.pattern.permute.xlu2 %v12503_v19 }
0x1f52   : > { %v6017_v32 = vpop.permute.xlu1 %6016  ;;  %v6051_v51 = vpop.permute.xlu0 %6050 }
0x1f53   : > { %v6131_v56 = vsel %vm5217_vm11, %v6017_v32, %v6019_v6  ;;  %v11605_v2 = vpop.permute.xlu2 %6086  ;;  %v12505_v6 = vld [vmem:[#allocation9_spill] sm:$0xff] }
0x1f54   : > { %6204 = vmatpush.bf16.msra.mxu0 %v6131_v56  ;;  %v6127_v49 = vsel %vm5217_vm11, %v12505_v6, %v11463_v48  ;;  %v6126_v29 = vsel %vm5217_vm11, %v12505_v6, %v11445_v17  ;;  %v6125_v42 = vsel %vm5217_vm11, %v12505_v6, %v11426_v50  ;;  %v7796_v48 = vld [vmem:[%s12450_s1 + $0x500] sm:$0xf]  ;;  %v8085_v17 = vld [vmem:[%s12450_s1 + $0x510] sm:$0xf0]  ;;  %v6124_v21 = vsel %vm5217_vm11, %v12505_v6, %v11414_v33 }
0x1f55   : > { %v7797_v25 = vor.u32 %v8085_v17, %v7796_v48  ;;  %v6138_v50 = vsel %vm5217_vm11, %v6045_v3, %v11529_v60  ;;  %v6137_v56 = vsel %vm5217_vm11, %v11519_v8, %v11551_v13  ;;  %v6136_v33 = vsel %vm5217_vm11, %v11494_v26, %v11527_v27  ;;  %v6356_v8 = vld [vmem:[%s12451_s2 + $0x210] sm:$0xff] }
0x1f56   : > { %6394 = vperm.xlu1 %8237, %v6356_v8   ;;  %v6142_v27 = vsel %vm5217_vm11, %v11562_v16, %v11539_v10  ;;  %v7836_v17 = vld [vmem:[%s12450_s1 + $0x550] sm:$0xf] }
0x1f58   : > { %6364 = vperm.xlu0 %8232, %v11610_v30   ;;  %6205 = vmatpush.bf16.msra.mxu0 %v6130_v59 }
0x1f5a   : > { %v6065_v31 = vpop.permute.xlu1 %6064  ;;  %v11614_v62 = vpop.permute.xlu0 %6104 }
0x1f5b   : > { %v11616_v55 = vpop.permute.xlu2 %6022 }
0x1f5c   : > { %6206 = vmatpush.bf16.msra.mxu0 %v6129_v39 }
0x1f60   : > { %6207 = vmatpush.bf16.msra.mxu0 %v6128_v28  ;;  %8244 = vset.pattern.permute.xlu0 %v12504_v40  ;;  %v7816_v28 = vld [vmem:[%s12450_s1 + $0x528] sm:$0xf] }
0x1f61   : > { %6434 = vperm.xlu0 %8244, %v6356_v8  }
0x1f62   : > { %v11624_v18 = vpop.permute.xlu1 %6094  ;;  %v6035_v34 = vpop.permute.xlu0 %6034 }
0x1f63   : > { %v11626_v23 = vpop.permute.xlu2 %6120 }
0x1f64   : > { %6208 = vmatpush.bf16.msra.mxu0 %v6127_v49  ;;  %v8090_v49 = vld [vmem:[%s12450_s1 + $0x538] sm:$0xf0] }
0x1f65   : > { %v7817_v26 = vor.u32 %v8090_v49, %v7816_v28 }
0x1f68   : > { %6209 = vmatpush.bf16.msra.mxu0 %v6126_v29 }
0x1f6a   : > { %v6061_v63 = vpop.permute.xlu1 %6060  ;;  %v11634_v7 = vpop.permute.xlu0 %6092 }
0x1f6b   : > { %v6049_v14 = vpop.permute.xlu2 %6048  ;;  %v6140_v16 = vsel %vm5217_vm11, %v6061_v63, %v11590_v1  ;;  %v8083_v1 = vld [vmem:[%s12450_s1 + $0x504] sm:$0xf] }
0x1f6c   : > { %v6139_v20 = vsel %vm5217_vm11, %v6049_v14, %v6051_v51  ;;  %6210 = vmatpush.bf16.msra.mxu0 %v6125_v42  ;;  %v6141_v42 = vsel %vm5217_vm11, %v6065_v31, %v11564_v22 }
0x1f6d   : > { %6233 = vmatpush.bf16.msrb.mxu2 %v6139_v20  ;;  %v6353_v20 = vld [vmem:[%s12451_s2 + $0x1f8] sm:$0xff] }
0x1f6e   : > { %6379 = vperm.xlu1 %8237, %v6353_v20  }
0x1f70   : > { %6211 = vmatpush.bf16.msra.mxu0 %v6124_v21 }
0x1f71   : > { %6234 = vmatpush.bf16.msrb.mxu2 %v6138_v50 }
0x1f72   : > { %v11651_v5 = vpop.permute.xlu1 %6084  ;;  %v6031_v32 = vpop.permute.xlu0 %6030 }
0x1f73   : > { %v11653_v51 = vpop.permute.xlu2 %6076  ;;  %6212 = vmatmul.bf16.vlgmr.msra.gmra.mxu0 %v7797_v25  ;;  %v6134_v10 = vsel %vm5217_vm11, %v11576_v15, %v6031_v32  ;;  %v8095_v15 = vld [vmem:[%s12450_s1 + $0x560] sm:$0xf0] }
0x1f74   : > { %v7837_v63 = vor.u32 %v8095_v15, %v7836_v17  ;;  %v7812_v17 = vld [vmem:[%s12450_s1 + $0x510] sm:$0xf]  ;;  %v8087_v15 = vld [vmem:[%s12450_s1 + $0x520] sm:$0xf0] }
0x1f75   : > { %6235 = vmatpush.bf16.msrb.mxu2 %v6137_v56  ;;  %v6149_v56 = vsel %vm5217_vm11, %v11566_v61, %v11537_v53  ;;  %v6354_v53 = vld [vmem:[%s12451_s2 + $0x200] sm:$0xff] }
0x1f76   : > { %8239 = vset.pattern.permute.xlu1 %v12504_v40  ;;  %6384 = vperm.xlu2 %8238, %v6354_v53  }
0x1f77   : > { %6422 = vperm.xlu1 %8239, %v6353_v20  }
0x1f79   : > { %6236 = vmatpush.bf16.msrb.mxu2 %v6136_v33 }
0x1f7a   : > { %v6021_v59 = vpop.permute.xlu1 %6020  ;;  %v6089_v39 = vpop.permute.xlu0 %6088 }
0x1f7b   : > { %v6075_v60 = vpop.permute.xlu2 %6074  ;;  %v6132_v21 = vsel %vm5217_vm11, %v6021_v59, %v11616_v55 }
0x1f7c   : > { %v6143_v3 = vsel %vm5217_vm11, %v6073_v37, %v6075_v60  ;;  %v8088_v60 = vld [vmem:[%s12450_s1 + $0x52c] sm:$0xf] }
0x1f7d   : > { %6262 = vmatpush.bf16.msra.mxu1 %v6143_v3  ;;  %v7818_v3 = vld [vmem:[%s12450_s1 + $0x53c] sm:$0xf0] }
0x1f7e   : > { %v7821_v49 = vor.u32 %v8088_v60, %v7818_v3  ;;  %8240 = vset.pattern.permute.xlu2 %v12504_v40  ;;  %v7844_v3 = vld [vmem:[%s12450_s1 + $0x558] sm:$0xf] }
0x1f7f   : > { %8241 = vset.pattern.permute.xlu1 %v12503_v19  ;;  %6426 = vperm.xlu2 %8240, %v6354_v53   ;;  %v7832_v53 = vld [vmem:[%s12450_s1 + $0x538] sm:$0xf] }
0x1f81   : > { %6263 = vmatpush.bf16.msra.mxu1 %v6142_v27 }
0x1f82   : > { %v11674_v13 = vpop.permute.xlu1 %6082  ;;  %v6027_v37 = vpop.permute.xlu0 %6026 }
0x1f83   : > { %v6033_v29 = vpop.permute.xlu2 %6032  ;;  %6217 = vmatmul.bf16.gmra.mxu0 %v7817_v26  ;;  %v6133_v31 = vsel %vm5217_vm11, %v11595_v43, %v6027_v37  ;;  %v6150_v43 = vsel %vm5217_vm11, %v11586_v11, %v11588_v58  ;;  %v6148_v11 = vsel %vm5217_vm11, %v11634_v7, %v11624_v18  ;;  %v6352_v58 = vld [vmem:[%s12451_s2 + $0x1f0] sm:$0xff]  ;;  %v7856_v18 = vld [vmem:[%s12450_s1 + $0x578] sm:$0xf]  ;;  %v8100_v7 = vld [vmem:[%s12450_s1 + $0x588] sm:$0xf0] }
0x1f84   : > { %v6135_v14 = vsel %vm5217_vm11, %v6033_v29, %v6035_v34  ;;  %6374 = vperm.xlu1 %8241, %v6352_v58   ;;  %v7857_v28 = vor.u32 %v8100_v7, %v7856_v18 }
0x1f85   : > { %6237 = vmatpush.bf16.msrb.mxu2 %v6135_v14  ;;  %6264 = vmatpush.bf16.msra.mxu1 %v6141_v42 }
0x1f87   : > { %6414 = vperm.xlu2 %8240, %v11600_v41  }
0x1f89   : > { %6238 = vmatpush.bf16.msrb.mxu2 %v6134_v10  ;;  %6265 = vmatpush.bf16.msra.mxu1 %v6140_v16 }
0x1f8a   : > { %v6107_v48 = vpop.permute.xlu1 %6106  ;;  %v6059_v34 = vpop.permute.xlu0 %6058 }
0x1f8b   : > { %v6151_v22 = vsel %vm5217_vm11, %v11614_v62, %v6107_v48  ;;  %v7798_v62 = vld [vmem:[%s12450_s1 + $0x514] sm:$0xf0]  ;;  %v6119_v59 = vpop.permute.xlu2 %6118  ;;  %v8093_v48 = vld [vmem:[%s12450_s1 + $0x554] sm:$0xf] }
0x1f8c   : > { %6291 = vmatpush.bf16.msrb.mxu3 %v6151_v22  ;;  %v7801_v25 = vor.u32 %v8083_v1, %v7798_v62  ;;  %8242 = vset.pattern.permute.xlu1 %v12504_v40  ;;  %v8086_v22 = vld [vmem:[%s12450_s1 + $0x518] sm:$0xf0] }
0x1f8d   : > { %6239 = vmatpush.bf16.msrb.mxu2 %v6133_v31  ;;  %6266 = vmatpush.bf16.msra.mxu1 %v6059_v34  ;;  %v7804_v34 = vld [vmem:[%s12450_s1 + $0x508] sm:$0xf] }
0x1f8e   : > { %6418 = vperm.xlu1 %8242, %v6352_v58   ;;  %v7824_v58 = vld [vmem:[%s12450_s1 + $0x530] sm:$0xf] }
0x1f8f   : > { %8243 = vset.pattern.permute.xlu2 %v12503_v19 }
0x1f90   : > { %6292 = vmatpush.bf16.msrb.mxu3 %v6150_v43  ;;  %v7805_v43 = vor.u32 %v8086_v22, %v7804_v34 }
0x1f91   : > { %6240 = vmatpush.bf16.msrb.mxu2 %v6132_v21  ;;  %v7813_v21 = vor.u32 %v8087_v15, %v7812_v17 }
0x1f92   : > { %v6057_v50 = vpop.permute.xlu1 %6056  ;;  %v6081_v32 = vpop.permute.xlu0 %6080 }
0x1f93   : > { %6222 = vmatmul.bf16.gmra.mxu0 %v7837_v63  ;;  %6267 = vmatpush.bf16.msra.mxu1 %v6057_v50  ;;  %v6145_v37 = vsel %vm5217_vm11, %v6081_v32, %v11674_v13  ;;  %v6115_v29 = vpop.permute.xlu2 %6114  ;;  %v7826_v50 = vld [vmem:[%s12450_s1 + $0x544] sm:$0xf0] }
0x1f94   : > { %6241 = vmatmul.bf16.vlgmr.msrb.gmra.mxu2 %v7801_v25  ;;  %6293 = vmatpush.bf16.msrb.mxu3 %v6149_v56  ;;  %v8089_v25 = vld [vmem:[%s12450_s1 + $0x534] sm:$0xf]  ;;  %v8098_v56 = vld [vmem:[%s12450_s1 + $0x57c] sm:$0xf] }
0x1f95   : > { %v7829_v32 = vor.u32 %v8089_v25, %v7826_v50 }
0x1f98   : > { %6294 = vmatpush.bf16.msrb.mxu3 %v6148_v11  ;;  %v7858_v11 = vld [vmem:[%s12450_s1 + $0x58c] sm:$0xf0] }
0x1f9a   : > { %v6091_v55 = vpop.permute.xlu1 %6090  ;;  %v6079_v33 = vpop.permute.xlu0 %6078 }
0x1f9b   : > { %v6147_v61 = vsel %vm5217_vm11, %v6089_v39, %v6091_v55  ;;  %v6146_v39 = vsel %vm5217_vm11, %v11651_v5, %v11605_v2  ;;  %v8084_v2 = vld [vmem:[%s12450_s1 + $0x50c] sm:$0xf]  ;;  %v7806_v5 = vld [vmem:[%s12450_s1 + $0x51c] sm:$0xf0]  ;;  %v6144_v13 = vsel %vm5217_vm11, %v11653_v51, %v6079_v33  ;;  %v7838_v51 = vld [vmem:[%s12450_s1 + $0x564] sm:$0xf0]  ;;  %v6111_v1 = vpop.permute.xlu2 %6110  ;;  %v7861_v33 = vor.u32 %v8098_v56, %v7858_v11 }
0x1f9c   : > { %6295 = vmatpush.bf16.msrb.mxu3 %v6147_v61  ;;  %v7809_v14 = vor.u32 %v8084_v2, %v7806_v5  ;;  %v7841_v31 = vor.u32 %v8093_v48, %v7838_v51  ;;  %v8091_v55 = vld [vmem:[%s12450_s1 + $0x540] sm:$0xf0]  ;;  %v8092_v61 = vld [vmem:[%s12450_s1 + $0x548] sm:$0xf0]  ;;  %v7864_v5 = vld [vmem:[%s12450_s1 + $0x580] sm:$0xf] }
0x1f9d   : > { %v7825_v18 = vor.u32 %v8091_v55, %v7824_v58  ;;  %v7833_v7 = vor.u32 %v8092_v61, %v7832_v53 }
0x1fa0   : > { %6296 = vmatpush.bf16.msrb.mxu3 %v6146_v39  ;;  %v8096_v39 = vld [vmem:[%s12450_s1 + $0x568] sm:$0xf0] }
0x1fa2   : > { %v6117_v8 = vpop.permute.xlu1 %6116  ;;  %v6123_v26 = vpop.permute.xlu0 %6122 }
0x1fa3   : > { %v6155_v27 = vsel %vm5217_vm11, %v11626_v23, %v6123_v26  ;;  %6227 = vmatmul.bf16.gmra.mxu0 %v7857_v28  ;;  %v6349_v23 = vld [vmem:[%s12451_s2 + $0x1d8] sm:$0xff]  ;;  %v6154_v42 = vsel %vm5217_vm11, %v6117_v8, %v6119_v59  ;;  %v7852_v28 = vld [vmem:[%s12450_s1 + $0x560] sm:$0xf]  ;;  %v7845_v8 = vor.u32 %v8096_v39, %v7844_v3  ;;  %v11848_v22 = vpop.permute.xlu2 %6430 }
0x1fa4   : > { %6246 = vmatmul.bf16.gmra.mxu2 %v7821_v49  ;;  %6297 = vmatpush.bf16.msrb.mxu3 %v6145_v37  ;;  %v8094_v59 = vld [vmem:[%s12450_s1 + $0x55c] sm:$0xf]  ;;  %v8097_v49 = vld [vmem:[%s12450_s1 + $0x570] sm:$0xf0]  ;;  %v7866_v37 = vld [vmem:[%s12450_s1 + $0x594] sm:$0xf0] }
0x1fa5   : > { %6324 = vmatpush.bf16.msrb.mxu0 %v6155_v27  ;;  %6406 = vperm.xlu1 %8242, %v6349_v23   ;;  %v7853_v26 = vor.u32 %v8097_v49, %v7852_v28  ;;  %v8099_v27 = vld [vmem:[%s12450_s1 + $0x584] sm:$0xf] }
0x1fa6   : > { %6359 = vperm.xlu2 %8243, %v6349_v23   ;;  %v7869_v2 = vor.u32 %v8099_v27, %v7866_v37  ;;  %v8101_v23 = vld [vmem:[%s12450_s1 + $0x590] sm:$0xf0] }
0x1fa8   : > { %6298 = vmatpush.bf16.msrb.mxu3 %v6144_v13  ;;  %v8102_v13 = vld [vmem:[%s12450_s1 + $0x598] sm:$0xf0] }
0x1fa9   : > { %6325 = vmatpush.bf16.msrb.mxu0 %v6154_v42 }
0x1faa   : > { %v6113_v20 = vpop.permute.xlu1 %6112  ;;  %v6055_v10 = vpop.permute.xlu0 %6054 }
0x1fab   : > { %6268 = vmatpush.bf16.msra.mxu1 %v6055_v10  ;;  %6299 = vmatmul.bf16.vlgmr.msrb.gmra.mxu3 %v7809_v14  ;;  %v6153_v16 = vsel %vm5217_vm11, %v6113_v20, %v6115_v29  ;;  %v7872_v29 = vld [vmem:[%s12450_s1 + $0x588] sm:$0xf]  ;;  %v7865_v14 = vor.u32 %v8101_v23, %v7864_v5 }
0x1fac   : > { %v7873_v42 = vor.u32 %v8102_v13, %v7872_v29 }
0x1fad   : > { %6326 = vmatpush.bf16.msrb.mxu0 %v6153_v16  ;;  %8246 = vset.pattern.permute.xlu1 %v12503_v19 }
0x1fae   : > { %8245 = vset.pattern.permute.xlu2 %v12504_v40 }
0x1faf   : > { %6410 = vperm.xlu2 %8245, %v11610_v30   ;;  %v7846_v30 = vld [vmem:[%s12450_s1 + $0x56c] sm:$0xf0] }
0x1fb0   : > { %v7849_v60 = vor.u32 %v8094_v59, %v7846_v30 }
0x1fb2   : > { %v6109_v41 = vpop.permute.xlu1 %6108  ;;  %v6053_v62 = vpop.permute.xlu0 %6052 }
0x1fb3   : > { %6269 = vmatpush.bf16.msra.mxu1 %v6053_v62  ;;  %v6152_v63 = vsel %vm5217_vm11, %v6109_v41, %v6111_v1 }
0x1fb4   : > { %6251 = vmatmul.bf16.gmra.mxu2 %v7841_v31  ;;  %6327 = vmatpush.bf16.msrb.mxu0 %v6152_v63 }
0x1fb6   : > { %6270 = vmatmul.bf16.vlgmr.msra.gmra.mxu1 %v7805_v43 }
0x1fb7   : > { %7874 = vmatmul.msk.bf16.vlgmr.msrb.gmra.mxu0 %vm5286_vm13, %v7813_v21 }
0x1fba   : > { %v11866_v50 = vpop.permute.xlu0 %6389 }
0x1fbb   : > { %6304 = vmatmul.bf16.gmra.mxu3 %v7829_v32 }
0x1fc2   : > { %v6370_v59 = vpop.permute.xlu0 %6369 }
0x1fc4   : > { %6256 = vmatmul.bf16.gmra.mxu2 %v7861_v33 }
0x1fc6   : > { %6275 = vmatmul.bf16.gmra.mxu1 %v7825_v18 }
0x1fc7   : > { %7875 = vmatmul.msk.bf16.gmra.mxu0 %vm5286_vm13, %v7833_v7 }
0x1fc8   : > { %v11844_v51 = vpop.permute.xlu1 %6394 }
0x1fca   : > { %v6365_v13 = vpop.permute.xlu0 %6364 }
0x1fcb   : > { %6309 = vmatmul.bf16.gmra.mxu3 %v7849_v60 }
0x1fd0   : > { %v11854_v15 = vpop.permute.xlu2 %6384 }
0x1fd6   : > { %6280 = vmatmul.bf16.gmra.mxu1 %v7845_v8 }
0x1fd7   : > { %7876 = vmatmul.msk.bf16.gmra.mxu0 %vm5286_vm13, %v7853_v26 }
0x1fd9   : > { %v11860_v43 = vpop.permute.xlu2 %6426 }
0x1fdb   : > { %6314 = vmatmul.bf16.gmra.mxu3 %v7869_v2 }
0x1fe0   : > { %v11850_v31 = vpop.permute.xlu1 %6379 }
0x1fe1   : > { %v6415_v56 = vpop.permute.xlu2 %6414 }
0x1fe6   : > { %6285 = vmatmul.bf16.gmra.mxu1 %v7865_v14 }
0x1fe7   : > { %7877 = vmatmul.msk.bf16.gmra.mxu0 %vm5286_vm13, %v7873_v42 }
0x1fe9   : > { %v11856_v1 = vpop.permute.xlu1 %6422 }
0x1ff0   : > { %v6213_v20 = vpop.f32.mrf.mxu0 }
0x1ff6   : > { %v11862_v63 = vpop.permute.xlu1 %6374 }
0x1ff8   : > { %v6215_v10 = vpop.f32.mrf.mxu0 }
0x2000   : > { %v6218_v16 = vpop.f32.mrf.mxu0  ;;  %v6419_v11 = vpop.permute.xlu1 %6418 }
0x2001   : > { %v6360_v30 = vpop.permute.xlu2 %6359 }
0x2008   : > { %v6220_v48 = vpop.f32.mrf.mxu0 }
0x2009   : > { %v6411_v14 = vpop.permute.xlu2 %6410 }
0x2010   : > { %v11846_v34 = vpop.f32.mrf.mxu0 }
0x2017   : > { %v6242_v41 = vpop.f32.mrf.mxu2  ;;  %v6407_v3 = vpop.permute.xlu1 %6406 }
0x2018   : > { %v11852_v17 = vpop.f32.mrf.mxu0  ;;  %v6243_v58 = vadd.f32 %v6242_v41, %v6213_v20 }
0x201f   : > { %v6244_v21 = vpop.f32.mrf.mxu2 }
0x2020   : > { %v11858_v62 = vpop.f32.mrf.mxu0  ;;  %v6245_v39 = vadd.f32 %v6244_v21, %v6215_v10 }
0x2027   : > { %v6247_v61 = vpop.f32.mrf.mxu2 }
0x2028   : > { %v11864_v25 = vpop.f32.mrf.mxu0  ;;  %v6248_v42 = vadd.f32 %v6247_v61, %v6218_v16 }
0x202e   : > { %v6300_v32 = vpop.f32.mrf.mxu3 }
0x202f   : > { %v6249_v5 = vpop.f32.mrf.mxu2 }
0x2030   : > { %v6250_v61 = vadd.f32 %v6249_v5, %v6220_v48 }
0x2033   : > { %v6271_v55 = vpop.f32.mrf.mxu1 }
0x2034   : > { %v6272_v33 = vadd.f32 %v6271_v55, %v6243_v58  ;;  %v6329_v53 = vpop.f32.mrf.mxu0 }
0x2036   : > { %v6301_v18 = vadd.f32 %v6300_v32, %v6272_v33  ;;  %v6302_v7 = vpop.f32.mrf.mxu3  ;;  %v11871_v32 = vld [vmem:[%s12452_s3 + $0x5] ss:$0 sm:$0xff] }
0x2037   : > { %v6252_v16 = vpop.f32.mrf.mxu2 }
0x2038   : > { %v6330_v60 = vadd.f32 %v6329_v53, %v6301_v18  ;;  %v6253_v48 = vadd.f32 %v6252_v16, %v11846_v34 }
0x203a   : > { %v6397_v28 = vmul.f32 %v6360_v30, %v6330_v60 }
0x203b   : > { %v6273_v49 = vpop.f32.mrf.mxu1 }
0x203c   : > { %v6437_v8 = vadd.f32 %v6407_v3, %v6397_v28  ;;  %v6274_v26 = vadd.f32 %v6273_v49, %v6245_v39  ;;  %v6331_v27 = vpop.f32.mrf.mxu0 }
0x203e   : > { %v6303_v37 = vadd.f32 %v6302_v7, %v6274_v26  ;;  %v6305_v2 = vpop.f32.mrf.mxu3  ;;  %v6445_v23 = vmax.f32 %v6437_v8, 0.0 }
0x203f   : > { %v6254_v5 = vpop.f32.mrf.mxu2 }
0x2040   : > { %v6332_v29 = vadd.f32 %v6331_v27, %v6303_v37  ;;  %v6453_v10 = vmul.f32 %v11871_v32, %v6445_v23  ;;  %v6255_v34 = vadd.f32 %v6254_v5, %v11852_v17 }
0x2042   : > { %v6398_v20 = vmul.f32 %v6365_v13, %v6332_v29  ;;  %v6461_v7 = vpack.c.bf16 %v6453_v10, %v6453_v10 }
0x2043   : > { %v6276_v41 = vpop.f32.mrf.mxu1 }
0x2044   : > { %v6438_v21 = vadd.f32 %v6411_v14, %v6398_v20  ;;  %v6277_v58 = vadd.f32 %v6276_v41, %v6248_v42  ;;  %v6334_v55 = vpop.f32.mrf.mxu0  ;;  %v6477_v49 = vunpack.c.l.b16 %v6461_v7 }
0x2046   : > { %v6446_v33 = vmax.f32 %v6438_v21, 0.0  ;;  %v6306_v53 = vadd.f32 %v6305_v2, %v6277_v58  ;;  %v6307_v18 = vpop.f32.mrf.mxu3 }
0x2048   : > { %v6454_v30 = vmul.f32 %v11871_v32, %v6446_v33  ;;  %v6335_v60 = vadd.f32 %v6334_v55, %v6306_v53 }
0x204a   : > { %v6462_v3 = vpack.c.bf16 %v6454_v30, %v6454_v30  ;;  %v6399_v39 = vmul.f32 %v6370_v59, %v6335_v60 }
0x204b   : > { %v6278_v28 = vpop.f32.mrf.mxu1 }
0x204c   : > { %v6478_v8 = vunpack.c.l.b16 %v6462_v3  ;;  %v6439_v26 = vadd.f32 %v6415_v56, %v6399_v39  ;;  %v6279_v27 = vadd.f32 %v6278_v28, %v6250_v61  ;;  %v6336_v37 = vpop.f32.mrf.mxu0  ;;  %v6257_v39 = vpop.f32.mrf.mxu2 }
0x204e   : > { %v6485_v23 = vpack.c.b16 %v6478_v8, %v6477_v49  ;;  %v6308_v29 = vadd.f32 %v6307_v18, %v6279_v27  ;;  %v6310_v13 = vpop.f32.mrf.mxu3  ;;  %v6447_v14 = vmax.f32 %v6439_v26, 0.0 }
0x2050   : > { %v6337_v2 = vadd.f32 %v6336_v37, %v6308_v29  ;;  %6513 = vrot.lane.b32.xlu1 %v6485_v23, %s8294_s25  ;;  %6533 = vrot.lane.b32.xlu2 %v6485_v23, %s8288_s12  ;;  %v6455_v56 = vmul.f32 %v11871_v32, %v6447_v14 }
0x2051   : > { %6489 = vrot.lane.b32.xlu0 %v6485_v23, %s8279_s22 }
0x2052   : > { %v6400_v59 = vmul.f32 %v11862_v63, %v6337_v2  ;;  %v6463_v33 = vpack.c.bf16 %v6455_v56, %v6455_v56 }
0x2053   : > { %v6281_v42 = vpop.f32.mrf.mxu1 }
0x2054   : > { %v6440_v20 = vadd.f32 %v6419_v11, %v6400_v59  ;;  %v6282_v41 = vadd.f32 %v6281_v42, %v6253_v48  ;;  %v6339_v10 = vpop.f32.mrf.mxu0  ;;  %v6479_v30 = vunpack.c.l.b16 %v6463_v33  ;;  %v6259_v59 = vpop.f32.mrf.mxu2 }
0x2056   : > { %v6448_v21 = vmax.f32 %v6440_v20, 0.0  ;;  %v6311_v58 = vadd.f32 %v6310_v13, %v6282_v41  ;;  %v6312_v55 = vpop.f32.mrf.mxu3 }
0x2058   : > { %v6456_v53 = vmul.f32 %v11871_v32, %v6448_v21  ;;  %v6340_v18 = vadd.f32 %v6339_v10, %v6311_v58  ;;  %6501 = vrot.lane.b32.xlu1 %v6485_v23, %s8277_s20  ;;  %6557 = vrot.lane.b32.xlu2 %v6485_v23, %s8297_s27 }
0x2059   : > { %6705 = vrot.lane.b32.xlu0 %v6485_v23, %s8295_s19 }
0x205a   : > { %v6464_v63 = vpack.c.bf16 %v6456_v53, %v6456_v53  ;;  %v6401_v11 = vmul.f32 %v11850_v31, %v6340_v18  ;;  %v6258_v31 = vadd.f32 %v6257_v39, %v11858_v62 }
0x205b   : > { %v6283_v7 = vpop.f32.mrf.mxu1 }
0x205c   : > { %v6480_v60 = vunpack.c.l.b16 %v6464_v63  ;;  %v6441_v16 = vadd.f32 %v11856_v1, %v6401_v11  ;;  %v6284_v61 = vadd.f32 %v6283_v7, %v6255_v34  ;;  %v6341_v3 = vpop.f32.mrf.mxu0 }
0x205e   : > { %v6486_v28 = vpack.c.b16 %v6480_v60, %v6479_v30  ;;  %v6313_v49 = vadd.f32 %v6312_v55, %v6284_v61  ;;  %v6449_v8 = vmax.f32 %v6441_v16, 0.0  ;;  %v6315_v17 = vpop.f32.mrf.mxu3 }
0x2060   : > { %v6342_v26 = vadd.f32 %v6341_v3, %v6313_v49  ;;  %6545 = vrot.lane.b32.xlu1 %v6485_v23, %s8290_s16  ;;  %6491 = vrot.lane.b32.xlu2 %v6486_v28, %s8279_s22  ;;  %v6457_v1 = vmul.f32 %v11871_v32, %v6449_v8 }
0x2061   : > { %6525 = vrot.lane.b32.xlu0 %v6485_v23, %s8296_s14 }
0x2062   : > { %v6402_v27 = vmul.f32 %v11854_v15, %v6342_v26  ;;  %v6465_v5 = vpack.c.bf16 %v6457_v1, %v6457_v1  ;;  %v6260_v15 = vadd.f32 %v6259_v59, %v11864_v25  ;;  %v6435_v25 = vpop.permute.xlu0 %6434 }
0x2063   : > { %v6286_v37 = vpop.f32.mrf.mxu1 }
0x2064   : > { %v6442_v29 = vadd.f32 %v11860_v43, %v6402_v27  ;;  %v6287_v13 = vadd.f32 %v6286_v37, %v6258_v31  ;;  %v6344_v14 = vpop.f32.mrf.mxu0  ;;  %v6481_v10 = vunpack.c.l.b16 %v6465_v5 }
0x2066   : > { %v6450_v2 = vmax.f32 %v6442_v29, 0.0  ;;  %v6316_v48 = vadd.f32 %v6315_v17, %v6287_v13  ;;  %v6317_v41 = vpop.f32.mrf.mxu3 }
0x2068   : > { %v6458_v42 = vmul.f32 %v11871_v32, %v6450_v2  ;;  %v6345_v56 = vadd.f32 %v6344_v14, %v6316_v48  ;;  %6535 = vrot.lane.b32.xlu1 %v6486_v28, %s8288_s12  ;;  %6707 = vrot.lane.b32.xlu2 %v6486_v28, %s8295_s19 }
0x2069   : > { %6569 = vrot.lane.b32.xlu0 %v6485_v23, %s12487_s24 }
0x206a   : > { %v6466_v62 = vpack.c.bf16 %v6458_v42, %v6458_v42  ;;  %v6403_v43 = vmul.f32 %v11866_v50, %v6345_v56 }
0x206b   : > { %v6288_v20 = vpop.f32.mrf.mxu1 }
0x206c   : > { %v6482_v21 = vunpack.c.l.b16 %v6466_v62  ;;  %v6443_v58 = vadd.f32 %v11848_v22, %v6403_v43  ;;  %v6289_v55 = vadd.f32 %v6288_v20, %v6260_v15  ;;  %v6346_v33 = vpop.f32.mrf.mxu0 }
0x206e   : > { %v6487_v53 = vpack.c.b16 %v6482_v21, %v6481_v10  ;;  %v6318_v18 = vadd.f32 %v6317_v41, %v6289_v55  ;;  %v6451_v34 = vmax.f32 %v6443_v58, 0.0 }
0x2070   : > { %v6347_v63 = vadd.f32 %v6346_v33, %v6318_v18  ;;  %6515 = vrot.lane.b32.xlu1 %v6486_v28, %s8294_s25  ;;  %6559 = vrot.lane.b32.xlu2 %v6486_v28, %s8297_s27  ;;  %v6459_v23 = vmul.f32 %v11871_v32, %v6451_v34 }
0x2071   : > { %6503 = vrot.lane.b32.xlu0 %v6486_v28, %s8277_s20 }
0x2072   : > { %v6404_v50 = vmul.f32 %v11844_v51, %v6347_v63  ;;  %v6467_v22 = vpack.c.bf16 %v6459_v23, %v6459_v23 }
0x2074   : > { %v6444_v11 = vadd.f32 %v6435_v25, %v6404_v50  ;;  %v6483_v16 = vunpack.c.l.b16 %v6467_v22 }
0x2076   : > { %v6452_v7 = vmax.f32 %v6444_v11, 0.0 }
0x2078   : > { %v6460_v30 = vmul.f32 %v11871_v32, %v6452_v7  ;;  %6493 = vrot.lane.b32.xlu1 %v6487_v53, %s8279_s22  ;;  %6527 = vrot.lane.b32.xlu2 %v6486_v28, %s8296_s14 }
0x2079   : > { %6517 = vrot.lane.b32.xlu0 %v6487_v53, %s8294_s25 }
0x207a   : > { %v6468_v60 = vpack.c.bf16 %v6460_v30, %v6460_v30 }
0x207c   : > { %v6484_v61 = vunpack.c.l.b16 %v6468_v60 }
0x207e   : > { %v6488_v3 = vpack.c.b16 %v6484_v61, %v6483_v16 }
0x2080   : > { %6537 = vrot.lane.b32.xlu1 %v6487_v53, %s8288_s12  ;;  %6571 = vrot.lane.b32.xlu2 %v6486_v28, %s12487_s24 }
0x2081   : > { %6561 = vrot.lane.b32.xlu0 %v6487_v53, %s8297_s27 }
0x2088   : > { %6529 = vrot.lane.b32.xlu1 %v6487_v53, %s8296_s14  ;;  %6547 = vrot.lane.b32.xlu2 %v6486_v28, %s8290_s16 }
0x2089   : > { %6495 = vrot.lane.b32.xlu0 %v6488_v3, %s8279_s22 }
0x2090   : > { %6573 = vrot.lane.b32.xlu1 %v6487_v53, %s12487_s24  ;;  %6709 = vrot.lane.b32.xlu2 %v6487_v53, %s8295_s19 }
0x2091   : > { %6711 = vrot.lane.b32.xlu0 %v6488_v3, %s8295_s19 }
0x2098   : > { %6549 = vrot.lane.b32.xlu1 %v6487_v53, %s8290_s16  ;;  %6505 = vrot.lane.b32.xlu2 %v6487_v53, %s8277_s20 }
0x2099   : > { %6519 = vrot.lane.b32.xlu0 %v6488_v3, %s8294_s25 }
0x20a0   : > { %6563 = vrot.lane.b32.xlu2 %v6488_v3, %s8297_s27  ;;  %6539 = vrot.lane.b32.xlu1 %v6488_v3, %s8288_s12 }
0x20a1   : > { %6531 = vrot.lane.b32.xlu0 %v6488_v3, %s8296_s14 }
0x20a8   : > { %6507 = vrot.lane.b32.xlu1 %v6488_v3, %s8277_s20 }
0x20a9   : > { %6575 = vrot.lane.b32.xlu0 %v6488_v3, %s12487_s24 }
0x20aa   : > { %v6534_v51 = vpop.permute.xlu2 %6533 }
0x20ab   : > { %v6541_v17 = vsel %vm3251_vm1, %v6534_v51, %v12499_v44 }
0x20b0   : > { %6769 = vrot.lane.b32.xlu1 %v6534_v51, %s8295_s19 }
0x20b1   : > { %6551 = vrot.lane.b32.xlu0 %v6488_v3, %s8290_s16 }
0x20b2   : > { %v11930_v32 = vpop.permute.xlu2 %6557 }
0x20b3   : > { %v6565_v30 = vsel %vm4946_vm12, %v11930_v32, %v12498_v46 }
0x20ba   : > { %v6492_v39 = vpop.permute.xlu2 %6491 }
0x20bb   : > { %v6498_v2 = vsel %vm360_vm8, %v12496_v45, %v6492_v39 }
0x20c2   : > { %v6514_v28 = vpop.permute.xlu1 %6513  ;;  %v11945_v27 = vpop.permute.xlu2 %6707 }
0x20c3   : > { %v6490_v49 = vpop.permute.xlu0 %6489  ;;  %6747 = vrot.lane.b32.xlu0 %v6514_v28, %s8295_s19  ;;  %v6521_v1 = vsel %vm4899_vm10, %v12497_v9, %v6514_v28 }
0x20c4   : > { %v6497_v8 = vsel %vm360_vm8, %v12496_v45, %v6490_v49  ;;  %6715 = vrot.lane.b32.xlu2 %v6490_v49, %s8295_s19 }
0x20c5   : > { %6713 = vrot.lane.b32.xlu1 %v6497_v8, %s8295_s19 }
0x20ca   : > { %v11937_v26 = vpop.permute.xlu1 %6501  ;;  %v6560_v13 = vpop.permute.xlu2 %6559 }
0x20cb   : > { %v11941_v31 = vpop.permute.xlu0 %6705  ;;  %6801 = vrot.lane.b32.xlu0 %v11930_v32, %s8295_s19  ;;  %v6566_v10 = vsel %vm4946_vm12, %v6560_v13, %v12498_v46 }
0x20cc   : > { %6771 = vrot.lane.b32.xlu2 %v6541_v17, %s8295_s19 }
0x20d2   : > { %v11948_v37 = vpop.permute.xlu1 %6545  ;;  %v11962_v59 = vpop.permute.xlu2 %6527 }
0x20d3   : > { %v11952_v29 = vpop.permute.xlu0 %6525  ;;  %6719 = vrot.lane.b32.xlu0 %v6492_v39, %s8295_s19 }
0x20d4   : > { %6745 = vrot.lane.b32.xlu2 %v6521_v1, %s8295_s19 }
0x20da   : > { %v6536_v14 = vpop.permute.xlu1 %6535  ;;  %v11971_v15 = vpop.permute.xlu2 %6571 }
0x20db   : > { %v11958_v48 = vpop.permute.xlu0 %6569  ;;  %6773 = vrot.lane.b32.xlu1 %v6536_v14, %s8295_s19  ;;  %v6542_v42 = vsel %vm3251_vm1, %v6536_v14, %v12499_v44 }
0x20dc   : > { %6717 = vrot.lane.b32.xlu2 %v6498_v2, %s8295_s19 }
0x20e2   : > { %v6516_v5 = vpop.permute.xlu1 %6515  ;;  %v11982_v55 = vpop.permute.xlu2 %6547 }
0x20e3   : > { %v11966_v56 = vpop.permute.xlu0 %6503  ;;  %6751 = vrot.lane.b32.xlu0 %v6516_v5, %s8295_s19  ;;  %6805 = vrot.lane.b32.xlu1 %v6560_v13, %s8295_s19  ;;  %v6522_v43 = vsel %vm4899_vm10, %v12497_v9, %v6516_v5 }
0x20e4   : > { %6775 = vrot.lane.b32.xlu2 %v6542_v42, %s8295_s19  ;;  %v6510_v13 = vsel %vm372_vm7, %v12500_v36, %v11966_v56 }
0x20ea   : > { %v6494_v62 = vpop.permute.xlu1 %6493  ;;  %v11993_v63 = vpop.permute.xlu2 %6709 }
0x20eb   : > { %v6518_v20 = vpop.permute.xlu0 %6517  ;;  %6723 = vrot.lane.b32.xlu1 %v6494_v62, %s8295_s19  ;;  %v6499_v7 = vsel %vm360_vm8, %v12496_v45, %v6494_v62 }
0x20ec   : > { %6749 = vrot.lane.b32.xlu2 %v6522_v43, %s8295_s19  ;;  %v6523_v53 = vsel %vm4899_vm10, %v12497_v9, %v6518_v20 }
0x20f2   : > { %v6538_v41 = vpop.permute.xlu1 %6537  ;;  %v6506_v11 = vpop.permute.xlu2 %6505 }
0x20f3   : > { %v6543_v21 = vsel %vm3251_vm1, %v6538_v41, %v12499_v44  ;;  %v6562_v58 = vpop.permute.xlu0 %6561  ;;  %6777 = vrot.lane.b32.xlu0 %v6538_v41, %s8295_s19  ;;  %v6511_v14 = vsel %vm372_vm7, %v12500_v36, %v6506_v11 }
0x20f4   : > { %6807 = vrot.lane.b32.xlu2 %v6566_v10, %s8295_s19  ;;  %6779 = vrot.lane.b32.xlu1 %v6543_v21, %s8295_s19  ;;  %v6567_v18 = vsel %vm4946_vm12, %v6562_v58, %v12498_v46 }
0x20fa   : > { %v6530_v33 = vpop.permute.xlu1 %6529  ;;  %v6564_v16 = vpop.permute.xlu2 %6563 }
0x20fb   : > { %v6496_v34 = vpop.permute.xlu0 %6495  ;;  %6755 = vrot.lane.b32.xlu0 %v6518_v20, %s8295_s19 }
0x20fc   : > { %6753 = vrot.lane.b32.xlu2 %v6523_v53, %s8295_s19  ;;  %6811 = vrot.lane.b32.xlu1 %v6567_v18, %s8295_s19  ;;  %v6500_v50 = vsel %vm360_vm8, %v12496_v45, %v6496_v34  ;;  %vm7253_vm8 = vcmask 5120  }
0x2102   : > { %v6574_v25 = vpop.permute.xlu1 %6573 }
0x2103   : > { %v11997_v23 = vpop.permute.xlu0 %6711  ;;  %6809 = vrot.lane.b32.xlu0 %v6562_v58, %s8295_s19  ;;  %v6579_v17 = vsel %vm2382_vm0, %v6574_v25, %v12502_v35 }
0x2104   : > { %6727 = vrot.lane.b32.xlu2 %v6496_v34, %s8295_s19  ;;  %6725 = vrot.lane.b32.xlu1 %v6500_v50, %s8295_s19 }
0x210a   : > { %v6550_v22 = vpop.permute.xlu1 %6549 }
0x210b   : > { %v6520_v60 = vpop.permute.xlu0 %6519  ;;  %6721 = vrot.lane.b32.xlu0 %v6499_v7, %s8295_s19  ;;  %v6555_v62 = vsel %vm3264_vm4, %v6550_v22, %v12501_v38 }
0x210c   : > { %6803 = vrot.lane.b32.xlu1 %v6565_v30, %s8295_s19  ;;  %v6524_v20 = vsel %vm4899_vm10, %v12497_v9, %v6520_v60  ;;  %v6554_v30 = vsel %vm3264_vm4, %v11982_v55, %v12501_v38 }
0x2112   : > { %v6540_v61 = vpop.permute.xlu1 %6539 }
0x2113   : > { %v6532_v3 = vpop.permute.xlu0 %6531  ;;  %6813 = vrot.lane.b32.xlu0 %v6564_v16, %s8295_s19  ;;  %6781 = vrot.lane.b32.xlu2 %v6540_v61, %s8295_s19 }
0x2114   : > { %6765 = vrot.lane.b32.xlu1 %v6530_v33, %s8295_s19 }
0x211a   : > { %v6508_v51 = vpop.permute.xlu1 %6507 }
0x211b   : > { %v6576_v45 = vpop.permute.xlu0 %6575  ;;  %6759 = vrot.lane.b32.xlu2 %v6520_v60, %s8295_s19  ;;  %6767 = vrot.lane.b32.xlu0 %v6532_v3, %s8295_s19 }
0x211c   : > { %v6580_v53 = vsel %vm2382_vm0, %v6576_v45, %v12502_v35 }
0x211e   : > { %v12014_v32 = vpop.permute.xlu2 %6715 }
0x2122   : > { %v6770_v28 = vpop.permute.xlu1 %6769 }
0x2123   : > { %v6552_v39 = vpop.permute.xlu0 %6551  ;;  %6743 = vrot.lane.b32.xlu2 %v6508_v51, %s8295_s19  ;;  %6739 = vrot.lane.b32.xlu0 %v6506_v11, %s8295_s19  ;;  %v6512_v11 = vsel %vm372_vm7, %v12500_v36, %v6508_v51 }
0x2124   : > { %6797 = vrot.lane.b32.xlu1 %v6552_v39, %s8295_s19  ;;  %v6556_v50 = vsel %vm3264_vm4, %v6552_v39, %v12501_v38  ;;  %v7064_v39 = vld [vmem:[%s12451_s2 + $0x248] sm:$0xff] }
0x2126   : > { %v6772_v49 = vpop.permute.xlu2 %6771 }
0x2127   : > { %v12020_v8 = vsel %vm5217_vm11, %v6770_v28, %v6772_v49 }
0x212b   : > { %6825 = vrot.lane.b32.xlu0 %v6574_v25, %s8295_s19  ;;  %6829 = vrot.lane.b32.xlu2 %v6576_v45, %s8295_s19 }
0x212c   : > { %6827 = vrot.lane.b32.xlu1 %v6579_v17, %s8295_s19 }
0x212e   : > { %v6746_v1 = vpop.permute.xlu2 %6745 }
0x2133   : > { %6733 = vrot.lane.b32.xlu0 %v6510_v13, %s8295_s19  ;;  %6737 = vrot.lane.b32.xlu2 %v6511_v14, %s8295_s19 }
0x2134   : > { %6735 = vrot.lane.b32.xlu1 %v11966_v56, %s8295_s19  ;;  %v6544_v56 = vsel %vm3251_vm1, %v6540_v61, %v12499_v44  ;;  %v6568_v44 = vsel %vm4946_vm12, %v6564_v16, %v12498_v46 }
0x2135   : > { %v6748_v2 = vpop.permute.xlu0 %6747 }
0x2136   : > { %v12036_v5 = vpop.permute.xlu2 %6717  ;;  %v12039_v42 = vsel %vm5217_vm11, %v6746_v1, %v6748_v2 }
0x2137   : > { %v12057_v10 = vpop.permute.xlu1 %6713 }
0x213b   : > { %6795 = vrot.lane.b32.xlu0 %v6555_v62, %s8295_s19  ;;  %6763 = vrot.lane.b32.xlu2 %v11962_v59, %s8295_s19  ;;  %v6578_v59 = vsel %vm2382_vm0, %v11971_v15, %v12502_v35 }
0x213c   : > { %6821 = vrot.lane.b32.xlu1 %v11971_v15, %s8295_s19  ;;  %v6509_v15 = vsel %vm372_vm7, %v12500_v36, %v11937_v26  ;;  %vm7249_vm7 = vcmask 7168  }
0x213d   : > { %v12052_v41 = vpop.permute.xlu0 %6801 }
0x213e   : > { %v6776_v43 = vpop.permute.xlu2 %6775 }
0x2143   : > { %6783 = vrot.lane.b32.xlu0 %v6544_v56, %s8295_s19  ;;  %6793 = vrot.lane.b32.xlu2 %v6550_v22, %s8295_s19  ;;  %v6577_v22 = vsel %vm2382_vm0, %v11958_v48, %v12502_v35  ;;  %v7065_v35 = vld [vmem:[%s12451_s2 + $0x250] sm:$0xff] }
0x2144   : > { %6757 = vrot.lane.b32.xlu1 %v6524_v20, %s8295_s19  ;;  %v6837_v20 = vsel %vm5217_vm11, %v12057_v10, %v12014_v32  ;;  %v6834_v32 = vsel %vm5217_vm11, %v12505_v6, %v11945_v27  ;;  %v8105_v10 = vld [vmem:[%s12450_s1 + $0x5b0] sm:$0xf0] }
0x2145   : > { %v6720_v9 = vpop.permute.xlu0 %6719 }
0x2146   : > { %v6750_v21 = vpop.permute.xlu2 %6749  ;;  %v6838_v62 = vsel %vm5217_vm11, %v12036_v5, %v6720_v9  ;;  %v6835_v5 = vsel %vm5217_vm11, %v12505_v6, %v11993_v63  ;;  %v6833_v63 = vsel %vm5217_vm11, %v12505_v6, %v11941_v31 }
0x214b   : > { %6761 = vrot.lane.b32.xlu0 %v11952_v29, %s8295_s19  ;;  %6823 = vrot.lane.b32.xlu2 %v6578_v59, %s8295_s19  ;;  %v6836_v59 = vsel %vm5217_vm11, %v12505_v6, %v11997_v23  ;;  %v7880_v23 = vld [vmem:[%s12450_s1 + $0x5a0] sm:$0xf] }
0x214c   : > { %6815 = vrot.lane.b32.xlu1 %v6568_v44, %s8295_s19 }
0x214d   : > { %v6774_v58 = vpop.permute.xlu1 %6773 }
0x214e   : > { %v12069_v33 = vsel %vm5217_vm11, %v6774_v58, %v6776_v43  ;;  %v6808_v46 = vpop.permute.xlu2 %6807 }
0x2153   : > { %6831 = vrot.lane.b32.xlu0 %v6580_v53, %s8295_s19  ;;  %6731 = vrot.lane.b32.xlu2 %v11937_v26, %s8295_s19  ;;  %v7881_v53 = vor.u32 %v8105_v10, %v7880_v23  ;;  %v7058_v23 = vld [vmem:[%s12451_s2 + $0x218] sm:$0xff] }
0x2154   : > { %6729 = vrot.lane.b32.xlu1 %v6509_v15, %s8295_s19 }
0x2155   : > { %v6806_v29 = vpop.permute.xlu1 %6805  ;;  %v6752_v18 = vpop.permute.xlu0 %6751 }
0x2156   : > { %v12081_v34 = vsel %vm5217_vm11, %v6750_v21, %v6752_v18  ;;  %v12084_v25 = vsel %vm5217_vm11, %v6806_v29, %v6808_v46  ;;  %v6754_v7 = vpop.permute.xlu2 %6753  ;;  %v7900_v18 = vld [vmem:[%s12450_s1 + $0x5c8] sm:$0xf] }
0x215b   : > { %6789 = vrot.lane.b32.xlu0 %v11982_v55, %s8295_s19  ;;  %6799 = vrot.lane.b32.xlu2 %v6556_v50, %s8295_s19  ;;  %v6553_v55 = vsel %vm3264_vm4, %v11948_v37, %v12501_v38  ;;  %v8110_v50 = vld [vmem:[%s12450_s1 + $0x5d8] sm:$0xf0] }
0x215c   : > { %6741 = vrot.lane.b32.xlu1 %v6512_v11, %s8295_s19  ;;  %v7901_v31 = vor.u32 %v8110_v50, %v7900_v18  ;;  %v7882_v18 = vld [vmem:[%s12450_s1 + $0x5b4] sm:$0xf0] }
0x215d   : > { %v6724_v26 = vpop.permute.xlu1 %6723 }
0x215e   : > { %v6728_v61 = vpop.permute.xlu2 %6727 }
0x2163   : > { %6819 = vrot.lane.b32.xlu0 %v6577_v22, %s8295_s19  ;;  %6817 = vrot.lane.b32.xlu2 %v11958_v48, %s8295_s19 }
0x2164   : > { %6791 = vrot.lane.b32.xlu1 %v6554_v30, %s8295_s19  ;;  %v7062_v30 = vld [vmem:[%s12451_s2 + $0x238] sm:$0xff] }
0x2165   : > { %v6778_v36 = vpop.permute.xlu0 %6777 }
0x2166   : > { %v6780_v60 = vpop.permute.xlu1 %6779 }
0x2167   : > { %v12105_v16 = vsel %vm5217_vm11, %v6778_v36, %v6780_v60  ;;  %v7920_v36 = vld [vmem:[%s12450_s1 + $0x5f0] sm:$0xf]  ;;  %v8115_v60 = vld [vmem:[%s12450_s1 + $0x600] sm:$0xf0] }
0x216b   : > { %7143 = vperm.xlu0 %8244, %v7065_v35   ;;  %6787 = vrot.lane.b32.xlu2 %v6553_v55, %s8295_s19 }
0x216c   : > { %6785 = vrot.lane.b32.xlu1 %v11948_v37, %s8295_s19 }
0x216d   : > { %v6756_v48 = vpop.permute.xlu0 %6755  ;;  %v6782_v51 = vpop.permute.xlu2 %6781 }
0x216e   : > { %v6812_v3 = vpop.permute.xlu1 %6811  ;;  %v12117_v45 = vsel %vm5217_vm11, %v6754_v7, %v6756_v48 }
0x2173   : > { %7139 = vperm.xlu2 %8245, %v7064_v39   ;;  %8247 = vset.pattern.permute.xlu0 %v12503_v19 }
0x2174   : > { %7103 = vperm.xlu1 %8246, %v7065_v35   ;;  %7098 = vperm.xlu0 %8247, %v7064_v39  }
0x2175   : > { %v6810_v38 = vpop.permute.xlu0 %6809  ;;  %v6760_v17 = vpop.permute.xlu2 %6759 }
0x2176   : > { %v6726_v28 = vpop.permute.xlu1 %6725  ;;  %v12124_v49 = vsel %vm5217_vm11, %v6810_v38, %v6812_v3  ;;  %v7921_v3 = vor.u32 %v8115_v60, %v7920_v36  ;;  %v7908_v36 = vld [vmem:[%s12450_s1 + $0x5d0] sm:$0xf]  ;;  %v8111_v60 = vld [vmem:[%s12450_s1 + $0x5e0] sm:$0xf0] }
0x2177   : > { %v6840_v37 = vsel %vm5217_vm11, %v6726_v28, %v6728_v61 }
0x2178   : > { %6913 = vmatpush.bf16.msra.mxu2 %v6840_v37 }
0x217b   : > { %8248 = vset.pattern.permute.xlu2 %v12503_v19 }
0x217c   : > { %7088 = vperm.xlu1 %8246, %v7062_v30  }
0x217d   : > { %v6722_v1 = vpop.permute.xlu0 %6721  ;;  %v12135_v43 = vpop.permute.xlu2 %6743 }
0x217e   : > { %v6804_v13 = vpop.permute.xlu1 %6803  ;;  %v6839_v14 = vsel %vm5217_vm11, %v6722_v1, %v6724_v26 }
0x217f   : > { %6914 = vmatpush.bf16.msra.mxu2 %v6839_v14  ;;  %v12131_v2 = vsel %vm5217_vm11, %v12052_v41, %v6804_v13 }
0x2183   : > { %6915 = vmatpush.bf16.msra.mxu2 %v6838_v62 }
0x2184   : > { %8249 = vset.pattern.permute.xlu1 %v12504_v40 }
0x2185   : > { %v6814_v56 = vpop.permute.xlu0 %6813  ;;  %v6830_v41 = vpop.permute.xlu2 %6829  ;;  %7131 = vperm.xlu1 %8249, %v7062_v30  }
0x2186   : > { %v12145_v44 = vpop.permute.xlu1 %6765 }
0x2187   : > { %6916 = vmatpush.bf16.msra.mxu2 %v6837_v20 }
0x218b   : > { %6917 = vmatpush.bf16.msra.mxu2 %v6836_v59  ;;  %v7063_v59 = vld [vmem:[%s12451_s2 + $0x240] sm:$0xff] }
0x218c   : > { %7093 = vperm.xlu2 %8248, %v7063_v59  }
0x218d   : > { %v12143_v21 = vpop.permute.xlu0 %6767  ;;  %v12166_v27 = vpop.permute.xlu2 %6737  ;;  %8251 = vset.pattern.permute.xlu1 %v12503_v19 }
0x218f   : > { %6918 = vmatpush.bf16.msra.mxu2 %v6835_v5  ;;  %v7896_v5 = vld [vmem:[%s12450_s1 + $0x5b0] sm:$0xf] }
0x2193   : > { %6919 = vmatpush.bf16.msra.mxu2 %v6834_v32  ;;  %v8107_v32 = vld [vmem:[%s12450_s1 + $0x5c0] sm:$0xf0] }
0x2194   : > { %8250 = vset.pattern.permute.xlu2 %v12504_v40 }
0x2195   : > { %v12159_v9 = vpop.permute.xlu0 %6739  ;;  %v12168_v29 = vpop.permute.xlu2 %6763  ;;  %7135 = vperm.xlu2 %8250, %v7063_v59   ;;  %v8118_v59 = vld [vmem:[%s12450_s1 + $0x61c] sm:$0xf] }
0x2196   : > { %v12161_v58 = vpop.permute.xlu1 %6797 }
0x2197   : > { %6920 = vmatpush.bf16.msra.mxu2 %v6833_v63 }
0x219a   : > { %6921 = vmatmul.bf16.vlgmr.msra.gmra.mxu2 %v7881_v53  ;;  %v7897_v53 = vor.u32 %v8107_v32, %v7896_v5 }
0x219d   : > { %v6826_v15 = vpop.permute.xlu0 %6825  ;;  %v12180_v26 = vpop.permute.xlu2 %6793 }
0x219e   : > { %v6828_v46 = vpop.permute.xlu1 %6827 }
0x219f   : > { %v6863_v14 = vsel %vm5217_vm11, %v6826_v15, %v6828_v46 }
0x21a5   : > { %v12176_v11 = vpop.permute.xlu0 %6733  ;;  %v6824_v35 = vpop.permute.xlu2 %6823 }
0x21a6   : > { %v12178_v6 = vpop.permute.xlu1 %6735 }
0x21a7   : > { %v6842_v15 = vsel %vm5217_vm11, %v12176_v11, %v12178_v6  ;;  %v8104_v6 = vld [vmem:[%s12450_s1 + $0x5ac] sm:$0xf] }
0x21aa   : > { %6926 = vmatmul.bf16.gmra.mxu2 %v7901_v31  ;;  %v7890_v31 = vld [vmem:[%s12450_s1 + $0x5bc] sm:$0xf0] }
0x21ab   : > { %v7893_v30 = vor.u32 %v8104_v6, %v7890_v31 }
0x21ad   : > { %v12182_v7 = vpop.permute.xlu0 %6795 }
0x21ae   : > { %v6822_v22 = vpop.permute.xlu1 %6821 }
0x21af   : > { %v6862_v62 = vsel %vm5217_vm11, %v6822_v22, %v6824_v35  ;;  %v7916_v35 = vld [vmem:[%s12450_s1 + $0x5d8] sm:$0xf] }
0x21b5   : > { %v6784_v61 = vpop.permute.xlu0 %6783 }
0x21b6   : > { %v6758_v55 = vpop.permute.xlu1 %6757  ;;  %v6852_v48 = vsel %vm5217_vm11, %v6782_v51, %v6784_v61  ;;  %v12200_v51 = vpop.permute.xlu2 %6731  ;;  %v7909_v61 = vor.u32 %v8111_v60, %v7908_v36 }
0x21b7   : > { %v6848_v39 = vsel %vm5217_vm11, %v6758_v55, %v6760_v17  ;;  %6971 = vmatpush.bf16.msra.mxu3 %v6852_v48  ;;  %v7061_v17 = vld [vmem:[%s12451_s2 + $0x230] sm:$0xff]  ;;  %v8112_v55 = vld [vmem:[%s12450_s1 + $0x5e8] sm:$0xf0] }
0x21b8   : > { %6942 = vmatpush.bf16.msrb.mxu1 %v6848_v39  ;;  %7083 = vperm.xlu1 %8251, %v7061_v17   ;;  %v7917_v48 = vor.u32 %v8112_v55, %v7916_v35  ;;  %v7902_v39 = vld [vmem:[%s12450_s1 + $0x5dc] sm:$0xf0] }
0x21ba   : > { %6931 = vmatmul.bf16.gmra.mxu2 %v7921_v3  ;;  %v8108_v3 = vld [vmem:[%s12450_s1 + $0x5cc] sm:$0xf] }
0x21bb   : > { %6972 = vmatpush.bf16.msra.mxu3 %v12105_v16  ;;  %v7940_v16 = vld [vmem:[%s12450_s1 + $0x618] sm:$0xf] }
0x21bc   : > { %6943 = vmatpush.bf16.msrb.mxu1 %v12117_v45 }
0x21bd   : > { %v6762_v38 = vpop.permute.xlu0 %6761 }
0x21be   : > { %v6816_v28 = vpop.permute.xlu1 %6815 }
0x21bf   : > { %v6860_v37 = vsel %vm5217_vm11, %v6814_v56, %v6816_v28  ;;  %6973 = vmatpush.bf16.msra.mxu3 %v12069_v33  ;;  %v8120_v33 = vld [vmem:[%s12450_s1 + $0x628] sm:$0xf0]  ;;  %v8109_v28 = vld [vmem:[%s12450_s1 + $0x5d4] sm:$0xf] }
0x21c0   : > { %6944 = vmatpush.bf16.msrb.mxu1 %v12081_v34  ;;  %7000 = vmatpush.bf16.msra.mxu0 %v6860_v37  ;;  %v7941_v13 = vor.u32 %v8120_v33, %v7940_v16  ;;  %v7910_v37 = vld [vmem:[%s12450_s1 + $0x5e4] sm:$0xf0]  ;;  %v7936_v33 = vld [vmem:[%s12450_s1 + $0x600] sm:$0xf] }
0x21c1   : > { %8252 = vset.pattern.permute.xlu1 %v12504_v40 }
0x21c2   : > { %7127 = vperm.xlu1 %8252, %v7061_v17   ;;  %v7928_v17 = vld [vmem:[%s12450_s1 + $0x5f8] sm:$0xf] }
0x21c3   : > { %6974 = vmatpush.bf16.msra.mxu3 %v12020_v8  ;;  %v6800_v8 = vpop.permute.xlu2 %6799 }
0x21c4   : > { %6945 = vmatpush.bf16.msrb.mxu1 %v12039_v42  ;;  %7001 = vmatpush.bf16.msra.mxu0 %v12124_v49  ;;  %v6856_v20 = vsel %vm5217_vm11, %v12161_v58, %v6800_v8 }
0x21c5   : > { %v6832_v34 = vpop.permute.xlu0 %6831 }
0x21c6   : > { %v6730_v45 = vpop.permute.xlu1 %6729  ;;  %v6864_v1 = vsel %vm5217_vm11, %v6830_v41, %v6832_v34  ;;  %v6843_v41 = vsel %vm5217_vm11, %v12166_v27, %v12159_v9  ;;  %v7059_v27 = vld [vmem:[%s12451_s2 + $0x220] sm:$0xff]  ;;  %v8117_v34 = vld [vmem:[%s12450_s1 + $0x610] sm:$0xf0] }
0x21c7   : > { %6975 = vmatpush.bf16.msra.mxu3 %v12143_v21  ;;  %7033 = vmatpush.bf16.msrb.mxu2 %v6864_v1  ;;  %v7060_v21 = vld [vmem:[%s12451_s2 + $0x228] sm:$0xff]  ;;  %v6841_v50 = vsel %vm5217_vm11, %v6730_v45, %v12200_v51  ;;  %v7913_v51 = vor.u32 %v8109_v28, %v7910_v37  ;;  %v7937_v45 = vor.u32 %v8117_v34, %v7936_v33  ;;  %v8113_v1 = vld [vmem:[%s12450_s1 + $0x5f4] sm:$0xf] }
0x21c8   : > { %7002 = vmatpush.bf16.msra.mxu0 %v12084_v25  ;;  %v7888_v25 = vld [vmem:[%s12450_s1 + $0x5a8] sm:$0xf]  ;;  %7078 = vperm.xlu0 %8247, %v7060_v21  }
0x21c9   : > { %7123 = vperm.xlu2 %8250, %v7060_v21   ;;  %v7942_v21 = vld [vmem:[%s12450_s1 + $0x62c] sm:$0xf0] }
0x21ca   : > { %6936 = vmatmul.bf16.gmra.mxu2 %v7941_v13  ;;  %7115 = vperm.xlu1 %8252, %v7058_v23   ;;  %v7922_v13 = vld [vmem:[%s12450_s1 + $0x604] sm:$0xf0] }
0x21cb   : > { %6976 = vmatpush.bf16.msra.mxu3 %v12145_v44  ;;  %7034 = vmatpush.bf16.msrb.mxu2 %v6863_v14  ;;  %v6855_v44 = vsel %vm5217_vm11, %v12180_v26, %v12182_v7  ;;  %v6818_v10 = vpop.permute.xlu2 %6817  ;;  %v7925_v8 = vor.u32 %v8113_v1, %v7922_v13  ;;  %v8114_v14 = vld [vmem:[%s12450_s1 + $0x5fc] sm:$0xf] }
0x21cc   : > { %7003 = vmatpush.bf16.msra.mxu0 %v12131_v2  ;;  %v8106_v2 = vld [vmem:[%s12450_s1 + $0x5b8] sm:$0xf0] }
0x21cd   : > { %v6790_v42 = vpop.permute.xlu0 %6789 }
0x21ce   : > { %v6742_v49 = vpop.permute.xlu1 %6741 }
0x21cf   : > { %v6844_v56 = vsel %vm5217_vm11, %v6742_v49, %v12135_v43  ;;  %6977 = vmatpush.bf16.msra.mxu3 %v12168_v29  ;;  %7035 = vmatpush.bf16.msrb.mxu2 %v6862_v62  ;;  %v7889_v43 = vor.u32 %v8106_v2, %v7888_v25  ;;  %v8103_v29 = vld [vmem:[%s12450_s1 + $0x5a4] sm:$0xf]  ;;  %v7948_v49 = vld [vmem:[%s12450_s1 + $0x620] sm:$0xf]  ;;  %v8121_v62 = vld [vmem:[%s12450_s1 + $0x630] sm:$0xf0] }
0x21d0   : > { %6946 = vmatpush.bf16.msrb.mxu1 %v6844_v56  ;;  %7004 = vmatpush.bf16.msra.mxu0 %v6856_v20  ;;  %v7885_v11 = vor.u32 %v8103_v29, %v7882_v18  ;;  %v7949_v25 = vor.u32 %v8121_v62, %v7948_v49  ;;  %v7956_v56 = vld [vmem:[%s12450_s1 + $0x628] sm:$0xf]  ;;  %v8122_v20 = vld [vmem:[%s12450_s1 + $0x638] sm:$0xf0] }
0x21d1   : > { %7073 = vperm.xlu0 %8247, %v7059_v27   ;;  %8253 = vset.pattern.permute.xlu2 %v12503_v19  ;;  %v8116_v19 = vld [vmem:[%s12450_s1 + $0x608] sm:$0xf0]  ;;  %v7957_v2 = vor.u32 %v8122_v20, %v7956_v56 }
0x21d2   : > { %7068 = vperm.xlu2 %8253, %v7058_v23   ;;  %v7929_v16 = vor.u32 %v8116_v19, %v7928_v17 }
0x21d3   : > { %6978 = vmatpush.bf16.msra.mxu3 %v6762_v38  ;;  %v6788_v26 = vpop.permute.xlu2 %6787  ;;  %v7905_v38 = vor.u32 %v8108_v3, %v7902_v39 }
0x21d4   : > { %6947 = vmatpush.bf16.msrb.mxu1 %v6843_v41  ;;  %7005 = vmatpush.bf16.msra.mxu0 %v6855_v44  ;;  %v8119_v41 = vld [vmem:[%s12450_s1 + $0x624] sm:$0xf]  ;;  %v7950_v44 = vld [vmem:[%s12450_s1 + $0x634] sm:$0xf0] }
0x21d5   : > { %v6820_v9 = vpop.permute.xlu0 %6819  ;;  %v7953_v5 = vor.u32 %v8119_v41, %v7950_v44 }
0x21d6   : > { %v6792_v58 = vpop.permute.xlu1 %6791  ;;  %6979 = vmatmul.bf16.vlgmr.msra.gmra.mxu3 %v7889_v43  ;;  %v6861_v63 = vsel %vm5217_vm11, %v6818_v10, %v6820_v9  ;;  %v7945_v43 = vor.u32 %v8118_v59, %v7942_v21 }
0x21d7   : > { %v6854_v46 = vsel %vm5217_vm11, %v6790_v42, %v6792_v58  ;;  %7036 = vmatpush.bf16.msrb.mxu2 %v6861_v63 }
0x21d8   : > { %6948 = vmatpush.bf16.msrb.mxu1 %v6842_v15  ;;  %7006 = vmatpush.bf16.msra.mxu0 %v6854_v46 }
0x21d9   : > { %8255 = vset.pattern.permute.xlu0 %v12504_v40 }
0x21da   : > { %7958 = vmatmul.msk.bf16.vlgmr.msrb.gmra.mxu2 %vm5286_vm13, %v7897_v53  ;;  %8254 = vset.pattern.permute.xlu2 %v12504_v40  ;;  %v7930_v40 = vld [vmem:[%s12450_s1 + $0x60c] sm:$0xf0] }
0x21db   : > { %7119 = vperm.xlu2 %8254, %v7059_v27   ;;  %v7933_v42 = vor.u32 %v8114_v14, %v7930_v40  ;;  %v12369_v6 = vpop.permute.xlu2 %7139 }
0x21dc   : > { %6949 = vmatpush.bf16.msrb.mxu1 %v6841_v50 }
0x21de   : > { %v6786_v7 = vpop.permute.xlu1 %6785 }
0x21df   : > { %6950 = vmatmul.bf16.vlgmr.msrb.gmra.mxu1 %v7885_v11  ;;  %v6853_v22 = vsel %vm5217_vm11, %v6786_v7, %v6788_v26 }
0x21e0   : > { %7007 = vmatpush.bf16.msra.mxu0 %v6853_v22 }
0x21e3   : > { %7008 = vmatmul.bf16.vlgmr.msra.gmra.mxu0 %v7893_v30 }
0x21e6   : > { %6984 = vmatmul.bf16.gmra.mxu3 %v7909_v61  ;;  %v12365_v46 = vpop.permute.xlu1 %7103  ;;  %v7094_v36 = vpop.permute.xlu2 %7093 }
0x21ea   : > { %7959 = vmatmul.msk.bf16.gmra.mxu2 %vm5286_vm13, %v7917_v48 }
0x21ee   : > { %v7089_v26 = vpop.permute.xlu1 %7088 }
0x21ef   : > { %6955 = vmatmul.bf16.gmra.mxu1 %v7905_v38  ;;  %v7136_v39 = vpop.permute.xlu2 %7135 }
0x21f3   : > { %7013 = vmatmul.bf16.gmra.mxu0 %v7913_v51 }
0x21f6   : > { %6989 = vmatmul.bf16.gmra.mxu3 %v7929_v16  ;;  %v12379_v16 = vpop.permute.xlu0 %7143 }
0x21f7   : > { %v7132_v35 = vpop.permute.xlu1 %7131 }
0x21fa   : > { %7960 = vmatmul.msk.bf16.gmra.mxu2 %vm5286_vm13, %v7937_v45 }
0x21fe   : > { %v7099_v20 = vpop.permute.xlu0 %7098 }
0x21ff   : > { %6960 = vmatmul.bf16.gmra.mxu1 %v7925_v8 }
0x2203   : > { %7018 = vmatmul.bf16.gmra.mxu0 %v7933_v42 }
0x2206   : > { %6994 = vmatmul.bf16.gmra.mxu3 %v7949_v25 }
0x220a   : > { %7961 = vmatmul.msk.bf16.gmra.mxu2 %vm5286_vm13, %v7957_v2 }
0x220f   : > { %6965 = vmatmul.bf16.gmra.mxu1 %v7945_v43 }
0x2213   : > { %7023 = vmatmul.bf16.gmra.mxu0 %v7953_v5 }
0x221d   : > { %v6922_v32 = vpop.f32.mrf.mxu2 }
0x2223   : > { %v12381_v45 = vpop.permute.xlu2 %7123 }
0x2225   : > { %v6924_v23 = vpop.f32.mrf.mxu2 }
0x222a   : > { %v12377_v37 = vpop.permute.xlu1 %7083 }
0x222d   : > { %v6927_v10 = vpop.f32.mrf.mxu2 }
0x2234   : > { %v12383_v42 = vpop.permute.xlu1 %7127 }
0x2235   : > { %v12359_v9 = vpop.f32.mrf.mxu2 }
0x223d   : > { %v6932_v58 = vpop.f32.mrf.mxu2 }
0x2245   : > { %v6934_v63 = vpop.f32.mrf.mxu2 }
0x224d   : > { %v12361_v53 = vpop.f32.mrf.mxu2 }
0x2255   : > { %v12363_v27 = vpop.f32.mrf.mxu2 }
0x2259   : > { %v6980_v15 = vpop.f32.mrf.mxu3 }
0x225c   : > { %v6951_v29 = vpop.f32.mrf.mxu1 }
0x225d   : > { %v7038_v18 = vpop.f32.mrf.mxu2  ;;  %v6952_v17 = vadd.f32 %v6951_v29, %v6922_v32 }
0x225f   : > { %v6981_v13 = vadd.f32 %v6980_v15, %v6952_v17 }
0x2260   : > { %v7009_v50 = vpop.f32.mrf.mxu0 }
0x2261   : > { %v12367_v11 = vpop.f32.mrf.mxu3  ;;  %v7010_v62 = vadd.f32 %v7009_v50, %v6981_v13 }
0x2263   : > { %v7039_v44 = vadd.f32 %v7038_v18, %v7010_v62  ;;  %v12391_v18 = vld [vmem:[%s12452_s3 + $0x5] ss:$0 sm:$0xff] }
0x2264   : > { %v6953_v31 = vpop.f32.mrf.mxu1 }
0x2265   : > { %v12371_v7 = vpop.f32.mrf.mxu2 }
0x2268   : > { %v12373_v22 = vpop.f32.mrf.mxu0 }
0x2269   : > { %v6985_v30 = vpop.f32.mrf.mxu3 }
0x226c   : > { %v6956_v60 = vpop.f32.mrf.mxu1 }
0x226d   : > { %v7043_v61 = vpop.f32.mrf.mxu2  ;;  %v6957_v25 = vadd.f32 %v6956_v60, %v6927_v10 }
0x226f   : > { %v6986_v5 = vadd.f32 %v6985_v30, %v6957_v25  ;;  %v7079_v30 = vpop.permute.xlu0 %7078 }
0x2270   : > { %v7014_v55 = vpop.f32.mrf.mxu0 }
0x2271   : > { %v6987_v48 = vpop.f32.mrf.mxu3  ;;  %v7015_v50 = vadd.f32 %v7014_v55, %v6986_v5 }
0x2273   : > { %v7044_v13 = vadd.f32 %v7043_v61, %v7015_v50 }
0x2274   : > { %v6958_v3 = vpop.f32.mrf.mxu1 }
0x2275   : > { %v12375_v38 = vpop.f32.mrf.mxu2  ;;  %v7108_v25 = vmul.f32 %v7079_v30, %v7044_v13 }
0x2278   : > { %v7016_v28 = vpop.f32.mrf.mxu0 }
0x2279   : > { %v6990_v51 = vpop.f32.mrf.mxu3 }
0x227c   : > { %v6961_v19 = vpop.f32.mrf.mxu1 }
0x227d   : > { %v6962_v33 = vadd.f32 %v6961_v19, %v6932_v58  ;;  %v7048_v34 = vpop.f32.mrf.mxu2  ;;  %v7069_v58 = vpop.permute.xlu2 %7068 }
0x227e   : > { %v7106_v19 = vmul.f32 %v7069_v58, %v7039_v44 }
0x227f   : > { %v6991_v1 = vadd.f32 %v6990_v51, %v6962_v33  ;;  %v6954_v33 = vadd.f32 %v6953_v31, %v6924_v23 }
0x2280   : > { %v7019_v8 = vpop.f32.mrf.mxu0 }
0x2281   : > { %v7020_v14 = vadd.f32 %v7019_v8, %v6991_v1  ;;  %v6992_v40 = vpop.f32.mrf.mxu3  ;;  %v6983_v55 = vadd.f32 %v12367_v11, %v6954_v33 }
0x2283   : > { %v7049_v49 = vadd.f32 %v7048_v34, %v7020_v14  ;;  %v7116_v34 = vpop.permute.xlu1 %7115  ;;  %v7012_v62 = vadd.f32 %v12373_v22, %v6983_v55  ;;  %v7148_v22 = vadd.f32 %v12381_v45, %v7108_v25 }
0x2284   : > { %v6963_v56 = vpop.f32.mrf.mxu1  ;;  %v7146_v31 = vadd.f32 %v7116_v34, %v7106_v19 }
0x2285   : > { %v7110_v2 = vmul.f32 %v7089_v26, %v7049_v49  ;;  %v6964_v59 = vadd.f32 %v6963_v56, %v6934_v63  ;;  %v7050_v21 = vpop.f32.mrf.mxu2  ;;  %v6959_v63 = vadd.f32 %v6958_v3, %v12359_v9  ;;  %v7120_v45 = vpop.permute.xlu2 %7119 }
0x2286   : > { %v7154_v49 = vadd.f32 %v7146_v31, %v11286_v47  ;;  %v7074_v47 = vpop.permute.xlu0 %7073 }
0x2287   : > { %v7150_v43 = vadd.f32 %v7132_v35, %v7110_v2  ;;  %v6993_v41 = vadd.f32 %v6992_v40, %v6964_v59 }
0x2288   : > { %v7021_v32 = vpop.f32.mrf.mxu0 }
0x2289   : > { %v7022_v15 = vadd.f32 %v7021_v32, %v6993_v41  ;;  %v7158_v29 = vadd.f32 %v7150_v43, %v11334_v12  ;;  %v6995_v10 = vpop.f32.mrf.mxu3  ;;  %v7041_v43 = vadd.f32 %v12371_v7, %v7012_v62  ;;  %v8124_v62 = vld [vmem:[%s12456_s7 + $0x8] sm:$0x70] }
0x228b   : > { %v7051_v51 = vadd.f32 %v7050_v21, %v7022_v15  ;;  %v7166_v17 = vmax.f32 %v7158_v29, 0.0  ;;  %v7107_v58 = vmul.f32 %v7074_v47, %v7041_v43  ;;  %v7213_v43 = vld [vmem:[%s12457_s8 + $0x18] sm:$0x3f] }
0x228c   : > { %v6966_v60 = vpop.f32.mrf.mxu1 }
0x228d   : > { %v7111_v26 = vmul.f32 %v7094_v36, %v7051_v51  ;;  %v6967_v35 = vadd.f32 %v6966_v60, %v12361_v53  ;;  %v7174_v12 = vmul.f32 %v12391_v18, %v7166_v17  ;;  %v7053_v8 = vpop.f32.mrf.mxu2  ;;  %v6988_v36 = vadd.f32 %v6987_v48, %v6959_v63 }
0x228e   : > { %v7156_v51 = vadd.f32 %v7148_v22, %v11306_v57 }
0x228f   : > { %v7151_v1 = vadd.f32 %v7136_v39, %v7111_v26  ;;  %7186 = vadd.xlane.f32.xlu2 %v7174_v12  ;;  %v6996_v23 = vadd.f32 %v6995_v10, %v6967_v35  ;;  %v7017_v56 = vadd.f32 %v7016_v28, %v6988_v36 }
0x2290   : > { %v7024_v9 = vpop.f32.mrf.mxu0  ;;  %v7164_v33 = vmax.f32 %v7156_v51, 0.0 }
0x2291   : > { %v7025_v3 = vadd.f32 %v7024_v9, %v6996_v23  ;;  %v7159_v53 = vadd.f32 %v7151_v1, %v11342_v0  ;;  %v6997_v61 = vpop.f32.mrf.mxu3  ;;  %v7162_v0 = vmax.f32 %v7154_v49, 0.0  ;;  %v7046_v44 = vadd.f32 %v12375_v38, %v7017_v56  ;;  %v7968_v49 = vld [vmem:[%s12456_s7 + $0x8] sm:$0xf] }
0x2292   : > { %v7172_v10 = vmul.f32 %v12391_v18, %v7164_v33  ;;  %v7969_v25 = vor.u32 %v8124_v62, %v7968_v49 }
0x2293   : > { %v7054_v14 = vadd.f32 %v7053_v8, %v7025_v3  ;;  %v7167_v40 = vmax.f32 %v7159_v53, 0.0  ;;  %v7109_v15 = vmul.f32 %v12377_v37, %v7046_v44 }
0x2294   : > { %v6968_v39 = vpop.f32.mrf.mxu1 }
0x2295   : > { %v7112_v2 = vmul.f32 %v7099_v20, %v7054_v14  ;;  %v6969_v59 = vadd.f32 %v6968_v39, %v12363_v27  ;;  %v7175_v11 = vmul.f32 %v12391_v18, %v7167_v40  ;;  %v7055_v27 = vpop.f32.mrf.mxu2  ;;  %v7149_v17 = vadd.f32 %v12383_v42, %v7109_v15  ;;  %v8123_v40 = vld [vmem:[%s12456_s7] sm:$0xff] }
0x2296   : > { %v7210_v39 = vld [vmem:[%s12457_s8] sm:$0xff] }
0x2297   : > { %v7152_v48 = vadd.f32 %v12369_v6, %v7112_v2  ;;  %7188 = vadd.xlane.f32.xlu2 %v7175_v11  ;;  %v6998_v21 = vadd.f32 %v6997_v61, %v6969_v59  ;;  %v7170_v6 = vmul.f32 %v12391_v18, %v7162_v0  ;;  %v7157_v57 = vadd.f32 %v7149_v17, %v11315_v54  ;;  %v7211_v59 = vld [vmem:[%s12457_s8 + $0x8] sm:$0xff] }
0x2298   : > { %v7026_v41 = vpop.f32.mrf.mxu0 }
0x2299   : > { %v7027_v28 = vadd.f32 %v7026_v41, %v6998_v21  ;;  %v7160_v20 = vadd.f32 %v7152_v48, %v11367_v24  ;;  %v7147_v24 = vadd.f32 %v7120_v45, %v7107_v58  ;;  %v7165_v60 = vmax.f32 %v7157_v57, 0.0  ;;  %v7212_v48 = vld [vmem:[%s12457_s8 + $0x10] sm:$0xff] }
0x229b   : > { %v7056_v5 = vadd.f32 %v7055_v27, %v7027_v28  ;;  %v7168_v32 = vmax.f32 %v7160_v20, 0.0  ;;  %v7155_v37 = vadd.f32 %v7147_v24, %v11294_v52  ;;  %v7173_v34 = vmul.f32 %v12391_v18, %v7165_v60 }
0x229d   : > { %v7113_v29 = vmul.f32 %v12365_v46, %v7056_v5  ;;  %v7176_v7 = vmul.f32 %v12391_v18, %v7168_v32 }
0x229f   : > { %v7153_v38 = vadd.f32 %v12379_v16, %v7113_v29  ;;  %7178 = vadd.xlane.f32.xlu2 %v7170_v6  ;;  %7190 = vadd.xlane.f32.xlu0 %v7176_v7  ;;  %v7163_v16 = vmax.f32 %v7155_v37, 0.0 }
0x22a1   : > { %v7161_v19 = vadd.f32 %v7153_v38, %v11364_v4  ;;  %v7171_v42 = vmul.f32 %v12391_v18, %v7163_v16 }
0x22a3   : > { %v7169_v50 = vmax.f32 %v7161_v19, 0.0 }
0x22a5   : > { %v7177_v46 = vmul.f32 %v12391_v18, %v7169_v50 }
0x22a7   : > { %7192 = vadd.xlane.f32.xlu1 %v7177_v46  ;;  %7182 = vadd.xlane.f32.xlu0 %v7172_v10 }
0x22af   : > { %7184 = vadd.xlane.f32.xlu1 %v7173_v34  ;;  %7180 = vadd.xlane.f32.xlu0 %v7171_v42 }
0x2302   : > { %v7187_v4 = vpop.xlane.xlu2 %7186 }
0x2303   : > { %v7198_v54 = vmul.f32 0.25, %v7187_v4 }
0x230a   : > { %v7189_v26 = vpop.xlane.xlu2 %7188 }
0x230b   : > { %v7199_v1 = vmul.f32 0.25, %v7189_v26 }
0x230d   : > { %v7208_v31 = vpack.c.bf16 %v7199_v1, %v7198_v54 }
0x2312   : > { %v7191_v63 = vpop.xlane.xlu0 %7190  ;;  %v7179_v18 = vpop.xlane.xlu2 %7178 }
0x2313   : > { %v7200_v12 = vmul.f32 0.25, %v7191_v63  ;;  %v7194_v53 = vmul.f32 0.25, %v7179_v18 }
0x231a   : > { %v7193_v52 = vpop.xlane.xlu1 %7192  ;;  %v7183_v35 = vpop.xlane.xlu0 %7182 }
0x231b   : > { %v7201_v30 = vmul.f32 0.25, %v7193_v52  ;;  %v7196_v8 = vmul.f32 0.25, %v7183_v35 }
0x231d   : > { %v7209_v23 = vpack.c.bf16 %v7201_v30, %v7200_v12 }
0x231f   : > { %7234 = vmatpush.bf16.msra.mxu1 %v7209_v23 }
0x2322   : > { %v7185_v55 = vpop.xlane.xlu1 %7184  ;;  %v7181_v13 = vpop.xlane.xlu0 %7180 }
0x2323   : > { %v7197_v9 = vmul.f32 0.25, %v7185_v55  ;;  %7235 = vmatpush.bf16.msra.mxu1 %v7208_v31  ;;  %v7195_v3 = vmul.f32 0.25, %v7181_v13 }
0x2325   : > { %v7207_v36 = vpack.c.bf16 %v7197_v9, %v7196_v8  ;;  %v7206_v14 = vpack.c.bf16 %v7195_v3, %v7194_v53 }
0x2327   : > { %7236 = vmatpush.bf16.msra.mxu1 %v7207_v36 }
0x232b   : > { %7237 = vmatpush.bf16.msra.mxu1 %v7206_v14 }
0x232e   : > { %7970 = vmatmul.msk.bf16.vlgmr.msra.gmra.mxu1 %vm5286_vm13, %v8123_v40 }
0x233e   : > { %7971 = vmatmul.msk.bf16.gmra.mxu1 %vm5286_vm13, %v7969_v25 }
0x23ab   : > { %v7239_v56 = vpop.f32.mrf.mxu1 }
0x23ac   : > { %v7240_v2 = vadd.f32 %v7239_v56, %v7210_v39 }
0x23ae   : > { %7250 = vst.msk [vmem:[%s332_s21] sm:$0xff] %vm7249_vm7, %v7240_v2 }
0x23b3   : > { %v7241_v11 = vpop.f32.mrf.mxu1 }
0x23b4   : > { %v7242_v61 = vadd.f32 %v7241_v11, %v7211_v59 }
0x23b6   : > { %7251 = vst.msk [vmem:[%s332_s21 + $0x8] sm:$0xff] %vm7249_vm7, %v7242_v61 }
0x23bb   : > { %v7244_v21 = vpop.f32.mrf.mxu1 }
0x23bc   : > { %v7245_v0 = vadd.f32 %v7244_v21, %v7212_v48 }
0x23be   : > { %7252 = vst.msk [vmem:[%s332_s21 + $0x10] sm:$0xff] %vm7249_vm7, %v7245_v0 }
0x23c3   : > { %v7246_v41 = vpop.f32.mrf.mxu1 }
0x23c4   : > { %v7247_v47 = vadd.f32 %v7246_v41, %v7213_v43 }
0x23c6   : > { %7254 = vst.msk [vmem:[%s332_s21 + $0x18] sm:$0x3f] %vm7253_vm8, %v7247_v47 }
0x23c7 PF: > { %s19_s30 = sadd.s32 1, %s8269_s30  }
0x23c8   : > { %p16_p4 = scmp.ge.s32.totalorder %s19_s30, 4  }
0x23ca   :  { %18 = sbr.rel (!%p16_p4) target bundleno = 1 (0x1), region = 86 }

</bundles_post_ra>
